<compile_context>
chip_gen: v6e
topology: v6e:2x2x1
jax: 0.10.0
libtpu: 0.0.40
codegen_flags: <defaults>
</compile_context>

<pallas_src>
import functools

import jax
import jax.numpy as jnp
from jax.experimental import pallas as pl
from jax.experimental.pallas import tpu as pltpu


def _round_up(x, m):
    return (x + m - 1) // m * m


# ---------------------------------------------------------------------------
# Pallas kernel: single-shot GEMM + bias + optional ReLU epilogue.
#   x: (G, M, K) bf16   w: (G, K, N) bf16   b: (G, 1, N) f32  ->  o: (G, M, N)
# ---------------------------------------------------------------------------
def _gemm_bias_act_kernel(x_ref, w_ref, b_ref, o_ref, *, relu):
    acc = jnp.dot(x_ref[0], w_ref[0], preferred_element_type=jnp.float32)
    acc = acc + b_ref[0]
    if relu:
        acc = jnp.maximum(acc, 0.0)
    o_ref[0] = acc.astype(o_ref.dtype)


def grouped_gemm_bias_act(x, w, b, *, relu, out_dtype):
    """x: (G, M, K), w: (G, K, N), b: (G, 1, N).  Returns (G, M, N)."""
    G, M, K = x.shape
    _, _, N = w.shape
    x = x.astype(jnp.bfloat16)
    w = w.astype(jnp.bfloat16)
    b = b.astype(jnp.float32)

    # Big M tiles (512) per review; full M when it is already small.
    if M <= 512:
        tm, Mp = M, M
    else:
        tm = 512
        Mp = _round_up(M, tm)
        if Mp != M:
            x = jnp.pad(x, ((0, 0), (0, Mp - M), (0, 0)))

    out = pl.pallas_call(
        functools.partial(_gemm_bias_act_kernel, relu=relu),
        out_shape=jax.ShapeDtypeStruct((G, Mp, N), out_dtype),
        grid_spec=pltpu.PrefetchScalarGridSpec(
            num_scalar_prefetch=0,
            grid=(G, Mp // tm),
            in_specs=[
                pl.BlockSpec((1, tm, K), lambda g, i: (g, i, 0)),
                pl.BlockSpec((1, K, N), lambda g, i: (g, 0, 0)),
                pl.BlockSpec((1, 1, N), lambda g, i: (g, 0, 0)),
            ],
            out_specs=pl.BlockSpec((1, tm, N), lambda g, i: (g, i, 0)),
        ),
        compiler_params=pltpu.CompilerParams(
            dimension_semantics=("parallel", "parallel"),
            vmem_limit_bytes=32 * 1024 * 1024,
        ),
    )(x, w, b)
    if Mp != M:
        out = out[:, :M, :]
    return out


# ---------------------------------------------------------------------------
# Pallas softmax over the last dim (channels already on lanes).
# ---------------------------------------------------------------------------
def _softmax_kernel(x_ref, o_ref):
    x = x_ref[...]
    m = jnp.max(x, axis=-1, keepdims=True)
    e = jnp.exp(x - m)
    s = jnp.sum(e, axis=-1, keepdims=True)
    o_ref[...] = e * pl.reciprocal(s, approx=True)


def softmax_lastdim(x):
    M, C = x.shape
    tm = min(512, _round_up(M, 8))
    Mp, Cp = _round_up(M, tm), _round_up(C, 128)
    xp = x.astype(jnp.float32)
    if (Mp, Cp) != (M, C):
        # very negative padding -> ~0 probability; padded rows are sliced off
        xp = jnp.pad(xp, ((0, Mp - M), (0, Cp - C)), constant_values=-1e30)
    out = pl.pallas_call(
        _softmax_kernel,
        out_shape=jax.ShapeDtypeStruct((Mp, Cp), jnp.float32),
        grid_spec=pltpu.PrefetchScalarGridSpec(
            num_scalar_prefetch=0,
            grid=(Mp // tm,),
            in_specs=[pl.BlockSpec((tm, Cp), lambda i: (i, 0))],
            out_specs=pl.BlockSpec((tm, Cp), lambda i: (i, 0)),
        ),
        compiler_params=pltpu.CompilerParams(
            dimension_semantics=("parallel",)),
    )(xp)
    return out[:M, :C]


# ---------------------------------------------------------------------------
# Channels-last im2col (bf16, transpose-free) + conv wrapper
# ---------------------------------------------------------------------------
def _im2col_cl(x, k, stride, padding, dilation):
    """x: (N, D, H, W, C) -> patches (N*Do*Ho*Wo, k^3*C), tap-major K order."""
    n, D, H, W, C = x.shape
    s, p, d = stride, padding, dilation
    if p:
        x = jnp.pad(x, ((0, 0), (p, p), (p, p), (p, p), (0, 0)))
    Dp, Hp, Wp = D + 2 * p, H + 2 * p, W + 2 * p
    Do = (Dp - d * (k - 1) - 1) // s + 1
    Ho = (Hp - d * (k - 1) - 1) // s + 1
    Wo = (Wp - d * (k - 1) - 1) // s + 1
    taps = []
    for i in range(k):
        for j in range(k):
            for l in range(k):
                taps.append(x[:, i * d: i * d + s * (Do - 1) + 1: s,
                                 j * d: j * d + s * (Ho - 1) + 1: s,
                                 l * d: l * d + s * (Wo - 1) + 1: s, :])
    pat = jnp.concatenate(taps, axis=-1).reshape(n * Do * Ho * Wo, k * k * k * C)
    return pat, (Do, Ho, Wo)


def conv3d_cl(x, wk, b, *, k, stride=1, padding=0, dilation=1, relu=True,
              out_dtype=jnp.bfloat16):
    """Channels-last conv: x (N,D,H,W,Cin), wk (k^3*Cin, Cout) bf16, b (1,Cout)."""
    n = x.shape[0]
    cout = wk.shape[-1]
    x = x.astype(jnp.bfloat16)
    if k == 1 and stride == 1 and padding == 0:
        Do, Ho, Wo = x.shape[1:4]
        pat = x.reshape(-1, x.shape[-1])
    else:
        pat, (Do, Ho, Wo) = _im2col_cl(x, k, stride, padding, dilation)
    out = grouped_gemm_bias_act(pat[None], wk[None], b[None],
                                relu=relu, out_dtype=out_dtype)[0]
    return out.reshape(n, Do, Ho, Wo, cout)


# ---------------------------------------------------------------------------
# Trilinear upsample (align_corners=True) as separable interpolation matrices
# TODO(synk): done as plain-JAX einsums on the channels-last tensor, not in-kernel.
# ---------------------------------------------------------------------------
def _interp_matrix(out_size, in_size):
    if in_size == 1:
        return jnp.ones((out_size, 1), jnp.float32)
    if out_size == 1:
        return jnp.zeros((1, in_size), jnp.float32).at[0, 0].set(1.0)
    scale = (in_size - 1) / (out_size - 1)
    src = jnp.arange(out_size, dtype=jnp.float32) * scale
    i0 = jnp.clip(jnp.floor(src).astype(jnp.int32), 0, in_size - 2)
    frac = src - i0.astype(jnp.float32)
    rows = jnp.arange(out_size)
    m = jnp.zeros((out_size, in_size), jnp.float32)
    m = m.at[rows, i0].add(1.0 - frac)
    m = m.at[rows, i0 + 1].add(frac)
    return m


def trilinear_cl(x, size):
    """x: (N, D, H, W, C) channels-last; computed in f32."""
    Dn, Hn, Wn = size
    _, D, H, W, _ = x.shape
    x = x.astype(jnp.float32)
    x = jnp.einsum('od,ndhwc->nohwc', _interp_matrix(Dn, D), x)
    x = jnp.einsum('ph,ndhwc->ndpwc', _interp_matrix(Hn, H), x)
    x = jnp.einsum('qw,ndhwc->ndhqc', _interp_matrix(Wn, W), x)
    return x


# ---------------------------------------------------------------------------
# Deterministic parameter construction -> GEMM-ready bf16 weights at init
# ---------------------------------------------------------------------------
def _kaiming_conv(key, cout, cin, k):
    fan_out = cout * k ** 3
    std = (2.0 / fan_out) ** 0.5
    w = jax.random.normal(key, (cout, cin, k, k, k), jnp.float32) * std
    b = jnp.zeros((cout,), jnp.float32)
    return w, b


def _fold_bn(w, b, eps=1e-5):
    # BatchNorm3d init: gamma=1, beta=0, running_mean=0, running_var=1 (eval)
    cout = w.shape[0]
    gamma = jnp.ones((cout,), jnp.float32)
    beta = jnp.zeros((cout,), jnp.float32)
    mean = jnp.zeros((cout,), jnp.float32)
    var = jnp.ones((cout,), jnp.float32)
    scale = gamma / jnp.sqrt(var + eps)
    return w * scale[:, None, None, None, None], beta + (b - mean) * scale


def _to_gemm(w, b):
    # PyTorch (Cout, Cin, kd, kh, kw) -> bf16 (kd*kh*kw*Cin, Cout) matching the
    # tap-major / channel-minor im2col column order, plus fp32 (1, Cout) bias.
    cout, cin, kd, kh, kw = w.shape
    wk = (w.transpose(2, 3, 4, 1, 0)
           .reshape(kd * kh * kw * cin, cout)
           .astype(jnp.bfloat16))
    return wk, b.reshape(1, cout).astype(jnp.float32)


def init_params(key, in_channels, num_classes, atrous_rates, aspp_ch=64):
    keys = iter(jax.random.split(key, 32))
    P = {}

    def cbr(name, cin, cout, k):          # Conv3d + folded BatchNorm3d (+ReLU)
        w, b = _kaiming_conv(next(keys), cout, cin, k)
        P[name] = _to_gemm(*_fold_bn(w, b))

    # backbone stand-in (MobileNet3d-like): llf @ stride 4, hlf @ stride 8
    cbr('bb_stem', in_channels, 16, 3)
    cbr('bb_1', 16, 24, 3)                # low level feats (llf_channels = 24)
    cbr('bb_2', 24, 64, 3)                # high level feats (hlf_channels = 64)
    # ASPP3d (last_channel = aspp_ch)
    cbr('aspp_b0', 64, aspp_ch, 1)
    for r in atrous_rates:
        cbr(f'aspp_r{r}', 64, aspp_ch, 3)
    cbr('aspp_pool', 64, aspp_ch, 1)
    cbr('aspp_proj', aspp_ch * (2 + len(atrous_rates)), aspp_ch, 1)
    # low level decoder: 1x1 Conv3dBNReLU(llf_channels -> aspp.last_channel)
    cbr('llf_dec', 24, aspp_ch, 1)
    # decoder: Conv3dBNReLU(2*last_channel -> 256, k=3) + Conv3d(256 -> nc, k=3)
    cbr('dec_0', 2 * aspp_ch, 256, 3)
    P['dec_1'] = _to_gemm(*_kaiming_conv(next(keys), num_classes, 256, 3))
    return P


# ---------------------------------------------------------------------------
# Forward pass (mirrors DeepLab3D.forward); channels-last inside, NCDHW at the
# module boundary.
# ---------------------------------------------------------------------------
def deeplab3d_forward(P, x_ncdhw, atrous_rates):
    x = jnp.transpose(x_ncdhw, (0, 2, 3, 4, 1))            # NDHWC (boundary only)

    def cbr(name, t, k, **kw):
        wk, b = P[name]
        return conv3d_cl(t, wk, b, k=k, relu=True, **kw)

    # backbone
    h = cbr('bb_stem', x, 3, stride=2, padding=1)
    llf = cbr('bb_1', h, 3, stride=2, padding=1)
    hlf = cbr('bb_2', llf, 3, stride=2, padding=1)
    n = hlf.shape[0]

    # ---- ASPP ----
    b0 = cbr('aspp_b0', hlf, 1)
    # Three dilated 3x3x3 branches share (M, K, N): batch them into ONE
    # pallas_call with a leading 'parallel' branch axis (v7x second TC).
    hlf16 = hlf.astype(jnp.bfloat16)
    pats, dims = [], None
    for r in atrous_rates:
        p, dims = _im2col_cl(hlf16, 3, 1, r, r)
        pats.append(p)
    og = grouped_gemm_bias_act(
        jnp.stack(pats, 0),
        jnp.stack([P[f'aspp_r{r}'][0] for r in atrous_rates], 0),
        jnp.stack([P[f'aspp_r{r}'][1] for r in atrous_rates], 0),
        relu=True, out_dtype=jnp.bfloat16)
    Do, Ho, Wo = dims
    dil = [og[i].reshape(n, Do, Ho, Wo, -1) for i in range(len(atrous_rates))]

    pooled = jnp.mean(hlf.astype(jnp.float32), axis=(1, 2, 3), keepdims=True)
    pooled = cbr('aspp_pool', pooled.astype(jnp.bfloat16), 1)
    pooled = jnp.broadcast_to(pooled, hlf.shape[:4] + (pooled.shape[-1],))
    aspp = cbr('aspp_proj', jnp.concatenate([b0, *dil, pooled], axis=-1), 1)

    # ---- decoder ----
    aspp_up = trilinear_cl(aspp, llf.shape[1:4]).astype(jnp.bfloat16)
    llf_dec = cbr('llf_dec', llf, 1)
    xdec = cbr('dec_0', jnp.concatenate([llf_dec, aspp_up], axis=-1),
               3, padding=1)
    wk, b = P['dec_1']
    logits = conv3d_cl(xdec, wk, b, k=3, padding=0, relu=False,
                       out_dtype=jnp.float32)              # nn.Conv3d default pad

    # upsample to input resolution + channel softmax (channels already on lanes)
    logits = trilinear_cl(logits, x.shape[1:4])
    nb, D, H, W, C = logits.shape
    probs = softmax_lastdim(logits.reshape(-1, C)).reshape(nb, D, H, W, C)
    return jnp.transpose(probs, (0, 4, 1, 2, 3))           # NCDHW at boundary


if __name__ == "__main__":
    key = jax.random.PRNGKey(0)
    kp, kx = jax.random.split(key)
    in_channels, num_classes = 4, 3
    atrous_rates = (6, 12, 18)

    params = init_params(kp, in_channels, num_classes, atrous_rates)
    x = jax.random.normal(kx, (2, in_channels, 16, 16, 16), jnp.float32)

    fwd = jax.jit(functools.partial(deeplab3d_forward,
                                    atrous_rates=atrous_rates))
    out = jax.block_until_ready(fwd(params, x))

    assert out.shape == (2, num_classes, 16, 16, 16), out.shape
    assert bool(jnp.all(jnp.isfinite(out)))
    # per-voxel class probabilities must sum to ~1 (approx reciprocal + bf16 MXU)
    sums = jnp.sum(out, axis=1)
    assert bool(jnp.all(jnp.abs(sums - 1.0) < 2e-3)), float(
        jnp.max(jnp.abs(sums - 1.0)))
    print("KERNEL_OK")
</pallas_src>

<mosaic_0001>
module attributes {stable_mosaic.version = 11 : i64} {
  func.func private @main(%arg0: i32) attributes {dimension_semantics = [#tpu.dimension_semantics<core_parallel>], iteration_bounds = array<i64: 2>, tpu.core_type = #tpu.core_type<sc_scalar_subcore>, window_params = []} {
    return
  }
}

module attributes {stable_mosaic.version = 11 : i64} {
  func.func private @main(%arg0: i32) attributes {dimension_semantics = [#tpu.dimension_semantics<core_parallel>], iteration_bounds = array<i64: 2>, tpu.core_type = #tpu.core_type<sc_scalar_subcore>, window_params = []} {
    return
  }
}

module attributes {stable_mosaic.version = 11 : i64} {
  func.func @_gemm_bias_act_kernel(%arg0: i32, %arg1: i32, %arg2: memref<1x512x108xbf16, #tpu.memory_space<vmem>>, %arg3: memref<1x108x16xbf16, #tpu.memory_space<vmem>>, %arg4: memref<1x1x16xf32, #tpu.memory_space<vmem>>, %arg5: memref<1x512x16xbf16, #tpu.memory_space<vmem>>) attributes {dimension_semantics = [#tpu.dimension_semantics<parallel>, #tpu.dimension_semantics<parallel>], iteration_bounds = array<i64: 1, 2>, scalar_prefetch = 0 : i64, scratch_operands = 0 : i64, tpu.core_type = #tpu.core_type<tc>, window_params = [{transform_indices = @transform_0, window_bounds = array<i64: 1, 512, 108>}, {transform_indices = @transform_1, window_bounds = array<i64: 1, 108, 16>}, {transform_indices = @transform_2, window_bounds = array<i64: 1, 1, 16>}, {transform_indices = @transform_3, window_bounds = array<i64: 1, 512, 16>}]} {
    %c0 = arith.constant 0 : index
    %c0_0 = arith.constant 0 : index
    %c0_1 = arith.constant 0 : index
    %0 = vector.load %arg2[%c0, %c0_0, %c0_1] : memref<1x512x108xbf16, #tpu.memory_space<vmem>>, vector<1x512x108xbf16>
    %1 = vector.shape_cast %0 : vector<1x512x108xbf16> to vector<512x108xbf16>
    %c0_2 = arith.constant 0 : index
    %c0_3 = arith.constant 0 : index
    %c0_4 = arith.constant 0 : index
    %2 = vector.load %arg3[%c0_2, %c0_3, %c0_4] : memref<1x108x16xbf16, #tpu.memory_space<vmem>>, vector<1x108x16xbf16>
    %3 = vector.shape_cast %2 : vector<1x108x16xbf16> to vector<108x16xbf16>
    %cst = arith.constant dense<0.000000e+00> : vector<512x16xf32>
    %4 = tpu.matmul %1, %3, %cst {dimension_numbers = #tpu.dot_dimension_numbers<[1], [0], [0], [1], [0, 0, 1, 1], [], []>} : vector<512x108xbf16>, vector<108x16xbf16>, vector<512x16xf32> -> vector<512x16xf32>
    %c0_5 = arith.constant 0 : index
    %c0_6 = arith.constant 0 : index
    %c0_7 = arith.constant 0 : index
    %5 = vector.load %arg4[%c0_5, %c0_6, %c0_7] : memref<1x1x16xf32, #tpu.memory_space<vmem>>, vector<1x1x16xf32>
    %6 = vector.shape_cast %5 : vector<1x1x16xf32> to vector<1x16xf32>
    %7 = vector.broadcast %6 : vector<1x16xf32> to vector<512x16xf32>
    %8 = arith.addf %4, %7 : vector<512x16xf32>
    %cst_8 = arith.constant 0.000000e+00 : f32
    %9 = vector.broadcast %cst_8 : f32 to vector<512x16xf32>
    %10 = arith.maximumf %8, %9 : vector<512x16xf32>
    %11 = arith.truncf %10 : vector<512x16xf32> to vector<512x16xbf16>
    %c0_9 = arith.constant 0 : index
    %c0_10 = arith.constant 0 : index
    %c0_11 = arith.constant 0 : index
    %12 = vector.load %arg5[%c0_9, %c0_10, %c0_11] : memref<1x512x16xbf16, #tpu.memory_space<vmem>>, vector<1x512x16xbf16>
    %13 = vector.shape_cast %12 : vector<1x512x16xbf16> to vector<512x16xbf16>
    %14 = vector.shape_cast %11 : vector<512x16xbf16> to vector<1x512x16xbf16>
    tpu.vector_store %arg5[%c0_9, %c0_10, %c0_11], %14 {strides = array<i32>} : memref<1x512x16xbf16, #tpu.memory_space<vmem>>, vector<1x512x16xbf16>,
    return
  }
  func.func @transform_0(%arg0: i32, %arg1: i32) -> (i32, i32, i32) {
    %c0_i32 = arith.constant 0 : i32
    %c0_i32_0 = arith.constant 0 : i32
    return %arg0, %arg1, %c0_i32 : i32, i32, i32
  }
  func.func @transform_1(%arg0: i32, %arg1: i32) -> (i32, i32, i32) {
    %c0_i32 = arith.constant 0 : i32
    %c0_i32_0 = arith.constant 0 : i32
    %c0_i32_1 = arith.constant 0 : i32
    return %arg0, %c0_i32, %c0_i32_0 : i32, i32, i32
  }
  func.func @transform_2(%arg0: i32, %arg1: i32) -> (i32, i32, i32) {
    %c0_i32 = arith.constant 0 : i32
    %c0_i32_0 = arith.constant 0 : i32
    %c0_i32_1 = arith.constant 0 : i32
    return %arg0, %c0_i32, %c0_i32_0 : i32, i32, i32
  }
  func.func @transform_3(%arg0: i32, %arg1: i32) -> (i32, i32, i32) {
    %c0_i32 = arith.constant 0 : i32
    %c0_i32_0 = arith.constant 0 : i32
    return %arg0, %arg1, %c0_i32 : i32, i32, i32
  }
}

module attributes {stable_mosaic.version = 11 : i64} {
  func.func @_gemm_bias_act_kernel(%arg0: i32, %arg1: i32, %arg2: memref<1x128x432xbf16, #tpu.memory_space<vmem>>, %arg3: memref<1x432x24xbf16, #tpu.memory_space<vmem>>, %arg4: memref<1x1x24xf32, #tpu.memory_space<vmem>>, %arg5: memref<1x128x24xbf16, #tpu.memory_space<vmem>>) attributes {dimension_semantics = [#tpu.dimension_semantics<parallel>, #tpu.dimension_semantics<parallel>], iteration_bounds = array<i64: 1, 1>, scalar_prefetch = 0 : i64, scratch_operands = 0 : i64, tpu.core_type = #tpu.core_type<tc>, window_params = [{transform_indices = @transform_0, window_bounds = array<i64: 1, 128, 432>}, {transform_indices = @transform_1, window_bounds = array<i64: 1, 432, 24>}, {transform_indices = @transform_2, window_bounds = array<i64: 1, 1, 24>}, {transform_indices = @transform_3, window_bounds = array<i64: 1, 128, 24>}]} {
    %c0 = arith.constant 0 : index
    %c0_0 = arith.constant 0 : index
    %c0_1 = arith.constant 0 : index
    %0 = vector.load %arg2[%c0, %c0_0, %c0_1] : memref<1x128x432xbf16, #tpu.memory_space<vmem>>, vector<1x128x432xbf16>
    %1 = vector.shape_cast %0 : vector<1x128x432xbf16> to vector<128x432xbf16>
    %c0_2 = arith.constant 0 : index
    %c0_3 = arith.constant 0 : index
    %c0_4 = arith.constant 0 : index
    %2 = vector.load %arg3[%c0_2, %c0_3, %c0_4] : memref<1x432x24xbf16, #tpu.memory_space<vmem>>, vector<1x432x24xbf16>
    %3 = vector.shape_cast %2 : vector<1x432x24xbf16> to vector<432x24xbf16>
    %cst = arith.constant dense<0.000000e+00> : vector<128x24xf32>
    %4 = tpu.matmul %1, %3, %cst {dimension_numbers = #tpu.dot_dimension_numbers<[1], [0], [0], [1], [0, 0, 1, 1], [], []>} : vector<128x432xbf16>, vector<432x24xbf16>, vector<128x24xf32> -> vector<128x24xf32>
    %c0_5 = arith.constant 0 : index
    %c0_6 = arith.constant 0 : index
    %c0_7 = arith.constant 0 : index
    %5 = vector.load %arg4[%c0_5, %c0_6, %c0_7] : memref<1x1x24xf32, #tpu.memory_space<vmem>>, vector<1x1x24xf32>
    %6 = vector.shape_cast %5 : vector<1x1x24xf32> to vector<1x24xf32>
    %7 = vector.broadcast %6 : vector<1x24xf32> to vector<128x24xf32>
    %8 = arith.addf %4, %7 : vector<128x24xf32>
    %cst_8 = arith.constant 0.000000e+00 : f32
    %9 = vector.broadcast %cst_8 : f32 to vector<128x24xf32>
    %10 = arith.maximumf %8, %9 : vector<128x24xf32>
    %11 = arith.truncf %10 : vector<128x24xf32> to vector<128x24xbf16>
    %c0_9 = arith.constant 0 : index
    %c0_10 = arith.constant 0 : index
    %c0_11 = arith.constant 0 : index
    %12 = vector.load %arg5[%c0_9, %c0_10, %c0_11] : memref<1x128x24xbf16, #tpu.memory_space<vmem>>, vector<1x128x24xbf16>
    %13 = vector.shape_cast %12 : vector<1x128x24xbf16> to vector<128x24xbf16>
    %14 = vector.shape_cast %11 : vector<128x24xbf16> to vector<1x128x24xbf16>
    tpu.vector_store %arg5[%c0_9, %c0_10, %c0_11], %14 {strides = array<i32>} : memref<1x128x24xbf16, #tpu.memory_space<vmem>>, vector<1x128x24xbf16>,
    return
  }
  func.func @transform_0(%arg0: i32, %arg1: i32) -> (i32, i32, i32) {
    %c0_i32 = arith.constant 0 : i32
    %c0_i32_0 = arith.constant 0 : i32
    return %arg0, %arg1, %c0_i32 : i32, i32, i32
  }
  func.func @transform_1(%arg0: i32, %arg1: i32) -> (i32, i32, i32) {
    %c0_i32 = arith.constant 0 : i32
    %c0_i32_0 = arith.constant 0 : i32
    %c0_i32_1 = arith.constant 0 : i32
    return %arg0, %c0_i32, %c0_i32_0 : i32, i32, i32
  }
  func.func @transform_2(%arg0: i32, %arg1: i32) -> (i32, i32, i32) {
    %c0_i32 = arith.constant 0 : i32
    %c0_i32_0 = arith.constant 0 : i32
    %c0_i32_1 = arith.constant 0 : i32
    return %arg0, %c0_i32, %c0_i32_0 : i32, i32, i32
  }
  func.func @transform_3(%arg0: i32, %arg1: i32) -> (i32, i32, i32) {
    %c0_i32 = arith.constant 0 : i32
    %c0_i32_0 = arith.constant 0 : i32
    return %arg0, %arg1, %c0_i32 : i32, i32, i32
  }
}

module attributes {stable_mosaic.version = 11 : i64} {
  func.func @_gemm_bias_act_kernel(%arg0: i32, %arg1: i32, %arg2: memref<1x16x648xbf16, #tpu.memory_space<vmem>>, %arg3: memref<1x648x64xbf16, #tpu.memory_space<vmem>>, %arg4: memref<1x1x64xf32, #tpu.memory_space<vmem>>, %arg5: memref<1x16x64xbf16, #tpu.memory_space<vmem>>) attributes {dimension_semantics = [#tpu.dimension_semantics<parallel>, #tpu.dimension_semantics<parallel>], iteration_bounds = array<i64: 1, 1>, scalar_prefetch = 0 : i64, scratch_operands = 0 : i64, tpu.core_type = #tpu.core_type<tc>, window_params = [{transform_indices = @transform_0, window_bounds = array<i64: 1, 16, 648>}, {transform_indices = @transform_1, window_bounds = array<i64: 1, 648, 64>}, {transform_indices = @transform_2, window_bounds = array<i64: 1, 1, 64>}, {transform_indices = @transform_3, window_bounds = array<i64: 1, 16, 64>}]} {
    %c0 = arith.constant 0 : index
    %c0_0 = arith.constant 0 : index
    %c0_1 = arith.constant 0 : index
    %0 = vector.load %arg2[%c0, %c0_0, %c0_1] : memref<1x16x648xbf16, #tpu.memory_space<vmem>>, vector<1x16x648xbf16>
    %1 = vector.shape_cast %0 : vector<1x16x648xbf16> to vector<16x648xbf16>
    %c0_2 = arith.constant 0 : index
    %c0_3 = arith.constant 0 : index
    %c0_4 = arith.constant 0 : index
    %2 = vector.load %arg3[%c0_2, %c0_3, %c0_4] : memref<1x648x64xbf16, #tpu.memory_space<vmem>>, vector<1x648x64xbf16>
    %3 = vector.shape_cast %2 : vector<1x648x64xbf16> to vector<648x64xbf16>
    %cst = arith.constant dense<0.000000e+00> : vector<16x64xf32>
    %4 = tpu.matmul %1, %3, %cst {dimension_numbers = #tpu.dot_dimension_numbers<[1], [0], [0], [1], [0, 0, 1, 1], [], []>} : vector<16x648xbf16>, vector<648x64xbf16>, vector<16x64xf32> -> vector<16x64xf32>
    %c0_5 = arith.constant 0 : index
    %c0_6 = arith.constant 0 : index
    %c0_7 = arith.constant 0 : index
    %5 = vector.load %arg4[%c0_5, %c0_6, %c0_7] : memref<1x1x64xf32, #tpu.memory_space<vmem>>, vector<1x1x64xf32>
    %6 = vector.shape_cast %5 : vector<1x1x64xf32> to vector<1x64xf32>
    %7 = vector.broadcast %6 : vector<1x64xf32> to vector<16x64xf32>
    %8 = arith.addf %4, %7 : vector<16x64xf32>
    %cst_8 = arith.constant 0.000000e+00 : f32
    %9 = vector.broadcast %cst_8 : f32 to vector<16x64xf32>
    %10 = arith.maximumf %8, %9 : vector<16x64xf32>
    %11 = arith.truncf %10 : vector<16x64xf32> to vector<16x64xbf16>
    %c0_9 = arith.constant 0 : index
    %c0_10 = arith.constant 0 : index
    %c0_11 = arith.constant 0 : index
    %12 = vector.load %arg5[%c0_9, %c0_10, %c0_11] : memref<1x16x64xbf16, #tpu.memory_space<vmem>>, vector<1x16x64xbf16>
    %13 = vector.shape_cast %12 : vector<1x16x64xbf16> to vector<16x64xbf16>
    %14 = vector.shape_cast %11 : vector<16x64xbf16> to vector<1x16x64xbf16>
    tpu.vector_store %arg5[%c0_9, %c0_10, %c0_11], %14 {strides = array<i32>} : memref<1x16x64xbf16, #tpu.memory_space<vmem>>, vector<1x16x64xbf16>,
    return
  }
  func.func @transform_0(%arg0: i32, %arg1: i32) -> (i32, i32, i32) {
    %c0_i32 = arith.constant 0 : i32
    %c0_i32_0 = arith.constant 0 : i32
    return %arg0, %arg1, %c0_i32 : i32, i32, i32
  }
  func.func @transform_1(%arg0: i32, %arg1: i32) -> (i32, i32, i32) {
    %c0_i32 = arith.constant 0 : i32
    %c0_i32_0 = arith.constant 0 : i32
    %c0_i32_1 = arith.constant 0 : i32
    return %arg0, %c0_i32, %c0_i32_0 : i32, i32, i32
  }
  func.func @transform_2(%arg0: i32, %arg1: i32) -> (i32, i32, i32) {
    %c0_i32 = arith.constant 0 : i32
    %c0_i32_0 = arith.constant 0 : i32
    %c0_i32_1 = arith.constant 0 : i32
    return %arg0, %c0_i32, %c0_i32_0 : i32, i32, i32
  }
  func.func @transform_3(%arg0: i32, %arg1: i32) -> (i32, i32, i32) {
    %c0_i32 = arith.constant 0 : i32
    %c0_i32_0 = arith.constant 0 : i32
    return %arg0, %arg1, %c0_i32 : i32, i32, i32
  }
}

module attributes {stable_mosaic.version = 11 : i64} {
  func.func @_gemm_bias_act_kernel(%arg0: i32, %arg1: i32, %arg2: memref<1x16x1728xbf16, #tpu.memory_space<vmem>>, %arg3: memref<1x1728x64xbf16, #tpu.memory_space<vmem>>, %arg4: memref<1x1x64xf32, #tpu.memory_space<vmem>>, %arg5: memref<1x16x64xbf16, #tpu.memory_space<vmem>>) attributes {dimension_semantics = [#tpu.dimension_semantics<parallel>, #tpu.dimension_semantics<parallel>], iteration_bounds = array<i64: 3, 1>, scalar_prefetch = 0 : i64, scratch_operands = 0 : i64, tpu.core_type = #tpu.core_type<tc>, window_params = [{transform_indices = @transform_0, window_bounds = array<i64: 1, 16, 1728>}, {transform_indices = @transform_1, window_bounds = array<i64: 1, 1728, 64>}, {transform_indices = @transform_2, window_bounds = array<i64: 1, 1, 64>}, {transform_indices = @transform_3, window_bounds = array<i64: 1, 16, 64>}]} {
    %c0 = arith.constant 0 : index
    %c0_0 = arith.constant 0 : index
    %c0_1 = arith.constant 0 : index
    %0 = vector.load %arg2[%c0, %c0_0, %c0_1] : memref<1x16x1728xbf16, #tpu.memory_space<vmem>>, vector<1x16x1728xbf16>
    %1 = vector.shape_cast %0 : vector<1x16x1728xbf16> to vector<16x1728xbf16>
    %c0_2 = arith.constant 0 : index
    %c0_3 = arith.constant 0 : index
    %c0_4 = arith.constant 0 : index
    %2 = vector.load %arg3[%c0_2, %c0_3, %c0_4] : memref<1x1728x64xbf16, #tpu.memory_space<vmem>>, vector<1x1728x64xbf16>
    %3 = vector.shape_cast %2 : vector<1x1728x64xbf16> to vector<1728x64xbf16>
    %cst = arith.constant dense<0.000000e+00> : vector<16x64xf32>
    %4 = tpu.matmul %1, %3, %cst {dimension_numbers = #tpu.dot_dimension_numbers<[1], [0], [0], [1], [0, 0, 1, 1], [], []>} : vector<16x1728xbf16>, vector<1728x64xbf16>, vector<16x64xf32> -> vector<16x64xf32>
    %c0_5 = arith.constant 0 : index
    %c0_6 = arith.constant 0 : index
    %c0_7 = arith.constant 0 : index
    %5 = vector.load %arg4[%c0_5, %c0_6, %c0_7] : memref<1x1x64xf32, #tpu.memory_space<vmem>>, vector<1x1x64xf32>
    %6 = vector.shape_cast %5 : vector<1x1x64xf32> to vector<1x64xf32>
    %7 = vector.broadcast %6 : vector<1x64xf32> to vector<16x64xf32>
    %8 = arith.addf %4, %7 : vector<16x64xf32>
    %cst_8 = arith.constant 0.000000e+00 : f32
    %9 = vector.broadcast %cst_8 : f32 to vector<16x64xf32>
    %10 = arith.maximumf %8, %9 : vector<16x64xf32>
    %11 = arith.truncf %10 : vector<16x64xf32> to vector<16x64xbf16>
    %c0_9 = arith.constant 0 : index
    %c0_10 = arith.constant 0 : index
    %c0_11 = arith.constant 0 : index
    %12 = vector.load %arg5[%c0_9, %c0_10, %c0_11] : memref<1x16x64xbf16, #tpu.memory_space<vmem>>, vector<1x16x64xbf16>
    %13 = vector.shape_cast %12 : vector<1x16x64xbf16> to vector<16x64xbf16>
    %14 = vector.shape_cast %11 : vector<16x64xbf16> to vector<1x16x64xbf16>
    tpu.vector_store %arg5[%c0_9, %c0_10, %c0_11], %14 {strides = array<i32>} : memref<1x16x64xbf16, #tpu.memory_space<vmem>>, vector<1x16x64xbf16>,
    return
  }
  func.func @transform_0(%arg0: i32, %arg1: i32) -> (i32, i32, i32) {
    %c0_i32 = arith.constant 0 : i32
    %c0_i32_0 = arith.constant 0 : i32
    return %arg0, %arg1, %c0_i32 : i32, i32, i32
  }
  func.func @transform_1(%arg0: i32, %arg1: i32) -> (i32, i32, i32) {
    %c0_i32 = arith.constant 0 : i32
    %c0_i32_0 = arith.constant 0 : i32
    %c0_i32_1 = arith.constant 0 : i32
    return %arg0, %c0_i32, %c0_i32_0 : i32, i32, i32
  }
  func.func @transform_2(%arg0: i32, %arg1: i32) -> (i32, i32, i32) {
    %c0_i32 = arith.constant 0 : i32
    %c0_i32_0 = arith.constant 0 : i32
    %c0_i32_1 = arith.constant 0 : i32
    return %arg0, %c0_i32, %c0_i32_0 : i32, i32, i32
  }
  func.func @transform_3(%arg0: i32, %arg1: i32) -> (i32, i32, i32) {
    %c0_i32 = arith.constant 0 : i32
    %c0_i32_0 = arith.constant 0 : i32
    return %arg0, %arg1, %c0_i32 : i32, i32, i32
  }
}

module attributes {stable_mosaic.version = 11 : i64} {
  func.func @_gemm_bias_act_kernel(%arg0: i32, %arg1: i32, %arg2: memref<1x16x64xbf16, #tpu.memory_space<vmem>>, %arg3: memref<1x64x64xbf16, #tpu.memory_space<vmem>>, %arg4: memref<1x1x64xf32, #tpu.memory_space<vmem>>, %arg5: memref<1x16x64xbf16, #tpu.memory_space<vmem>>) attributes {dimension_semantics = [#tpu.dimension_semantics<parallel>, #tpu.dimension_semantics<parallel>], iteration_bounds = array<i64: 1, 1>, scalar_prefetch = 0 : i64, scratch_operands = 0 : i64, tpu.core_type = #tpu.core_type<tc>, window_params = [{transform_indices = @transform_0, window_bounds = array<i64: 1, 16, 64>}, {transform_indices = @transform_1, window_bounds = array<i64: 1, 64, 64>}, {transform_indices = @transform_2, window_bounds = array<i64: 1, 1, 64>}, {transform_indices = @transform_3, window_bounds = array<i64: 1, 16, 64>}]} {
    %c0 = arith.constant 0 : index
    %c0_0 = arith.constant 0 : index
    %c0_1 = arith.constant 0 : index
    %0 = vector.load %arg2[%c0, %c0_0, %c0_1] : memref<1x16x64xbf16, #tpu.memory_space<vmem>>, vector<1x16x64xbf16>
    %1 = vector.shape_cast %0 : vector<1x16x64xbf16> to vector<16x64xbf16>
    %c0_2 = arith.constant 0 : index
    %c0_3 = arith.constant 0 : index
    %c0_4 = arith.constant 0 : index
    %2 = vector.load %arg3[%c0_2, %c0_3, %c0_4] : memref<1x64x64xbf16, #tpu.memory_space<vmem>>, vector<1x64x64xbf16>
    %3 = vector.shape_cast %2 : vector<1x64x64xbf16> to vector<64x64xbf16>
    %cst = arith.constant dense<0.000000e+00> : vector<16x64xf32>
    %4 = tpu.matmul %1, %3, %cst {dimension_numbers = #tpu.dot_dimension_numbers<[1], [0], [0], [1], [0, 0, 1, 1], [], []>} : vector<16x64xbf16>, vector<64x64xbf16>, vector<16x64xf32> -> vector<16x64xf32>
    %c0_5 = arith.constant 0 : index
    %c0_6 = arith.constant 0 : index
    %c0_7 = arith.constant 0 : index
    %5 = vector.load %arg4[%c0_5, %c0_6, %c0_7] : memref<1x1x64xf32, #tpu.memory_space<vmem>>, vector<1x1x64xf32>
    %6 = vector.shape_cast %5 : vector<1x1x64xf32> to vector<1x64xf32>
    %7 = vector.broadcast %6 : vector<1x64xf32> to vector<16x64xf32>
    %8 = arith.addf %4, %7 : vector<16x64xf32>
    %cst_8 = arith.constant 0.000000e+00 : f32
    %9 = vector.broadcast %cst_8 : f32 to vector<16x64xf32>
    %10 = arith.maximumf %8, %9 : vector<16x64xf32>
    %11 = arith.truncf %10 : vector<16x64xf32> to vector<16x64xbf16>
    %c0_9 = arith.constant 0 : index
    %c0_10 = arith.constant 0 : index
    %c0_11 = arith.constant 0 : index
    %12 = vector.load %arg5[%c0_9, %c0_10, %c0_11] : memref<1x16x64xbf16, #tpu.memory_space<vmem>>, vector<1x16x64xbf16>
    %13 = vector.shape_cast %12 : vector<1x16x64xbf16> to vector<16x64xbf16>
    %14 = vector.shape_cast %11 : vector<16x64xbf16> to vector<1x16x64xbf16>
    tpu.vector_store %arg5[%c0_9, %c0_10, %c0_11], %14 {strides = array<i32>} : memref<1x16x64xbf16, #tpu.memory_space<vmem>>, vector<1x16x64xbf16>,
    return
  }
  func.func @transform_0(%arg0: i32, %arg1: i32) -> (i32, i32, i32) {
    %c0_i32 = arith.constant 0 : i32
    %c0_i32_0 = arith.constant 0 : i32
    return %arg0, %arg1, %c0_i32 : i32, i32, i32
  }
  func.func @transform_1(%arg0: i32, %arg1: i32) -> (i32, i32, i32) {
    %c0_i32 = arith.constant 0 : i32
    %c0_i32_0 = arith.constant 0 : i32
    %c0_i32_1 = arith.constant 0 : i32
    return %arg0, %c0_i32, %c0_i32_0 : i32, i32, i32
  }
  func.func @transform_2(%arg0: i32, %arg1: i32) -> (i32, i32, i32) {
    %c0_i32 = arith.constant 0 : i32
    %c0_i32_0 = arith.constant 0 : i32
    %c0_i32_1 = arith.constant 0 : i32
    return %arg0, %c0_i32, %c0_i32_0 : i32, i32, i32
  }
  func.func @transform_3(%arg0: i32, %arg1: i32) -> (i32, i32, i32) {
    %c0_i32 = arith.constant 0 : i32
    %c0_i32_0 = arith.constant 0 : i32
    return %arg0, %arg1, %c0_i32 : i32, i32, i32
  }
}

module attributes {stable_mosaic.version = 11 : i64} {
  func.func @_gemm_bias_act_kernel(%arg0: i32, %arg1: i32, %arg2: memref<1x2x64xbf16, #tpu.memory_space<vmem>>, %arg3: memref<1x64x64xbf16, #tpu.memory_space<vmem>>, %arg4: memref<1x1x64xf32, #tpu.memory_space<vmem>>, %arg5: memref<1x2x64xbf16, #tpu.memory_space<vmem>>) attributes {dimension_semantics = [#tpu.dimension_semantics<parallel>, #tpu.dimension_semantics<parallel>], iteration_bounds = array<i64: 1, 1>, scalar_prefetch = 0 : i64, scratch_operands = 0 : i64, tpu.core_type = #tpu.core_type<tc>, window_params = [{transform_indices = @transform_0, window_bounds = array<i64: 1, 2, 64>}, {transform_indices = @transform_1, window_bounds = array<i64: 1, 64, 64>}, {transform_indices = @transform_2, window_bounds = array<i64: 1, 1, 64>}, {transform_indices = @transform_3, window_bounds = array<i64: 1, 2, 64>}]} {
    %c0 = arith.constant 0 : index
    %c0_0 = arith.constant 0 : index
    %c0_1 = arith.constant 0 : index
    %0 = vector.load %arg2[%c0, %c0_0, %c0_1] : memref<1x2x64xbf16, #tpu.memory_space<vmem>>, vector<1x2x64xbf16>
    %1 = vector.shape_cast %0 : vector<1x2x64xbf16> to vector<2x64xbf16>
    %c0_2 = arith.constant 0 : index
    %c0_3 = arith.constant 0 : index
    %c0_4 = arith.constant 0 : index
    %2 = vector.load %arg3[%c0_2, %c0_3, %c0_4] : memref<1x64x64xbf16, #tpu.memory_space<vmem>>, vector<1x64x64xbf16>
    %3 = vector.shape_cast %2 : vector<1x64x64xbf16> to vector<64x64xbf16>
    %cst = arith.constant dense<0.000000e+00> : vector<2x64xf32>
    %4 = tpu.matmul %1, %3, %cst {dimension_numbers = #tpu.dot_dimension_numbers<[1], [0], [0], [1], [0, 0, 1, 1], [], []>} : vector<2x64xbf16>, vector<64x64xbf16>, vector<2x64xf32> -> vector<2x64xf32>
    %c0_5 = arith.constant 0 : index
    %c0_6 = arith.constant 0 : index
    %c0_7 = arith.constant 0 : index
    %5 = vector.load %arg4[%c0_5, %c0_6, %c0_7] : memref<1x1x64xf32, #tpu.memory_space<vmem>>, vector<1x1x64xf32>
    %6 = vector.shape_cast %5 : vector<1x1x64xf32> to vector<1x64xf32>
    %7 = vector.broadcast %6 : vector<1x64xf32> to vector<2x64xf32>
    %8 = arith.addf %4, %7 : vector<2x64xf32>
    %cst_8 = arith.constant 0.000000e+00 : f32
    %9 = vector.broadcast %cst_8 : f32 to vector<2x64xf32>
    %10 = arith.maximumf %8, %9 : vector<2x64xf32>
    %11 = arith.truncf %10 : vector<2x64xf32> to vector<2x64xbf16>
    %c0_9 = arith.constant 0 : index
    %c0_10 = arith.constant 0 : index
    %c0_11 = arith.constant 0 : index
    %12 = vector.load %arg5[%c0_9, %c0_10, %c0_11] : memref<1x2x64xbf16, #tpu.memory_space<vmem>>, vector<1x2x64xbf16>
    %13 = vector.shape_cast %12 : vector<1x2x64xbf16> to vector<2x64xbf16>
    %14 = vector.shape_cast %11 : vector<2x64xbf16> to vector<1x2x64xbf16>
    tpu.vector_store %arg5[%c0_9, %c0_10, %c0_11], %14 {strides = array<i32>} : memref<1x2x64xbf16, #tpu.memory_space<vmem>>, vector<1x2x64xbf16>,
    return
  }
  func.func @transform_0(%arg0: i32, %arg1: i32) -> (i32, i32, i32) {
    %c0_i32 = arith.constant 0 : i32
    %c0_i32_0 = arith.constant 0 : i32
    return %arg0, %arg1, %c0_i32 : i32, i32, i32
  }
  func.func @transform_1(%arg0: i32, %arg1: i32) -> (i32, i32, i32) {
    %c0_i32 = arith.constant 0 : i32
    %c0_i32_0 = arith.constant 0 : i32
    %c0_i32_1 = arith.constant 0 : i32
    return %arg0, %c0_i32, %c0_i32_0 : i32, i32, i32
  }
  func.func @transform_2(%arg0: i32, %arg1: i32) -> (i32, i32, i32) {
    %c0_i32 = arith.constant 0 : i32
    %c0_i32_0 = arith.constant 0 : i32
    %c0_i32_1 = arith.constant 0 : i32
    return %arg0, %c0_i32, %c0_i32_0 : i32, i32, i32
  }
  func.func @transform_3(%arg0: i32, %arg1: i32) -> (i32, i32, i32) {
    %c0_i32 = arith.constant 0 : i32
    %c0_i32_0 = arith.constant 0 : i32
    return %arg0, %arg1, %c0_i32 : i32, i32, i32
  }
}

module attributes {stable_mosaic.version = 11 : i64} {
  func.func @_gemm_bias_act_kernel(%arg0: i32, %arg1: i32, %arg2: memref<1x16x320xbf16, #tpu.memory_space<vmem>>, %arg3: memref<1x320x64xbf16, #tpu.memory_space<vmem>>, %arg4: memref<1x1x64xf32, #tpu.memory_space<vmem>>, %arg5: memref<1x16x64xbf16, #tpu.memory_space<vmem>>) attributes {dimension_semantics = [#tpu.dimension_semantics<parallel>, #tpu.dimension_semantics<parallel>], iteration_bounds = array<i64: 1, 1>, scalar_prefetch = 0 : i64, scratch_operands = 0 : i64, tpu.core_type = #tpu.core_type<tc>, window_params = [{transform_indices = @transform_0, window_bounds = array<i64: 1, 16, 320>}, {transform_indices = @transform_1, window_bounds = array<i64: 1, 320, 64>}, {transform_indices = @transform_2, window_bounds = array<i64: 1, 1, 64>}, {transform_indices = @transform_3, window_bounds = array<i64: 1, 16, 64>}]} {
    %c0 = arith.constant 0 : index
    %c0_0 = arith.constant 0 : index
    %c0_1 = arith.constant 0 : index
    %0 = vector.load %arg2[%c0, %c0_0, %c0_1] : memref<1x16x320xbf16, #tpu.memory_space<vmem>>, vector<1x16x320xbf16>
    %1 = vector.shape_cast %0 : vector<1x16x320xbf16> to vector<16x320xbf16>
    %c0_2 = arith.constant 0 : index
    %c0_3 = arith.constant 0 : index
    %c0_4 = arith.constant 0 : index
    %2 = vector.load %arg3[%c0_2, %c0_3, %c0_4] : memref<1x320x64xbf16, #tpu.memory_space<vmem>>, vector<1x320x64xbf16>
    %3 = vector.shape_cast %2 : vector<1x320x64xbf16> to vector<320x64xbf16>
    %cst = arith.constant dense<0.000000e+00> : vector<16x64xf32>
    %4 = tpu.matmul %1, %3, %cst {dimension_numbers = #tpu.dot_dimension_numbers<[1], [0], [0], [1], [0, 0, 1, 1], [], []>} : vector<16x320xbf16>, vector<320x64xbf16>, vector<16x64xf32> -> vector<16x64xf32>
    %c0_5 = arith.constant 0 : index
    %c0_6 = arith.constant 0 : index
    %c0_7 = arith.constant 0 : index
    %5 = vector.load %arg4[%c0_5, %c0_6, %c0_7] : memref<1x1x64xf32, #tpu.memory_space<vmem>>, vector<1x1x64xf32>
    %6 = vector.shape_cast %5 : vector<1x1x64xf32> to vector<1x64xf32>
    %7 = vector.broadcast %6 : vector<1x64xf32> to vector<16x64xf32>
    %8 = arith.addf %4, %7 : vector<16x64xf32>
    %cst_8 = arith.constant 0.000000e+00 : f32
    %9 = vector.broadcast %cst_8 : f32 to vector<16x64xf32>
    %10 = arith.maximumf %8, %9 : vector<16x64xf32>
    %11 = arith.truncf %10 : vector<16x64xf32> to vector<16x64xbf16>
    %c0_9 = arith.constant 0 : index
    %c0_10 = arith.constant 0 : index
    %c0_11 = arith.constant 0 : index
    %12 = vector.load %arg5[%c0_9, %c0_10, %c0_11] : memref<1x16x64xbf16, #tpu.memory_space<vmem>>, vector<1x16x64xbf16>
    %13 = vector.shape_cast %12 : vector<1x16x64xbf16> to vector<16x64xbf16>
    %14 = vector.shape_cast %11 : vector<16x64xbf16> to vector<1x16x64xbf16>
    tpu.vector_store %arg5[%c0_9, %c0_10, %c0_11], %14 {strides = array<i32>} : memref<1x16x64xbf16, #tpu.memory_space<vmem>>, vector<1x16x64xbf16>,
    return
  }
  func.func @transform_0(%arg0: i32, %arg1: i32) -> (i32, i32, i32) {
    %c0_i32 = arith.constant 0 : i32
    %c0_i32_0 = arith.constant 0 : i32
    return %arg0, %arg1, %c0_i32 : i32, i32, i32
  }
  func.func @transform_1(%arg0: i32, %arg1: i32) -> (i32, i32, i32) {
    %c0_i32 = arith.constant 0 : i32
    %c0_i32_0 = arith.constant 0 : i32
    %c0_i32_1 = arith.constant 0 : i32
    return %arg0, %c0_i32, %c0_i32_0 : i32, i32, i32
  }
  func.func @transform_2(%arg0: i32, %arg1: i32) -> (i32, i32, i32) {
    %c0_i32 = arith.constant 0 : i32
    %c0_i32_0 = arith.constant 0 : i32
    %c0_i32_1 = arith.constant 0 : i32
    return %arg0, %c0_i32, %c0_i32_0 : i32, i32, i32
  }
  func.func @transform_3(%arg0: i32, %arg1: i32) -> (i32, i32, i32) {
    %c0_i32 = arith.constant 0 : i32
    %c0_i32_0 = arith.constant 0 : i32
    return %arg0, %arg1, %c0_i32 : i32, i32, i32
  }
}

module attributes {stable_mosaic.version = 11 : i64} {
  func.func @_gemm_bias_act_kernel(%arg0: i32, %arg1: i32, %arg2: memref<1x128x24xbf16, #tpu.memory_space<vmem>>, %arg3: memref<1x24x64xbf16, #tpu.memory_space<vmem>>, %arg4: memref<1x1x64xf32, #tpu.memory_space<vmem>>, %arg5: memref<1x128x64xbf16, #tpu.memory_space<vmem>>) attributes {dimension_semantics = [#tpu.dimension_semantics<parallel>, #tpu.dimension_semantics<parallel>], iteration_bounds = array<i64: 1, 1>, scalar_prefetch = 0 : i64, scratch_operands = 0 : i64, tpu.core_type = #tpu.core_type<tc>, window_params = [{transform_indices = @transform_0, window_bounds = array<i64: 1, 128, 24>}, {transform_indices = @transform_1, window_bounds = array<i64: 1, 24, 64>}, {transform_indices = @transform_2, window_bounds = array<i64: 1, 1, 64>}, {transform_indices = @transform_3, window_bounds = array<i64: 1, 128, 64>}]} {
    %c0 = arith.constant 0 : index
    %c0_0 = arith.constant 0 : index
    %c0_1 = arith.constant 0 : index
    %0 = vector.load %arg2[%c0, %c0_0, %c0_1] : memref<1x128x24xbf16, #tpu.memory_space<vmem>>, vector<1x128x24xbf16>
    %1 = vector.shape_cast %0 : vector<1x128x24xbf16> to vector<128x24xbf16>
    %c0_2 = arith.constant 0 : index
    %c0_3 = arith.constant 0 : index
    %c0_4 = arith.constant 0 : index
    %2 = vector.load %arg3[%c0_2, %c0_3, %c0_4] : memref<1x24x64xbf16, #tpu.memory_space<vmem>>, vector<1x24x64xbf16>
    %3 = vector.shape_cast %2 : vector<1x24x64xbf16> to vector<24x64xbf16>
    %cst = arith.constant dense<0.000000e+00> : vector<128x64xf32>
    %4 = tpu.matmul %1, %3, %cst {dimension_numbers = #tpu.dot_dimension_numbers<[1], [0], [0], [1], [0, 0, 1, 1], [], []>} : vector<128x24xbf16>, vector<24x64xbf16>, vector<128x64xf32> -> vector<128x64xf32>
    %c0_5 = arith.constant 0 : index
    %c0_6 = arith.constant 0 : index
    %c0_7 = arith.constant 0 : index
    %5 = vector.load %arg4[%c0_5, %c0_6, %c0_7] : memref<1x1x64xf32, #tpu.memory_space<vmem>>, vector<1x1x64xf32>
    %6 = vector.shape_cast %5 : vector<1x1x64xf32> to vector<1x64xf32>
    %7 = vector.broadcast %6 : vector<1x64xf32> to vector<128x64xf32>
    %8 = arith.addf %4, %7 : vector<128x64xf32>
    %cst_8 = arith.constant 0.000000e+00 : f32
    %9 = vector.broadcast %cst_8 : f32 to vector<128x64xf32>
    %10 = arith.maximumf %8, %9 : vector<128x64xf32>
    %11 = arith.truncf %10 : vector<128x64xf32> to vector<128x64xbf16>
    %c0_9 = arith.constant 0 : index
    %c0_10 = arith.constant 0 : index
    %c0_11 = arith.constant 0 : index
    %12 = vector.load %arg5[%c0_9, %c0_10, %c0_11] : memref<1x128x64xbf16, #tpu.memory_space<vmem>>, vector<1x128x64xbf16>
    %13 = vector.shape_cast %12 : vector<1x128x64xbf16> to vector<128x64xbf16>
    %14 = vector.shape_cast %11 : vector<128x64xbf16> to vector<1x128x64xbf16>
    tpu.vector_store %arg5[%c0_9, %c0_10, %c0_11], %14 {strides = array<i32>} : memref<1x128x64xbf16, #tpu.memory_space<vmem>>, vector<1x128x64xbf16>,
    return
  }
  func.func @transform_0(%arg0: i32, %arg1: i32) -> (i32, i32, i32) {
    %c0_i32 = arith.constant 0 : i32
    %c0_i32_0 = arith.constant 0 : i32
    return %arg0, %arg1, %c0_i32 : i32, i32, i32
  }
  func.func @transform_1(%arg0: i32, %arg1: i32) -> (i32, i32, i32) {
    %c0_i32 = arith.constant 0 : i32
    %c0_i32_0 = arith.constant 0 : i32
    %c0_i32_1 = arith.constant 0 : i32
    return %arg0, %c0_i32, %c0_i32_0 : i32, i32, i32
  }
  func.func @transform_2(%arg0: i32, %arg1: i32) -> (i32, i32, i32) {
    %c0_i32 = arith.constant 0 : i32
    %c0_i32_0 = arith.constant 0 : i32
    %c0_i32_1 = arith.constant 0 : i32
    return %arg0, %c0_i32, %c0_i32_0 : i32, i32, i32
  }
  func.func @transform_3(%arg0: i32, %arg1: i32) -> (i32, i32, i32) {
    %c0_i32 = arith.constant 0 : i32
    %c0_i32_0 = arith.constant 0 : i32
    return %arg0, %arg1, %c0_i32 : i32, i32, i32
  }
}

module attributes {stable_mosaic.version = 11 : i64} {
  func.func @_gemm_bias_act_kernel(%arg0: i32, %arg1: i32, %arg2: memref<1x128x3456xbf16, #tpu.memory_space<vmem>>, %arg3: memref<1x3456x256xbf16, #tpu.memory_space<vmem>>, %arg4: memref<1x1x256xf32, #tpu.memory_space<vmem>>, %arg5: memref<1x128x256xbf16, #tpu.memory_space<vmem>>) attributes {dimension_semantics = [#tpu.dimension_semantics<parallel>, #tpu.dimension_semantics<parallel>], iteration_bounds = array<i64: 1, 1>, scalar_prefetch = 0 : i64, scratch_operands = 0 : i64, tpu.core_type = #tpu.core_type<tc>, window_params = [{transform_indices = @transform_0, window_bounds = array<i64: 1, 128, 3456>}, {transform_indices = @transform_1, window_bounds = array<i64: 1, 3456, 256>}, {transform_indices = @transform_2, window_bounds = array<i64: 1, 1, 256>}, {transform_indices = @transform_3, window_bounds = array<i64: 1, 128, 256>}]} {
    %c0 = arith.constant 0 : index
    %c0_0 = arith.constant 0 : index
    %c0_1 = arith.constant 0 : index
    %0 = vector.load %arg2[%c0, %c0_0, %c0_1] : memref<1x128x3456xbf16, #tpu.memory_space<vmem>>, vector<1x128x3456xbf16>
    %1 = vector.shape_cast %0 : vector<1x128x3456xbf16> to vector<128x3456xbf16>
    %c0_2 = arith.constant 0 : index
    %c0_3 = arith.constant 0 : index
    %c0_4 = arith.constant 0 : index
    %2 = vector.load %arg3[%c0_2, %c0_3, %c0_4] : memref<1x3456x256xbf16, #tpu.memory_space<vmem>>, vector<1x3456x256xbf16>
    %3 = vector.shape_cast %2 : vector<1x3456x256xbf16> to vector<3456x256xbf16>
    %cst = arith.constant dense<0.000000e+00> : vector<128x256xf32>
    %4 = tpu.matmul %1, %3, %cst {dimension_numbers = #tpu.dot_dimension_numbers<[1], [0], [0], [1], [0, 0, 1, 1], [], []>} : vector<128x3456xbf16>, vector<3456x256xbf16>, vector<128x256xf32> -> vector<128x256xf32>
    %c0_5 = arith.constant 0 : index
    %c0_6 = arith.constant 0 : index
    %c0_7 = arith.constant 0 : index
    %5 = vector.load %arg4[%c0_5, %c0_6, %c0_7] : memref<1x1x256xf32, #tpu.memory_space<vmem>>, vector<1x1x256xf32>
    %6 = vector.shape_cast %5 : vector<1x1x256xf32> to vector<1x256xf32>
    %7 = vector.broadcast %6 : vector<1x256xf32> to vector<128x256xf32>
    %8 = arith.addf %4, %7 : vector<128x256xf32>
    %cst_8 = arith.constant 0.000000e+00 : f32
    %9 = vector.broadcast %cst_8 : f32 to vector<128x256xf32>
    %10 = arith.maximumf %8, %9 : vector<128x256xf32>
    %11 = arith.truncf %10 : vector<128x256xf32> to vector<128x256xbf16>
    %c0_9 = arith.constant 0 : index
    %c0_10 = arith.constant 0 : index
    %c0_11 = arith.constant 0 : index
    %12 = vector.load %arg5[%c0_9, %c0_10, %c0_11] : memref<1x128x256xbf16, #tpu.memory_space<vmem>>, vector<1x128x256xbf16>
    %13 = vector.shape_cast %12 : vector<1x128x256xbf16> to vector<128x256xbf16>
    %14 = vector.shape_cast %11 : vector<128x256xbf16> to vector<1x128x256xbf16>
    tpu.vector_store %arg5[%c0_9, %c0_10, %c0_11], %14 {strides = array<i32>} : memref<1x128x256xbf16, #tpu.memory_space<vmem>>, vector<1x128x256xbf16>,
    return
  }
  func.func @transform_0(%arg0: i32, %arg1: i32) -> (i32, i32, i32) {
    %c0_i32 = arith.constant 0 : i32
    %c0_i32_0 = arith.constant 0 : i32
    return %arg0, %arg1, %c0_i32 : i32, i32, i32
  }
  func.func @transform_1(%arg0: i32, %arg1: i32) -> (i32, i32, i32) {
    %c0_i32 = arith.constant 0 : i32
    %c0_i32_0 = arith.constant 0 : i32
    %c0_i32_1 = arith.constant 0 : i32
    return %arg0, %c0_i32, %c0_i32_0 : i32, i32, i32
  }
  func.func @transform_2(%arg0: i32, %arg1: i32) -> (i32, i32, i32) {
    %c0_i32 = arith.constant 0 : i32
    %c0_i32_0 = arith.constant 0 : i32
    %c0_i32_1 = arith.constant 0 : i32
    return %arg0, %c0_i32, %c0_i32_0 : i32, i32, i32
  }
  func.func @transform_3(%arg0: i32, %arg1: i32) -> (i32, i32, i32) {
    %c0_i32 = arith.constant 0 : i32
    %c0_i32_0 = arith.constant 0 : i32
    return %arg0, %arg1, %c0_i32 : i32, i32, i32
  }
}

module attributes {stable_mosaic.version = 11 : i64} {
  func.func @_gemm_bias_act_kernel(%arg0: i32, %arg1: i32, %arg2: memref<1x16x6912xbf16, #tpu.memory_space<vmem>>, %arg3: memref<1x6912x3xbf16, #tpu.memory_space<vmem>>, %arg4: memref<1x1x3xf32, #tpu.memory_space<vmem>>, %arg5: memref<1x16x3xf32, #tpu.memory_space<vmem>>) attributes {dimension_semantics = [#tpu.dimension_semantics<parallel>, #tpu.dimension_semantics<parallel>], iteration_bounds = array<i64: 1, 1>, scalar_prefetch = 0 : i64, scratch_operands = 0 : i64, tpu.core_type = #tpu.core_type<tc>, window_params = [{transform_indices = @transform_0, window_bounds = array<i64: 1, 16, 6912>}, {transform_indices = @transform_1, window_bounds = array<i64: 1, 6912, 3>}, {transform_indices = @transform_2, window_bounds = array<i64: 1, 1, 3>}, {transform_indices = @transform_3, window_bounds = array<i64: 1, 16, 3>}]} {
    %c0 = arith.constant 0 : index
    %c0_0 = arith.constant 0 : index
    %c0_1 = arith.constant 0 : index
    %0 = vector.load %arg2[%c0, %c0_0, %c0_1] : memref<1x16x6912xbf16, #tpu.memory_space<vmem>>, vector<1x16x6912xbf16>
    %1 = vector.shape_cast %0 : vector<1x16x6912xbf16> to vector<16x6912xbf16>
    %c0_2 = arith.constant 0 : index
    %c0_3 = arith.constant 0 : index
    %c0_4 = arith.constant 0 : index
    %2 = vector.load %arg3[%c0_2, %c0_3, %c0_4] : memref<1x6912x3xbf16, #tpu.memory_space<vmem>>, vector<1x6912x3xbf16>
    %3 = vector.shape_cast %2 : vector<1x6912x3xbf16> to vector<6912x3xbf16>
    %cst = arith.constant dense<0.000000e+00> : vector<16x3xf32>
    %4 = tpu.matmul %1, %3, %cst {dimension_numbers = #tpu.dot_dimension_numbers<[1], [0], [0], [1], [0, 0, 1, 1], [], []>} : vector<16x6912xbf16>, vector<6912x3xbf16>, vector<16x3xf32> -> vector<16x3xf32>
    %c0_5 = arith.constant 0 : index
    %c0_6 = arith.constant 0 : index
    %c0_7 = arith.constant 0 : index
    %5 = vector.load %arg4[%c0_5, %c0_6, %c0_7] : memref<1x1x3xf32, #tpu.memory_space<vmem>>, vector<1x1x3xf32>
    %6 = vector.shape_cast %5 : vector<1x1x3xf32> to vector<1x3xf32>
    %7 = vector.broadcast %6 : vector<1x3xf32> to vector<16x3xf32>
    %8 = arith.addf %4, %7 : vector<16x3xf32>
    %c0_8 = arith.constant 0 : index
    %c0_9 = arith.constant 0 : index
    %c0_10 = arith.constant 0 : index
    %9 = vector.load %arg5[%c0_8, %c0_9, %c0_10] : memref<1x16x3xf32, #tpu.memory_space<vmem>>, vector<1x16x3xf32>
    %10 = vector.shape_cast %9 : vector<1x16x3xf32> to vector<16x3xf32>
    %11 = vector.shape_cast %8 : vector<16x3xf32> to vector<1x16x3xf32>
    tpu.vector_store %arg5[%c0_8, %c0_9, %c0_10], %11 {strides = array<i32>} : memref<1x16x3xf32, #tpu.memory_space<vmem>>, vector<1x16x3xf32>,
    return
  }
  func.func @transform_0(%arg0: i32, %arg1: i32) -> (i32, i32, i32) {
    %c0_i32 = arith.constant 0 : i32
    %c0_i32_0 = arith.constant 0 : i32
    return %arg0, %arg1, %c0_i32 : i32, i32, i32
  }
  func.func @transform_1(%arg0: i32, %arg1: i32) -> (i32, i32, i32) {
    %c0_i32 = arith.constant 0 : i32
    %c0_i32_0 = arith.constant 0 : i32
    %c0_i32_1 = arith.constant 0 : i32
    return %arg0, %c0_i32, %c0_i32_0 : i32, i32, i32
  }
  func.func @transform_2(%arg0: i32, %arg1: i32) -> (i32, i32, i32) {
    %c0_i32 = arith.constant 0 : i32
    %c0_i32_0 = arith.constant 0 : i32
    %c0_i32_1 = arith.constant 0 : i32
    return %arg0, %c0_i32, %c0_i32_0 : i32, i32, i32
  }
  func.func @transform_3(%arg0: i32, %arg1: i32) -> (i32, i32, i32) {
    %c0_i32 = arith.constant 0 : i32
    %c0_i32_0 = arith.constant 0 : i32
    return %arg0, %arg1, %c0_i32 : i32, i32, i32
  }
}

module attributes {stable_mosaic.version = 11 : i64} {
  func.func @_softmax_kernel(%arg0: i32, %arg1: memref<512x128xf32, #tpu.memory_space<vmem>>, %arg2: memref<512x128xf32, #tpu.memory_space<vmem>>) attributes {dimension_semantics = [#tpu.dimension_semantics<parallel>], iteration_bounds = array<i64: 16>, scalar_prefetch = 0 : i64, scratch_operands = 0 : i64, tpu.core_type = #tpu.core_type<tc>, window_params = [{transform_indices = @transform_0, window_bounds = array<i64: 512, 128>}, {transform_indices = @transform_1, window_bounds = array<i64: 512, 128>}]} {
    %c0 = arith.constant 0 : index
    %c0_0 = arith.constant 0 : index
    %0 = vector.load %arg1[%c0, %c0_0] : memref<512x128xf32, #tpu.memory_space<vmem>>, vector<512x128xf32>
    %cst = arith.constant dense<0xFF800000> : vector<512xf32>
    %1 = vector.multi_reduction <maximumf>, %0, %cst [1] : vector<512x128xf32> to vector<512xf32>
    %2 = vector.shape_cast %1 : vector<512xf32> to vector<512x1xf32>
    %3 = vector.broadcast %2 : vector<512x1xf32> to vector<512x128xf32>
    %4 = arith.subf %0, %3 : vector<512x128xf32>
    %5 = math.exp %4 : vector<512x128xf32>
    %cst_1 = arith.constant dense<0.000000e+00> : vector<512xf32>
    %6 = vector.multi_reduction <add>, %5, %cst_1 [1] : vector<512x128xf32> to vector<512xf32>
    %7 = vector.shape_cast %6 : vector<512xf32> to vector<512x1xf32>
    %8 = tpu.reciprocal %7 {approx = true} : vector<512x1xf32> -> vector<512x1xf32>
    %9 = vector.broadcast %8 : vector<512x1xf32> to vector<512x128xf32>
    %10 = arith.mulf %5, %9 : vector<512x128xf32>
    %c0_2 = arith.constant 0 : index
    %c0_3 = arith.constant 0 : index
    %11 = vector.load %arg2[%c0_2, %c0_3] : memref<512x128xf32, #tpu.memory_space<vmem>>, vector<512x128xf32>
    tpu.vector_store %arg2[%c0_2, %c0_3], %10 {strides = array<i32>} : memref<512x128xf32, #tpu.memory_space<vmem>>, vector<512x128xf32>,
    return
  }
  func.func @transform_0(%arg0: i32) -> (i32, i32) {
    %c0_i32 = arith.constant 0 : i32
    %c0_i32_0 = arith.constant 0 : i32
    return %arg0, %c0_i32 : i32, i32
  }
  func.func @transform_1(%arg0: i32) -> (i32, i32) {
    %c0_i32 = arith.constant 0 : i32
    %c0_i32_0 = arith.constant 0 : i32
    return %arg0, %c0_i32 : i32, i32
  }
}

</mosaic_0001>

<bundles_post_ra>
// kernel: deeplab3d_forward.11
= control target key start
LH: loop header
LB: loop body
LE: loop exit
PB: predicated region body
PF: predicated region fallthrough
CT: control target
= control target key end

     0   :  { %s1873_s12 = smov 0   ;;  %s1875_s13 = smov 0   ;;  %s2199_s0 = inlined_call_operand.vmem [shape: bf16[1,1024,108], index: 0, kind: input, shape index: {}]   ;;  %s2200_s1 = inlined_call_operand.vmem [shape: bf16[1,108,16], index: 1, kind: input, shape index: {}]   ;;  %s2201_s2 = inlined_call_operand.vmem [shape: f32[1,1,16], index: 2, kind: input, shape index: {}]   ;;  %s2202_s3 = inlined_call_operand.vmem [shape: bf16[1,1024,16], index: 3, kind: output, shape index: {}]  }
   0x1   :  { %s1877_s14 = smov 0  }
   0x2 LB: > { %s22_s15 = sadd.s32 1, %s1847_s13  ;;  %p1426_p0 = scmp.ge.s32.totalorder %s1851_s14, 1  ;;  %s1851_s14 = sphi %s1877_s14, %s13_s14   ;;  %s1847_s13 = sphi %s1875_s13, %s2204_s13   ;;  %s1843_s12 = sphi %s1873_s12, %s2203_s12  }
   0x3   : > { %p23_p1 = scmp.ge.s32.totalorder %s22_s15, 2  ;;  %p176_p2 = scmp.lt.s32.totalorder %s1851_s14, 3 }
   0x5   : > { %s2206_s15 = smov (%p23_p1, %s22_s15), 0  ;;  %p177_p3 = pnand %p1426_p0, %p176_p2 }
   0x6   : > { %s1427_s20 = sshll.u32 (!%p177_p3), %s1843_s12, 6 }
   0x7   : > { %180 = sbr.rel (%p177_p3) target bundleno = 303 (0x12f), region = 32  ;;  %p219_p4 = scmp.lt.s32.totalorder (!%p177_p3), %s1427_s20, 127 }
   0xc   : > { %v1790_v0 = vld [vmem:[%s2200_s1 + $0x30] sm:$0x3f]   ;;  %vm628_vm0 = vcmask 1045504   ;;  %v1791_v1 = vld [vmem:[%s2200_s1 + $0x28] sm:$0xff]   ;;  %v1792_v3 = vld [vmem:[%s2200_s1 + $0x20] sm:$0xff]   ;;  %s2208_s20 = smov (!%p219_p4, %s1427_s20), 127 }
   0xd   : > { %1764 = vmatprep.subr.msk.bf16.mxu0 %vm628_vm0, %v1790_v0  ;;  %1765 = vmatprep.subr.msk.bf16.mxu1 %vm628_vm0, %v1790_v0  ;;  %v630_v2 = vsel %vm628_vm0, %v1790_v0, 0  ;;  %v1793_v4 = vld [vmem:[%s2200_s1 + $0x18] sm:$0xff]   ;;  %s1428_s25 = sshll.u32 %s2208_s20, 2  ;;  %vm531_vm1 = vcmask 883712   ;;  %v1794_v7 = vld [vmem:[%s2200_s1 + $0x10] sm:$0xff]   ;;  %v1795_v8 = vld [vmem:[%s2200_s1 + $0x8] sm:$0xff]  }
   0xe   : > { %1673 = vmatpush3.bf16.msra.mxu0 %v630_v2  ;;  %1757 = vmatpush3.bf16.msra.mxu1 %v630_v2  ;;  %s1911_s28 = scalar_lea.vmem %s2199_s0, %s1428_s25  ;;  %v1796_v9 = vld [vmem:[%s2200_s1] sm:$0xff]   ;;  %s2000_s12 = scalar_lea.vmem %s2202_s3, %s1428_s25  ;;  %vm1241_vm2 = vcmask 125952  }
   0xf   : > { %1674 = vmatprep.subr.bf16.mxu0 %v1791_v1  ;;  %1751 = vmatprep.subr.bf16.mxu1 %v1791_v1  ;;  %v1797_v5 = vld [vmem:[%s1911_s28] sm:$0xff]   ;;  %v1799_v10 = vld [vmem:[%s1911_s28 + $0x8] sm:$0xff]   ;;  %v1801_v12 = vld [vmem:[%s1911_s28 + $0x10] sm:$0xff]  }
  0x10   : > { %v1798_v6 = vld [vmem:[%s1911_s28 + $0x80] sm:$0xff]   ;;  %1686 = vmatprep.mubr.msk.bf16.mxu0 %vm531_vm1, %v1797_v5  ;;  %v1800_v11 = vld [vmem:[%s1911_s28 + $0x88] sm:$0xff]   ;;  %v1802_v13 = vld [vmem:[%s1911_s28 + $0x90] sm:$0xff]  }
  0x11   : > { %1718 = vmatprep.mubr.msk.bf16.mxu1 %vm531_vm1, %v1798_v6  ;;  %v1803_v14 = vld [vmem:[%s1911_s28 + $0x18] sm:$0xff]   ;;  %v1805_v16 = vld [vmem:[%s1911_s28 + $0x20] sm:$0xff]   ;;  %v1807_v18 = vld [vmem:[%s1911_s28 + $0x28] sm:$0xff]  }
  0x12   : > { %1675 = vmatpush3.bf16.msra.mxu0 %v1791_v1  ;;  %1758 = vmatpush3.bf16.msra.mxu1 %v1791_v1  ;;  %v1804_v15 = vld [vmem:[%s1911_s28 + $0x98] sm:$0xff]   ;;  %v1806_v17 = vld [vmem:[%s1911_s28 + $0xa0] sm:$0xff]   ;;  %v1808_v19 = vld [vmem:[%s1911_s28 + $0xa8] sm:$0xff]  }
  0x13   : > { %1676 = vmatprep.subr.bf16.mxu0 %v1792_v3  ;;  %1752 = vmatprep.subr.bf16.mxu1 %v1792_v3  ;;  %v1809_v20 = vld [vmem:[%s1911_s28 + $0x30] sm:$0xff]   ;;  %v1811_v22 = vld [vmem:[%s1911_s28 + $0x38] sm:$0xff]   ;;  %v1813_v24 = vld [vmem:[%s1911_s28 + $0x40] sm:$0xff]  }
  0x14   : > { %v1810_v21 = vld [vmem:[%s1911_s28 + $0xb0] sm:$0xff]   ;;  %v1812_v23 = vld [vmem:[%s1911_s28 + $0xb8] sm:$0xff]   ;;  %v1814_v25 = vld [vmem:[%s1911_s28 + $0xc0] sm:$0xff]  }
  0x15   : > { %v1815_v26 = vld [vmem:[%s1911_s28 + $0x48] sm:$0xff]   ;;  %v1817_v28 = vld [vmem:[%s1911_s28 + $0x50] sm:$0xff]   ;;  %v1819_v30 = vld [vmem:[%s1911_s28 + $0x58] sm:$0xff]  }
  0x16   : > { %1677 = vmatpush3.bf16.msra.mxu0 %v1792_v3  ;;  %1759 = vmatpush3.bf16.msra.mxu1 %v1792_v3  ;;  %v1816_v27 = vld [vmem:[%s1911_s28 + $0xc8] sm:$0xff]   ;;  %v1818_v29 = vld [vmem:[%s1911_s28 + $0xd0] sm:$0xff]   ;;  %v1820_v31 = vld [vmem:[%s1911_s28 + $0xd8] sm:$0xff]  }
  0x17   : > { %1678 = vmatprep.subr.bf16.mxu0 %v1793_v4  ;;  %1753 = vmatprep.subr.bf16.mxu1 %v1793_v4  ;;  %v1821_v32 = vld [vmem:[%s1911_s28 + $0x60] sm:$0xff]   ;;  %v1823_v34 = vld [vmem:[%s1911_s28 + $0x68] sm:$0xff]   ;;  %v1825_v36 = vld [vmem:[%s1911_s28 + $0x70] sm:$0xff]  }
  0x18   : > { %v1822_v33 = vld [vmem:[%s1911_s28 + $0xe0] sm:$0xff]   ;;  %v1824_v35 = vld [vmem:[%s1911_s28 + $0xe8] sm:$0xff]   ;;  %v1826_v37 = vld [vmem:[%s1911_s28 + $0xf0] sm:$0xff]  }
  0x19   : > { %v1827_v38 = vld [vmem:[%s1911_s28 + $0x78] sm:$0xff]   ;;  %v1989_v40 = vld [vmem:[%s2201_s2] ss:$0 sm:$0xff] }
  0x1a   : > { %1679 = vmatpush3.bf16.msra.mxu0 %v1793_v4  ;;  %1760 = vmatpush3.bf16.msra.mxu1 %v1793_v4  ;;  %v1828_v39 = vld [vmem:[%s1911_s28 + $0xf8] sm:$0xff]  }
  0x1b   : > { %1680 = vmatprep.subr.bf16.mxu0 %v1794_v7  ;;  %1754 = vmatprep.subr.bf16.mxu1 %v1794_v7 }
  0x1e   : > { %1681 = vmatpush3.bf16.msra.mxu0 %v1794_v7  ;;  %1761 = vmatpush3.bf16.msra.mxu1 %v1794_v7 }
  0x1f   : > { %1682 = vmatprep.subr.bf16.mxu0 %v1795_v8  ;;  %1755 = vmatprep.subr.bf16.mxu1 %v1795_v8 }
  0x22   : > { %1683 = vmatpush3.bf16.msra.mxu0 %v1795_v8  ;;  %1762 = vmatpush3.bf16.msra.mxu1 %v1795_v8 }
  0x23   : > { %1684 = vmatprep.subr.bf16.mxu0 %v1796_v9  ;;  %1756 = vmatprep.subr.bf16.mxu1 %v1796_v9 }
  0x26   : > { %1685 = vmatpush3.bf16.msra.mxu0 %v1796_v9  ;;  %1763 = vmatpush3.bf16.msra.mxu1 %v1796_v9 }
  0x29   : > { %1687 = vmatmul.mubr.msk.bf16.vlgmr.msra.gmra.mxu0 %vm531_vm1, %v1799_v10  ;;  %1719 = vmatmul.mubr.msk.bf16.vlgmr.msra.gmra.mxu1 %vm531_vm1, %v1800_v11 }
  0x2a   : > { %1690 = vmatprep.mubr.msk.bf16.mxu0 %vm531_vm1, %v1801_v12  ;;  %1722 = vmatprep.mubr.msk.bf16.mxu1 %vm531_vm1, %v1802_v13 }
  0x31   : > { %1691 = vmatmul.mubr.msk.bf16.gmra.mxu0 %vm531_vm1, %v1803_v14  ;;  %1723 = vmatmul.mubr.msk.bf16.gmra.mxu1 %vm531_vm1, %v1804_v15 }
  0x32   : > { %1694 = vmatprep.mubr.msk.bf16.mxu0 %vm531_vm1, %v1805_v16  ;;  %1726 = vmatprep.mubr.msk.bf16.mxu1 %vm531_vm1, %v1806_v17 }
  0x39   : > { %1695 = vmatmul.mubr.msk.bf16.gmra.mxu0 %vm531_vm1, %v1807_v18  ;;  %1727 = vmatmul.mubr.msk.bf16.gmra.mxu1 %vm531_vm1, %v1808_v19 }
  0x3a   : > { %1698 = vmatprep.mubr.msk.bf16.mxu0 %vm531_vm1, %v1809_v20  ;;  %1730 = vmatprep.mubr.msk.bf16.mxu1 %vm531_vm1, %v1810_v21 }
  0x41   : > { %1699 = vmatmul.mubr.msk.bf16.gmra.mxu0 %vm531_vm1, %v1811_v22  ;;  %1731 = vmatmul.mubr.msk.bf16.gmra.mxu1 %vm531_vm1, %v1812_v23 }
  0x42   : > { %1702 = vmatprep.mubr.msk.bf16.mxu0 %vm531_vm1, %v1813_v24  ;;  %1734 = vmatprep.mubr.msk.bf16.mxu1 %vm531_vm1, %v1814_v25 }
  0x49   : > { %1703 = vmatmul.mubr.msk.bf16.gmra.mxu0 %vm531_vm1, %v1815_v26  ;;  %1735 = vmatmul.mubr.msk.bf16.gmra.mxu1 %vm531_vm1, %v1816_v27 }
  0x4a   : > { %1706 = vmatprep.mubr.msk.bf16.mxu0 %vm531_vm1, %v1817_v28  ;;  %1738 = vmatprep.mubr.msk.bf16.mxu1 %vm531_vm1, %v1818_v29 }
  0x51   : > { %1707 = vmatmul.mubr.msk.bf16.gmra.mxu0 %vm531_vm1, %v1819_v30  ;;  %1739 = vmatmul.mubr.msk.bf16.gmra.mxu1 %vm531_vm1, %v1820_v31 }
  0x52   : > { %1710 = vmatprep.mubr.msk.bf16.mxu0 %vm531_vm1, %v1821_v32  ;;  %1742 = vmatprep.mubr.msk.bf16.mxu1 %vm531_vm1, %v1822_v33 }
  0x59   : > { %1711 = vmatmul.mubr.msk.bf16.gmra.mxu0 %vm531_vm1, %v1823_v34  ;;  %1743 = vmatmul.mubr.msk.bf16.gmra.mxu1 %vm531_vm1, %v1824_v35 }
  0x5a   : > { %1714 = vmatprep.mubr.msk.bf16.mxu0 %vm531_vm1, %v1825_v36  ;;  %1746 = vmatprep.mubr.msk.bf16.mxu1 %vm531_vm1, %v1826_v37 }
  0x61   : > { %1715 = vmatmul.mubr.msk.bf16.gmra.mxu0 %vm531_vm1, %v1827_v38  ;;  %1747 = vmatmul.mubr.msk.bf16.gmra.mxu1 %vm531_vm1, %v1828_v39 }
  0xe9   : > { %v1688_v41 = vpop.f32.mrf.mxu0  ;;  %v1720_v42 = vpop.f32.mrf.mxu1 }
  0xea   : > { %v675_v43 = vadd.f32 %v1688_v41, %v1989_v40  ;;  %v803_v44 = vadd.f32 %v1720_v42, %v1989_v40 }
  0xeb   : > { %v666_v45 = vpop.f32.mrf.mxu0  ;;  %v794_v46 = vpop.f32.mrf.mxu1 }
  0xec   : > { %v923_v47 = vmax.f32 %v675_v43, 0.0  ;;  %v955_v48 = vmax.f32 %v803_v44, 0.0  ;;  %v667_v49 = vadd.f32 %v1989_v40, %v666_v45  ;;  %v795_v50 = vadd.f32 %v1989_v40, %v794_v46 }
  0xed   : > { %v1689_v51 = vpop.f32.mrf.mxu0  ;;  %v1721_v52 = vpop.f32.mrf.mxu1 }
  0xee   : > { %v1571_v53 = vpack.c.bf16 %v923_v47, %v923_v47  ;;  %v1603_v54 = vpack.c.bf16 %v955_v48, %v955_v48  ;;  %v921_v55 = vmax.f32 %v667_v49, 0.0  ;;  %v953_v56 = vmax.f32 %v795_v50, 0.0 }
  0xef   : > { %v678_v57 = vadd.f32 %v1689_v51, %v1989_v40  ;;  %v806_v58 = vadd.f32 %v1721_v52, %v1989_v40  ;;  %v669_v59 = vpop.f32.mrf.mxu0  ;;  %v797_v60 = vpop.f32.mrf.mxu1 }
  0xf0   : > { %1244 = vst.msk [vmem:[%s2000_s12 + $0x8] sm:$0xf] %vm1241_vm2, %v1571_v53  ;;  %1276 = vst.msk [vmem:[%s2000_s12 + $0x88] sm:$0xf] %vm1241_vm2, %v1603_v54  ;;  %v1569_v61 = vpack.c.bf16 %v921_v55, %v921_v55  ;;  %v1601_v62 = vpack.c.bf16 %v953_v56, %v953_v56  ;;  %v670_v63 = vadd.f32 %v1989_v40, %v669_v59 }
  0xf1   : > { %v798_v0 = vadd.f32 %v1989_v40, %v797_v60  ;;  %v924_v1 = vmax.f32 %v678_v57, 0.0  ;;  %v956_v2 = vmax.f32 %v806_v58, 0.0  ;;  %v1692_v3 = vpop.f32.mrf.mxu0  ;;  %v1724_v4 = vpop.f32.mrf.mxu1 }
  0xf2   : > { %1242 = vst.msk [vmem:[%s2000_s12] sm:$0xf] %vm1241_vm2, %v1569_v61  ;;  %1274 = vst.msk [vmem:[%s2000_s12 + $0x80] sm:$0xf] %vm1241_vm2, %v1601_v62  ;;  %v922_v5 = vmax.f32 %v670_v63, 0.0  ;;  %v691_v7 = vadd.f32 %v1692_v3, %v1989_v40  ;;  %v819_v8 = vadd.f32 %v1724_v4, %v1989_v40 }
  0xf3   : > { %v954_v6 = vmax.f32 %v798_v0, 0.0  ;;  %v1572_v9 = vpack.c.bf16 %v924_v1, %v924_v1  ;;  %v1604_v10 = vpack.c.bf16 %v956_v2, %v956_v2  ;;  %v682_v11 = vpop.f32.mrf.mxu0  ;;  %v810_v12 = vpop.f32.mrf.mxu1 }
  0xf4   : > { %v1570_v13 = vpack.c.bf16 %v922_v5, %v922_v5  ;;  %v927_v15 = vmax.f32 %v691_v7, 0.0  ;;  %v959_v16 = vmax.f32 %v819_v8, 0.0  ;;  %v683_v17 = vadd.f32 %v1989_v40, %v682_v11 }
  0xf5   : > { %v1602_v14 = vpack.c.bf16 %v954_v6, %v954_v6  ;;  %1245 = vst.msk [vmem:[%s2000_s12 + $0xc] sm:$0xf] %vm1241_vm2, %v1572_v9  ;;  %1277 = vst.msk [vmem:[%s2000_s12 + $0x8c] sm:$0xf] %vm1241_vm2, %v1604_v10  ;;  %v811_v18 = vadd.f32 %v1989_v40, %v810_v12  ;;  %v1693_v19 = vpop.f32.mrf.mxu0  ;;  %v1725_v20 = vpop.f32.mrf.mxu1 }
  0xf6   : > { %1243 = vst.msk [vmem:[%s2000_s12 + $0x4] sm:$0xf] %vm1241_vm2, %v1570_v13  ;;  %v1575_v21 = vpack.c.bf16 %v927_v15, %v927_v15  ;;  %v1607_v22 = vpack.c.bf16 %v959_v16, %v959_v16  ;;  %v694_v23 = vadd.f32 %v1693_v19, %v1989_v40  ;;  %v822_v24 = vadd.f32 %v1725_v20, %v1989_v40 }
  0xf7   : > { %1275 = vst.msk [vmem:[%s2000_s12 + $0x84] sm:$0xf] %vm1241_vm2, %v1602_v14  ;;  %v925_v25 = vmax.f32 %v683_v17, 0.0  ;;  %v957_v26 = vmax.f32 %v811_v18, 0.0  ;;  %v685_v27 = vpop.f32.mrf.mxu0  ;;  %v813_v28 = vpop.f32.mrf.mxu1 }
  0xf8   : > { %1248 = vst.msk [vmem:[%s2000_s12 + $0x18] sm:$0xf] %vm1241_vm2, %v1575_v21  ;;  %1280 = vst.msk [vmem:[%s2000_s12 + $0x98] sm:$0xf] %vm1241_vm2, %v1607_v22  ;;  %v928_v29 = vmax.f32 %v694_v23, 0.0  ;;  %v960_v30 = vmax.f32 %v822_v24, 0.0  ;;  %v686_v31 = vadd.f32 %v1989_v40, %v685_v27  ;;  %v814_v32 = vadd.f32 %v1989_v40, %v813_v28 }
  0xf9   : > { %v1573_v33 = vpack.c.bf16 %v925_v25, %v925_v25  ;;  %v1605_v34 = vpack.c.bf16 %v957_v26, %v957_v26  ;;  %v1696_v35 = vpop.f32.mrf.mxu0  ;;  %v1728_v36 = vpop.f32.mrf.mxu1 }
  0xfa   : > { %v1576_v37 = vpack.c.bf16 %v928_v29, %v928_v29  ;;  %v1608_v38 = vpack.c.bf16 %v960_v30, %v960_v30  ;;  %v926_v39 = vmax.f32 %v686_v31, 0.0  ;;  %v958_v41 = vmax.f32 %v814_v32, 0.0 }
  0xfb   : > { %1246 = vst.msk [vmem:[%s2000_s12 + $0x10] sm:$0xf] %vm1241_vm2, %v1573_v33  ;;  %1278 = vst.msk [vmem:[%s2000_s12 + $0x90] sm:$0xf] %vm1241_vm2, %v1605_v34  ;;  %v707_v42 = vadd.f32 %v1696_v35, %v1989_v40  ;;  %v835_v43 = vadd.f32 %v1728_v36, %v1989_v40  ;;  %v698_v44 = vpop.f32.mrf.mxu0  ;;  %v826_v45 = vpop.f32.mrf.mxu1 }
  0xfc   : > { %1249 = vst.msk [vmem:[%s2000_s12 + $0x1c] sm:$0xf] %vm1241_vm2, %v1576_v37  ;;  %1281 = vst.msk [vmem:[%s2000_s12 + $0x9c] sm:$0xf] %vm1241_vm2, %v1608_v38  ;;  %v1574_v46 = vpack.c.bf16 %v926_v39, %v926_v39  ;;  %v1606_v47 = vpack.c.bf16 %v958_v41, %v958_v41  ;;  %v699_v48 = vadd.f32 %v1989_v40, %v698_v44 }
  0xfd   : > { %v827_v49 = vadd.f32 %v1989_v40, %v826_v45  ;;  %v931_v50 = vmax.f32 %v707_v42, 0.0  ;;  %v963_v51 = vmax.f32 %v835_v43, 0.0  ;;  %v1697_v52 = vpop.f32.mrf.mxu0  ;;  %v1729_v53 = vpop.f32.mrf.mxu1 }
  0xfe   : > { %1247 = vst.msk [vmem:[%s2000_s12 + $0x14] sm:$0xf] %vm1241_vm2, %v1574_v46  ;;  %1279 = vst.msk [vmem:[%s2000_s12 + $0x94] sm:$0xf] %vm1241_vm2, %v1606_v47  ;;  %v929_v54 = vmax.f32 %v699_v48, 0.0  ;;  %v710_v56 = vadd.f32 %v1697_v52, %v1989_v40  ;;  %v838_v57 = vadd.f32 %v1729_v53, %v1989_v40 }
  0xff   : > { %v961_v55 = vmax.f32 %v827_v49, 0.0  ;;  %v1579_v58 = vpack.c.bf16 %v931_v50, %v931_v50  ;;  %v1611_v59 = vpack.c.bf16 %v963_v51, %v963_v51  ;;  %v701_v60 = vpop.f32.mrf.mxu0  ;;  %v829_v61 = vpop.f32.mrf.mxu1 }
 0x100   : > { %v1577_v62 = vpack.c.bf16 %v929_v54, %v929_v54  ;;  %v932_v0 = vmax.f32 %v710_v56, 0.0  ;;  %v964_v1 = vmax.f32 %v838_v57, 0.0  ;;  %v702_v2 = vadd.f32 %v1989_v40, %v701_v60 }
 0x101   : > { %v1609_v63 = vpack.c.bf16 %v961_v55, %v961_v55  ;;  %1252 = vst.msk [vmem:[%s2000_s12 + $0x28] sm:$0xf] %vm1241_vm2, %v1579_v58  ;;  %1284 = vst.msk [vmem:[%s2000_s12 + $0xa8] sm:$0xf] %vm1241_vm2, %v1611_v59  ;;  %v830_v3 = vadd.f32 %v1989_v40, %v829_v61  ;;  %v1700_v4 = vpop.f32.mrf.mxu0  ;;  %v1732_v5 = vpop.f32.mrf.mxu1 }
 0x102   : > { %1250 = vst.msk [vmem:[%s2000_s12 + $0x20] sm:$0xf] %vm1241_vm2, %v1577_v62  ;;  %v1580_v6 = vpack.c.bf16 %v932_v0, %v932_v0  ;;  %v1612_v7 = vpack.c.bf16 %v964_v1, %v964_v1  ;;  %v723_v8 = vadd.f32 %v1700_v4, %v1989_v40  ;;  %v851_v9 = vadd.f32 %v1732_v5, %v1989_v40 }
 0x103   : > { %1282 = vst.msk [vmem:[%s2000_s12 + $0xa0] sm:$0xf] %vm1241_vm2, %v1609_v63  ;;  %v930_v10 = vmax.f32 %v702_v2, 0.0  ;;  %v962_v11 = vmax.f32 %v830_v3, 0.0  ;;  %v714_v12 = vpop.f32.mrf.mxu0  ;;  %v842_v13 = vpop.f32.mrf.mxu1 }
 0x104   : > { %1253 = vst.msk [vmem:[%s2000_s12 + $0x2c] sm:$0xf] %vm1241_vm2, %v1580_v6  ;;  %1285 = vst.msk [vmem:[%s2000_s12 + $0xac] sm:$0xf] %vm1241_vm2, %v1612_v7  ;;  %v935_v14 = vmax.f32 %v723_v8, 0.0  ;;  %v967_v15 = vmax.f32 %v851_v9, 0.0  ;;  %v715_v16 = vadd.f32 %v1989_v40, %v714_v12  ;;  %v843_v17 = vadd.f32 %v1989_v40, %v842_v13 }
 0x105   : > { %v1578_v18 = vpack.c.bf16 %v930_v10, %v930_v10  ;;  %v1610_v19 = vpack.c.bf16 %v962_v11, %v962_v11  ;;  %v1701_v20 = vpop.f32.mrf.mxu0  ;;  %v1733_v21 = vpop.f32.mrf.mxu1 }
 0x106   : > { %v1583_v22 = vpack.c.bf16 %v935_v14, %v935_v14  ;;  %v1615_v23 = vpack.c.bf16 %v967_v15, %v967_v15  ;;  %v933_v24 = vmax.f32 %v715_v16, 0.0  ;;  %v965_v25 = vmax.f32 %v843_v17, 0.0 }
 0x107   : > { %1251 = vst.msk [vmem:[%s2000_s12 + $0x24] sm:$0xf] %vm1241_vm2, %v1578_v18  ;;  %1283 = vst.msk [vmem:[%s2000_s12 + $0xa4] sm:$0xf] %vm1241_vm2, %v1610_v19  ;;  %v726_v26 = vadd.f32 %v1701_v20, %v1989_v40  ;;  %v854_v27 = vadd.f32 %v1733_v21, %v1989_v40  ;;  %v717_v28 = vpop.f32.mrf.mxu0  ;;  %v845_v29 = vpop.f32.mrf.mxu1 }
 0x108   : > { %1256 = vst.msk [vmem:[%s2000_s12 + $0x38] sm:$0xf] %vm1241_vm2, %v1583_v22  ;;  %1288 = vst.msk [vmem:[%s2000_s12 + $0xb8] sm:$0xf] %vm1241_vm2, %v1615_v23  ;;  %v1581_v30 = vpack.c.bf16 %v933_v24, %v933_v24  ;;  %v1613_v31 = vpack.c.bf16 %v965_v25, %v965_v25  ;;  %v718_v32 = vadd.f32 %v1989_v40, %v717_v28 }
 0x109   : > { %v846_v33 = vadd.f32 %v1989_v40, %v845_v29  ;;  %v936_v34 = vmax.f32 %v726_v26, 0.0  ;;  %v968_v35 = vmax.f32 %v854_v27, 0.0  ;;  %v1704_v36 = vpop.f32.mrf.mxu0  ;;  %v1736_v37 = vpop.f32.mrf.mxu1 }
 0x10a   : > { %1254 = vst.msk [vmem:[%s2000_s12 + $0x30] sm:$0xf] %vm1241_vm2, %v1581_v30  ;;  %1286 = vst.msk [vmem:[%s2000_s12 + $0xb0] sm:$0xf] %vm1241_vm2, %v1613_v31  ;;  %v934_v38 = vmax.f32 %v718_v32, 0.0  ;;  %v739_v41 = vadd.f32 %v1704_v36, %v1989_v40  ;;  %v867_v42 = vadd.f32 %v1736_v37, %v1989_v40 }
 0x10b   : > { %v966_v39 = vmax.f32 %v846_v33, 0.0  ;;  %v1584_v43 = vpack.c.bf16 %v936_v34, %v936_v34  ;;  %v1616_v44 = vpack.c.bf16 %v968_v35, %v968_v35  ;;  %v730_v45 = vpop.f32.mrf.mxu0  ;;  %v858_v46 = vpop.f32.mrf.mxu1 }
 0x10c   : > { %v1582_v47 = vpack.c.bf16 %v934_v38, %v934_v38  ;;  %v939_v49 = vmax.f32 %v739_v41, 0.0  ;;  %v971_v50 = vmax.f32 %v867_v42, 0.0  ;;  %v731_v51 = vadd.f32 %v1989_v40, %v730_v45 }
 0x10d   : > { %v1614_v48 = vpack.c.bf16 %v966_v39, %v966_v39  ;;  %1257 = vst.msk [vmem:[%s2000_s12 + $0x3c] sm:$0xf] %vm1241_vm2, %v1584_v43  ;;  %1289 = vst.msk [vmem:[%s2000_s12 + $0xbc] sm:$0xf] %vm1241_vm2, %v1616_v44  ;;  %v859_v52 = vadd.f32 %v1989_v40, %v858_v46  ;;  %v1705_v53 = vpop.f32.mrf.mxu0  ;;  %v1737_v54 = vpop.f32.mrf.mxu1 }
 0x10e   : > { %1255 = vst.msk [vmem:[%s2000_s12 + $0x34] sm:$0xf] %vm1241_vm2, %v1582_v47  ;;  %v1587_v55 = vpack.c.bf16 %v939_v49, %v939_v49  ;;  %v1619_v56 = vpack.c.bf16 %v971_v50, %v971_v50  ;;  %v742_v57 = vadd.f32 %v1705_v53, %v1989_v40  ;;  %v870_v58 = vadd.f32 %v1737_v54, %v1989_v40 }
 0x10f   : > { %1287 = vst.msk [vmem:[%s2000_s12 + $0xb4] sm:$0xf] %vm1241_vm2, %v1614_v48  ;;  %v937_v59 = vmax.f32 %v731_v51, 0.0  ;;  %v969_v60 = vmax.f32 %v859_v52, 0.0  ;;  %v733_v61 = vpop.f32.mrf.mxu0  ;;  %v861_v62 = vpop.f32.mrf.mxu1 }
 0x110   : > { %1260 = vst.msk [vmem:[%s2000_s12 + $0x48] sm:$0xf] %vm1241_vm2, %v1587_v55  ;;  %1292 = vst.msk [vmem:[%s2000_s12 + $0xc8] sm:$0xf] %vm1241_vm2, %v1619_v56  ;;  %v940_v63 = vmax.f32 %v742_v57, 0.0  ;;  %v972_v0 = vmax.f32 %v870_v58, 0.0  ;;  %v734_v1 = vadd.f32 %v1989_v40, %v733_v61  ;;  %v862_v2 = vadd.f32 %v1989_v40, %v861_v62 }
 0x111   : > { %v1585_v3 = vpack.c.bf16 %v937_v59, %v937_v59  ;;  %v1617_v4 = vpack.c.bf16 %v969_v60, %v969_v60  ;;  %v1708_v5 = vpop.f32.mrf.mxu0  ;;  %v1740_v6 = vpop.f32.mrf.mxu1 }
 0x112   : > { %v1588_v7 = vpack.c.bf16 %v940_v63, %v940_v63  ;;  %v1620_v8 = vpack.c.bf16 %v972_v0, %v972_v0  ;;  %v938_v9 = vmax.f32 %v734_v1, 0.0  ;;  %v970_v10 = vmax.f32 %v862_v2, 0.0 }
 0x113   : > { %1258 = vst.msk [vmem:[%s2000_s12 + $0x40] sm:$0xf] %vm1241_vm2, %v1585_v3  ;;  %1290 = vst.msk [vmem:[%s2000_s12 + $0xc0] sm:$0xf] %vm1241_vm2, %v1617_v4  ;;  %v755_v11 = vadd.f32 %v1708_v5, %v1989_v40  ;;  %v883_v12 = vadd.f32 %v1740_v6, %v1989_v40  ;;  %v746_v13 = vpop.f32.mrf.mxu0  ;;  %v874_v14 = vpop.f32.mrf.mxu1 }
 0x114   : > { %1261 = vst.msk [vmem:[%s2000_s12 + $0x4c] sm:$0xf] %vm1241_vm2, %v1588_v7  ;;  %1293 = vst.msk [vmem:[%s2000_s12 + $0xcc] sm:$0xf] %vm1241_vm2, %v1620_v8  ;;  %v1586_v15 = vpack.c.bf16 %v938_v9, %v938_v9  ;;  %v1618_v16 = vpack.c.bf16 %v970_v10, %v970_v10  ;;  %v747_v17 = vadd.f32 %v1989_v40, %v746_v13 }
 0x115   : > { %v875_v18 = vadd.f32 %v1989_v40, %v874_v14  ;;  %v943_v19 = vmax.f32 %v755_v11, 0.0  ;;  %v975_v20 = vmax.f32 %v883_v12, 0.0  ;;  %v1709_v21 = vpop.f32.mrf.mxu0  ;;  %v1741_v22 = vpop.f32.mrf.mxu1 }
 0x116   : > { %1259 = vst.msk [vmem:[%s2000_s12 + $0x44] sm:$0xf] %vm1241_vm2, %v1586_v15  ;;  %1291 = vst.msk [vmem:[%s2000_s12 + $0xc4] sm:$0xf] %vm1241_vm2, %v1618_v16  ;;  %v941_v23 = vmax.f32 %v747_v17, 0.0  ;;  %v758_v25 = vadd.f32 %v1709_v21, %v1989_v40  ;;  %v886_v26 = vadd.f32 %v1741_v22, %v1989_v40 }
 0x117   : > { %v973_v24 = vmax.f32 %v875_v18, 0.0  ;;  %v1591_v27 = vpack.c.bf16 %v943_v19, %v943_v19  ;;  %v1623_v28 = vpack.c.bf16 %v975_v20, %v975_v20  ;;  %v749_v29 = vpop.f32.mrf.mxu0  ;;  %v877_v30 = vpop.f32.mrf.mxu1 }
 0x118   : > { %v1589_v31 = vpack.c.bf16 %v941_v23, %v941_v23  ;;  %v944_v33 = vmax.f32 %v758_v25, 0.0  ;;  %v976_v34 = vmax.f32 %v886_v26, 0.0  ;;  %v750_v35 = vadd.f32 %v1989_v40, %v749_v29 }
 0x119   : > { %v1621_v32 = vpack.c.bf16 %v973_v24, %v973_v24  ;;  %1264 = vst.msk [vmem:[%s2000_s12 + $0x58] sm:$0xf] %vm1241_vm2, %v1591_v27  ;;  %1296 = vst.msk [vmem:[%s2000_s12 + $0xd8] sm:$0xf] %vm1241_vm2, %v1623_v28  ;;  %v878_v36 = vadd.f32 %v1989_v40, %v877_v30  ;;  %v1712_v37 = vpop.f32.mrf.mxu0  ;;  %v1744_v38 = vpop.f32.mrf.mxu1 }
 0x11a   : > { %1262 = vst.msk [vmem:[%s2000_s12 + $0x50] sm:$0xf] %vm1241_vm2, %v1589_v31  ;;  %v1592_v39 = vpack.c.bf16 %v944_v33, %v944_v33  ;;  %v1624_v41 = vpack.c.bf16 %v976_v34, %v976_v34  ;;  %v771_v42 = vadd.f32 %v1712_v37, %v1989_v40  ;;  %v899_v43 = vadd.f32 %v1744_v38, %v1989_v40 }
 0x11b   : > { %1294 = vst.msk [vmem:[%s2000_s12 + $0xd0] sm:$0xf] %vm1241_vm2, %v1621_v32  ;;  %v942_v44 = vmax.f32 %v750_v35, 0.0  ;;  %v974_v45 = vmax.f32 %v878_v36, 0.0  ;;  %v762_v46 = vpop.f32.mrf.mxu0  ;;  %v890_v47 = vpop.f32.mrf.mxu1 }
 0x11c   : > { %1265 = vst.msk [vmem:[%s2000_s12 + $0x5c] sm:$0xf] %vm1241_vm2, %v1592_v39  ;;  %1297 = vst.msk [vmem:[%s2000_s12 + $0xdc] sm:$0xf] %vm1241_vm2, %v1624_v41  ;;  %v947_v48 = vmax.f32 %v771_v42, 0.0  ;;  %v979_v49 = vmax.f32 %v899_v43, 0.0  ;;  %v763_v50 = vadd.f32 %v1989_v40, %v762_v46  ;;  %v891_v51 = vadd.f32 %v1989_v40, %v890_v47 }
 0x11d   : > { %v1590_v52 = vpack.c.bf16 %v942_v44, %v942_v44  ;;  %v1622_v53 = vpack.c.bf16 %v974_v45, %v974_v45  ;;  %v1713_v54 = vpop.f32.mrf.mxu0  ;;  %v1745_v55 = vpop.f32.mrf.mxu1 }
 0x11e   : > { %v1595_v56 = vpack.c.bf16 %v947_v48, %v947_v48  ;;  %v1627_v57 = vpack.c.bf16 %v979_v49, %v979_v49  ;;  %v945_v58 = vmax.f32 %v763_v50, 0.0  ;;  %v977_v59 = vmax.f32 %v891_v51, 0.0 }
 0x11f   : > { %1263 = vst.msk [vmem:[%s2000_s12 + $0x54] sm:$0xf] %vm1241_vm2, %v1590_v52  ;;  %1295 = vst.msk [vmem:[%s2000_s12 + $0xd4] sm:$0xf] %vm1241_vm2, %v1622_v53  ;;  %v774_v60 = vadd.f32 %v1713_v54, %v1989_v40  ;;  %v902_v61 = vadd.f32 %v1745_v55, %v1989_v40  ;;  %v765_v62 = vpop.f32.mrf.mxu0  ;;  %v893_v63 = vpop.f32.mrf.mxu1 }
 0x120   : > { %1268 = vst.msk [vmem:[%s2000_s12 + $0x68] sm:$0xf] %vm1241_vm2, %v1595_v56  ;;  %1300 = vst.msk [vmem:[%s2000_s12 + $0xe8] sm:$0xf] %vm1241_vm2, %v1627_v57  ;;  %v1593_v0 = vpack.c.bf16 %v945_v58, %v945_v58  ;;  %v1625_v1 = vpack.c.bf16 %v977_v59, %v977_v59  ;;  %v766_v2 = vadd.f32 %v1989_v40, %v765_v62 }
 0x121   : > { %v894_v3 = vadd.f32 %v1989_v40, %v893_v63  ;;  %v948_v4 = vmax.f32 %v774_v60, 0.0  ;;  %v980_v5 = vmax.f32 %v902_v61, 0.0  ;;  %v1716_v6 = vpop.f32.mrf.mxu0  ;;  %v1748_v7 = vpop.f32.mrf.mxu1 }
 0x122   : > { %1266 = vst.msk [vmem:[%s2000_s12 + $0x60] sm:$0xf] %vm1241_vm2, %v1593_v0  ;;  %1298 = vst.msk [vmem:[%s2000_s12 + $0xe0] sm:$0xf] %vm1241_vm2, %v1625_v1  ;;  %v946_v8 = vmax.f32 %v766_v2, 0.0  ;;  %v787_v10 = vadd.f32 %v1716_v6, %v1989_v40  ;;  %v915_v11 = vadd.f32 %v1748_v7, %v1989_v40 }
 0x123   : > { %v978_v9 = vmax.f32 %v894_v3, 0.0  ;;  %v1596_v12 = vpack.c.bf16 %v948_v4, %v948_v4  ;;  %v1628_v13 = vpack.c.bf16 %v980_v5, %v980_v5  ;;  %v778_v14 = vpop.f32.mrf.mxu0  ;;  %v906_v15 = vpop.f32.mrf.mxu1 }
 0x124   : > { %v1594_v16 = vpack.c.bf16 %v946_v8, %v946_v8  ;;  %v951_v18 = vmax.f32 %v787_v10, 0.0  ;;  %v983_v19 = vmax.f32 %v915_v11, 0.0  ;;  %v779_v20 = vadd.f32 %v1989_v40, %v778_v14 }
 0x125   : > { %v1626_v17 = vpack.c.bf16 %v978_v9, %v978_v9  ;;  %1269 = vst.msk [vmem:[%s2000_s12 + $0x6c] sm:$0xf] %vm1241_vm2, %v1596_v12  ;;  %1301 = vst.msk [vmem:[%s2000_s12 + $0xec] sm:$0xf] %vm1241_vm2, %v1628_v13  ;;  %v907_v21 = vadd.f32 %v1989_v40, %v906_v15  ;;  %v1717_v22 = vpop.f32.mrf.mxu0  ;;  %v1749_v23 = vpop.f32.mrf.mxu1 }
 0x126   : > { %1267 = vst.msk [vmem:[%s2000_s12 + $0x64] sm:$0xf] %vm1241_vm2, %v1594_v16  ;;  %v1599_v24 = vpack.c.bf16 %v951_v18, %v951_v18  ;;  %v1631_v25 = vpack.c.bf16 %v983_v19, %v983_v19  ;;  %v790_v26 = vadd.f32 %v1717_v22, %v1989_v40  ;;  %v918_v27 = vadd.f32 %v1749_v23, %v1989_v40 }
 0x127   : > { %1299 = vst.msk [vmem:[%s2000_s12 + $0xe4] sm:$0xf] %vm1241_vm2, %v1626_v17  ;;  %v949_v28 = vmax.f32 %v779_v20, 0.0  ;;  %v981_v29 = vmax.f32 %v907_v21, 0.0  ;;  %v781_v30 = vpop.f32.mrf.mxu0  ;;  %v909_v31 = vpop.f32.mrf.mxu1 }
 0x128   : > { %1272 = vst.msk [vmem:[%s2000_s12 + $0x78] sm:$0xf] %vm1241_vm2, %v1599_v24  ;;  %1304 = vst.msk [vmem:[%s2000_s12 + $0xf8] sm:$0xf] %vm1241_vm2, %v1631_v25  ;;  %v952_v32 = vmax.f32 %v790_v26, 0.0  ;;  %v984_v33 = vmax.f32 %v918_v27, 0.0  ;;  %v782_v34 = vadd.f32 %v1989_v40, %v781_v30  ;;  %v910_v35 = vadd.f32 %v1989_v40, %v909_v31 }
 0x129   : > { %v1597_v36 = vpack.c.bf16 %v949_v28, %v949_v28  ;;  %v1629_v37 = vpack.c.bf16 %v981_v29, %v981_v29 }
 0x12a   : > { %v1600_v38 = vpack.c.bf16 %v952_v32, %v952_v32  ;;  %v1632_v39 = vpack.c.bf16 %v984_v33, %v984_v33  ;;  %v950_v41 = vmax.f32 %v782_v34, 0.0  ;;  %v982_v42 = vmax.f32 %v910_v35, 0.0 }
 0x12b   : > { %1270 = vst.msk [vmem:[%s2000_s12 + $0x70] sm:$0xf] %vm1241_vm2, %v1597_v36  ;;  %1302 = vst.msk [vmem:[%s2000_s12 + $0xf0] sm:$0xf] %vm1241_vm2, %v1629_v37 }
 0x12c   : > { %1273 = vst.msk [vmem:[%s2000_s12 + $0x7c] sm:$0xf] %vm1241_vm2, %v1600_v38  ;;  %1305 = vst.msk [vmem:[%s2000_s12 + $0xfc] sm:$0xf] %vm1241_vm2, %v1632_v39  ;;  %v1598_v43 = vpack.c.bf16 %v950_v41, %v950_v41  ;;  %v1630_v44 = vpack.c.bf16 %v982_v42, %v982_v42 }
 0x12e   : > { %1271 = vst.msk [vmem:[%s2000_s12 + $0x74] sm:$0xf] %vm1241_vm2, %v1598_v43  ;;  %1303 = vst.msk [vmem:[%s2000_s12 + $0xf4] sm:$0xf] %vm1241_vm2, %v1630_v44 }
 0x12f PF: > { %s13_s14 = sadd.s32 1, %s1851_s14   ;;  %s2203_s12 = smov %s1847_s13 }
 0x130   : > { %p10_p5 = scmp.ge.s32.totalorder %s13_s14, 4   ;;  %s2204_s13 = smov %s2206_s15 }
 0x132   :  { %12 = sbr.rel (!%p10_p5) target bundleno = 2 (0x2), region = 68 }

// kernel: deeplab3d_forward.12
= control target key start
LH: loop header
LB: loop body
LE: loop exit
PB: predicated region body
PF: predicated region fallthrough
CT: control target
= control target key end

     0   :  { %v982_v0 = vmov 0   ;;  %vm422_vm0 = vcmask 392192   ;;  %vm721_vm1 = vcmask 191488   ;;  %s1284_s1 = inlined_call_operand.vmem [shape: bf16[1,432,24], index: 1, kind: input, shape index: {}]   ;;  %s1285_s0 = inlined_call_operand.vmem [shape: bf16[1,128,432], index: 0, kind: input, shape index: {}]   ;;  %s1286_s2 = inlined_call_operand.vmem [shape: f32[1,1,24], index: 2, kind: input, shape index: {}]   ;;  %s1287_s3 = inlined_call_operand.vmem [shape: bf16[1,128,24], index: 3, kind: output, shape index: {}]  }
   0x1   :  { %544 = vmatprep.subr.bf16.mxu1 %v982_v0  ;;  %v907_v1 = vld [vmem:[%s1284_s1 + $0x78] sm:$0xff]   ;;  %v910_v4 = vld [vmem:[%s1284_s1 + $0x70] sm:$0xff]   ;;  %v913_v7 = vld [vmem:[%s1284_s1 + $0x68] sm:$0xff]  }
   0x2   :  { %v908_v2 = vld [vmem:[%s1284_s1 + $0xb8] sm:$0xff]   ;;  %842 = vmatprep.subr.bf16.mxu0 %v907_v1  ;;  %v911_v5 = vld [vmem:[%s1284_s1 + $0xb0] sm:$0xff]   ;;  %v914_v8 = vld [vmem:[%s1284_s1 + $0xa8] sm:$0xff]  }
   0x3   :  { %v909_v3 = vld [vmem:[%s1284_s1 + $0x38] sm:$0xff]   ;;  %545 = vmatpush1.bf16.msra.mxu1 %v908_v2  ;;  %v912_v6 = vld [vmem:[%s1284_s1 + $0x30] sm:$0xff]   ;;  %v915_v9 = vld [vmem:[%s1284_s1 + $0x28] sm:$0xff]  }
   0x4   :  { %843 = vmatpush3.bf16.msra.mxu0 %v909_v3  ;;  %546 = vmatprep.subr.bf16.mxu1 %v982_v0  ;;  %v916_v10 = vld [vmem:[%s1284_s1 + $0x60] sm:$0xff]   ;;  %v919_v13 = vld [vmem:[%s1284_s1 + $0x58] sm:$0xff]   ;;  %v922_v16 = vld [vmem:[%s1284_s1 + $0x50] sm:$0xff]  }
   0x5   :  { %844 = vmatprep.subr.bf16.mxu0 %v910_v4  ;;  %v917_v11 = vld [vmem:[%s1284_s1 + $0xa0] sm:$0xff]   ;;  %v920_v14 = vld [vmem:[%s1284_s1 + $0x98] sm:$0xff]   ;;  %v923_v17 = vld [vmem:[%s1284_s1 + $0x90] sm:$0xff]  }
   0x6   :  { %v918_v12 = vld [vmem:[%s1284_s1 + $0x20] sm:$0xff]   ;;  %v921_v15 = vld [vmem:[%s1284_s1 + $0x18] sm:$0xff]   ;;  %v924_v18 = vld [vmem:[%s1284_s1 + $0x10] sm:$0xff]  }
   0x7   :  { %547 = vmatpush1.bf16.msra.mxu1 %v911_v5  ;;  %v925_v19 = vld [vmem:[%s1284_s1 + $0x48] sm:$0xff]   ;;  %v928_v22 = vld [vmem:[%s1284_s1 + $0x40] sm:$0xff]   ;;  %v934_v28 = vld [vmem:[%s1284_s1 + $0xd0] sm:$0xff]  }
   0x8   :  { %845 = vmatpush3.bf16.msra.mxu0 %v912_v6  ;;  %548 = vmatprep.subr.bf16.mxu1 %v982_v0  ;;  %v926_v20 = vld [vmem:[%s1284_s1 + $0x88] sm:$0xff]   ;;  %v933_v23 = vld [vmem:[%s1285_s0 + $0x4] ss:$16 sps:$4 sm:$0xff]   ;;  %v931_v26 = vld [vmem:[%s1285_s0] ss:$16 sps:$4 sm:$0xff]  }
   0x9   :  { %846 = vmatprep.subr.bf16.mxu0 %v913_v7  ;;  %v927_v21 = vld [vmem:[%s1284_s1 + $0x8] sm:$0xff]   ;;  %v929_v24 = vld [vmem:[%s1284_s1 + $0x80] sm:$0xff]   ;;  %479 = vmatprep.mubr.bf16.mxu0 %v933_v23 }
   0xa   :  { %v930_v25 = vld [vmem:[%s1284_s1] sm:$0xff]   ;;  %v942_v27 = vld [vmem:[%s1285_s0 + $0xc] ss:$16 sps:$4 sm:$0xff]   ;;  %v940_v34 = vld [vmem:[%s1285_s0 + $0x8] ss:$16 sps:$4 sm:$0xff]  }
   0xb   :  { %549 = vmatpush1.bf16.msra.mxu1 %v914_v8  ;;  %v936_v29 = vld [vmem:[%s1285_s0 + $0x24] ss:$16 sps:$4 sm:$0xff]   ;;  %802 = vmatprep.mubr.msk.bf16.mxu1 %vm422_vm0, %v942_v27  ;;  %v935_v30 = vld [vmem:[%s1284_s1 + $0xc8] sm:$0xff]   ;;  %v938_v31 = vld [vmem:[%s1285_s0 + $0x20] ss:$16 sps:$4 sm:$0xff]  }
   0xc   :  { %847 = vmatpush3.bf16.msra.mxu0 %v915_v9  ;;  %550 = vmatprep.subr.bf16.mxu1 %v982_v0  ;;  %v939_v32 = vld [vmem:[%s1284_s1 + $0xc0] sm:$0xff]   ;;  %v946_v35 = vld [vmem:[%s1285_s0 + $0x2c] ss:$16 sps:$4 sm:$0xff]   ;;  %v948_v38 = vld [vmem:[%s1285_s0 + $0x28] ss:$16 sps:$4 sm:$0xff]  }
   0xd   :  { %848 = vmatprep.subr.bf16.mxu0 %v916_v10  ;;  %v943_v33 = vld [vmem:[%s1285_s0 + $0x44] ss:$16 sps:$4 sm:$0xff]   ;;  %v945_v36 = vld [vmem:[%s1285_s0 + $0x40] ss:$16 sps:$4 sm:$0xff]   ;;  %v952_v39 = vld [vmem:[%s1285_s0 + $0x4c] ss:$16 sps:$4 sm:$0xff]  }
   0xe   :  { %v949_v37 = vld [vmem:[%s1285_s0 + $0x64] ss:$16 sps:$4 sm:$0xff]   ;;  %v951_v40 = vld [vmem:[%s1285_s0 + $0x60] ss:$16 sps:$4 sm:$0xff]   ;;  %v954_v42 = vld [vmem:[%s1285_s0 + $0x48] ss:$16 sps:$4 sm:$0xff]  }
   0xf   :  { %551 = vmatpush1.bf16.msra.mxu1 %v917_v11  ;;  %v955_v41 = vld [vmem:[%s1285_s0 + $0x84] ss:$16 sps:$4 sm:$0xff]   ;;  %v958_v43 = vld [vmem:[%s1285_s0 + $0x6c] ss:$16 sps:$4 sm:$0xff]   ;;  %v957_v44 = vld [vmem:[%s1285_s0 + $0x80] ss:$16 sps:$4 sm:$0xff]  }
  0x10   :  { %849 = vmatpush3.bf16.msra.mxu0 %v918_v12  ;;  %552 = vmatprep.subr.bf16.mxu1 %v982_v0  ;;  %v961_v45 = vld [vmem:[%s1285_s0 + $0xa4] ss:$16 sps:$4 sm:$0xff]   ;;  %v960_v46 = vld [vmem:[%s1285_s0 + $0x68] ss:$16 sps:$4 sm:$0xff]   ;;  %v964_v47 = vld [vmem:[%s1285_s0 + $0x8c] ss:$16 sps:$4 sm:$0xff]  }
  0x11   :  { %850 = vmatprep.subr.bf16.mxu0 %v919_v13  ;;  %v963_v48 = vld [vmem:[%s1285_s0 + $0xa0] ss:$16 sps:$4 sm:$0xff]   ;;  %v967_v49 = vld [vmem:[%s1285_s0 + $0xc4] ss:$16 sps:$4 sm:$0xff]   ;;  %v966_v50 = vld [vmem:[%s1285_s0 + $0x88] ss:$16 sps:$4 sm:$0xff]  }
  0x12   :  { %v970_v51 = vld [vmem:[%s1285_s0 + $0xac] ss:$16 sps:$4 sm:$0xff]   ;;  %v969_v52 = vld [vmem:[%s1285_s0 + $0xc0] ss:$16 sps:$4 sm:$0xff]   ;;  %v973_v53 = vld [vmem:[%s1285_s0 + $0xe4] ss:$16 sps:$4 sm:$0xff]  }
  0x13   :  { %553 = vmatpush1.bf16.msra.mxu1 %v920_v14  ;;  %v972_v54 = vld [vmem:[%s1285_s0 + $0xa8] ss:$16 sps:$4 sm:$0xff]   ;;  %v976_v55 = vld [vmem:[%s1285_s0 + $0xcc] ss:$16 sps:$4 sm:$0xff]   ;;  %v975_v56 = vld [vmem:[%s1285_s0 + $0xe0] ss:$16 sps:$4 sm:$0xff]  }
  0x14   :  { %851 = vmatpush3.bf16.msra.mxu0 %v921_v15  ;;  %554 = vmatprep.subr.bf16.mxu1 %v982_v0  ;;  %v978_v57 = vld [vmem:[%s1285_s0 + $0xc8] ss:$16 sps:$4 sm:$0xff]   ;;  %v979_v58 = vld [vmem:[%s1285_s0 + $0xec] ss:$16 sps:$4 sm:$0xff]   ;;  %v1202_v1 = vld [vmem:[%s1286_s2] ss:$0 sm:$0xff] }
  0x15   :  { %852 = vmatprep.subr.bf16.mxu0 %v922_v16  ;;  %v981_v59 = vld [vmem:[%s1285_s0 + $0xe8] ss:$16 sps:$4 sm:$0xff]  }
  0x17   :  { %555 = vmatpush1.bf16.msra.mxu1 %v923_v17 }
  0x18   :  { %853 = vmatpush3.bf16.msra.mxu0 %v924_v18  ;;  %556 = vmatprep.subr.bf16.mxu1 %v982_v0 }
  0x19   :  { %854 = vmatprep.subr.bf16.mxu0 %v925_v19 }
  0x1b   :  { %557 = vmatpush1.bf16.msra.mxu1 %v926_v20 }
  0x1c   :  { %855 = vmatpush3.bf16.msra.mxu0 %v927_v21  ;;  %558 = vmatprep.subr.bf16.mxu1 %v982_v0 }
  0x1d   :  { %856 = vmatprep.subr.bf16.mxu0 %v928_v22 }
  0x1f   :  { %559 = vmatpush1.bf16.msra.mxu1 %v929_v24 }
  0x20   :  { %857 = vmatpush3.bf16.msra.mxu0 %v930_v25  ;;  %570 = vmatprep.subr.bf16.mxu1 %v982_v0 }
  0x23   :  { %480 = vmatmul.mubr.bf16.vlgmr.msra.gmra.mxu0 %v931_v26  ;;  %571 = vmatpush2.bf16.msra.mxu1 %v934_v28 }
  0x24   :  { %572 = vmatprep.subr.bf16.mxu1 %v982_v0  ;;  %487 = vmatprep.mubr.bf16.mxu0 %v936_v29 }
  0x27   :  { %573 = vmatpush2.bf16.msra.mxu1 %v935_v30 }
  0x28   :  { %574 = vmatprep.subr.bf16.mxu1 %v982_v0 }
  0x2b   :  { %488 = vmatmul.mubr.bf16.gmra.mxu0 %v938_v31  ;;  %575 = vmatpush2.bf16.msra.mxu1 %v939_v32 }
  0x2c   :  { %495 = vmatprep.mubr.bf16.mxu0 %v943_v33 }
  0x2e   :  { %577 = vmatmul.mubr.bf16.vlgmr.msra.gmra.mxu1 %v940_v34 }
  0x2f   :  { %803 = vmatprep.mubr.msk.bf16.mxu1 %vm422_vm0, %v946_v35 }
  0x33   :  { %496 = vmatmul.mubr.bf16.gmra.mxu0 %v945_v36 }
  0x34   :  { %503 = vmatprep.mubr.bf16.mxu0 %v949_v37 }
  0x36   :  { %585 = vmatmul.mubr.bf16.gmra.mxu1 %v948_v38 }
  0x37   :  { %804 = vmatprep.mubr.msk.bf16.mxu1 %vm422_vm0, %v952_v39 }
  0x3b   :  { %504 = vmatmul.mubr.bf16.gmra.mxu0 %v951_v40 }
  0x3c   :  { %511 = vmatprep.mubr.bf16.mxu0 %v955_v41 }
  0x3e   :  { %593 = vmatmul.mubr.bf16.gmra.mxu1 %v954_v42 }
  0x3f   :  { %805 = vmatprep.mubr.msk.bf16.mxu1 %vm422_vm0, %v958_v43 }
  0x43   :  { %512 = vmatmul.mubr.bf16.gmra.mxu0 %v957_v44 }
  0x44   :  { %519 = vmatprep.mubr.bf16.mxu0 %v961_v45 }
  0x46   :  { %601 = vmatmul.mubr.bf16.gmra.mxu1 %v960_v46 }
  0x47   :  { %806 = vmatprep.mubr.msk.bf16.mxu1 %vm422_vm0, %v964_v47 }
  0x4b   :  { %520 = vmatmul.mubr.bf16.gmra.mxu0 %v963_v48 }
  0x4c   :  { %527 = vmatprep.mubr.bf16.mxu0 %v967_v49 }
  0x4e   :  { %609 = vmatmul.mubr.bf16.gmra.mxu1 %v966_v50 }
  0x4f   :  { %807 = vmatprep.mubr.msk.bf16.mxu1 %vm422_vm0, %v970_v51 }
  0x53   :  { %528 = vmatmul.mubr.bf16.gmra.mxu0 %v969_v52 }
  0x54   :  { %535 = vmatprep.mubr.bf16.mxu0 %v973_v53 }
  0x56   :  { %617 = vmatmul.mubr.bf16.gmra.mxu1 %v972_v54 }
  0x57   :  { %808 = vmatprep.mubr.msk.bf16.mxu1 %vm422_vm0, %v976_v55 }
  0x5b   :  { %536 = vmatmul.mubr.bf16.gmra.mxu0 %v975_v56 }
  0x5e   :  { %625 = vmatmul.mubr.bf16.gmra.mxu1 %v978_v57 }
  0x5f   :  { %809 = vmatprep.mubr.msk.bf16.mxu1 %vm422_vm0, %v979_v58 }
  0x66   :  { %633 = vmatmul.mubr.bf16.gmra.mxu1 %v981_v59 }
  0xe3   :  { %v858_v60 = vpop.f32.mrf.mxu0 }
  0xe5   :  { %v859_v61 = vpop.f32.mrf.mxu0 }
  0xe6   :  { %v860_v63 = vadd.f32 %v859_v61, %v858_v60 }
  0xe7   :  { %v861_v62 = vpop.f32.mrf.mxu0 }
  0xe8   :  { %v482_v5 = vadd.f32 %v860_v63, %v1202_v1 }
  0xe9   :  { %v862_v0 = vpop.f32.mrf.mxu0 }
  0xea   :  { %v863_v3 = vadd.f32 %v862_v0, %v861_v62 }
  0xeb   :  { %v864_v2 = vpop.f32.mrf.mxu0 }
  0xec   :  { %v485_v13 = vadd.f32 %v863_v3, %v1202_v1 }
  0xed   :  { %v865_v4 = vpop.f32.mrf.mxu0 }
  0xee   :  { %v578_v6 = vpop.f32.mrf.mxu1  ;;  %v866_v10 = vadd.f32 %v865_v4, %v864_v2 }
  0xef   :  { %v579_v7 = vadd.f32 %v578_v6, %v482_v5  ;;  %v867_v8 = vpop.f32.mrf.mxu0 }
  0xf0   :  { %v580_v9 = vpop.f32.mrf.mxu1  ;;  %v490_v22 = vadd.f32 %v866_v10, %v1202_v1 }
  0xf1   :  { %v641_v11 = vmax.f32 %v579_v7, 0.0  ;;  %v868_v12 = vpop.f32.mrf.mxu0 }
  0xf2   :  { %v581_v14 = vpop.f32.mrf.mxu1  ;;  %v869_v19 = vadd.f32 %v868_v12, %v867_v8 }
  0xf3   :  { %v826_v15 = vpack.c.bf16 %v641_v11, %v641_v11  ;;  %v582_v16 = vadd.f32 %v581_v14, %v485_v13  ;;  %v870_v17 = vpop.f32.mrf.mxu0 }
  0xf4   :  { %v583_v18 = vpop.f32.mrf.mxu1  ;;  %v493_v31 = vadd.f32 %v869_v19, %v1202_v1 }
  0xf5   :  { %722 = vst.msk [vmem:[%s1287_s3] sm:$0xf] %vm721_vm1, %v826_v15  ;;  %v642_v20 = vmax.f32 %v582_v16, 0.0  ;;  %v871_v21 = vpop.f32.mrf.mxu0 }
  0xf6   :  { %v586_v23 = vpop.f32.mrf.mxu1  ;;  %v872_v28 = vadd.f32 %v871_v21, %v870_v17 }
  0xf7   :  { %v827_v24 = vpack.c.bf16 %v642_v20, %v642_v20  ;;  %v587_v25 = vadd.f32 %v586_v23, %v490_v22  ;;  %v873_v26 = vpop.f32.mrf.mxu0 }
  0xf8   :  { %v588_v27 = vpop.f32.mrf.mxu1  ;;  %v498_v40 = vadd.f32 %v872_v28, %v1202_v1 }
  0xf9   :  { %723 = vst.msk [vmem:[%s1287_s3 + $0x4] sm:$0xf] %vm721_vm1, %v827_v24  ;;  %v643_v29 = vmax.f32 %v587_v25, 0.0  ;;  %v874_v30 = vpop.f32.mrf.mxu0 }
  0xfa   :  { %v589_v32 = vpop.f32.mrf.mxu1  ;;  %v875_v37 = vadd.f32 %v874_v30, %v873_v26 }
  0xfb   :  { %v828_v33 = vpack.c.bf16 %v643_v29, %v643_v29  ;;  %v590_v34 = vadd.f32 %v589_v32, %v493_v31  ;;  %v876_v35 = vpop.f32.mrf.mxu0 }
  0xfc   :  { %v591_v36 = vpop.f32.mrf.mxu1  ;;  %v501_v49 = vadd.f32 %v875_v37, %v1202_v1 }
  0xfd   :  { %724 = vst.msk [vmem:[%s1287_s3 + $0x8] sm:$0xf] %vm721_vm1, %v828_v33  ;;  %v644_v38 = vmax.f32 %v590_v34, 0.0  ;;  %v877_v39 = vpop.f32.mrf.mxu0 }
  0xfe   :  { %v594_v41 = vpop.f32.mrf.mxu1  ;;  %v878_v46 = vadd.f32 %v877_v39, %v876_v35 }
  0xff   :  { %v829_v42 = vpack.c.bf16 %v644_v38, %v644_v38  ;;  %v595_v43 = vadd.f32 %v594_v41, %v498_v40  ;;  %v879_v44 = vpop.f32.mrf.mxu0 }
 0x100   :  { %v596_v45 = vpop.f32.mrf.mxu1  ;;  %v506_v58 = vadd.f32 %v878_v46, %v1202_v1 }
 0x101   :  { %725 = vst.msk [vmem:[%s1287_s3 + $0xc] sm:$0xf] %vm721_vm1, %v829_v42  ;;  %v645_v47 = vmax.f32 %v595_v43, 0.0  ;;  %v880_v48 = vpop.f32.mrf.mxu0 }
 0x102   :  { %v597_v50 = vpop.f32.mrf.mxu1  ;;  %v881_v55 = vadd.f32 %v880_v48, %v879_v44 }
 0x103   :  { %v830_v51 = vpack.c.bf16 %v645_v47, %v645_v47  ;;  %v598_v52 = vadd.f32 %v597_v50, %v501_v49  ;;  %v882_v53 = vpop.f32.mrf.mxu0 }
 0x104   :  { %v599_v54 = vpop.f32.mrf.mxu1  ;;  %v509_v4 = vadd.f32 %v881_v55, %v1202_v1 }
 0x105   :  { %726 = vst.msk [vmem:[%s1287_s3 + $0x10] sm:$0xf] %vm721_vm1, %v830_v51  ;;  %v646_v56 = vmax.f32 %v598_v52, 0.0  ;;  %v883_v57 = vpop.f32.mrf.mxu0 }
 0x106   :  { %v602_v59 = vpop.f32.mrf.mxu1  ;;  %v884_v0 = vadd.f32 %v883_v57, %v882_v53 }
 0x107   :  { %v831_v60 = vpack.c.bf16 %v646_v56, %v646_v56  ;;  %v603_v61 = vadd.f32 %v602_v59, %v506_v58  ;;  %v885_v62 = vpop.f32.mrf.mxu0 }
 0x108   :  { %v604_v63 = vpop.f32.mrf.mxu1  ;;  %v514_v13 = vadd.f32 %v884_v0, %v1202_v1 }
 0x109   :  { %727 = vst.msk [vmem:[%s1287_s3 + $0x14] sm:$0xf] %vm721_vm1, %v831_v60  ;;  %v647_v2 = vmax.f32 %v603_v61, 0.0  ;;  %v886_v3 = vpop.f32.mrf.mxu0 }
 0x10a   :  { %v605_v5 = vpop.f32.mrf.mxu1  ;;  %v887_v10 = vadd.f32 %v886_v3, %v885_v62 }
 0x10b   :  { %v832_v6 = vpack.c.bf16 %v647_v2, %v647_v2  ;;  %v606_v7 = vadd.f32 %v605_v5, %v509_v4  ;;  %v888_v8 = vpop.f32.mrf.mxu0 }
 0x10c   :  { %v607_v9 = vpop.f32.mrf.mxu1  ;;  %v517_v22 = vadd.f32 %v887_v10, %v1202_v1 }
 0x10d   :  { %728 = vst.msk [vmem:[%s1287_s3 + $0x18] sm:$0xf] %vm721_vm1, %v832_v6  ;;  %v648_v11 = vmax.f32 %v606_v7, 0.0  ;;  %v889_v12 = vpop.f32.mrf.mxu0 }
 0x10e   :  { %v610_v14 = vpop.f32.mrf.mxu1  ;;  %v890_v19 = vadd.f32 %v889_v12, %v888_v8 }
 0x10f   :  { %v833_v15 = vpack.c.bf16 %v648_v11, %v648_v11  ;;  %v611_v16 = vadd.f32 %v610_v14, %v514_v13  ;;  %v891_v17 = vpop.f32.mrf.mxu0 }
 0x110   :  { %v612_v18 = vpop.f32.mrf.mxu1  ;;  %v522_v31 = vadd.f32 %v890_v19, %v1202_v1 }
 0x111   :  { %729 = vst.msk [vmem:[%s1287_s3 + $0x1c] sm:$0xf] %vm721_vm1, %v833_v15  ;;  %v649_v20 = vmax.f32 %v611_v16, 0.0  ;;  %v892_v21 = vpop.f32.mrf.mxu0 }
 0x112   :  { %v613_v23 = vpop.f32.mrf.mxu1  ;;  %v893_v28 = vadd.f32 %v892_v21, %v891_v17 }
 0x113   :  { %v834_v24 = vpack.c.bf16 %v649_v20, %v649_v20  ;;  %v614_v25 = vadd.f32 %v613_v23, %v517_v22  ;;  %v894_v26 = vpop.f32.mrf.mxu0 }
 0x114   :  { %v615_v27 = vpop.f32.mrf.mxu1  ;;  %v525_v40 = vadd.f32 %v893_v28, %v1202_v1 }
 0x115   :  { %730 = vst.msk [vmem:[%s1287_s3 + $0x20] sm:$0xf] %vm721_vm1, %v834_v24  ;;  %v650_v29 = vmax.f32 %v614_v25, 0.0  ;;  %v895_v30 = vpop.f32.mrf.mxu0 }
 0x116   :  { %v618_v32 = vpop.f32.mrf.mxu1  ;;  %v896_v37 = vadd.f32 %v895_v30, %v894_v26 }
 0x117   :  { %v835_v33 = vpack.c.bf16 %v650_v29, %v650_v29  ;;  %v619_v34 = vadd.f32 %v618_v32, %v522_v31  ;;  %v897_v35 = vpop.f32.mrf.mxu0 }
 0x118   :  { %v620_v36 = vpop.f32.mrf.mxu1  ;;  %v530_v49 = vadd.f32 %v896_v37, %v1202_v1 }
 0x119   :  { %731 = vst.msk [vmem:[%s1287_s3 + $0x24] sm:$0xf] %vm721_vm1, %v835_v33  ;;  %v651_v38 = vmax.f32 %v619_v34, 0.0  ;;  %v898_v39 = vpop.f32.mrf.mxu0 }
 0x11a   :  { %v621_v41 = vpop.f32.mrf.mxu1  ;;  %v899_v46 = vadd.f32 %v898_v39, %v897_v35 }
 0x11b   :  { %v836_v42 = vpack.c.bf16 %v651_v38, %v651_v38  ;;  %v622_v43 = vadd.f32 %v621_v41, %v525_v40  ;;  %v900_v44 = vpop.f32.mrf.mxu0 }
 0x11c   :  { %v623_v45 = vpop.f32.mrf.mxu1  ;;  %v533_v57 = vadd.f32 %v899_v46, %v1202_v1 }
 0x11d   :  { %732 = vst.msk [vmem:[%s1287_s3 + $0x28] sm:$0xf] %vm721_vm1, %v836_v42  ;;  %v652_v47 = vmax.f32 %v622_v43, 0.0  ;;  %v901_v48 = vpop.f32.mrf.mxu0 }
 0x11e   :  { %v626_v50 = vpop.f32.mrf.mxu1  ;;  %v902_v55 = vadd.f32 %v901_v48, %v900_v44 }
 0x11f   :  { %v837_v51 = vpack.c.bf16 %v652_v47, %v652_v47  ;;  %v627_v52 = vadd.f32 %v626_v50, %v530_v49  ;;  %v903_v53 = vpop.f32.mrf.mxu0 }
 0x120   :  { %v628_v54 = vpop.f32.mrf.mxu1  ;;  %v538_v2 = vadd.f32 %v902_v55, %v1202_v1 }
 0x121   :  { %733 = vst.msk [vmem:[%s1287_s3 + $0x2c] sm:$0xf] %vm721_vm1, %v837_v51  ;;  %v653_v56 = vmax.f32 %v627_v52, 0.0  ;;  %v904_v58 = vpop.f32.mrf.mxu0 }
 0x122   :  { %v629_v59 = vpop.f32.mrf.mxu1  ;;  %v905_v63 = vadd.f32 %v904_v58, %v903_v53 }
 0x123   :  { %v838_v60 = vpack.c.bf16 %v653_v56, %v653_v56  ;;  %v630_v61 = vadd.f32 %v629_v59, %v533_v57 }
 0x124   :  { %v631_v62 = vpop.f32.mrf.mxu1  ;;  %v541_v8 = vadd.f32 %v905_v63, %v1202_v1 }
 0x125   :  { %734 = vst.msk [vmem:[%s1287_s3 + $0x30] sm:$0xf] %vm721_vm1, %v838_v60  ;;  %v654_v0 = vmax.f32 %v630_v61, 0.0 }
 0x126   :  { %v634_v3 = vpop.f32.mrf.mxu1 }
 0x127   :  { %v839_v4 = vpack.c.bf16 %v654_v0, %v654_v0  ;;  %v635_v5 = vadd.f32 %v634_v3, %v538_v2 }
 0x128   :  { %v636_v6 = vpop.f32.mrf.mxu1 }
 0x129   :  { %735 = vst.msk [vmem:[%s1287_s3 + $0x34] sm:$0xf] %vm721_vm1, %v839_v4  ;;  %v655_v7 = vmax.f32 %v635_v5, 0.0 }
 0x12a   :  { %v637_v9 = vpop.f32.mrf.mxu1 }
 0x12b   :  { %v840_v10 = vpack.c.bf16 %v655_v7, %v655_v7  ;;  %v638_v11 = vadd.f32 %v637_v9, %v541_v8 }
 0x12c   :  { %v639_v12 = vpop.f32.mrf.mxu1 }
 0x12d   :  { %736 = vst.msk [vmem:[%s1287_s3 + $0x38] sm:$0xf] %vm721_vm1, %v840_v10  ;;  %v656_v13 = vmax.f32 %v638_v11, 0.0 }
 0x12f   :  { %v841_v14 = vpack.c.bf16 %v656_v13, %v656_v13 }
 0x131   :  { %737 = vst.msk [vmem:[%s1287_s3 + $0x3c] sm:$0xf] %vm721_vm1, %v841_v14 }

// kernel: deeplab3d_forward.13
= control target key start
LH: loop header
LB: loop body
LE: loop exit
PB: predicated region body
PF: predicated region fallthrough
CT: control target
= control target key end

     0   :  { %v677_v1 = vmov 0   ;;  %vm381_vm0 = vcmask 64512   ;;  %vm385_vm1 = vcmask 1043456   ;;  %vm522_vm2 = vcmask 519168   ;;  %s857_s1 = inlined_call_operand.vmem [shape: bf16[1,648,64], index: 1, kind: input, shape index: {}]   ;;  %s858_s0 = inlined_call_operand.vmem [shape: bf16[1,16,648], index: 0, kind: input, shape index: {}]   ;;  %s859_s2 = inlined_call_operand.vmem [shape: f32[1,1,64], index: 2, kind: input, shape index: {}]   ;;  %s860_s3 = inlined_call_operand.vmem [shape: bf16[1,16,64], index: 3, kind: output, shape index: {}]  }
   0x1   :  { %v627_v0 = vld [vmem:[%s857_s1 + $0x78] sm:$0xff]   ;;  %471 = vmatprep.subr.bf16.mxu0 %v677_v1  ;;  %v629_v3 = vld [vmem:[%s857_s1 + $0x70] sm:$0xff]   ;;  %v631_v5 = vld [vmem:[%s857_s1 + $0x68] sm:$0xff]  }
   0x2   :  { %v628_v2 = vld [vmem:[%s857_s1 + $0x38] sm:$0xff]   ;;  %582 = vmatprep.subr.bf16.mxu1 %v627_v0  ;;  %v630_v4 = vld [vmem:[%s857_s1 + $0x30] sm:$0xff]   ;;  %v632_v6 = vld [vmem:[%s857_s1 + $0x28] sm:$0xff]  }
   0x3   :  { %583 = vmatpush3.bf16.msra.mxu1 %v628_v2  ;;  %v633_v7 = vld [vmem:[%s857_s1 + $0x60] sm:$0xff]   ;;  %v635_v9 = vld [vmem:[%s857_s1 + $0x58] sm:$0xff]   ;;  %v637_v11 = vld [vmem:[%s857_s1 + $0x50] sm:$0xff]  }
   0x4   :  { %584 = vmatprep.subr.bf16.mxu1 %v629_v3  ;;  %v634_v8 = vld [vmem:[%s857_s1 + $0x20] sm:$0xff]   ;;  %v636_v10 = vld [vmem:[%s857_s1 + $0x18] sm:$0xff]   ;;  %v638_v14 = vld [vmem:[%s857_s1 + $0x10] sm:$0xff]  }
   0x5   :  { %v643_v12 = vld [vmem:[%s857_s1 + $0x138] sm:$0xff]   ;;  %v639_v15 = vld [vmem:[%s857_s1 + $0x48] sm:$0xff]   ;;  %v649_v16 = vld [vmem:[%s857_s1 + $0x130] sm:$0xff]  }
   0x6   :  { %472 = vmatpush1.bf16.msra.mxu0 %v643_v12  ;;  %v646_v13 = vld [vmem:[%s858_s0 + $0x4] ss:$24 sps:$4 sm:$0xff]   ;;  %v640_v17 = vld [vmem:[%s857_s1 + $0x8] sm:$0xff]   ;;  %v644_v23 = vld [vmem:[%s858_s0] ss:$24 sps:$4 sm:$0xff]  }
   0x7   :  { %585 = vmatpush3.bf16.msra.mxu1 %v630_v4  ;;  %473 = vmatprep.subr.bf16.mxu0 %v677_v1  ;;  %v641_v18 = vld [vmem:[%s857_s1 + $0x40] sm:$0xff]   ;;  %v652_v19 = vld [vmem:[%s857_s1 + $0x128] sm:$0xff]   ;;  %v647_v22 = vld [vmem:[%s857_s1 + $0xf8] sm:$0xff]  }
   0x8   :  { %586 = vmatprep.subr.bf16.mxu1 %v631_v5  ;;  %421 = vmatprep.mubr.bf16.mxu1 %v646_v13  ;;  %v642_v20 = vld [vmem:[%s857_s1] sm:$0xff]   ;;  %v648_v24 = vld [vmem:[%s857_s1 + $0xb8] sm:$0xff]   ;;  %v650_v26 = vld [vmem:[%s857_s1 + $0xf0] sm:$0xff]  }
   0x9   :  { %v655_v21 = vld [vmem:[%s857_s1 + $0x120] sm:$0xff]   ;;  %v658_v25 = vld [vmem:[%s857_s1 + $0x118] sm:$0xff]   ;;  %v651_v27 = vld [vmem:[%s857_s1 + $0xb0] sm:$0xff]  }
   0xa   :  { %474 = vmatpush1.bf16.msra.mxu0 %v649_v16  ;;  %v661_v28 = vld [vmem:[%s857_s1 + $0x110] sm:$0xff]   ;;  %v653_v29 = vld [vmem:[%s857_s1 + $0xe8] sm:$0xff]   ;;  %v656_v32 = vld [vmem:[%s857_s1 + $0xe0] sm:$0xff]  }
   0xb   :  { %587 = vmatpush3.bf16.msra.mxu1 %v632_v6  ;;  %475 = vmatprep.subr.bf16.mxu0 %v677_v1  ;;  %v654_v30 = vld [vmem:[%s857_s1 + $0xa8] sm:$0xff]   ;;  %v657_v33 = vld [vmem:[%s857_s1 + $0xa0] sm:$0xff]   ;;  %v659_v36 = vld [vmem:[%s857_s1 + $0xd8] sm:$0xff]  }
   0xc   :  { %588 = vmatprep.subr.bf16.mxu1 %v633_v7  ;;  %v664_v31 = vld [vmem:[%s857_s1 + $0x108] sm:$0xff]   ;;  %v667_v34 = vld [vmem:[%s857_s1 + $0x100] sm:$0xff]   ;;  %v660_v39 = vld [vmem:[%s857_s1 + $0x98] sm:$0xff]  }
   0xd   :  { %v673_v35 = vld [vmem:[%s858_s0 + $0xc] ss:$24 sps:$4 sm:$0xff]   ;;  %v670_v37 = vld [vmem:[%s857_s1 + $0x140] ss:$0 sps:$4 sm:$0xff]   ;;  %v662_v40 = vld [vmem:[%s857_s1 + $0xd0] sm:$0xff]  }
   0xe   :  { %476 = vmatpush1.bf16.msra.mxu0 %v652_v19  ;;  %v676_v38 = vld [vmem:[%s858_s0 + $0x14] ss:$24 sps:$4 sm:$0xff]   ;;  %v387_v41 = vsel %vm385_vm1, %v670_v37, 0  ;;  %v674_v42 = vld [vmem:[%s858_s0 + $0x10] ss:$24 sps:$4 sm:$0xff]   ;;  %v668_v46 = vld [vmem:[%s857_s1 + $0xc0] sm:$0xff]  }
   0xf   :  { %589 = vmatpush3.bf16.msra.mxu1 %v634_v8  ;;  %477 = vmatprep.subr.bf16.mxu0 %v677_v1  ;;  %v663_v43 = vld [vmem:[%s857_s1 + $0x90] sm:$0xff]   ;;  %v665_v44 = vld [vmem:[%s857_s1 + $0xc8] sm:$0xff]   ;;  %v669_v47 = vld [vmem:[%s857_s1 + $0x80] sm:$0xff]  }
  0x10   :  { %590 = vmatprep.subr.bf16.mxu1 %v635_v9  ;;  %577 = vmatprep.mubr.msk.bf16.mxu0 %vm381_vm0, %v676_v38  ;;  %v666_v45 = vld [vmem:[%s857_s1 + $0x88] sm:$0xff]   ;;  %v529_v58 = vld [vmem:[%s859_s2] ss:$0 sm:$0xff] }
  0x11   :  { %v671_v48 = vld [vmem:[%s858_s0 + $0x8] ss:$24 sps:$4 sm:$0xff]  }
  0x12   :  { %478 = vmatpush1.bf16.msra.mxu0 %v655_v21 }
  0x13   :  { %591 = vmatpush3.bf16.msra.mxu1 %v636_v10  ;;  %479 = vmatprep.subr.bf16.mxu0 %v677_v1 }
  0x14   :  { %592 = vmatprep.subr.bf16.mxu1 %v637_v11 }
  0x16   :  { %480 = vmatpush1.bf16.msra.mxu0 %v658_v25 }
  0x17   :  { %593 = vmatpush3.bf16.msra.mxu1 %v638_v14  ;;  %481 = vmatprep.subr.bf16.mxu0 %v677_v1 }
  0x18   :  { %594 = vmatprep.subr.bf16.mxu1 %v639_v15 }
  0x1a   :  { %482 = vmatpush1.bf16.msra.mxu0 %v661_v28 }
  0x1b   :  { %595 = vmatpush3.bf16.msra.mxu1 %v640_v17  ;;  %483 = vmatprep.subr.bf16.mxu0 %v677_v1 }
  0x1c   :  { %596 = vmatprep.subr.bf16.mxu1 %v641_v18 }
  0x1e   :  { %484 = vmatpush1.bf16.msra.mxu0 %v664_v31 }
  0x1f   :  { %597 = vmatpush3.bf16.msra.mxu1 %v642_v20  ;;  %485 = vmatprep.subr.bf16.mxu0 %v677_v1 }
  0x20   :  { %604 = vmatprep.subr.bf16.mxu1 %v647_v22 }
  0x22   :  { %422 = vmatmul.mubr.bf16.vlgmr.msra.gmra.mxu1 %v644_v23  ;;  %486 = vmatpush1.bf16.msra.mxu0 %v667_v34 }
  0x23   :  { %605 = vmatpush3.bf16.msra.mxu1 %v648_v24  ;;  %462 = vmatprep.mubr.bf16.mxu1 %v673_v35 }
  0x24   :  { %606 = vmatprep.subr.bf16.mxu1 %v650_v26  ;;  %501 = vmatprep.subr.bf16.mxu0 %v677_v1 }
  0x26   :  { %502 = vmatpush2.bf16.msra.mxu0 %v387_v41 }
  0x27   :  { %607 = vmatpush3.bf16.msra.mxu1 %v651_v27 }
  0x28   :  { %608 = vmatprep.subr.bf16.mxu1 %v653_v29 }
  0x29   :  { %504 = vmatmul.mubr.bf16.vlgmr.msra.gmra.mxu0 %v674_v42 }
  0x2b   :  { %609 = vmatpush3.bf16.msra.mxu1 %v654_v30 }
  0x2c   :  { %610 = vmatprep.subr.bf16.mxu1 %v656_v32 }
  0x2f   :  { %611 = vmatpush3.bf16.msra.mxu1 %v657_v33 }
  0x30   :  { %612 = vmatprep.subr.bf16.mxu1 %v659_v36 }
  0x33   :  { %613 = vmatpush3.bf16.msra.mxu1 %v660_v39 }
  0x34   :  { %614 = vmatprep.subr.bf16.mxu1 %v662_v40 }
  0x37   :  { %615 = vmatpush3.bf16.msra.mxu1 %v663_v43 }
  0x38   :  { %616 = vmatprep.subr.bf16.mxu1 %v665_v44 }
  0x3b   :  { %617 = vmatpush3.bf16.msra.mxu1 %v666_v45 }
  0x3c   :  { %618 = vmatprep.subr.bf16.mxu1 %v668_v46 }
  0x3f   :  { %619 = vmatpush3.bf16.msra.mxu1 %v669_v47 }
  0x42   :  { %463 = vmatmul.mubr.bf16.vlgmr.msra.gmra.mxu1 %v671_v48 }
  0xe2   :  { %v598_v49 = vpop.f32.mrf.mxu1 }
  0xe4   :  { %v599_v51 = vpop.f32.mrf.mxu1 }
  0xe5   :  { %v600_v57 = vadd.f32 %v599_v51, %v598_v49 }
  0xe6   :  { %v601_v54 = vpop.f32.mrf.mxu1 }
  0xe7   :  { %v424_v61 = vadd.f32 %v600_v57, %v529_v58 }
  0xe8   :  { %v602_v56 = vpop.f32.mrf.mxu1 }
  0xe9   :  { %v505_v50 = vpop.f32.mrf.mxu0  ;;  %v603_v62 = vadd.f32 %v602_v56, %v601_v54 }
  0xeb   :  { %v507_v52 = vpop.f32.mrf.mxu0  ;;  %v427_v3 = vadd.f32 %v603_v62, %v529_v58 }
  0xed   :  { %v508_v53 = vpop.f32.mrf.mxu0 }
  0xef   :  { %v510_v55 = vpop.f32.mrf.mxu0 }
 0x102   :  { %v620_v59 = vpop.f32.mrf.mxu1 }
 0x104   :  { %v621_v60 = vpop.f32.mrf.mxu1 }
 0x105   :  { %v622_v63 = vadd.f32 %v621_v60, %v620_v59 }
 0x106   :  { %v623_v0 = vpop.f32.mrf.mxu1 }
 0x107   :  { %v465_v1 = vadd.f32 %v622_v63, %v424_v61 }
 0x108   :  { %v624_v2 = vpop.f32.mrf.mxu1 }
 0x109   :  { %v506_v4 = vadd.f32 %v505_v50, %v465_v1  ;;  %v625_v5 = vadd.f32 %v624_v2, %v623_v0 }
 0x10b   :  { %v512_v6 = vmax.f32 %v506_v4, 0.0  ;;  %v468_v7 = vadd.f32 %v625_v5, %v427_v3 }
 0x10d   :  { %v580_v8 = vpack.c.bf16 %v512_v6, %v512_v6  ;;  %v509_v9 = vadd.f32 %v508_v53, %v468_v7 }
 0x10f   :  { %523 = vst.msk [vmem:[%s860_s3] sm:$0xf] %vm522_vm2, %v580_v8  ;;  %v513_v10 = vmax.f32 %v509_v9, 0.0 }
 0x111   :  { %v581_v11 = vpack.c.bf16 %v513_v10, %v513_v10 }
 0x113   :  { %524 = vst.msk [vmem:[%s860_s3 + $0x4] sm:$0xf] %vm522_vm2, %v581_v11 }

// kernel: deeplab3d_forward.14
= control target key start
LH: loop header
LB: loop body
LE: loop exit
PB: predicated region body
PF: predicated region fallthrough
CT: control target
= control target key end

     0   :  { %v158_v0 = vmov 0.0   ;;  %vm159_vm0 = vmmov 0   ;;  %vm61_vm1 = vcmask 523264   ;;  %vm116_vm2 = vcmask 519168   ;;  %s204_s1 = inlined_call_operand.vmem [shape: bf16[1,64,64], index: 1, kind: input, shape index: {}]   ;;  %s205_s0 = inlined_call_operand.vmem [shape: bf16[1,16,64], index: 0, kind: input, shape index: {}]   ;;  %s206_s2 = inlined_call_operand.vmem [shape: f32[1,1,64], index: 2, kind: input, shape index: {}]   ;;  %s207_s3 = inlined_call_operand.vmem [shape: bf16[1,16,64], index: 3, kind: output, shape index: {}]  }
   0x1   :  { %139 = vmatprep.subr.bf16.mxu0 %v158_v0  ;;  %v153_v1 = vld [vmem:[%s204_s1 + $0x18] sm:$0xff]   ;;  %147 = vmatprep.mubr.msk.bf16.mxu0 %vm159_vm0, %v158_v0  ;;  %v154_v2 = vld [vmem:[%s204_s1 + $0x10] sm:$0xff]   ;;  %v155_v3 = vld [vmem:[%s204_s1 + $0x8] sm:$0xff]  }
   0x2   :  { %140 = vmatpush3.bf16.msra.mxu0 %v153_v1  ;;  %v156_v4 = vld [vmem:[%s204_s1] sm:$0xff]  }
   0x3   :  { %141 = vmatprep.subr.bf16.mxu0 %v158_v0  ;;  %v157_v5 = vld [vmem:[%s205_s0] sm:$0xff]  }
   0x4   :  { %v123_v6 = vld [vmem:[%s206_s2] ss:$0 sm:$0xff] }
   0x6   :  { %142 = vmatpush3.bf16.msra.mxu0 %v154_v2 }
   0x7   :  { %143 = vmatprep.subr.bf16.mxu0 %v158_v0 }
   0xa   :  { %144 = vmatpush3.bf16.msra.mxu0 %v155_v3 }
   0xb   :  { %145 = vmatprep.subr.bf16.mxu0 %v158_v0 }
   0xe   :  { %146 = vmatpush3.bf16.msra.mxu0 %v156_v4 }
  0x11   :  { %148 = vmatmul.mubr.msk.bf16.vlgmr.msra.gmra.mxu0 %vm61_vm1, %v157_v5 }
  0xd1   :  { %v99_v7 = vpop.f32.mrf.mxu0 }
  0xd2   :  { %v100_v8 = vadd.f32 %v123_v6, %v99_v7 }
  0xd3   :  { %v149_v9 = vpop.f32.mrf.mxu0 }
  0xd4   :  { %v106_v10 = vmax.f32 %v100_v8, 0.0 }
  0xd5   :  { %v102_v11 = vpop.f32.mrf.mxu0 }
  0xd6   :  { %v132_v12 = vpack.c.bf16 %v106_v10, %v106_v10  ;;  %v103_v13 = vadd.f32 %v123_v6, %v102_v11 }
  0xd7   :  { %v150_v14 = vpop.f32.mrf.mxu0 }
  0xd8   :  { %117 = vst.msk [vmem:[%s207_s3] sm:$0xf] %vm116_vm2, %v132_v12  ;;  %v107_v15 = vmax.f32 %v103_v13, 0.0 }
  0xda   :  { %v133_v16 = vpack.c.bf16 %v107_v15, %v107_v15 }
  0xdc   :  { %118 = vst.msk [vmem:[%s207_s3 + $0x4] sm:$0xf] %vm116_vm2, %v133_v16 }

// kernel: deeplab3d_forward.16
= control target key start
LH: loop header
LB: loop body
LE: loop exit
PB: predicated region body
PF: predicated region fallthrough
CT: control target
= control target key end

     0   :  { %v136_v0 = vmov 0.0   ;;  %vm137_vm0 = vmmov 0   ;;  %vm55_vm1 = vcmask 523264   ;;  %vm101_vm2 = vcmask 516096   ;;  %s179_s1 = inlined_call_operand.vmem [shape: bf16[1,64,64], index: 1, kind: input, shape index: {}]   ;;  %s180_s0 = inlined_call_operand.vmem [shape: bf16[1,2,64], index: 0, kind: input, shape index: {}]   ;;  %s181_s2 = inlined_call_operand.vmem [shape: f32[1,1,64], index: 2, kind: input, shape index: {}]   ;;  %s182_s3 = inlined_call_operand.vmem [shape: bf16[1,2,64], index: 3, kind: output, shape index: {}]  }
   0x1   :  { %118 = vmatprep.subr.bf16.mxu0 %v136_v0  ;;  %v132_v1 = vld [vmem:[%s179_s1 + $0x18] sm:$0xff]   ;;  %126 = vmatprep.mubr.msk.bf16.mxu0 %vm137_vm0, %v136_v0  ;;  %v133_v2 = vld [vmem:[%s179_s1 + $0x10] sm:$0xff]   ;;  %v134_v3 = vld [vmem:[%s179_s1 + $0x8] sm:$0xff]  }
   0x2   :  { %119 = vmatpush3.bf16.msra.mxu0 %v132_v1  ;;  %v135_v4 = vld [vmem:[%s179_s1] sm:$0xff]  }
   0x3   :  { %120 = vmatprep.subr.bf16.mxu0 %v136_v0  ;;  %v15_v5 = vld [vmem:[%s180_s0] sm:$0x1] }
   0x4   :  { %v107_v6 = vld [vmem:[%s181_s2] ss:$0 sm:$0xff] }
   0x6   :  { %121 = vmatpush3.bf16.msra.mxu0 %v133_v2 }
   0x7   :  { %122 = vmatprep.subr.bf16.mxu0 %v136_v0 }
   0xa   :  { %123 = vmatpush3.bf16.msra.mxu0 %v134_v3 }
   0xb   :  { %124 = vmatprep.subr.bf16.mxu0 %v136_v0 }
   0xe   :  { %125 = vmatpush3.bf16.msra.mxu0 %v135_v4 }
  0x11   :  { %127 = vmatmul.mubr.msk.bf16.vlgmr.msra.gmra.mxu0 %vm55_vm1, %v15_v5 }
  0xd1   :  { %v93_v7 = vpop.f32.mrf.mxu0 }
  0xd2   :  { %v94_v8 = vadd.f32 %v107_v6, %v93_v7 }
  0xd3   :  { %v128_v9 = vpop.f32.mrf.mxu0 }
  0xd4   :  { %v99_v10 = vmax.f32 %v94_v8, 0.0 }
  0xd5   :  { %v96_v11 = vpop.f32.mrf.mxu0 }
  0xd6   :  { %v100_v12 = vpack.c.bf16 %v99_v10, %v99_v10 }
  0xd7   :  { %v129_v13 = vpop.f32.mrf.mxu0 }
  0xd8   :  { %102 = vst.msk [vmem:[%s182_s3] sm:$0x1] %vm101_vm2, %v100_v12 }

// kernel: deeplab3d_forward.15
= control target key start
LH: loop header
LB: loop body
LE: loop exit
PB: predicated region body
PF: predicated region fallthrough
CT: control target
= control target key end

     0   :  { %s2090_s12 = smov 0   ;;  %s2092_s13 = smov 0   ;;  %s2273_s0 = inlined_call_operand.vmem [shape: bf16[3,16,1728], index: 0, kind: input, shape index: {}]   ;;  %s2274_s1 = inlined_call_operand.vmem [shape: bf16[3,1728,64], index: 1, kind: input, shape index: {}]   ;;  %s2275_s2 = inlined_call_operand.vmem [shape: f32[3,1,64], index: 2, kind: input, shape index: {}]   ;;  %s2276_s3 = inlined_call_operand.vmem [shape: bf16[3,16,64], index: 3, kind: output, shape index: {}]  }
   0x1   :  { %s2094_s14 = smov 0  }
   0x2 LB: > { %s25_s15 = sadd.s32 1, %s2063_s13  ;;  %p1621_p0 = scmp.ge.s32.totalorder %s2067_s14, 1  ;;  %s2067_s14 = sphi %s2094_s14, %s13_s14   ;;  %s2063_s13 = sphi %s2092_s13, %s2278_s13   ;;  %s2059_s12 = sphi %s2090_s12, %s2277_s12  }
   0x3   : > { %p27_p1 = scmp.ge.s32.totalorder %s25_s15, 3  ;;  %p177_p2 = scmp.lt.s32.totalorder %s2067_s14, 4 }
   0x5   : > { %s2280_s15 = smov (%p27_p1, %s25_s15), 0  ;;  %p178_p3 = pnand %p1621_p0, %p177_p2 }
   0x6   : > { %p219_p4 = scmp.lt.s32.totalorder (!%p178_p3), %s2059_s12, 2 }
   0x7   : > { %181 = sbr.rel (%p178_p3) target bundleno = 355 (0x163), region = 32 }
   0xc   : > { %s2282_s12 = smov (!%p219_p4, %s2059_s12), 2  ;;  %vm1202_vm0 = vcmask 523264   ;;  %vm1503_vm1 = vcmask 519168  }
   0xd   : > { %s1890_s16 = smul.u32 864, %s2282_s12  ;;  %s236_s26 = scalar_lea.vmem %s2275_s2, %s2282_s12 }
   0xe   : > { %s1889_s20 = smul.u32 112, %s2282_s12  ;;  %s1754_s27 = sshll.u32 %s2282_s12, 3 }
   0xf   : > { %s2114_s19 = scalar_lea.vmem %s2274_s1, %s1890_s16  ;;  %s245_s30 = scalar_lea.vmem %s2276_s3, %s1754_s27 }
  0x10   : > { %v1916_v0 = vld [vmem:[%s2114_s19 + $0x78] sm:$0xff]   ;;  %v1918_v2 = vld [vmem:[%s2114_s19 + $0x70] sm:$0xff]   ;;  %v1920_v4 = vld [vmem:[%s2114_s19 + $0x68] sm:$0xff]   ;;  %s2141_s23 = scalar_lea.vmem %s2273_s0, %s1889_s20 }
  0x11   : > { %v1917_v1 = vld [vmem:[%s2114_s19 + $0x38] sm:$0xff]   ;;  %1757 = vmatprep.subr.bf16.mxu1 %v1916_v0  ;;  %v1919_v3 = vld [vmem:[%s2114_s19 + $0x30] sm:$0xff]   ;;  %v1921_v5 = vld [vmem:[%s2114_s19 + $0x28] sm:$0xff]  }
  0x12   : > { %1758 = vmatpush3.bf16.msra.mxu1 %v1917_v1  ;;  %v1922_v6 = vld [vmem:[%s2114_s19 + $0x60] sm:$0xff]   ;;  %v1925_v7 = vld [vmem:[%s2114_s19 + $0x178] sm:$0xff]   ;;  %v1929_v11 = vld [vmem:[%s2114_s19 + $0x170] sm:$0xff]  }
  0x13   : > { %1759 = vmatprep.subr.bf16.mxu1 %v1918_v2  ;;  %v1923_v8 = vld [vmem:[%s2114_s19 + $0x20] sm:$0xff]   ;;  %1801 = vmatprep.subr.bf16.mxu0 %v1925_v7  ;;  %v1927_v9 = vld [vmem:[%s2114_s19 + $0x138] sm:$0xff]   ;;  %v1931_v13 = vld [vmem:[%s2114_s19 + $0x130] sm:$0xff]  }
  0x14   : > { %v1924_v10 = vld [vmem:[%s2114_s19 + $0x58] sm:$0xff]   ;;  %1802 = vmatpush3.bf16.msra.mxu0 %v1927_v9  ;;  %v1928_v14 = vld [vmem:[%s2114_s19 + $0x50] sm:$0xff]   ;;  %v1933_v15 = vld [vmem:[%s2114_s19 + $0x168] sm:$0xff]  }
  0x15   : > { %v1926_v12 = vld [vmem:[%s2114_s19 + $0x18] sm:$0xff]   ;;  %1803 = vmatprep.subr.bf16.mxu0 %v1929_v11  ;;  %v1930_v16 = vld [vmem:[%s2114_s19 + $0x10] sm:$0xff]   ;;  %v1935_v17 = vld [vmem:[%s2114_s19 + $0x128] sm:$0xff]  }
  0x16   : > { %1760 = vmatpush3.bf16.msra.mxu1 %v1919_v3  ;;  %v1932_v18 = vld [vmem:[%s2114_s19 + $0x48] sm:$0xff]   ;;  %v1937_v19 = vld [vmem:[%s2114_s19 + $0x160] sm:$0xff]   ;;  %v1944_v25 = vld [vmem:[%s2114_s19 + $0x158] sm:$0xff]  }
  0x17   : > { %1761 = vmatprep.subr.bf16.mxu1 %v1920_v4  ;;  %v1934_v20 = vld [vmem:[%s2114_s19 + $0x8] sm:$0xff]   ;;  %v1939_v21 = vld [vmem:[%s2114_s19 + $0x120] sm:$0xff]   ;;  %v1943_v27 = vld [vmem:[%s2114_s19 + $0xf8] sm:$0xff]  }
  0x18   : > { %1804 = vmatpush3.bf16.msra.mxu0 %v1931_v13  ;;  %v1936_v22 = vld [vmem:[%s2114_s19 + $0x40] sm:$0xff]   ;;  %v1946_v28 = vld [vmem:[%s2114_s19 + $0x118] sm:$0xff]   ;;  %v1948_v30 = vld [vmem:[%s2114_s19 + $0x150] sm:$0xff]  }
  0x19   : > { %1805 = vmatprep.subr.bf16.mxu0 %v1933_v15  ;;  %v1942_v23 = vld [vmem:[%s2141_s23 + $0x4] ss:$56 sps:$4 sm:$0xff]   ;;  %v1940_v26 = vld [vmem:[%s2141_s23] ss:$56 sps:$4 sm:$0xff]   ;;  %v1947_v31 = vld [vmem:[%s2114_s19 + $0xf0] sm:$0xff]  }
  0x1a   : > { %1762 = vmatpush3.bf16.msra.mxu1 %v1921_v5  ;;  %v1938_v24 = vld [vmem:[%s2114_s19] sm:$0xff]   ;;  %1238 = vmatprep.mubr.bf16.mxu1 %v1942_v23  ;;  %v1945_v29 = vld [vmem:[%s2114_s19 + $0xb8] sm:$0xff]   ;;  %v1950_v32 = vld [vmem:[%s2114_s19 + $0x110] sm:$0xff]  }
  0x1b   : > { %1763 = vmatprep.subr.bf16.mxu1 %v1922_v6  ;;  %v1949_v33 = vld [vmem:[%s2114_s19 + $0xb0] sm:$0xff]   ;;  %v1952_v34 = vld [vmem:[%s2114_s19 + $0x148] sm:$0xff]   ;;  %v1956_v38 = vld [vmem:[%s2114_s19 + $0x140] sm:$0xff]  }
  0x1c   : > { %1806 = vmatpush3.bf16.msra.mxu0 %v1935_v17  ;;  %v1951_v35 = vld [vmem:[%s2114_s19 + $0xe8] sm:$0xff]   ;;  %v1955_v39 = vld [vmem:[%s2114_s19 + $0xe0] sm:$0xff]   ;;  %v1959_v42 = vld [vmem:[%s2114_s19 + $0xd8] sm:$0xff]   ;;  %v2069_v17 = vmov 0  }
  0x1d   : > { %1807 = vmatprep.subr.bf16.mxu0 %v1937_v19  ;;  %v1954_v36 = vld [vmem:[%s2114_s19 + $0x108] sm:$0xff]   ;;  %v1957_v40 = vld [vmem:[%s2114_s19 + $0xa0] sm:$0xff]   ;;  %v1963_v45 = vld [vmem:[%s2114_s19 + $0x278] sm:$0xff]  }
  0x1e   : > { %1764 = vmatpush3.bf16.msra.mxu1 %v1923_v8  ;;  %v1953_v37 = vld [vmem:[%s2114_s19 + $0xa8] sm:$0xff]   ;;  %v1958_v41 = vld [vmem:[%s2114_s19 + $0x100] sm:$0xff]   ;;  %v1964_v46 = vld [vmem:[%s2114_s19 + $0x98] sm:$0xff]  }
  0x1f   : > { %1765 = vmatprep.subr.bf16.mxu1 %v1924_v10  ;;  %v1960_v43 = vld [vmem:[%s2141_s23 + $0x10] ss:$56 sps:$4 sm:$0xff]   ;;  %v1962_v44 = vld [vmem:[%s2141_s23 + $0x14] ss:$56 sps:$4 sm:$0xff]   ;;  %v1965_v47 = vld [vmem:[%s2114_s19 + $0x238] sm:$0xff]  }
  0x20   : > { %1808 = vmatpush3.bf16.msra.mxu0 %v1939_v21  ;;  %1320 = vmatprep.mubr.bf16.mxu0 %v1962_v44  ;;  %v1966_v48 = vld [vmem:[%s2114_s19 + $0xd0] sm:$0xff]   ;;  %v1970_v52 = vld [vmem:[%s2114_s19 + $0xc8] sm:$0xff]   ;;  %v1974_v56 = vld [vmem:[%s2114_s19 + $0xc0] sm:$0xff]  }
  0x21   : > { %1809 = vmatprep.subr.bf16.mxu0 %v1944_v25  ;;  %v1967_v49 = vld [vmem:[%s2114_s19 + $0x270] sm:$0xff]   ;;  %v1971_v53 = vld [vmem:[%s2114_s19 + $0x268] sm:$0xff]   ;;  %v1975_v57 = vld [vmem:[%s2114_s19 + $0x260] sm:$0xff]  }
  0x22   : > { %1766 = vmatpush3.bf16.msra.mxu1 %v1926_v12  ;;  %v1968_v50 = vld [vmem:[%s2114_s19 + $0x90] sm:$0xff]   ;;  %v1972_v54 = vld [vmem:[%s2114_s19 + $0x88] sm:$0xff]   ;;  %v1977_v58 = vld [vmem:[%s2114_s19 + $0x220] sm:$0xff]  }
  0x23   : > { %1767 = vmatprep.subr.bf16.mxu1 %v1928_v14  ;;  %v1969_v51 = vld [vmem:[%s2114_s19 + $0x230] sm:$0xff]   ;;  %v1973_v55 = vld [vmem:[%s2114_s19 + $0x228] sm:$0xff]   ;;  %v1976_v59 = vld [vmem:[%s2114_s19 + $0x80] sm:$0xff]  }
  0x24   : > { %1810 = vmatpush3.bf16.msra.mxu0 %v1946_v28  ;;  %v1980_v60 = vld [vmem:[%s2141_s23 + $0xc] ss:$56 sps:$4 sm:$0xff]   ;;  %v1978_v61 = vld [vmem:[%s2141_s23 + $0x8] ss:$56 sps:$4 sm:$0xff]   ;;  %v1981_v62 = vld [vmem:[%s2114_s19 + $0x1f8] sm:$0xff]  }
  0x25   : > { %1811 = vmatprep.subr.bf16.mxu0 %v1948_v30  ;;  %v1982_v63 = vld [vmem:[%s2114_s19 + $0x258] sm:$0xff]   ;;  %v1985_v2 = vld [vmem:[%s2114_s19 + $0x1f0] sm:$0xff]   ;;  %v1989_v6 = vld [vmem:[%s2114_s19 + $0x1e8] sm:$0xff]  }
  0x26   : > { %1768 = vmatpush3.bf16.msra.mxu1 %v1930_v16  ;;  %v1983_v0 = vld [vmem:[%s2114_s19 + $0x1b8] sm:$0xff]   ;;  %v1986_v3 = vld [vmem:[%s2114_s19 + $0x250] sm:$0xff]   ;;  %v1990_v7 = vld [vmem:[%s2114_s19 + $0x248] sm:$0xff]  }
  0x27   : > { %1769 = vmatprep.subr.bf16.mxu1 %v1932_v18  ;;  %v1984_v1 = vld [vmem:[%s2114_s19 + $0x218] sm:$0xff]   ;;  %v1987_v4 = vld [vmem:[%s2114_s19 + $0x1b0] sm:$0xff]   ;;  %v1991_v8 = vld [vmem:[%s2114_s19 + $0x1a8] sm:$0xff]  }
  0x28   : > { %1812 = vmatpush3.bf16.msra.mxu0 %v1950_v32  ;;  %v1988_v5 = vld [vmem:[%s2114_s19 + $0x210] sm:$0xff]   ;;  %v1992_v9 = vld [vmem:[%s2114_s19 + $0x208] sm:$0xff]   ;;  %v1993_v10 = vld [vmem:[%s2114_s19 + $0x1e0] sm:$0xff]  }
  0x29   : > { %1813 = vmatprep.subr.bf16.mxu0 %v1952_v34  ;;  %v1994_v11 = vld [vmem:[%s2114_s19 + $0x240] sm:$0xff]   ;;  %v1997_v14 = vld [vmem:[%s2114_s19 + $0x1d8] sm:$0xff]   ;;  %v2004_v21 = vld [vmem:[%s2114_s19 + $0x190] sm:$0xff]  }
  0x2a   : > { %1770 = vmatpush3.bf16.msra.mxu1 %v1934_v20  ;;  %v1995_v12 = vld [vmem:[%s2114_s19 + $0x1a0] sm:$0xff]   ;;  %v2001_v18 = vld [vmem:[%s2114_s19 + $0x198] sm:$0xff]   ;;  %v2003_v20 = vld [vmem:[%s2114_s19 + $0x1d0] sm:$0xff]  }
  0x2b   : > { %1771 = vmatprep.subr.bf16.mxu1 %v1936_v22  ;;  %v1996_v13 = vld [vmem:[%s2114_s19 + $0x200] sm:$0xff]   ;;  %v2002_v19 = vld [vmem:[%s2114_s19 + $0x338] sm:$0xff]   ;;  %v2005_v22 = vld [vmem:[%s2114_s19 + $0x330] sm:$0xff]  }
  0x2c   : > { %1814 = vmatpush3.bf16.msra.mxu0 %v1954_v36  ;;  %v1998_v15 = vld [vmem:[%s2141_s23 + $0x20] ss:$56 sps:$4 sm:$0xff]   ;;  %v2000_v16 = vld [vmem:[%s2141_s23 + $0x24] ss:$56 sps:$4 sm:$0xff]   ;;  %v2006_v23 = vld [vmem:[%s2114_s19 + $0x1c8] sm:$0xff]  }
  0x2d   : > { %1815 = vmatprep.subr.bf16.mxu0 %v1956_v38  ;;  %v2007_v25 = vld [vmem:[%s2114_s19 + $0x188] sm:$0xff]   ;;  %v2014_v28 = vld [vmem:[%s2141_s23 + $0x1c] ss:$56 sps:$4 sm:$0xff]  }
  0x2e   : > { %1772 = vmatpush3.bf16.msra.mxu1 %v1938_v24  ;;  %v2008_v24 = vld [vmem:[%s2114_s19 + $0x328] sm:$0xff]   ;;  %v2015_v30 = vld [vmem:[%s2114_s19 + $0x2f8] sm:$0xff]   ;;  %v2018_v34 = vld [vmem:[%s2114_s19 + $0x2f0] sm:$0xff]  }
  0x2f   : > { %1779 = vmatprep.subr.bf16.mxu1 %v1943_v27  ;;  %v2011_v27 = vld [vmem:[%s2114_s19 + $0x320] sm:$0xff]   ;;  %v2017_v32 = vld [vmem:[%s2114_s19 + $0x318] sm:$0xff]   ;;  %v2019_v36 = vld [vmem:[%s2114_s19 + $0x2b0] sm:$0xff]  }
  0x30   : > { %1816 = vmatpush3.bf16.msra.mxu0 %v1958_v41  ;;  %v2023_v38 = vld [vmem:[%s2114_s19 + $0x308] sm:$0xff]   ;;  %v2026_v41 = vld [vmem:[%s2114_s19 + $0x300] sm:$0xff]   ;;  %v2029_v44 = vld [vmem:[%s2114_s19 + $0x358] sm:$0xff]  }
  0x31   : > { %1239 = vmatmul.mubr.bf16.vlgmr.msra.gmra.mxu1 %v1940_v26  ;;  %1845 = vmatprep.subr.bf16.mxu0 %v1963_v45  ;;  %v2009_v26 = vld [vmem:[%s2114_s19 + $0x1c0] sm:$0xff]   ;;  %v2028_v45 = vld [vmem:[%s2114_s19 + $0x298] sm:$0xff]  }
  0x32   : > { %1780 = vmatpush3.bf16.msra.mxu1 %v1945_v29  ;;  %1279 = vmatprep.mubr.bf16.mxu1 %v1980_v60  ;;  %v2010_v29 = vld [vmem:[%s2114_s19 + $0x180] sm:$0xff]  }
  0x33   : > { %1781 = vmatprep.subr.bf16.mxu1 %v1947_v31  ;;  %1321 = vmatmul.mubr.bf16.vlgmr.msra.gmra.mxu0 %v1960_v43  ;;  %v2012_v31 = vld [vmem:[%s2141_s23 + $0x18] ss:$56 sps:$4 sm:$0xff]  }
  0x34   : > { %1846 = vmatpush3.bf16.msra.mxu0 %v1965_v47  ;;  %1402 = vmatprep.mubr.bf16.mxu0 %v2000_v16  ;;  %v2027_v43 = vld [vmem:[%s2114_s19 + $0x2d8] sm:$0xff]   ;;  %v2031_v47 = vld [vmem:[%s2114_s19 + $0x290] sm:$0xff]  }
  0x35   : > { %1847 = vmatprep.subr.bf16.mxu0 %v1967_v49  ;;  %v2033_v49 = vld [vmem:[%s2114_s19 + $0x2c8] sm:$0xff]  }
  0x36   : > { %1782 = vmatpush3.bf16.msra.mxu1 %v1949_v33  ;;  %v2016_v33 = vld [vmem:[%s2114_s19 + $0x2b8] sm:$0xff]  }
  0x37   : > { %1783 = vmatprep.subr.bf16.mxu1 %v1951_v35  ;;  %v2020_v35 = vld [vmem:[%s2114_s19 + $0x310] sm:$0xff]  }
  0x38   : > { %1848 = vmatpush3.bf16.msra.mxu0 %v1969_v51  ;;  %v2042_v51 = vld [vmem:[%s2141_s23 + $0x34] ss:$56 sps:$4 sm:$0xff]  }
  0x39   : > { %1849 = vmatprep.subr.bf16.mxu0 %v1971_v53  ;;  %v2034_v53 = vld [vmem:[%s2114_s19 + $0x288] sm:$0xff]  }
  0x3a   : > { %1784 = vmatpush3.bf16.msra.mxu1 %v1953_v37  ;;  %v2021_v37 = vld [vmem:[%s2114_s19 + $0x2e8] sm:$0xff]  }
  0x3b   : > { %1785 = vmatprep.subr.bf16.mxu1 %v1955_v39  ;;  %v2022_v39 = vld [vmem:[%s2114_s19 + $0x2a8] sm:$0xff]  }
  0x3c   : > { %1850 = vmatpush3.bf16.msra.mxu0 %v1973_v55  ;;  %v2038_v55 = vld [vmem:[%s2114_s19 + $0x340] sm:$0xff]  }
  0x3d   : > { %1851 = vmatprep.subr.bf16.mxu0 %v1975_v57  ;;  %v2044_v57 = vld [vmem:[%s2141_s23 + $0x30] ss:$56 sps:$4 sm:$0xff]  }
  0x3e   : > { %1786 = vmatpush3.bf16.msra.mxu1 %v1957_v40  ;;  %v2024_v40 = vld [vmem:[%s2114_s19 + $0x2e0] sm:$0xff]  }
  0x3f   : > { %1787 = vmatprep.subr.bf16.mxu1 %v1959_v42  ;;  %v2025_v42 = vld [vmem:[%s2114_s19 + $0x2a0] sm:$0xff]  }
  0x40   : > { %1852 = vmatpush3.bf16.msra.mxu0 %v1977_v58  ;;  %v2039_v58 = vld [vmem:[%s2141_s23 + $0x28] ss:$56 sps:$4 sm:$0xff]  }
  0x41   : > { %1853 = vmatprep.subr.bf16.mxu0 %v1982_v63 }
  0x42   : > { %1788 = vmatpush3.bf16.msra.mxu1 %v1964_v46  ;;  %v2030_v46 = vld [vmem:[%s2114_s19 + $0x2d0] sm:$0xff]  }
  0x43   : > { %1789 = vmatprep.subr.bf16.mxu1 %v1966_v48  ;;  %v2032_v48 = vld [vmem:[%s2114_s19 + $0x350] sm:$0xff]  }
  0x44   : > { %1854 = vmatpush3.bf16.msra.mxu0 %v1984_v1 }
  0x45   : > { %1855 = vmatprep.subr.bf16.mxu0 %v1986_v3 }
  0x46   : > { %1790 = vmatpush3.bf16.msra.mxu1 %v1968_v50  ;;  %v2041_v50 = vld [vmem:[%s2141_s23 + $0x2c] ss:$56 sps:$4 sm:$0xff]  }
  0x47   : > { %1791 = vmatprep.subr.bf16.mxu1 %v1970_v52  ;;  %v2035_v52 = vld [vmem:[%s2114_s19 + $0x348] sm:$0xff]  }
  0x48   : > { %1856 = vmatpush3.bf16.msra.mxu0 %v1988_v5 }
  0x49   : > { %1857 = vmatprep.subr.bf16.mxu0 %v1990_v7 }
  0x4a   : > { %1792 = vmatpush3.bf16.msra.mxu1 %v1972_v54  ;;  %v2036_v54 = vld [vmem:[%s2114_s19 + $0x2c0] sm:$0xff]  }
  0x4b   : > { %1793 = vmatprep.subr.bf16.mxu1 %v1974_v56  ;;  %v2037_v56 = vld [vmem:[%s2114_s19 + $0x280] sm:$0xff]  }
  0x4c   : > { %1858 = vmatpush3.bf16.msra.mxu0 %v1992_v9 }
  0x4d   : > { %1859 = vmatprep.subr.bf16.mxu0 %v1994_v11 }
  0x4e   : > { %1794 = vmatpush3.bf16.msra.mxu1 %v1976_v59 }
  0x4f   : > { %1823 = vmatprep.subr.bf16.mxu1 %v1981_v62 }
  0x50   : > { %1860 = vmatpush3.bf16.msra.mxu0 %v1996_v13 }
  0x51   : > { %1280 = vmatmul.mubr.bf16.vlgmr.msra.gmra.mxu1 %v1978_v61  ;;  %1452 = vmatprep.subr.bf16.mxu0 %v2069_v17 }
  0x52   : > { %1824 = vmatpush3.bf16.msra.mxu1 %v1983_v0  ;;  %1361 = vmatprep.mubr.bf16.mxu1 %v2014_v28 }
  0x53   : > { %1825 = vmatprep.subr.bf16.mxu1 %v1985_v2  ;;  %1403 = vmatmul.mubr.bf16.vlgmr.msra.gmra.mxu0 %v1998_v15 }
  0x54   : > { %1453 = vmatpush1.bf16.msra.mxu0 %v2002_v19  ;;  %1749 = vmatprep.mubr.msk.bf16.mxu0 %vm1202_vm0, %v2042_v51 }
  0x55   : > { %1454 = vmatprep.subr.bf16.mxu0 %v2069_v17 }
  0x56   : > { %1826 = vmatpush3.bf16.msra.mxu1 %v1987_v4 }
  0x57   : > { %1827 = vmatprep.subr.bf16.mxu1 %v1989_v6 }
  0x58   : > { %1455 = vmatpush1.bf16.msra.mxu0 %v2005_v22 }
  0x59   : > { %1456 = vmatprep.subr.bf16.mxu0 %v2069_v17 }
  0x5a   : > { %1828 = vmatpush3.bf16.msra.mxu1 %v1991_v8 }
  0x5b   : > { %1829 = vmatprep.subr.bf16.mxu1 %v1993_v10  ;;  %v1626_v10 = vld [vmem:[%s236_s26] ss:$0 sm:$0xff] }
  0x5c   : > { %1457 = vmatpush1.bf16.msra.mxu0 %v2008_v24 }
  0x5d   : > { %1458 = vmatprep.subr.bf16.mxu0 %v2069_v17 }
  0x5e   : > { %1830 = vmatpush3.bf16.msra.mxu1 %v1995_v12 }
  0x5f   : > { %1831 = vmatprep.subr.bf16.mxu1 %v1997_v14 }
  0x60   : > { %1459 = vmatpush1.bf16.msra.mxu0 %v2011_v27 }
  0x61   : > { %1460 = vmatprep.subr.bf16.mxu0 %v2069_v17 }
  0x62   : > { %1832 = vmatpush3.bf16.msra.mxu1 %v2001_v18 }
  0x63   : > { %1833 = vmatprep.subr.bf16.mxu1 %v2003_v20 }
  0x64   : > { %1461 = vmatpush1.bf16.msra.mxu0 %v2017_v32 }
  0x65   : > { %1462 = vmatprep.subr.bf16.mxu0 %v2069_v17 }
  0x66   : > { %1834 = vmatpush3.bf16.msra.mxu1 %v2004_v21 }
  0x67   : > { %1835 = vmatprep.subr.bf16.mxu1 %v2006_v23 }
  0x68   : > { %1463 = vmatpush1.bf16.msra.mxu0 %v2020_v35 }
  0x69   : > { %1464 = vmatprep.subr.bf16.mxu0 %v2069_v17 }
  0x6a   : > { %1836 = vmatpush3.bf16.msra.mxu1 %v2007_v25 }
  0x6b   : > { %1837 = vmatprep.subr.bf16.mxu1 %v2009_v26 }
  0x6c   : > { %1465 = vmatpush1.bf16.msra.mxu0 %v2023_v38 }
  0x6d   : > { %1466 = vmatprep.subr.bf16.mxu0 %v2069_v17 }
  0x6e   : > { %1838 = vmatpush3.bf16.msra.mxu1 %v2010_v29 }
  0x6f   : > { %1867 = vmatprep.subr.bf16.mxu1 %v2015_v30 }
  0x70   : > { %1467 = vmatpush1.bf16.msra.mxu0 %v2026_v41 }
  0x71   : > { %1362 = vmatmul.mubr.bf16.vlgmr.msra.gmra.mxu1 %v2012_v31  ;;  %1476 = vmatprep.subr.bf16.mxu0 %v2069_v17 }
  0x72   : > { %1868 = vmatpush3.bf16.msra.mxu1 %v2016_v33  ;;  %1443 = vmatprep.mubr.bf16.mxu1 %v2041_v50 }
  0x73   : > { %1869 = vmatprep.subr.bf16.mxu1 %v2018_v34 }
  0x74   : > { %1477 = vmatpush2.bf16.msra.mxu0 %v2029_v44 }
  0x75   : > { %1478 = vmatprep.subr.bf16.mxu0 %v2069_v17 }
  0x76   : > { %1870 = vmatpush3.bf16.msra.mxu1 %v2019_v36 }
  0x77   : > { %1871 = vmatprep.subr.bf16.mxu1 %v2021_v37 }
  0x78   : > { %1479 = vmatpush2.bf16.msra.mxu0 %v2032_v48 }
  0x79   : > { %1480 = vmatprep.subr.bf16.mxu0 %v2069_v17 }
  0x7a   : > { %1872 = vmatpush3.bf16.msra.mxu1 %v2022_v39 }
  0x7b   : > { %1873 = vmatprep.subr.bf16.mxu1 %v2024_v40 }
  0x7c   : > { %1481 = vmatpush2.bf16.msra.mxu0 %v2035_v52 }
  0x7d   : > { %1482 = vmatprep.subr.bf16.mxu0 %v2069_v17 }
  0x7e   : > { %1874 = vmatpush3.bf16.msra.mxu1 %v2025_v42 }
  0x7f   : > { %1875 = vmatprep.subr.bf16.mxu1 %v2027_v43 }
  0x80   : > { %1483 = vmatpush2.bf16.msra.mxu0 %v2038_v55 }
  0x82   : > { %1876 = vmatpush3.bf16.msra.mxu1 %v2028_v45 }
  0x83   : > { %1877 = vmatprep.subr.bf16.mxu1 %v2030_v46  ;;  %1485 = vmatmul.mubr.bf16.vlgmr.msra.gmra.mxu0 %v2044_v57 }
  0x86   : > { %1878 = vmatpush3.bf16.msra.mxu1 %v2031_v47 }
  0x87   : > { %1879 = vmatprep.subr.bf16.mxu1 %v2033_v49 }
  0x8a   : > { %1880 = vmatpush3.bf16.msra.mxu1 %v2034_v53 }
  0x8b   : > { %1881 = vmatprep.subr.bf16.mxu1 %v2036_v54 }
  0x8e   : > { %1882 = vmatpush3.bf16.msra.mxu1 %v2037_v56 }
  0x91   : > { %1444 = vmatmul.mubr.bf16.vlgmr.msra.gmra.mxu1 %v2039_v58 }
  0xf1   : > { %v1773_v59 = vpop.f32.mrf.mxu1 }
  0xf3   : > { %v1774_v60 = vpop.f32.mrf.mxu1  ;;  %v1817_v0 = vpop.f32.mrf.mxu0 }
  0xf4   : > { %v1775_v9 = vadd.f32 %v1774_v60, %v1773_v59 }
  0xf5   : > { %v1776_v61 = vpop.f32.mrf.mxu1  ;;  %v1818_v2 = vpop.f32.mrf.mxu0 }
  0xf6   : > { %v1241_v14 = vadd.f32 %v1775_v9, %v1626_v10  ;;  %v1819_v21 = vadd.f32 %v1818_v2, %v1817_v0 }
  0xf7   : > { %v1777_v62 = vpop.f32.mrf.mxu1  ;;  %v1820_v4 = vpop.f32.mrf.mxu0 }
  0xf8   : > { %v1778_v15 = vadd.f32 %v1777_v62, %v1776_v61 }
  0xf9   : > { %v1821_v6 = vpop.f32.mrf.mxu0 }
  0xfa   : > { %v1244_v20 = vadd.f32 %v1778_v15, %v1626_v10  ;;  %v1822_v27 = vadd.f32 %v1821_v6, %v1820_v4 }
 0x111   : > { %v1795_v63 = vpop.f32.mrf.mxu1 }
 0x113   : > { %v1796_v1 = vpop.f32.mrf.mxu1  ;;  %v1861_v8 = vpop.f32.mrf.mxu0 }
 0x114   : > { %v1797_v12 = vadd.f32 %v1796_v1, %v1795_v63 }
 0x115   : > { %v1798_v3 = vpop.f32.mrf.mxu1  ;;  %v1862_v13 = vpop.f32.mrf.mxu0 }
 0x116   : > { %v1282_v17 = vadd.f32 %v1797_v12, %v1241_v14  ;;  %v1863_v32 = vadd.f32 %v1862_v13, %v1861_v8 }
 0x117   : > { %v1799_v5 = vpop.f32.mrf.mxu1  ;;  %v1864_v19 = vpop.f32.mrf.mxu0 }
 0x118   : > { %v1800_v18 = vadd.f32 %v1799_v5, %v1798_v3  ;;  %v1323_v26 = vadd.f32 %v1819_v21, %v1282_v17 }
 0x119   : > { %v1865_v25 = vpop.f32.mrf.mxu0 }
 0x11a   : > { %v1285_v24 = vadd.f32 %v1800_v18, %v1244_v20  ;;  %v1866_v41 = vadd.f32 %v1865_v25, %v1864_v19 }
 0x11c   : > { %v1326_v33 = vadd.f32 %v1822_v27, %v1285_v24 }
 0x131   : > { %v1839_v7 = vpop.f32.mrf.mxu1 }
 0x133   : > { %v1840_v11 = vpop.f32.mrf.mxu1 }
 0x134   : > { %v1841_v22 = vadd.f32 %v1840_v11, %v1839_v7 }
 0x135   : > { %v1842_v16 = vpop.f32.mrf.mxu1 }
 0x136   : > { %v1364_v28 = vadd.f32 %v1841_v22, %v1323_v26 }
 0x137   : > { %v1843_v23 = vpop.f32.mrf.mxu1 }
 0x138   : > { %v1844_v29 = vadd.f32 %v1843_v23, %v1842_v16  ;;  %v1405_v37 = vadd.f32 %v1863_v32, %v1364_v28 }
 0x13a   : > { %v1367_v36 = vadd.f32 %v1844_v29, %v1326_v33 }
 0x13c   : > { %v1408_v46 = vadd.f32 %v1866_v41, %v1367_v36 }
 0x143   : > { %v1486_v30 = vpop.f32.mrf.mxu0 }
 0x145   : > { %v1488_v34 = vpop.f32.mrf.mxu0 }
 0x147   : > { %v1489_v39 = vpop.f32.mrf.mxu0 }
 0x149   : > { %v1491_v43 = vpop.f32.mrf.mxu0 }
 0x151   : > { %v1883_v31 = vpop.f32.mrf.mxu1 }
 0x153   : > { %v1884_v35 = vpop.f32.mrf.mxu1 }
 0x154   : > { %v1885_v38 = vadd.f32 %v1884_v35, %v1883_v31 }
 0x155   : > { %v1886_v40 = vpop.f32.mrf.mxu1 }
 0x156   : > { %v1446_v42 = vadd.f32 %v1885_v38, %v1405_v37 }
 0x157   : > { %v1887_v44 = vpop.f32.mrf.mxu1 }
 0x158   : > { %v1487_v45 = vadd.f32 %v1486_v30, %v1446_v42  ;;  %v1888_v47 = vadd.f32 %v1887_v44, %v1886_v40 }
 0x15a   : > { %v1493_v48 = vmax.f32 %v1487_v45, 0.0  ;;  %v1449_v49 = vadd.f32 %v1888_v47, %v1408_v46 }
 0x15c   : > { %v1755_v50 = vpack.c.bf16 %v1493_v48, %v1493_v48  ;;  %v1490_v51 = vadd.f32 %v1489_v39, %v1449_v49 }
 0x15e   : > { %1504 = vst.msk [vmem:[%s245_s30] sm:$0xf] %vm1503_vm1, %v1755_v50  ;;  %v1494_v52 = vmax.f32 %v1490_v51, 0.0 }
 0x160   : > { %v1756_v53 = vpack.c.bf16 %v1494_v52, %v1494_v52 }
 0x162   : > { %1505 = vst.msk [vmem:[%s245_s30 + $0x4] sm:$0xf] %vm1503_vm1, %v1756_v53 }
 0x163 PF: > { %s13_s14 = sadd.s32 1, %s2067_s14   ;;  %s2277_s12 = smov %s2063_s13 }
 0x164   : > { %p10_p5 = scmp.ge.s32.totalorder %s13_s14, 5   ;;  %s2278_s13 = smov %s2280_s15 }
 0x166   :  { %12 = sbr.rel (!%p10_p5) target bundleno = 2 (0x2), region = 68 }

// kernel: deeplab3d_forward.17
= control target key start
LH: loop header
LB: loop body
LE: loop exit
PB: predicated region body
PF: predicated region fallthrough
CT: control target
= control target key end

     0   :  { %v398_v1 = vmov 0.0   ;;  %vm399_vm0 = vmmov 0   ;;  %vm201_vm1 = vcmask 523264   ;;  %vm297_vm2 = vcmask 519168   ;;  %s498_s1 = inlined_call_operand.vmem [shape: bf16[1,320,64], index: 1, kind: input, shape index: {}]   ;;  %s499_s0 = inlined_call_operand.vmem [shape: bf16[1,16,320], index: 0, kind: input, shape index: {}]   ;;  %s500_s2 = inlined_call_operand.vmem [shape: f32[1,1,64], index: 2, kind: input, shape index: {}]   ;;  %s501_s3 = inlined_call_operand.vmem [shape: bf16[1,16,64], index: 3, kind: output, shape index: {}]  }
   0x1   :  { %v374_v0 = vld [vmem:[%s498_s1 + $0x78] sm:$0xff]   ;;  %360 = vmatprep.subr.bf16.mxu1 %v398_v1  ;;  %368 = vmatprep.mubr.msk.bf16.mxu1 %vm399_vm0, %v398_v1  ;;  %v376_v3 = vld [vmem:[%s498_s1 + $0x70] sm:$0xff]   ;;  %v378_v5 = vld [vmem:[%s498_s1 + $0x68] sm:$0xff]  }
   0x2   :  { %v375_v2 = vld [vmem:[%s498_s1 + $0x38] sm:$0xff]   ;;  %333 = vmatprep.subr.bf16.mxu0 %v374_v0  ;;  %v377_v4 = vld [vmem:[%s498_s1 + $0x30] sm:$0xff]   ;;  %v379_v6 = vld [vmem:[%s498_s1 + $0x28] sm:$0xff]  }
   0x3   :  { %334 = vmatpush3.bf16.msra.mxu0 %v375_v2  ;;  %v380_v7 = vld [vmem:[%s498_s1 + $0x60] sm:$0xff]   ;;  %v384_v8 = vld [vmem:[%s498_s1 + $0x98] sm:$0xff]   ;;  %v387_v11 = vld [vmem:[%s498_s1 + $0x90] sm:$0xff]  }
   0x4   :  { %335 = vmatprep.subr.bf16.mxu0 %v376_v3  ;;  %v381_v9 = vld [vmem:[%s498_s1 + $0x20] sm:$0xff]   ;;  %v382_v10 = vld [vmem:[%s498_s1 + $0x58] sm:$0xff]   ;;  %361 = vmatpush3.bf16.msra.mxu1 %v384_v8  ;;  %v385_v13 = vld [vmem:[%s498_s1 + $0x50] sm:$0xff]  }
   0x5   :  { %362 = vmatprep.subr.bf16.mxu1 %v398_v1  ;;  %v383_v12 = vld [vmem:[%s498_s1 + $0x18] sm:$0xff]   ;;  %v390_v14 = vld [vmem:[%s498_s1 + $0x88] sm:$0xff]   ;;  %v386_v15 = vld [vmem:[%s498_s1 + $0x10] sm:$0xff]  }
   0x6   :  { %v388_v16 = vld [vmem:[%s498_s1 + $0x48] sm:$0xff]   ;;  %v393_v17 = vld [vmem:[%s498_s1 + $0x80] sm:$0xff]  }
   0x7   :  { %336 = vmatpush3.bf16.msra.mxu0 %v377_v4  ;;  %v396_v18 = vld [vmem:[%s499_s0 + $0x4] ss:$12 sps:$4 sm:$0xff]   ;;  %v389_v19 = vld [vmem:[%s498_s1 + $0x8] sm:$0xff]   ;;  %v304_v29 = vld [vmem:[%s500_s2] ss:$0 sm:$0xff] }
   0x8   :  { %337 = vmatprep.subr.bf16.mxu0 %v378_v5  ;;  %363 = vmatpush3.bf16.msra.mxu1 %v387_v11  ;;  %v397_v20 = vld [vmem:[%s499_s0 + $0x8] ss:$12 sps:$4 sm:$0xff]   ;;  %v391_v21 = vld [vmem:[%s498_s1 + $0x40] sm:$0xff]  }
   0x9   :  { %364 = vmatprep.subr.bf16.mxu1 %v398_v1  ;;  %237 = vmatprep.mubr.bf16.mxu0 %v396_v18  ;;  %v392_v22 = vld [vmem:[%s498_s1] sm:$0xff]  }
   0xa   :  { %v394_v23 = vld [vmem:[%s499_s0] ss:$12 sps:$4 sm:$0xff]  }
   0xb   :  { %338 = vmatpush3.bf16.msra.mxu0 %v379_v6 }
   0xc   :  { %339 = vmatprep.subr.bf16.mxu0 %v380_v7  ;;  %365 = vmatpush3.bf16.msra.mxu1 %v390_v14 }
   0xd   :  { %366 = vmatprep.subr.bf16.mxu1 %v398_v1 }
   0xf   :  { %340 = vmatpush3.bf16.msra.mxu0 %v381_v9 }
  0x10   :  { %341 = vmatprep.subr.bf16.mxu0 %v382_v10  ;;  %367 = vmatpush3.bf16.msra.mxu1 %v393_v17 }
  0x13   :  { %342 = vmatpush3.bf16.msra.mxu0 %v383_v12  ;;  %369 = vmatmul.mubr.msk.bf16.vlgmr.msra.gmra.mxu1 %vm201_vm1, %v397_v20 }
  0x14   :  { %343 = vmatprep.subr.bf16.mxu0 %v385_v13 }
  0x17   :  { %344 = vmatpush3.bf16.msra.mxu0 %v386_v15 }
  0x18   :  { %345 = vmatprep.subr.bf16.mxu0 %v388_v16 }
  0x1b   :  { %346 = vmatpush3.bf16.msra.mxu0 %v389_v19 }
  0x1c   :  { %347 = vmatprep.subr.bf16.mxu0 %v391_v21 }
  0x1f   :  { %348 = vmatpush3.bf16.msra.mxu0 %v392_v22 }
  0x22   :  { %238 = vmatmul.mubr.bf16.vlgmr.msra.gmra.mxu0 %v394_v23 }
  0xd3   :  { %v280_v24 = vpop.f32.mrf.mxu1 }
  0xd5   :  { %v370_v25 = vpop.f32.mrf.mxu1 }
  0xd7   :  { %v283_v26 = vpop.f32.mrf.mxu1 }
  0xd9   :  { %v371_v27 = vpop.f32.mrf.mxu1 }
  0xe2   :  { %v349_v28 = vpop.f32.mrf.mxu0 }
  0xe4   :  { %v350_v30 = vpop.f32.mrf.mxu0 }
  0xe5   :  { %v351_v31 = vadd.f32 %v350_v30, %v349_v28 }
  0xe6   :  { %v352_v32 = vpop.f32.mrf.mxu0 }
  0xe7   :  { %v240_v33 = vadd.f32 %v351_v31, %v304_v29 }
  0xe8   :  { %v353_v34 = vpop.f32.mrf.mxu0 }
  0xe9   :  { %v281_v35 = vadd.f32 %v280_v24, %v240_v33  ;;  %v354_v36 = vadd.f32 %v353_v34, %v352_v32 }
  0xeb   :  { %v287_v37 = vmax.f32 %v281_v35, 0.0  ;;  %v243_v38 = vadd.f32 %v354_v36, %v304_v29 }
  0xed   :  { %v331_v39 = vpack.c.bf16 %v287_v37, %v287_v37  ;;  %v284_v40 = vadd.f32 %v283_v26, %v243_v38 }
  0xef   :  { %298 = vst.msk [vmem:[%s501_s3] sm:$0xf] %vm297_vm2, %v331_v39  ;;  %v288_v41 = vmax.f32 %v284_v40, 0.0 }
  0xf1   :  { %v332_v42 = vpack.c.bf16 %v288_v41, %v288_v41 }
  0xf3   :  { %299 = vst.msk [vmem:[%s501_s3 + $0x4] sm:$0xf] %vm297_vm2, %v332_v42 }

// kernel: deeplab3d_forward.18
= control target key start
LH: loop header
LB: loop body
LE: loop exit
PB: predicated region body
PF: predicated region fallthrough
CT: control target
= control target key end

     0   :  { %vm115_vm0 = vcmask 1043456   ;;  %vm90_vm1 = vcmask 195584   ;;  %vm296_vm2 = vcmask 519168   ;;  %s557_s1 = inlined_call_operand.vmem [shape: bf16[1,24,64], index: 1, kind: input, shape index: {}]   ;;  %s558_s0 = inlined_call_operand.vmem [shape: bf16[1,128,24], index: 0, kind: input, shape index: {}]   ;;  %s559_s2 = inlined_call_operand.vmem [shape: f32[1,1,64], index: 2, kind: input, shape index: {}]   ;;  %s560_s3 = inlined_call_operand.vmem [shape: bf16[1,128,64], index: 3, kind: output, shape index: {}]  }
   0x1   :  { %v404_v0 = vld [vmem:[%s557_s1 + $0x8] ss:$0 sps:$4 sm:$0xff]   ;;  %v405_v1 = vld [vmem:[%s557_s1] sm:$0xff]   ;;  %v410_v7 = vld [vmem:[%s558_s0 + $0x10] sm:$0xff]  }
   0x2   :  { %402 = vmatprep.subr.msk.bf16.mxu0 %vm115_vm0, %v404_v0  ;;  %403 = vmatprep.subr.msk.bf16.mxu1 %vm115_vm0, %v404_v0  ;;  %v117_v2 = vsel %vm115_vm0, %v404_v0, 0  ;;  %v406_v3 = vld [vmem:[%s558_s0] sm:$0xff]   ;;  %v408_v5 = vld [vmem:[%s558_s0 + $0x8] sm:$0xff]   ;;  %v411_v8 = vld [vmem:[%s558_s0 + $0x30] sm:$0xff]  }
   0x3   :  { %379 = vmatpush3.bf16.msra.mxu0 %v117_v2  ;;  %400 = vmatpush3.bf16.msra.mxu1 %v117_v2  ;;  %v407_v4 = vld [vmem:[%s558_s0 + $0x20] sm:$0xff]   ;;  %v409_v6 = vld [vmem:[%s558_s0 + $0x28] sm:$0xff]   ;;  %v412_v9 = vld [vmem:[%s558_s0 + $0x18] sm:$0xff]  }
   0x4   :  { %380 = vmatprep.subr.bf16.mxu0 %v405_v1  ;;  %399 = vmatprep.subr.bf16.mxu1 %v405_v1  ;;  %v413_v10 = vld [vmem:[%s558_s0 + $0x38] sm:$0xff]   ;;  %v475_v11 = vld [vmem:[%s559_s2] ss:$0 sm:$0xff] }
   0x5   :  { %382 = vmatprep.mubr.msk.bf16.mxu0 %vm90_vm1, %v406_v3  ;;  %390 = vmatprep.mubr.msk.bf16.mxu1 %vm90_vm1, %v407_v4 }
   0x7   :  { %381 = vmatpush3.bf16.msra.mxu0 %v405_v1  ;;  %401 = vmatpush3.bf16.msra.mxu1 %v405_v1 }
   0xa   :  { %383 = vmatmul.mubr.msk.bf16.vlgmr.msra.gmra.mxu0 %vm90_vm1, %v408_v5  ;;  %391 = vmatmul.mubr.msk.bf16.vlgmr.msra.gmra.mxu1 %vm90_vm1, %v409_v6 }
   0xb   :  { %386 = vmatprep.mubr.msk.bf16.mxu0 %vm90_vm1, %v410_v7  ;;  %394 = vmatprep.mubr.msk.bf16.mxu1 %vm90_vm1, %v411_v8 }
  0x12   :  { %387 = vmatmul.mubr.msk.bf16.gmra.mxu0 %vm90_vm1, %v412_v9  ;;  %395 = vmatmul.mubr.msk.bf16.gmra.mxu1 %vm90_vm1, %v413_v10 }
  0xca   :  { %v384_v12 = vpop.f32.mrf.mxu0  ;;  %v392_v13 = vpop.f32.mrf.mxu1 }
  0xcb   :  { %v162_v14 = vadd.f32 %v384_v12, %v475_v11  ;;  %v194_v15 = vadd.f32 %v392_v13, %v475_v11 }
  0xcc   :  { %v153_v16 = vpop.f32.mrf.mxu0  ;;  %v185_v17 = vpop.f32.mrf.mxu1 }
  0xcd   :  { %v218_v18 = vmax.f32 %v162_v14, 0.0  ;;  %v226_v19 = vmax.f32 %v194_v15, 0.0  ;;  %v154_v20 = vadd.f32 %v475_v11, %v153_v16  ;;  %v186_v21 = vadd.f32 %v475_v11, %v185_v17 }
  0xce   :  { %v385_v22 = vpop.f32.mrf.mxu0  ;;  %v393_v23 = vpop.f32.mrf.mxu1 }
  0xcf   :  { %v354_v24 = vpack.c.bf16 %v218_v18, %v218_v18  ;;  %v362_v25 = vpack.c.bf16 %v226_v19, %v226_v19  ;;  %v216_v26 = vmax.f32 %v154_v20, 0.0  ;;  %v224_v27 = vmax.f32 %v186_v21, 0.0 }
  0xd0   :  { %v165_v28 = vadd.f32 %v385_v22, %v475_v11  ;;  %v197_v29 = vadd.f32 %v393_v23, %v475_v11  ;;  %v156_v30 = vpop.f32.mrf.mxu0  ;;  %v188_v31 = vpop.f32.mrf.mxu1 }
  0xd1   :  { %299 = vst.msk [vmem:[%s560_s3 + $0x8] sm:$0xf] %vm296_vm2, %v354_v24  ;;  %307 = vst.msk [vmem:[%s560_s3 + $0x28] sm:$0xf] %vm296_vm2, %v362_v25  ;;  %v352_v32 = vpack.c.bf16 %v216_v26, %v216_v26  ;;  %v360_v33 = vpack.c.bf16 %v224_v27, %v224_v27  ;;  %v157_v34 = vadd.f32 %v475_v11, %v156_v30 }
  0xd2   :  { %v189_v35 = vadd.f32 %v475_v11, %v188_v31  ;;  %v219_v36 = vmax.f32 %v165_v28, 0.0  ;;  %v227_v37 = vmax.f32 %v197_v29, 0.0  ;;  %v388_v38 = vpop.f32.mrf.mxu0  ;;  %v396_v39 = vpop.f32.mrf.mxu1 }
  0xd3   :  { %297 = vst.msk [vmem:[%s560_s3] sm:$0xf] %vm296_vm2, %v352_v32  ;;  %305 = vst.msk [vmem:[%s560_s3 + $0x20] sm:$0xf] %vm296_vm2, %v360_v33  ;;  %v217_v40 = vmax.f32 %v157_v34, 0.0  ;;  %v178_v42 = vadd.f32 %v388_v38, %v475_v11  ;;  %v210_v43 = vadd.f32 %v396_v39, %v475_v11 }
  0xd4   :  { %v225_v41 = vmax.f32 %v189_v35, 0.0  ;;  %v355_v44 = vpack.c.bf16 %v219_v36, %v219_v36  ;;  %v363_v45 = vpack.c.bf16 %v227_v37, %v227_v37  ;;  %v169_v46 = vpop.f32.mrf.mxu0  ;;  %v201_v47 = vpop.f32.mrf.mxu1 }
  0xd5   :  { %v353_v48 = vpack.c.bf16 %v217_v40, %v217_v40  ;;  %v222_v50 = vmax.f32 %v178_v42, 0.0  ;;  %v230_v51 = vmax.f32 %v210_v43, 0.0  ;;  %v170_v52 = vadd.f32 %v475_v11, %v169_v46 }
  0xd6   :  { %v361_v49 = vpack.c.bf16 %v225_v41, %v225_v41  ;;  %300 = vst.msk [vmem:[%s560_s3 + $0xc] sm:$0xf] %vm296_vm2, %v355_v44  ;;  %308 = vst.msk [vmem:[%s560_s3 + $0x2c] sm:$0xf] %vm296_vm2, %v363_v45  ;;  %v202_v53 = vadd.f32 %v475_v11, %v201_v47  ;;  %v389_v54 = vpop.f32.mrf.mxu0  ;;  %v397_v55 = vpop.f32.mrf.mxu1 }
  0xd7   :  { %298 = vst.msk [vmem:[%s560_s3 + $0x4] sm:$0xf] %vm296_vm2, %v353_v48  ;;  %v358_v56 = vpack.c.bf16 %v222_v50, %v222_v50  ;;  %v366_v57 = vpack.c.bf16 %v230_v51, %v230_v51  ;;  %v181_v58 = vadd.f32 %v389_v54, %v475_v11  ;;  %v213_v59 = vadd.f32 %v397_v55, %v475_v11 }
  0xd8   :  { %306 = vst.msk [vmem:[%s560_s3 + $0x24] sm:$0xf] %vm296_vm2, %v361_v49  ;;  %v220_v60 = vmax.f32 %v170_v52, 0.0  ;;  %v228_v61 = vmax.f32 %v202_v53, 0.0  ;;  %v172_v62 = vpop.f32.mrf.mxu0  ;;  %v204_v63 = vpop.f32.mrf.mxu1 }
  0xd9   :  { %303 = vst.msk [vmem:[%s560_s3 + $0x18] sm:$0xf] %vm296_vm2, %v358_v56  ;;  %311 = vst.msk [vmem:[%s560_s3 + $0x38] sm:$0xf] %vm296_vm2, %v366_v57  ;;  %v223_v0 = vmax.f32 %v181_v58, 0.0  ;;  %v231_v1 = vmax.f32 %v213_v59, 0.0  ;;  %v173_v2 = vadd.f32 %v475_v11, %v172_v62  ;;  %v205_v3 = vadd.f32 %v475_v11, %v204_v63 }
  0xda   :  { %v356_v4 = vpack.c.bf16 %v220_v60, %v220_v60  ;;  %v364_v5 = vpack.c.bf16 %v228_v61, %v228_v61 }
  0xdb   :  { %v359_v6 = vpack.c.bf16 %v223_v0, %v223_v0  ;;  %v367_v7 = vpack.c.bf16 %v231_v1, %v231_v1  ;;  %v221_v8 = vmax.f32 %v173_v2, 0.0  ;;  %v229_v9 = vmax.f32 %v205_v3, 0.0 }
  0xdc   :  { %301 = vst.msk [vmem:[%s560_s3 + $0x10] sm:$0xf] %vm296_vm2, %v356_v4  ;;  %309 = vst.msk [vmem:[%s560_s3 + $0x30] sm:$0xf] %vm296_vm2, %v364_v5 }
  0xdd   :  { %304 = vst.msk [vmem:[%s560_s3 + $0x1c] sm:$0xf] %vm296_vm2, %v359_v6  ;;  %312 = vst.msk [vmem:[%s560_s3 + $0x3c] sm:$0xf] %vm296_vm2, %v367_v7  ;;  %v357_v10 = vpack.c.bf16 %v221_v8, %v221_v8  ;;  %v365_v11 = vpack.c.bf16 %v229_v9, %v229_v9 }
  0xdf   :  { %302 = vst.msk [vmem:[%s560_s3 + $0x14] sm:$0xf] %vm296_vm2, %v357_v10  ;;  %310 = vst.msk [vmem:[%s560_s3 + $0x34] sm:$0xf] %vm296_vm2, %v365_v11 }

// kernel: squeeze.22
= control target key start
LH: loop header
LB: loop body
LE: loop exit
PB: predicated region body
PF: predicated region fallthrough
CT: control target
= control target key end

     0   :  { %v1483_v54 = vmov 0.0   ;;  %s1798_s0 = inlined_call_operand.vmem [shape: bf16[1,128,256], index: 0, kind: input, shape index: {}]   ;;  %s1799_s1 = inlined_call_operand.vmem [shape: bf16[2,4,4,4,256], index: 1, kind: output, shape index: {}]  }
   0x1   :  { %v1467_v0 = vld [vmem:[%s1798_s0 + $0x78] sm:$0xff]   ;;  %v1468_v1 = vld [vmem:[%s1798_s0 + $0x70] sm:$0xff]   ;;  %v1469_v2 = vld [vmem:[%s1798_s0 + $0x68] sm:$0xff]  }
   0x2   :  { %v1405_v3 = vunpack.c.l.bf16 %v1467_v0  ;;  %v1406_v4 = vunpack.c.h.bf16 %v1467_v0  ;;  %v1409_v5 = vunpack.c.l.bf16 %v1468_v1  ;;  %v1410_v6 = vunpack.c.h.bf16 %v1468_v1  ;;  %v1470_v7 = vld [vmem:[%s1798_s0 + $0x60] sm:$0xff]   ;;  %v1471_v8 = vld [vmem:[%s1798_s0 + $0x58] sm:$0xff]   ;;  %v1472_v9 = vld [vmem:[%s1798_s0 + $0x50] sm:$0xff]  }
   0x3   :  { %v1413_v10 = vunpack.c.l.bf16 %v1469_v2  ;;  %v1414_v11 = vunpack.c.h.bf16 %v1469_v2  ;;  %v1417_v12 = vunpack.c.l.bf16 %v1470_v7  ;;  %v1418_v13 = vunpack.c.h.bf16 %v1470_v7  ;;  %v1473_v14 = vld [vmem:[%s1798_s0 + $0x48] sm:$0xff]   ;;  %v1474_v15 = vld [vmem:[%s1798_s0 + $0x40] sm:$0xff]   ;;  %v1475_v16 = vld [vmem:[%s1798_s0 + $0x38] sm:$0xff]  }
   0x4   :  { %v1421_v17 = vunpack.c.l.bf16 %v1471_v8  ;;  %v1422_v18 = vunpack.c.h.bf16 %v1471_v8  ;;  %v1425_v19 = vunpack.c.l.bf16 %v1472_v9  ;;  %v1426_v20 = vunpack.c.h.bf16 %v1472_v9  ;;  %v1476_v21 = vld [vmem:[%s1798_s0 + $0x30] sm:$0xff]   ;;  %v1477_v22 = vld [vmem:[%s1798_s0 + $0x28] sm:$0xff]   ;;  %v1478_v23 = vld [vmem:[%s1798_s0 + $0x20] sm:$0xff]   ;;  %683 = vst [vmem:[#allocation0 + $0x1c0] ss:$16 sps:$4 sm:$0xff] %v1409_v5  }
   0x5   :  { %689 = vst [vmem:[#allocation0 + $0x1c8] ss:$16 sps:$4 sm:$0xff] %v1410_v6   ;;  %695 = vst [vmem:[#allocation0 + $0x1e0] ss:$16 sps:$4 sm:$0xff] %v1405_v3   ;;  %v1429_v24 = vunpack.c.l.bf16 %v1473_v14  ;;  %v1430_v25 = vunpack.c.h.bf16 %v1473_v14  ;;  %v1433_v26 = vunpack.c.l.bf16 %v1474_v15  ;;  %v1434_v27 = vunpack.c.h.bf16 %v1474_v15  ;;  %v1479_v28 = vld [vmem:[%s1798_s0 + $0x18] sm:$0xff]   ;;  %v1480_v29 = vld [vmem:[%s1798_s0 + $0x10] sm:$0xff]  }
   0x6   :  { %701 = vst [vmem:[#allocation0 + $0x1e8] ss:$16 sps:$4 sm:$0xff] %v1406_v4   ;;  %659 = vst [vmem:[#allocation0 + $0x180] ss:$16 sps:$4 sm:$0xff] %v1417_v12   ;;  %v1437_v30 = vunpack.c.l.bf16 %v1475_v16  ;;  %v1438_v31 = vunpack.c.h.bf16 %v1475_v16  ;;  %v1441_v32 = vunpack.c.l.bf16 %v1476_v21  ;;  %v1442_v33 = vunpack.c.h.bf16 %v1476_v21  ;;  %v1481_v34 = vld [vmem:[%s1798_s0 + $0x8] sm:$0xff]   ;;  %v1464_v35 = vld [vmem:[%s1798_s0] sm:$0xff]  }
   0x7   :  { %665 = vst [vmem:[#allocation0 + $0x188] ss:$16 sps:$4 sm:$0xff] %v1418_v13   ;;  %671 = vst [vmem:[#allocation0 + $0x1a0] ss:$16 sps:$4 sm:$0xff] %v1413_v10   ;;  %v1445_v36 = vunpack.c.l.bf16 %v1477_v22  ;;  %v1446_v37 = vunpack.c.h.bf16 %v1477_v22  ;;  %v1449_v38 = vunpack.c.l.bf16 %v1478_v23  ;;  %v1450_v39 = vunpack.c.h.bf16 %v1478_v23 }
   0x8   :  { %677 = vst [vmem:[#allocation0 + $0x1a8] ss:$16 sps:$4 sm:$0xff] %v1414_v11   ;;  %635 = vst [vmem:[#allocation0 + $0x140] ss:$16 sps:$4 sm:$0xff] %v1425_v19   ;;  %v1453_v40 = vunpack.c.l.bf16 %v1479_v28  ;;  %v1454_v41 = vunpack.c.h.bf16 %v1479_v28  ;;  %v1457_v42 = vunpack.c.l.bf16 %v1480_v29  ;;  %v1458_v43 = vunpack.c.h.bf16 %v1480_v29 }
   0x9   :  { %641 = vst [vmem:[#allocation0 + $0x148] ss:$16 sps:$4 sm:$0xff] %v1426_v20   ;;  %647 = vst [vmem:[#allocation0 + $0x160] ss:$16 sps:$4 sm:$0xff] %v1421_v17   ;;  %v1461_v44 = vunpack.c.l.bf16 %v1481_v34  ;;  %v1462_v45 = vunpack.c.h.bf16 %v1481_v34  ;;  %v1465_v46 = vunpack.c.l.bf16 %v1464_v35  ;;  %v1466_v47 = vunpack.c.h.bf16 %v1464_v35 }
   0xa   :  { %653 = vst [vmem:[#allocation0 + $0x168] ss:$16 sps:$4 sm:$0xff] %v1422_v18   ;;  %611 = vst [vmem:[#allocation0 + $0x100] ss:$16 sps:$4 sm:$0xff] %v1433_v26  }
   0xb   :  { %617 = vst [vmem:[#allocation0 + $0x108] ss:$16 sps:$4 sm:$0xff] %v1434_v27   ;;  %623 = vst [vmem:[#allocation0 + $0x120] ss:$16 sps:$4 sm:$0xff] %v1429_v24   ;;  %v1154_v48 = vld [vmem:[#allocation0 + $0x1c0] sm:$0xf] }
   0xc   :  { %629 = vst [vmem:[#allocation0 + $0x128] ss:$16 sps:$4 sm:$0xff] %v1430_v25   ;;  %587 = vst [vmem:[#allocation0 + $0xc0] ss:$16 sps:$4 sm:$0xff] %v1441_v32   ;;  %v1162_v49 = vld [vmem:[#allocation0 + $0x1c8] sm:$0xf]  ;;  %v1155_v55 = vpack.c.bf16 %v1483_v54, %v1154_v48 }
   0xd   :  { %593 = vst [vmem:[#allocation0 + $0xc8] ss:$16 sps:$4 sm:$0xff] %v1442_v33   ;;  %599 = vst [vmem:[#allocation0 + $0xe0] ss:$16 sps:$4 sm:$0xff] %v1437_v30   ;;  %v1170_v50 = vld [vmem:[#allocation0 + $0x1d0] sm:$0xf]  ;;  %v1163_v56 = vpack.c.bf16 %v1483_v54, %v1162_v49 }
   0xe   :  { %605 = vst [vmem:[#allocation0 + $0xe8] ss:$16 sps:$4 sm:$0xff] %v1438_v31   ;;  %563 = vst [vmem:[#allocation0 + $0x80] ss:$16 sps:$4 sm:$0xff] %v1449_v38   ;;  %v1090_v51 = vld [vmem:[#allocation0 + $0x180] sm:$0xf]  ;;  %v1171_v57 = vpack.c.bf16 %v1483_v54, %v1170_v50 }
   0xf   :  { %569 = vst [vmem:[#allocation0 + $0x88] ss:$16 sps:$4 sm:$0xff] %v1450_v39   ;;  %575 = vst [vmem:[#allocation0 + $0xa0] ss:$16 sps:$4 sm:$0xff] %v1445_v36   ;;  %v1098_v52 = vld [vmem:[#allocation0 + $0x188] sm:$0xf]  ;;  %v1091_v61 = vpack.c.bf16 %v1483_v54, %v1090_v51 }
  0x10   :  { %581 = vst [vmem:[#allocation0 + $0xa8] ss:$16 sps:$4 sm:$0xff] %v1446_v37   ;;  %539 = vst [vmem:[#allocation0 + $0x40] ss:$16 sps:$4 sm:$0xff] %v1457_v42   ;;  %v1106_v53 = vld [vmem:[#allocation0 + $0x190] sm:$0xf]  ;;  %v1099_v62 = vpack.c.bf16 %v1483_v54, %v1098_v52 }
  0x11   :  { %545 = vst [vmem:[#allocation0 + $0x48] ss:$16 sps:$4 sm:$0xff] %v1458_v43   ;;  %551 = vst [vmem:[#allocation0 + $0x60] ss:$16 sps:$4 sm:$0xff] %v1453_v40   ;;  %v1026_v58 = vld [vmem:[#allocation0 + $0x140] sm:$0xf]  ;;  %v1107_v63 = vpack.c.bf16 %v1483_v54, %v1106_v53 }
  0x12   :  { %557 = vst [vmem:[#allocation0 + $0x68] ss:$16 sps:$4 sm:$0xff] %v1454_v41   ;;  %515 = vst [vmem:[#allocation0] ss:$16 sps:$4 sm:$0xff] %v1465_v46   ;;  %v1034_v59 = vld [vmem:[#allocation0 + $0x148] sm:$0xf]  ;;  %v1027_v3 = vpack.c.bf16 %v1483_v54, %v1026_v58 }
  0x13   :  { %521 = vst [vmem:[#allocation0 + $0x8] ss:$16 sps:$4 sm:$0xff] %v1466_v47   ;;  %527 = vst [vmem:[#allocation0 + $0x20] ss:$16 sps:$4 sm:$0xff] %v1461_v44   ;;  %v1042_v60 = vld [vmem:[#allocation0 + $0x150] sm:$0xf]  ;;  %v1035_v4 = vpack.c.bf16 %v1483_v54, %v1034_v59 }
  0x14   :  { %533 = vst [vmem:[#allocation0 + $0x28] ss:$16 sps:$4 sm:$0xff] %v1462_v45   ;;  %v962_v0 = vld [vmem:[#allocation0 + $0x100] sm:$0xf]  ;;  %v970_v1 = vld [vmem:[#allocation0 + $0x108] sm:$0xf]  ;;  %v1043_v5 = vpack.c.bf16 %v1483_v54, %v1042_v60 }
  0x15   :  { %v978_v2 = vld [vmem:[#allocation0 + $0x110] sm:$0xf]  ;;  %1395 = vst [vmem:[%s1799_s1 + $0x70] sm:$0x3] %v1155_v55  ;;  %1396 = vst [vmem:[%s1799_s1 + $0x72] sm:$0x3] %v1163_v56  ;;  %v963_v9 = vpack.c.bf16 %v1483_v54, %v962_v0  ;;  %v971_v10 = vpack.c.bf16 %v1483_v54, %v970_v1 }
  0x16   :  { %1397 = vst [vmem:[%s1799_s1 + $0x74] sm:$0x3] %v1171_v57  ;;  %v898_v6 = vld [vmem:[#allocation0 + $0xc0] sm:$0xf]  ;;  %v906_v7 = vld [vmem:[#allocation0 + $0xc8] sm:$0xf]  ;;  %v979_v11 = vpack.c.bf16 %v1483_v54, %v978_v2 }
  0x17   :  { %v914_v8 = vld [vmem:[#allocation0 + $0xd0] sm:$0xf]  ;;  %1387 = vst [vmem:[%s1799_s1 + $0x60] sm:$0x3] %v1091_v61  ;;  %1388 = vst [vmem:[%s1799_s1 + $0x62] sm:$0x3] %v1099_v62  ;;  %v899_v15 = vpack.c.bf16 %v1483_v54, %v898_v6  ;;  %v907_v16 = vpack.c.bf16 %v1483_v54, %v906_v7 }
  0x18   :  { %1389 = vst [vmem:[%s1799_s1 + $0x64] sm:$0x3] %v1107_v63  ;;  %v834_v12 = vld [vmem:[#allocation0 + $0x80] sm:$0xf]  ;;  %v842_v13 = vld [vmem:[#allocation0 + $0x88] sm:$0xf]  ;;  %v915_v17 = vpack.c.bf16 %v1483_v54, %v914_v8 }
  0x19   :  { %v850_v14 = vld [vmem:[#allocation0 + $0x90] sm:$0xf]  ;;  %1379 = vst [vmem:[%s1799_s1 + $0x50] sm:$0x3] %v1027_v3  ;;  %1380 = vst [vmem:[%s1799_s1 + $0x52] sm:$0x3] %v1035_v4  ;;  %v835_v21 = vpack.c.bf16 %v1483_v54, %v834_v12  ;;  %v843_v22 = vpack.c.bf16 %v1483_v54, %v842_v13 }
  0x1a   :  { %1381 = vst [vmem:[%s1799_s1 + $0x54] sm:$0x3] %v1043_v5  ;;  %v770_v18 = vld [vmem:[#allocation0 + $0x40] sm:$0xf]  ;;  %v778_v19 = vld [vmem:[#allocation0 + $0x48] sm:$0xf]  ;;  %v851_v23 = vpack.c.bf16 %v1483_v54, %v850_v14 }
  0x1b   :  { %v786_v20 = vld [vmem:[#allocation0 + $0x50] sm:$0xf]  ;;  %1371 = vst [vmem:[%s1799_s1 + $0x40] sm:$0x3] %v963_v9  ;;  %1372 = vst [vmem:[%s1799_s1 + $0x42] sm:$0x3] %v971_v10  ;;  %v771_v27 = vpack.c.bf16 %v1483_v54, %v770_v18  ;;  %v779_v28 = vpack.c.bf16 %v1483_v54, %v778_v19 }
  0x1c   :  { %1373 = vst [vmem:[%s1799_s1 + $0x44] sm:$0x3] %v979_v11  ;;  %v709_v24 = vld [vmem:[#allocation0] sm:$0xf]  ;;  %v715_v25 = vld [vmem:[#allocation0 + $0x8] sm:$0xf]  ;;  %v787_v29 = vpack.c.bf16 %v1483_v54, %v786_v20 }
  0x1d   :  { %v722_v26 = vld [vmem:[#allocation0 + $0x10] sm:$0xf]  ;;  %1363 = vst [vmem:[%s1799_s1 + $0x30] sm:$0x3] %v899_v15  ;;  %1364 = vst [vmem:[%s1799_s1 + $0x32] sm:$0x3] %v907_v16  ;;  %v710_v30 = vpack.c.bf16 %v1483_v54, %v709_v24  ;;  %v716_v31 = vpack.c.bf16 %v1483_v54, %v715_v25 }
  0x1e   :  { %1365 = vst [vmem:[%s1799_s1 + $0x34] sm:$0x3] %v915_v17  ;;  %v723_v32 = vpack.c.bf16 %v1483_v54, %v722_v26  ;;  %v730_v33 = vld [vmem:[#allocation0 + $0x18] sm:$0xf]  ;;  %v738_v34 = vld [vmem:[#allocation0 + $0x20] sm:$0xf] }
  0x1f   :  { %v746_v35 = vld [vmem:[#allocation0 + $0x28] sm:$0xf]  ;;  %1355 = vst [vmem:[%s1799_s1 + $0x20] sm:$0x3] %v835_v21  ;;  %1356 = vst [vmem:[%s1799_s1 + $0x22] sm:$0x3] %v843_v22  ;;  %v731_v36 = vpack.c.bf16 %v1483_v54, %v730_v33  ;;  %v739_v37 = vpack.c.bf16 %v1483_v54, %v738_v34 }
  0x20   :  { %1357 = vst [vmem:[%s1799_s1 + $0x24] sm:$0x3] %v851_v23  ;;  %v747_v38 = vpack.c.bf16 %v1483_v54, %v746_v35  ;;  %v754_v39 = vld [vmem:[#allocation0 + $0x30] sm:$0xf]  ;;  %v762_v40 = vld [vmem:[#allocation0 + $0x38] sm:$0xf] }
  0x21   :  { %1347 = vst [vmem:[%s1799_s1 + $0x10] sm:$0x3] %v771_v27  ;;  %1348 = vst [vmem:[%s1799_s1 + $0x12] sm:$0x3] %v779_v28  ;;  %v794_v41 = vld [vmem:[#allocation0 + $0x58] sm:$0xf]  ;;  %v755_v42 = vpack.c.bf16 %v1483_v54, %v754_v39  ;;  %v763_v43 = vpack.c.bf16 %v1483_v54, %v762_v40 }
  0x22   :  { %1349 = vst [vmem:[%s1799_s1 + $0x14] sm:$0x3] %v787_v29  ;;  %713 = vst [vmem:[%s1799_s1] sm:$0x3] %v710_v30  ;;  %v795_v44 = vpack.c.bf16 %v1483_v54, %v794_v41  ;;  %v802_v45 = vld [vmem:[#allocation0 + $0x60] sm:$0xf] }
  0x23   :  { %1340 = vst [vmem:[%s1799_s1 + $0x2] sm:$0x3] %v716_v31  ;;  %1341 = vst [vmem:[%s1799_s1 + $0x4] sm:$0x3] %v723_v32  ;;  %v810_v46 = vld [vmem:[#allocation0 + $0x68] sm:$0xf]  ;;  %v803_v48 = vpack.c.bf16 %v1483_v54, %v802_v45 }
  0x24   :  { %v818_v47 = vld [vmem:[#allocation0 + $0x70] sm:$0xf]  ;;  %1342 = vst [vmem:[%s1799_s1 + $0x6] sm:$0x3] %v731_v36  ;;  %1343 = vst [vmem:[%s1799_s1 + $0x8] sm:$0x3] %v739_v37  ;;  %v811_v49 = vpack.c.bf16 %v1483_v54, %v810_v46 }
  0x25   :  { %1344 = vst [vmem:[%s1799_s1 + $0xa] sm:$0x3] %v747_v38  ;;  %v819_v50 = vpack.c.bf16 %v1483_v54, %v818_v47  ;;  %v826_v51 = vld [vmem:[#allocation0 + $0x78] sm:$0xf]  ;;  %v866_v53 = vld [vmem:[#allocation0 + $0xa0] sm:$0xf] }
  0x26   :  { %v858_v52 = vld [vmem:[#allocation0 + $0x98] sm:$0xf]  ;;  %1345 = vst [vmem:[%s1799_s1 + $0xc] sm:$0x3] %v755_v42  ;;  %1346 = vst [vmem:[%s1799_s1 + $0xe] sm:$0x3] %v763_v43  ;;  %v827_v55 = vpack.c.bf16 %v1483_v54, %v826_v51  ;;  %v867_v57 = vpack.c.bf16 %v1483_v54, %v866_v53 }
  0x27   :  { %1350 = vst [vmem:[%s1799_s1 + $0x16] sm:$0x3] %v795_v44  ;;  %v859_v56 = vpack.c.bf16 %v1483_v54, %v858_v52  ;;  %v874_v58 = vld [vmem:[#allocation0 + $0xa8] sm:$0xf]  ;;  %v882_v59 = vld [vmem:[#allocation0 + $0xb0] sm:$0xf] }
  0x28   :  { %v890_v60 = vld [vmem:[#allocation0 + $0xb8] sm:$0xf]  ;;  %1351 = vst [vmem:[%s1799_s1 + $0x18] sm:$0x3] %v803_v48  ;;  %1352 = vst [vmem:[%s1799_s1 + $0x1a] sm:$0x3] %v811_v49  ;;  %v875_v61 = vpack.c.bf16 %v1483_v54, %v874_v58  ;;  %v883_v62 = vpack.c.bf16 %v1483_v54, %v882_v59 }
  0x29   :  { %1353 = vst [vmem:[%s1799_s1 + $0x1c] sm:$0x3] %v819_v50  ;;  %v891_v63 = vpack.c.bf16 %v1483_v54, %v890_v60  ;;  %v922_v0 = vld [vmem:[#allocation0 + $0xd8] sm:$0xf]  ;;  %v930_v1 = vld [vmem:[#allocation0 + $0xe0] sm:$0xf] }
  0x2a   :  { %v938_v2 = vld [vmem:[#allocation0 + $0xe8] sm:$0xf]  ;;  %1354 = vst [vmem:[%s1799_s1 + $0x1e] sm:$0x3] %v827_v55  ;;  %1358 = vst [vmem:[%s1799_s1 + $0x26] sm:$0x3] %v859_v56  ;;  %v923_v3 = vpack.c.bf16 %v1483_v54, %v922_v0  ;;  %v931_v4 = vpack.c.bf16 %v1483_v54, %v930_v1 }
  0x2b   :  { %1359 = vst [vmem:[%s1799_s1 + $0x28] sm:$0x3] %v867_v57  ;;  %v939_v5 = vpack.c.bf16 %v1483_v54, %v938_v2  ;;  %v946_v6 = vld [vmem:[#allocation0 + $0xf0] sm:$0xf]  ;;  %v954_v7 = vld [vmem:[#allocation0 + $0xf8] sm:$0xf] }
  0x2c   :  { %v986_v8 = vld [vmem:[#allocation0 + $0x118] sm:$0xf]  ;;  %1360 = vst [vmem:[%s1799_s1 + $0x2a] sm:$0x3] %v875_v61  ;;  %1361 = vst [vmem:[%s1799_s1 + $0x2c] sm:$0x3] %v883_v62  ;;  %v947_v9 = vpack.c.bf16 %v1483_v54, %v946_v6  ;;  %v955_v10 = vpack.c.bf16 %v1483_v54, %v954_v7 }
  0x2d   :  { %1362 = vst [vmem:[%s1799_s1 + $0x2e] sm:$0x3] %v891_v63  ;;  %v987_v11 = vpack.c.bf16 %v1483_v54, %v986_v8  ;;  %v994_v12 = vld [vmem:[#allocation0 + $0x120] sm:$0xf]  ;;  %v1002_v13 = vld [vmem:[#allocation0 + $0x128] sm:$0xf] }
  0x2e   :  { %v1010_v14 = vld [vmem:[#allocation0 + $0x130] sm:$0xf]  ;;  %1366 = vst [vmem:[%s1799_s1 + $0x36] sm:$0x3] %v923_v3  ;;  %1367 = vst [vmem:[%s1799_s1 + $0x38] sm:$0x3] %v931_v4  ;;  %v995_v15 = vpack.c.bf16 %v1483_v54, %v994_v12  ;;  %v1003_v16 = vpack.c.bf16 %v1483_v54, %v1002_v13 }
  0x2f   :  { %1368 = vst [vmem:[%s1799_s1 + $0x3a] sm:$0x3] %v939_v5  ;;  %v1011_v17 = vpack.c.bf16 %v1483_v54, %v1010_v14  ;;  %v1018_v18 = vld [vmem:[#allocation0 + $0x138] sm:$0xf]  ;;  %v1058_v20 = vld [vmem:[#allocation0 + $0x160] sm:$0xf] }
  0x30   :  { %v1050_v19 = vld [vmem:[#allocation0 + $0x158] sm:$0xf]  ;;  %1369 = vst [vmem:[%s1799_s1 + $0x3c] sm:$0x3] %v947_v9  ;;  %1370 = vst [vmem:[%s1799_s1 + $0x3e] sm:$0x3] %v955_v10  ;;  %v1019_v21 = vpack.c.bf16 %v1483_v54, %v1018_v18  ;;  %v1059_v23 = vpack.c.bf16 %v1483_v54, %v1058_v20 }
  0x31   :  { %1374 = vst [vmem:[%s1799_s1 + $0x46] sm:$0x3] %v987_v11  ;;  %v1051_v22 = vpack.c.bf16 %v1483_v54, %v1050_v19  ;;  %v1066_v24 = vld [vmem:[#allocation0 + $0x168] sm:$0xf]  ;;  %v1074_v25 = vld [vmem:[#allocation0 + $0x170] sm:$0xf] }
  0x32   :  { %v1082_v26 = vld [vmem:[#allocation0 + $0x178] sm:$0xf]  ;;  %1375 = vst [vmem:[%s1799_s1 + $0x48] sm:$0x3] %v995_v15  ;;  %1376 = vst [vmem:[%s1799_s1 + $0x4a] sm:$0x3] %v1003_v16  ;;  %v1067_v27 = vpack.c.bf16 %v1483_v54, %v1066_v24  ;;  %v1075_v28 = vpack.c.bf16 %v1483_v54, %v1074_v25 }
  0x33   :  { %1377 = vst [vmem:[%s1799_s1 + $0x4c] sm:$0x3] %v1011_v17  ;;  %v1083_v29 = vpack.c.bf16 %v1483_v54, %v1082_v26  ;;  %v1114_v30 = vld [vmem:[#allocation0 + $0x198] sm:$0xf]  ;;  %v1122_v31 = vld [vmem:[#allocation0 + $0x1a0] sm:$0xf] }
  0x34   :  { %v1130_v32 = vld [vmem:[#allocation0 + $0x1a8] sm:$0xf]  ;;  %1378 = vst [vmem:[%s1799_s1 + $0x4e] sm:$0x3] %v1019_v21  ;;  %1382 = vst [vmem:[%s1799_s1 + $0x56] sm:$0x3] %v1051_v22  ;;  %v1115_v33 = vpack.c.bf16 %v1483_v54, %v1114_v30  ;;  %v1123_v34 = vpack.c.bf16 %v1483_v54, %v1122_v31 }
  0x35   :  { %1383 = vst [vmem:[%s1799_s1 + $0x58] sm:$0x3] %v1059_v23  ;;  %v1131_v35 = vpack.c.bf16 %v1483_v54, %v1130_v32  ;;  %v1138_v36 = vld [vmem:[#allocation0 + $0x1b0] sm:$0xf]  ;;  %v1146_v37 = vld [vmem:[#allocation0 + $0x1b8] sm:$0xf] }
  0x36   :  { %v1178_v38 = vld [vmem:[#allocation0 + $0x1d8] sm:$0xf]  ;;  %1384 = vst [vmem:[%s1799_s1 + $0x5a] sm:$0x3] %v1067_v27  ;;  %1385 = vst [vmem:[%s1799_s1 + $0x5c] sm:$0x3] %v1075_v28  ;;  %v1139_v39 = vpack.c.bf16 %v1483_v54, %v1138_v36  ;;  %v1147_v40 = vpack.c.bf16 %v1483_v54, %v1146_v37 }
  0x37   :  { %1386 = vst [vmem:[%s1799_s1 + $0x5e] sm:$0x3] %v1083_v29  ;;  %v1179_v41 = vpack.c.bf16 %v1483_v54, %v1178_v38  ;;  %v1186_v42 = vld [vmem:[#allocation0 + $0x1e0] sm:$0xf]  ;;  %v1194_v43 = vld [vmem:[#allocation0 + $0x1e8] sm:$0xf] }
  0x38   :  { %v1202_v44 = vld [vmem:[#allocation0 + $0x1f0] sm:$0xf]  ;;  %1390 = vst [vmem:[%s1799_s1 + $0x66] sm:$0x3] %v1115_v33  ;;  %1391 = vst [vmem:[%s1799_s1 + $0x68] sm:$0x3] %v1123_v34  ;;  %v1187_v45 = vpack.c.bf16 %v1483_v54, %v1186_v42  ;;  %v1195_v46 = vpack.c.bf16 %v1483_v54, %v1194_v43 }
  0x39   :  { %1392 = vst [vmem:[%s1799_s1 + $0x6a] sm:$0x3] %v1131_v35  ;;  %v1203_v47 = vpack.c.bf16 %v1483_v54, %v1202_v44  ;;  %v1210_v48 = vld [vmem:[#allocation0 + $0x1f8] sm:$0xf]  ;;  %1393 = vst [vmem:[%s1799_s1 + $0x6c] sm:$0x3] %v1139_v39 }
  0x3a   :  { %1394 = vst [vmem:[%s1799_s1 + $0x6e] sm:$0x3] %v1147_v40  ;;  %1398 = vst [vmem:[%s1799_s1 + $0x76] sm:$0x3] %v1179_v41  ;;  %v1211_v54 = vpack.c.bf16 %v1483_v54, %v1210_v48 }
  0x3b   :  { %1399 = vst [vmem:[%s1799_s1 + $0x78] sm:$0x3] %v1187_v45  ;;  %1400 = vst [vmem:[%s1799_s1 + $0x7a] sm:$0x3] %v1195_v46 }
  0x3c   :  { %1401 = vst [vmem:[%s1799_s1 + $0x7c] sm:$0x3] %v1203_v47  ;;  %1402 = vst [vmem:[%s1799_s1 + $0x7e] sm:$0x3] %v1211_v54 }

// kernel: deeplab3d_forward.19
= control target key start
LH: loop header
LB: loop body
LE: loop exit
PB: predicated region body
PF: predicated region fallthrough
CT: control target
= control target key end

     0   :  { %s10036_s1 = inlined_call_operand.vmem [shape: bf16[1,3456,256], index: 1, kind: input, shape index: {}]   ;;  %s10037_s0 = inlined_call_operand.vmem [shape: bf16[1,128,3456], index: 0, kind: input, shape index: {}]   ;;  %s10038_s2 = inlined_call_operand.vmem [shape: f32[1,1,256], index: 2, kind: input, shape index: {}]   ;;  %s10039_s3 = inlined_call_operand.vmem [shape: bf16[1,128,256], index: 3, kind: output, shape index: {}]  }
   0x1   :  { %v6342_v0 = vld [vmem:[%s10036_s1 + $0x74] ss:$8 sps:$4 sm:$0xff]   ;;  %v6346_v2 = vld [vmem:[%s10036_s1 + $0x70] ss:$8 sps:$4 sm:$0xff]   ;;  %v6348_v4 = vld [vmem:[%s10036_s1 + $0x64] ss:$8 sps:$4 sm:$0xff]  }
   0x2   :  { %v6344_v1 = vld [vmem:[%s10036_s1 + $0x174] ss:$8 sps:$4 sm:$0xff]   ;;  %3931 = vmatprep.subr.bf16.mxu0 %v6342_v0  ;;  %v6347_v3 = vld [vmem:[%s10036_s1 + $0x170] ss:$8 sps:$4 sm:$0xff]   ;;  %v6350_v5 = vld [vmem:[%s10036_s1 + $0x164] ss:$8 sps:$4 sm:$0xff]  }
   0x3   :  { %4044 = vmatprep.subr.bf16.mxu1 %v6344_v1  ;;  %3932 = vmatpush1.bf16.msra.mxu0 %v6346_v2  ;;  %v6352_v6 = vld [vmem:[%s10036_s1 + $0x60] ss:$8 sps:$4 sm:$0xff]   ;;  %v6354_v8 = vld [vmem:[%s10036_s1 + $0x54] ss:$8 sps:$4 sm:$0xff]   ;;  %v6358_v10 = vld [vmem:[%s10036_s1 + $0x50] ss:$8 sps:$4 sm:$0xff]  }
   0x4   :  { %4045 = vmatpush1.bf16.msra.mxu1 %v6347_v3  ;;  %3933 = vmatprep.subr.bf16.mxu0 %v6348_v4  ;;  %v6353_v7 = vld [vmem:[%s10036_s1 + $0x160] ss:$8 sps:$4 sm:$0xff]   ;;  %v6356_v9 = vld [vmem:[%s10036_s1 + $0x154] ss:$8 sps:$4 sm:$0xff]   ;;  %v6359_v11 = vld [vmem:[%s10036_s1 + $0x150] ss:$8 sps:$4 sm:$0xff]  }
   0x5   :  { %4046 = vmatprep.subr.bf16.mxu1 %v6350_v5  ;;  %v6360_v12 = vld [vmem:[%s10036_s1 + $0x44] ss:$8 sps:$4 sm:$0xff]   ;;  %v6364_v14 = vld [vmem:[%s10036_s1 + $0x40] ss:$8 sps:$4 sm:$0xff]   ;;  %v6366_v16 = vld [vmem:[%s10036_s1 + $0x34] ss:$8 sps:$4 sm:$0xff]  }
   0x6   :  { %v6362_v13 = vld [vmem:[%s10036_s1 + $0x144] ss:$8 sps:$4 sm:$0xff]   ;;  %v6365_v15 = vld [vmem:[%s10036_s1 + $0x140] ss:$8 sps:$4 sm:$0xff]   ;;  %v6368_v17 = vld [vmem:[%s10036_s1 + $0x134] ss:$8 sps:$4 sm:$0xff]  }
   0x7   :  { %3934 = vmatpush1.bf16.msra.mxu0 %v6352_v6  ;;  %v6370_v18 = vld [vmem:[%s10036_s1 + $0x30] ss:$8 sps:$4 sm:$0xff]   ;;  %v6372_v20 = vld [vmem:[%s10036_s1 + $0x24] ss:$8 sps:$4 sm:$0xff]   ;;  %v6376_v22 = vld [vmem:[%s10036_s1 + $0x20] ss:$8 sps:$4 sm:$0xff]  }
   0x8   :  { %4047 = vmatpush1.bf16.msra.mxu1 %v6353_v7  ;;  %3935 = vmatprep.subr.bf16.mxu0 %v6354_v8  ;;  %v6371_v19 = vld [vmem:[%s10036_s1 + $0x130] ss:$8 sps:$4 sm:$0xff]   ;;  %v6374_v21 = vld [vmem:[%s10036_s1 + $0x124] ss:$8 sps:$4 sm:$0xff]   ;;  %v6377_v23 = vld [vmem:[%s10036_s1 + $0x120] ss:$8 sps:$4 sm:$0xff]  }
   0x9   :  { %4048 = vmatprep.subr.bf16.mxu1 %v6356_v9  ;;  %v6378_v24 = vld [vmem:[%s10036_s1 + $0x14] ss:$8 sps:$4 sm:$0xff]   ;;  %v6382_v26 = vld [vmem:[%s10036_s1 + $0x10] ss:$8 sps:$4 sm:$0xff]   ;;  %v6384_v28 = vld [vmem:[%s10036_s1 + $0x4] ss:$8 sps:$4 sm:$0xff]  }
   0xa   :  { %v6380_v25 = vld [vmem:[%s10036_s1 + $0x114] ss:$8 sps:$4 sm:$0xff]   ;;  %v6383_v27 = vld [vmem:[%s10036_s1 + $0x110] ss:$8 sps:$4 sm:$0xff]   ;;  %v6386_v29 = vld [vmem:[%s10036_s1 + $0x104] ss:$8 sps:$4 sm:$0xff]  }
   0xb   :  { %3936 = vmatpush1.bf16.msra.mxu0 %v6358_v10  ;;  %v6388_v30 = vld [vmem:[%s10036_s1] ss:$8 sps:$4 sm:$0xff]   ;;  %v6390_v32 = vld [vmem:[%s10036_s1 + $0xf4] ss:$8 sps:$4 sm:$0xff]   ;;  %v6394_v34 = vld [vmem:[%s10036_s1 + $0xf0] ss:$8 sps:$4 sm:$0xff]  }
   0xc   :  { %4049 = vmatpush1.bf16.msra.mxu1 %v6359_v11  ;;  %3937 = vmatprep.subr.bf16.mxu0 %v6360_v12  ;;  %v6389_v31 = vld [vmem:[%s10036_s1 + $0x100] ss:$8 sps:$4 sm:$0xff]   ;;  %v6392_v33 = vld [vmem:[%s10036_s1 + $0x1f4] ss:$8 sps:$4 sm:$0xff]   ;;  %v6395_v35 = vld [vmem:[%s10036_s1 + $0x1f0] ss:$8 sps:$4 sm:$0xff]  }
   0xd   :  { %4050 = vmatprep.subr.bf16.mxu1 %v6362_v13  ;;  %v6396_v36 = vld [vmem:[%s10036_s1 + $0xe4] ss:$8 sps:$4 sm:$0xff]   ;;  %v6400_v38 = vld [vmem:[%s10036_s1 + $0xe0] ss:$8 sps:$4 sm:$0xff]   ;;  %v6402_v40 = vld [vmem:[%s10036_s1 + $0xd4] ss:$8 sps:$4 sm:$0xff]  }
   0xe   :  { %v6398_v37 = vld [vmem:[%s10036_s1 + $0x1e4] ss:$8 sps:$4 sm:$0xff]   ;;  %v6401_v39 = vld [vmem:[%s10036_s1 + $0x1e0] ss:$8 sps:$4 sm:$0xff]   ;;  %v6404_v41 = vld [vmem:[%s10036_s1 + $0x1d4] ss:$8 sps:$4 sm:$0xff]  }
   0xf   :  { %3938 = vmatpush1.bf16.msra.mxu0 %v6364_v14  ;;  %v6406_v42 = vld [vmem:[%s10036_s1 + $0xd0] ss:$8 sps:$4 sm:$0xff]   ;;  %v6408_v44 = vld [vmem:[%s10036_s1 + $0xc4] ss:$8 sps:$4 sm:$0xff]   ;;  %v6412_v46 = vld [vmem:[%s10036_s1 + $0xc0] ss:$8 sps:$4 sm:$0xff]  }
  0x10   :  { %4051 = vmatpush1.bf16.msra.mxu1 %v6365_v15  ;;  %3939 = vmatprep.subr.bf16.mxu0 %v6366_v16  ;;  %v6407_v43 = vld [vmem:[%s10036_s1 + $0x1d0] ss:$8 sps:$4 sm:$0xff]   ;;  %v6410_v45 = vld [vmem:[%s10036_s1 + $0x1c4] ss:$8 sps:$4 sm:$0xff]   ;;  %v6413_v47 = vld [vmem:[%s10036_s1 + $0x1c0] ss:$8 sps:$4 sm:$0xff]  }
  0x11   :  { %4052 = vmatprep.subr.bf16.mxu1 %v6368_v17  ;;  %v6414_v48 = vld [vmem:[%s10036_s1 + $0xb4] ss:$8 sps:$4 sm:$0xff]   ;;  %v6440_v49 = vld [vmem:[%s10037_s0 + $0x4] ss:$108 sps:$4 sm:$0xff]   ;;  %v6443_v51 = vld [vmem:[%s10037_s0 + $0xc] ss:$108 sps:$4 sm:$0xff]  }
  0x12   :  { %v6416_v50 = vld [vmem:[%s10036_s1 + $0x1b4] ss:$8 sps:$4 sm:$0xff]   ;;  %3963 = vmatprep.mubr.bf16.mxu0 %v6440_v49  ;;  %v6418_v52 = vld [vmem:[%s10036_s1 + $0xb0] ss:$8 sps:$4 sm:$0xff]   ;;  %4076 = vmatprep.mubr.bf16.mxu1 %v6443_v51  ;;  %v6420_v54 = vld [vmem:[%s10036_s1 + $0xa4] ss:$8 sps:$4 sm:$0xff]  }
  0x13   :  { %3940 = vmatpush1.bf16.msra.mxu0 %v6370_v18  ;;  %v6419_v53 = vld [vmem:[%s10036_s1 + $0x1b0] ss:$8 sps:$4 sm:$0xff]   ;;  %v6422_v55 = vld [vmem:[%s10036_s1 + $0x1a4] ss:$8 sps:$4 sm:$0xff]   ;;  %v6424_v56 = vld [vmem:[%s10036_s1 + $0xa0] ss:$8 sps:$4 sm:$0xff]  }
  0x14   :  { %4053 = vmatpush1.bf16.msra.mxu1 %v6371_v19  ;;  %3941 = vmatprep.subr.bf16.mxu0 %v6372_v20  ;;  %v6425_v57 = vld [vmem:[%s10036_s1 + $0x1a0] ss:$8 sps:$4 sm:$0xff]   ;;  %v6426_v58 = vld [vmem:[%s10036_s1 + $0x94] ss:$8 sps:$4 sm:$0xff]   ;;  %v6430_v60 = vld [vmem:[%s10036_s1 + $0x90] ss:$8 sps:$4 sm:$0xff]  }
  0x15   :  { %4054 = vmatprep.subr.bf16.mxu1 %v6374_v21  ;;  %v6428_v59 = vld [vmem:[%s10036_s1 + $0x194] ss:$8 sps:$4 sm:$0xff]   ;;  %v6431_v61 = vld [vmem:[%s10036_s1 + $0x190] ss:$8 sps:$4 sm:$0xff]   ;;  %v6432_v62 = vld [vmem:[%s10036_s1 + $0x84] ss:$8 sps:$4 sm:$0xff]  }
  0x16   :  { %v6434_v63 = vld [vmem:[%s10036_s1 + $0x184] ss:$8 sps:$4 sm:$0xff]   ;;  %v6436_v0 = vld [vmem:[%s10036_s1 + $0x80] ss:$8 sps:$4 sm:$0xff]   ;;  %v6446_v2 = vld [vmem:[%s10036_s1 + $0x274] ss:$8 sps:$4 sm:$0xff]  }
  0x17   :  { %3942 = vmatpush1.bf16.msra.mxu0 %v6376_v22  ;;  %v6437_v1 = vld [vmem:[%s10036_s1 + $0x180] ss:$8 sps:$4 sm:$0xff]   ;;  %v6449_v3 = vld [vmem:[%s10036_s1 + $0x374] ss:$8 sps:$4 sm:$0xff]   ;;  %v6444_v6 = vld [vmem:[%s10036_s1 + $0x270] ss:$8 sps:$4 sm:$0xff]  }
  0x18   :  { %4055 = vmatpush1.bf16.msra.mxu1 %v6377_v23  ;;  %3943 = vmatprep.subr.bf16.mxu0 %v6378_v24  ;;  %v6438_v4 = vld [vmem:[%s10037_s0] ss:$108 sps:$4 sm:$0xff]   ;;  %v6441_v5 = vld [vmem:[%s10037_s0 + $0x8] ss:$108 sps:$4 sm:$0xff]   ;;  %v6447_v7 = vld [vmem:[%s10036_s1 + $0x370] ss:$8 sps:$4 sm:$0xff]  }
  0x19   :  { %4056 = vmatprep.subr.bf16.mxu1 %v6380_v25  ;;  %v6452_v8 = vld [vmem:[%s10036_s1 + $0x264] ss:$8 sps:$4 sm:$0xff]   ;;  %v6456_v10 = vld [vmem:[%s10037_s0 + $0xdc] ss:$108 sps:$4 sm:$0xff]   ;;  %v6462_v18 = vld [vmem:[%s10036_s1 + $0x250] ss:$8 sps:$4 sm:$0xff]  }
  0x1a   :  { %v6455_v9 = vld [vmem:[%s10036_s1 + $0x364] ss:$8 sps:$4 sm:$0xff]   ;;  %v6450_v12 = vld [vmem:[%s10036_s1 + $0x260] ss:$8 sps:$4 sm:$0xff]   ;;  %v6464_v14 = vld [vmem:[%s10036_s1 + $0x254] ss:$8 sps:$4 sm:$0xff]  }
  0x1b   :  { %3944 = vmatpush1.bf16.msra.mxu0 %v6382_v26  ;;  %v6458_v11 = vld [vmem:[%s10037_s0 + $0xe4] ss:$108 sps:$4 sm:$0xff]   ;;  %v6453_v13 = vld [vmem:[%s10036_s1 + $0x360] ss:$8 sps:$4 sm:$0xff]   ;;  %v6467_v15 = vld [vmem:[%s10036_s1 + $0x354] ss:$8 sps:$4 sm:$0xff]  }
  0x1c   :  { %4057 = vmatpush1.bf16.msra.mxu1 %v6383_v27  ;;  %3945 = vmatprep.subr.bf16.mxu0 %v6384_v28  ;;  %v6460_v16 = vld [vmem:[%s10037_s0 + $0xd8] ss:$108 sps:$4 sm:$0xff]   ;;  %v6461_v17 = vld [vmem:[%s10037_s0 + $0xe0] ss:$108 sps:$4 sm:$0xff]   ;;  %v6476_v23 = vld [vmem:[%s10037_s0 + $0x1bc] ss:$108 sps:$4 sm:$0xff]  }
  0x1d   :  { %4058 = vmatprep.subr.bf16.mxu1 %v6386_v29  ;;  %v6465_v19 = vld [vmem:[%s10036_s1 + $0x350] ss:$8 sps:$4 sm:$0xff]   ;;  %v6470_v20 = vld [vmem:[%s10036_s1 + $0x244] ss:$8 sps:$4 sm:$0xff]   ;;  %v6474_v22 = vld [vmem:[%s10037_s0 + $0x1b4] ss:$108 sps:$4 sm:$0xff]  }
  0x1e   :  { %v6473_v21 = vld [vmem:[%s10036_s1 + $0x344] ss:$8 sps:$4 sm:$0xff]   ;;  %v6468_v24 = vld [vmem:[%s10036_s1 + $0x240] ss:$8 sps:$4 sm:$0xff]   ;;  %v6482_v26 = vld [vmem:[%s10036_s1 + $0x234] ss:$8 sps:$4 sm:$0xff]  }
  0x1f   :  { %3946 = vmatpush1.bf16.msra.mxu0 %v6388_v30  ;;  %v6471_v25 = vld [vmem:[%s10036_s1 + $0x340] ss:$8 sps:$4 sm:$0xff]   ;;  %v6485_v27 = vld [vmem:[%s10036_s1 + $0x334] ss:$8 sps:$4 sm:$0xff]   ;;  %v6479_v29 = vld [vmem:[%s10037_s0 + $0x1b8] ss:$108 sps:$4 sm:$0xff]  }
  0x20   :  { %4059 = vmatpush1.bf16.msra.mxu1 %v6389_v31  ;;  %3947 = vmatprep.subr.bf16.mxu0 %v6390_v32  ;;  %v6478_v28 = vld [vmem:[%s10037_s0 + $0x1b0] ss:$108 sps:$4 sm:$0xff]   ;;  %v6488_v32 = vld [vmem:[%s10036_s1 + $0x224] ss:$8 sps:$4 sm:$0xff]   ;;  %v6507_v49 = vld [vmem:[%s10036_s1 + $0x300] ss:$8 sps:$4 sm:$0xff]  }
  0x21   :  { %4060 = vmatprep.subr.bf16.mxu1 %v6392_v33  ;;  %v6480_v30 = vld [vmem:[%s10036_s1 + $0x230] ss:$8 sps:$4 sm:$0xff]   ;;  %v6491_v33 = vld [vmem:[%s10036_s1 + $0x324] ss:$8 sps:$4 sm:$0xff]   ;;  %v6521_v51 = vld [vmem:[%s10036_s1 + $0x3f4] ss:$8 sps:$4 sm:$0xff]  }
  0x22   :  { %v6483_v31 = vld [vmem:[%s10036_s1 + $0x330] ss:$8 sps:$4 sm:$0xff]  }
  0x23   :  { %3948 = vmatpush2.bf16.msra.mxu0 %v6394_v34  ;;  %v6492_v34 = vld [vmem:[%s10037_s0 + $0x28c] ss:$108 sps:$4 sm:$0xff]  }
  0x24   :  { %4061 = vmatpush2.bf16.msra.mxu1 %v6395_v35  ;;  %3949 = vmatprep.subr.bf16.mxu0 %v6396_v36  ;;  %v6494_v35 = vld [vmem:[%s10037_s0 + $0x294] ss:$108 sps:$4 sm:$0xff]  }
  0x25   :  { %4062 = vmatprep.subr.bf16.mxu1 %v6398_v37  ;;  %v6486_v36 = vld [vmem:[%s10036_s1 + $0x220] ss:$8 sps:$4 sm:$0xff]  }
  0x26   :  { %v6489_v37 = vld [vmem:[%s10036_s1 + $0x320] ss:$8 sps:$4 sm:$0xff]  }
  0x27   :  { %3950 = vmatpush2.bf16.msra.mxu0 %v6400_v38  ;;  %v6500_v38 = vld [vmem:[%s10036_s1 + $0x214] ss:$8 sps:$4 sm:$0xff]  }
  0x28   :  { %4063 = vmatpush2.bf16.msra.mxu1 %v6401_v39  ;;  %3951 = vmatprep.subr.bf16.mxu0 %v6402_v40  ;;  %v6503_v39 = vld [vmem:[%s10036_s1 + $0x314] ss:$8 sps:$4 sm:$0xff]  }
  0x29   :  { %4064 = vmatprep.subr.bf16.mxu1 %v6404_v41  ;;  %v6496_v40 = vld [vmem:[%s10037_s0 + $0x288] ss:$108 sps:$4 sm:$0xff]   ;;  %v6497_v41 = vld [vmem:[%s10037_s0 + $0x290] ss:$108 sps:$4 sm:$0xff]  }
  0x2b   :  { %3952 = vmatpush2.bf16.msra.mxu0 %v6406_v42  ;;  %v6498_v42 = vld [vmem:[%s10036_s1 + $0x210] ss:$8 sps:$4 sm:$0xff]  }
  0x2c   :  { %4065 = vmatpush2.bf16.msra.mxu1 %v6407_v43  ;;  %3953 = vmatprep.subr.bf16.mxu0 %v6408_v44  ;;  %v6501_v43 = vld [vmem:[%s10036_s1 + $0x310] ss:$8 sps:$4 sm:$0xff]   ;;  %v6506_v44 = vld [vmem:[%s10036_s1 + $0x204] ss:$8 sps:$4 sm:$0xff]  }
  0x2d   :  { %4066 = vmatprep.subr.bf16.mxu1 %v6410_v45  ;;  %v6509_v45 = vld [vmem:[%s10036_s1 + $0x304] ss:$8 sps:$4 sm:$0xff]  }
  0x2f   :  { %3954 = vmatpush2.bf16.msra.mxu0 %v6412_v46  ;;  %v6510_v46 = vld [vmem:[%s10037_s0 + $0x364] ss:$108 sps:$4 sm:$0xff]  }
  0x30   :  { %4067 = vmatpush2.bf16.msra.mxu1 %v6413_v47  ;;  %3955 = vmatprep.subr.bf16.mxu0 %v6414_v48  ;;  %v6512_v47 = vld [vmem:[%s10037_s0 + $0x36c] ss:$108 sps:$4 sm:$0xff]   ;;  %v6504_v48 = vld [vmem:[%s10036_s1 + $0x200] ss:$8 sps:$4 sm:$0xff]  }
  0x31   :  { %4068 = vmatprep.subr.bf16.mxu1 %v6416_v50  ;;  %v6518_v50 = vld [vmem:[%s10036_s1 + $0x2f4] ss:$8 sps:$4 sm:$0xff]  }
  0x33   :  { %3956 = vmatpush2.bf16.msra.mxu0 %v6418_v52  ;;  %v6514_v52 = vld [vmem:[%s10037_s0 + $0x360] ss:$108 sps:$4 sm:$0xff]  }
  0x34   :  { %4069 = vmatpush2.bf16.msra.mxu1 %v6419_v53  ;;  %3957 = vmatprep.subr.bf16.mxu0 %v6420_v54  ;;  %v6515_v53 = vld [vmem:[%s10037_s0 + $0x368] ss:$108 sps:$4 sm:$0xff]   ;;  %v6516_v54 = vld [vmem:[%s10036_s1 + $0x2f0] ss:$8 sps:$4 sm:$0xff]  }
  0x35   :  { %4070 = vmatprep.subr.bf16.mxu1 %v6422_v55  ;;  %v6519_v55 = vld [vmem:[%s10036_s1 + $0x3f0] ss:$8 sps:$4 sm:$0xff]  }
  0x37   :  { %3958 = vmatpush2.bf16.msra.mxu0 %v6424_v56  ;;  %v6524_v56 = vld [vmem:[%s10036_s1 + $0x2e4] ss:$8 sps:$4 sm:$0xff]  }
  0x38   :  { %4071 = vmatpush2.bf16.msra.mxu1 %v6425_v57  ;;  %3959 = vmatprep.subr.bf16.mxu0 %v6426_v58  ;;  %v6527_v57 = vld [vmem:[%s10036_s1 + $0x3e4] ss:$8 sps:$4 sm:$0xff]   ;;  %v6528_v58 = vld [vmem:[%s10037_s0 + $0x43c] ss:$108 sps:$4 sm:$0xff]  }
  0x39   :  { %4072 = vmatprep.subr.bf16.mxu1 %v6428_v59  ;;  %v6530_v59 = vld [vmem:[%s10037_s0 + $0x444] ss:$108 sps:$4 sm:$0xff]  }
  0x3b   :  { %3960 = vmatpush2.bf16.msra.mxu0 %v6430_v60  ;;  %v6522_v60 = vld [vmem:[%s10036_s1 + $0x2e0] ss:$8 sps:$4 sm:$0xff]  }
  0x3c   :  { %4073 = vmatpush2.bf16.msra.mxu1 %v6431_v61  ;;  %3961 = vmatprep.subr.bf16.mxu0 %v6432_v62  ;;  %v6525_v61 = vld [vmem:[%s10036_s1 + $0x3e0] ss:$8 sps:$4 sm:$0xff]   ;;  %v6536_v62 = vld [vmem:[%s10036_s1 + $0x2d4] ss:$8 sps:$4 sm:$0xff]  }
  0x3d   :  { %4074 = vmatprep.subr.bf16.mxu1 %v6434_v63  ;;  %v6539_v63 = vld [vmem:[%s10036_s1 + $0x3d4] ss:$8 sps:$4 sm:$0xff]  }
  0x3f   :  { %3962 = vmatpush2.bf16.msra.mxu0 %v6436_v0  ;;  %v6532_v0 = vld [vmem:[%s10037_s0 + $0x438] ss:$108 sps:$4 sm:$0xff]  }
  0x40   :  { %4075 = vmatpush2.bf16.msra.mxu1 %v6437_v1  ;;  %4157 = vmatprep.subr.bf16.mxu0 %v6446_v2  ;;  %v6533_v1 = vld [vmem:[%s10037_s0 + $0x440] ss:$108 sps:$4 sm:$0xff]   ;;  %v6534_v2 = vld [vmem:[%s10036_s1 + $0x2d0] ss:$8 sps:$4 sm:$0xff]  }
  0x41   :  { %4270 = vmatprep.subr.bf16.mxu1 %v6449_v3  ;;  %v6537_v3 = vld [vmem:[%s10036_s1 + $0x3d0] ss:$8 sps:$4 sm:$0xff]  }
  0x42   :  { %3964 = vmatmul.mubr.bf16.vlgmr.msra.gmra.mxu0 %v6438_v4  ;;  %v6542_v4 = vld [vmem:[%s10036_s1 + $0x2c4] ss:$8 sps:$4 sm:$0xff]  }
  0x43   :  { %4077 = vmatmul.mubr.bf16.vlgmr.msra.gmra.mxu1 %v6441_v5  ;;  %4158 = vmatpush1.bf16.msra.mxu0 %v6444_v6  ;;  %v6545_v5 = vld [vmem:[%s10036_s1 + $0x3c4] ss:$8 sps:$4 sm:$0xff]   ;;  %v6546_v6 = vld [vmem:[%s10037_s0 + $0x514] ss:$108 sps:$4 sm:$0xff]  }
  0x44   :  { %4271 = vmatpush1.bf16.msra.mxu1 %v6447_v7  ;;  %4159 = vmatprep.subr.bf16.mxu0 %v6452_v8  ;;  %v6548_v7 = vld [vmem:[%s10037_s0 + $0x51c] ss:$108 sps:$4 sm:$0xff]  }
  0x45   :  { %4272 = vmatprep.subr.bf16.mxu1 %v6455_v9  ;;  %3973 = vmatprep.mubr.bf16.mxu0 %v6456_v10  ;;  %v6540_v8 = vld [vmem:[%s10036_s1 + $0x2c0] ss:$8 sps:$4 sm:$0xff]   ;;  %v6554_v10 = vld [vmem:[%s10036_s1 + $0x2b4] ss:$8 sps:$4 sm:$0xff]  }
  0x46   :  { %4086 = vmatprep.mubr.bf16.mxu1 %v6458_v11  ;;  %v6543_v9 = vld [vmem:[%s10036_s1 + $0x3c0] ss:$8 sps:$4 sm:$0xff]   ;;  %v6557_v11 = vld [vmem:[%s10036_s1 + $0x3b4] ss:$8 sps:$4 sm:$0xff]  }
  0x47   :  { %4160 = vmatpush1.bf16.msra.mxu0 %v6450_v12  ;;  %v6550_v12 = vld [vmem:[%s10037_s0 + $0x510] ss:$108 sps:$4 sm:$0xff]  }
  0x48   :  { %4273 = vmatpush1.bf16.msra.mxu1 %v6453_v13  ;;  %4161 = vmatprep.subr.bf16.mxu0 %v6464_v14  ;;  %v6551_v13 = vld [vmem:[%s10037_s0 + $0x518] ss:$108 sps:$4 sm:$0xff]  }
  0x49   :  { %4274 = vmatprep.subr.bf16.mxu1 %v6467_v15  ;;  %v6552_v14 = vld [vmem:[%s10036_s1 + $0x2b0] ss:$8 sps:$4 sm:$0xff]  }
  0x4a   :  { %3974 = vmatmul.mubr.bf16.gmra.mxu0 %v6460_v16  ;;  %v6555_v15 = vld [vmem:[%s10036_s1 + $0x3b0] ss:$8 sps:$4 sm:$0xff]   ;;  %v6560_v16 = vld [vmem:[%s10036_s1 + $0x2a4] ss:$8 sps:$4 sm:$0xff]  }
  0x4b   :  { %4087 = vmatmul.mubr.bf16.gmra.mxu1 %v6461_v17  ;;  %4162 = vmatpush1.bf16.msra.mxu0 %v6462_v18  ;;  %v6563_v17 = vld [vmem:[%s10036_s1 + $0x3a4] ss:$8 sps:$4 sm:$0xff]  }
  0x4c   :  { %4275 = vmatpush1.bf16.msra.mxu1 %v6465_v19  ;;  %4163 = vmatprep.subr.bf16.mxu0 %v6470_v20  ;;  %v6564_v18 = vld [vmem:[%s10037_s0 + $0x5ec] ss:$108 sps:$4 sm:$0xff]   ;;  %v6566_v19 = vld [vmem:[%s10037_s0 + $0x5f4] ss:$108 sps:$4 sm:$0xff]  }
  0x4d   :  { %4276 = vmatprep.subr.bf16.mxu1 %v6473_v21  ;;  %3983 = vmatprep.mubr.bf16.mxu0 %v6474_v22  ;;  %v6558_v20 = vld [vmem:[%s10036_s1 + $0x2a0] ss:$8 sps:$4 sm:$0xff]   ;;  %v6572_v22 = vld [vmem:[%s10036_s1 + $0x294] ss:$8 sps:$4 sm:$0xff]  }
  0x4e   :  { %4096 = vmatprep.mubr.bf16.mxu1 %v6476_v23  ;;  %v6561_v21 = vld [vmem:[%s10036_s1 + $0x3a0] ss:$8 sps:$4 sm:$0xff]   ;;  %v6575_v23 = vld [vmem:[%s10036_s1 + $0x394] ss:$8 sps:$4 sm:$0xff]  }
  0x4f   :  { %4164 = vmatpush1.bf16.msra.mxu0 %v6468_v24  ;;  %v6568_v24 = vld [vmem:[%s10037_s0 + $0x5e8] ss:$108 sps:$4 sm:$0xff]  }
  0x50   :  { %4277 = vmatpush1.bf16.msra.mxu1 %v6471_v25  ;;  %4165 = vmatprep.subr.bf16.mxu0 %v6482_v26  ;;  %v6569_v25 = vld [vmem:[%s10037_s0 + $0x5f0] ss:$108 sps:$4 sm:$0xff]  }
  0x51   :  { %4278 = vmatprep.subr.bf16.mxu1 %v6485_v27  ;;  %v6570_v26 = vld [vmem:[%s10036_s1 + $0x290] ss:$8 sps:$4 sm:$0xff]  }
  0x52   :  { %3984 = vmatmul.mubr.bf16.gmra.mxu0 %v6478_v28  ;;  %v6573_v27 = vld [vmem:[%s10036_s1 + $0x390] ss:$8 sps:$4 sm:$0xff]   ;;  %v6578_v28 = vld [vmem:[%s10036_s1 + $0x284] ss:$8 sps:$4 sm:$0xff]  }
  0x53   :  { %4097 = vmatmul.mubr.bf16.gmra.mxu1 %v6479_v29  ;;  %4166 = vmatpush1.bf16.msra.mxu0 %v6480_v30  ;;  %v6581_v29 = vld [vmem:[%s10036_s1 + $0x384] ss:$8 sps:$4 sm:$0xff]   ;;  %v6584_v30 = vld [vmem:[%s10037_s0 + $0x14] ss:$108 sps:$4 sm:$0xff]  }
  0x54   :  { %4279 = vmatpush1.bf16.msra.mxu1 %v6483_v31  ;;  %4167 = vmatprep.subr.bf16.mxu0 %v6488_v32  ;;  %v6587_v31 = vld [vmem:[%s10037_s0 + $0x1c] ss:$108 sps:$4 sm:$0xff]  }
  0x55   :  { %4280 = vmatprep.subr.bf16.mxu1 %v6491_v33  ;;  %3993 = vmatprep.mubr.bf16.mxu0 %v6492_v34  ;;  %v6576_v32 = vld [vmem:[%s10036_s1 + $0x280] ss:$8 sps:$4 sm:$0xff]   ;;  %v6590_v34 = vld [vmem:[%s10036_s1 + $0x474] ss:$8 sps:$4 sm:$0xff]  }
  0x56   :  { %4106 = vmatprep.mubr.bf16.mxu1 %v6494_v35  ;;  %v6579_v33 = vld [vmem:[%s10036_s1 + $0x380] ss:$8 sps:$4 sm:$0xff]   ;;  %v6593_v35 = vld [vmem:[%s10036_s1 + $0x574] ss:$8 sps:$4 sm:$0xff]  }
  0x57   :  { %4168 = vmatpush1.bf16.msra.mxu0 %v6486_v36  ;;  %v6582_v36 = vld [vmem:[%s10037_s0 + $0x10] ss:$108 sps:$4 sm:$0xff]  }
  0x58   :  { %4281 = vmatpush1.bf16.msra.mxu1 %v6489_v37  ;;  %4169 = vmatprep.subr.bf16.mxu0 %v6500_v38  ;;  %v6585_v37 = vld [vmem:[%s10037_s0 + $0x18] ss:$108 sps:$4 sm:$0xff]  }
  0x59   :  { %4282 = vmatprep.subr.bf16.mxu1 %v6503_v39  ;;  %v6588_v38 = vld [vmem:[%s10036_s1 + $0x470] ss:$8 sps:$4 sm:$0xff]  }
  0x5a   :  { %3994 = vmatmul.mubr.bf16.gmra.mxu0 %v6496_v40  ;;  %v6591_v39 = vld [vmem:[%s10036_s1 + $0x570] ss:$8 sps:$4 sm:$0xff]   ;;  %v6596_v40 = vld [vmem:[%s10036_s1 + $0x464] ss:$8 sps:$4 sm:$0xff]  }
  0x5b   :  { %4107 = vmatmul.mubr.bf16.gmra.mxu1 %v6497_v41  ;;  %4170 = vmatpush1.bf16.msra.mxu0 %v6498_v42  ;;  %v6599_v41 = vld [vmem:[%s10036_s1 + $0x564] ss:$8 sps:$4 sm:$0xff]  }
  0x5c   :  { %4283 = vmatpush1.bf16.msra.mxu1 %v6501_v43  ;;  %4171 = vmatprep.subr.bf16.mxu0 %v6506_v44  ;;  %v6600_v42 = vld [vmem:[%s10037_s0 + $0xec] ss:$108 sps:$4 sm:$0xff]   ;;  %v6602_v43 = vld [vmem:[%s10037_s0 + $0xf4] ss:$108 sps:$4 sm:$0xff]  }
  0x5d   :  { %4284 = vmatprep.subr.bf16.mxu1 %v6509_v45  ;;  %4003 = vmatprep.mubr.bf16.mxu0 %v6510_v46  ;;  %v6594_v44 = vld [vmem:[%s10036_s1 + $0x460] ss:$8 sps:$4 sm:$0xff]   ;;  %v6608_v46 = vld [vmem:[%s10036_s1 + $0x454] ss:$8 sps:$4 sm:$0xff]  }
  0x5e   :  { %4116 = vmatprep.mubr.bf16.mxu1 %v6512_v47  ;;  %v6597_v45 = vld [vmem:[%s10036_s1 + $0x560] ss:$8 sps:$4 sm:$0xff]   ;;  %v6611_v47 = vld [vmem:[%s10036_s1 + $0x554] ss:$8 sps:$4 sm:$0xff]  }
  0x5f   :  { %4172 = vmatpush1.bf16.msra.mxu0 %v6504_v48  ;;  %v6604_v48 = vld [vmem:[%s10037_s0 + $0xe8] ss:$108 sps:$4 sm:$0xff]  }
  0x60   :  { %4285 = vmatpush1.bf16.msra.mxu1 %v6507_v49  ;;  %4173 = vmatprep.subr.bf16.mxu0 %v6518_v50  ;;  %v6605_v49 = vld [vmem:[%s10037_s0 + $0xf0] ss:$108 sps:$4 sm:$0xff]  }
  0x61   :  { %4286 = vmatprep.subr.bf16.mxu1 %v6521_v51  ;;  %v6606_v50 = vld [vmem:[%s10036_s1 + $0x450] ss:$8 sps:$4 sm:$0xff]  }
  0x62   :  { %4004 = vmatmul.mubr.bf16.gmra.mxu0 %v6514_v52  ;;  %v6609_v51 = vld [vmem:[%s10036_s1 + $0x550] ss:$8 sps:$4 sm:$0xff]   ;;  %v6614_v52 = vld [vmem:[%s10036_s1 + $0x444] ss:$8 sps:$4 sm:$0xff]  }
  0x63   :  { %4117 = vmatmul.mubr.bf16.gmra.mxu1 %v6515_v53  ;;  %4174 = vmatpush2.bf16.msra.mxu0 %v6516_v54  ;;  %v6617_v53 = vld [vmem:[%s10036_s1 + $0x544] ss:$8 sps:$4 sm:$0xff]  }
  0x64   :  { %4287 = vmatpush2.bf16.msra.mxu1 %v6519_v55  ;;  %4175 = vmatprep.subr.bf16.mxu0 %v6524_v56  ;;  %v6618_v54 = vld [vmem:[%s10037_s0 + $0x1c4] ss:$108 sps:$4 sm:$0xff]   ;;  %v6620_v55 = vld [vmem:[%s10037_s0 + $0x1cc] ss:$108 sps:$4 sm:$0xff]   ;;  %v6612_v56 = vld [vmem:[%s10036_s1 + $0x440] ss:$8 sps:$4 sm:$0xff]  }
  0x65   :  { %4288 = vmatprep.subr.bf16.mxu1 %v6527_v57  ;;  %4013 = vmatprep.mubr.bf16.mxu0 %v6528_v58  ;;  %v6615_v57 = vld [vmem:[%s10036_s1 + $0x540] ss:$8 sps:$4 sm:$0xff]   ;;  %v6626_v58 = vld [vmem:[%s10036_s1 + $0x434] ss:$8 sps:$4 sm:$0xff]  }
  0x66   :  { %4126 = vmatprep.mubr.bf16.mxu1 %v6530_v59  ;;  %v6629_v59 = vld [vmem:[%s10036_s1 + $0x534] ss:$8 sps:$4 sm:$0xff]  }
  0x67   :  { %4176 = vmatpush2.bf16.msra.mxu0 %v6522_v60  ;;  %v6622_v60 = vld [vmem:[%s10037_s0 + $0x1c0] ss:$108 sps:$4 sm:$0xff]  }
  0x68   :  { %4289 = vmatpush2.bf16.msra.mxu1 %v6525_v61  ;;  %4177 = vmatprep.subr.bf16.mxu0 %v6536_v62  ;;  %v6623_v61 = vld [vmem:[%s10037_s0 + $0x1c8] ss:$108 sps:$4 sm:$0xff]   ;;  %v6624_v62 = vld [vmem:[%s10036_s1 + $0x430] ss:$8 sps:$4 sm:$0xff]  }
  0x69   :  { %4290 = vmatprep.subr.bf16.mxu1 %v6539_v63  ;;  %v6627_v63 = vld [vmem:[%s10036_s1 + $0x530] ss:$8 sps:$4 sm:$0xff]  }
  0x6a   :  { %4014 = vmatmul.mubr.bf16.gmra.mxu0 %v6532_v0  ;;  %v6632_v0 = vld [vmem:[%s10036_s1 + $0x424] ss:$8 sps:$4 sm:$0xff]  }
  0x6b   :  { %4127 = vmatmul.mubr.bf16.gmra.mxu1 %v6533_v1  ;;  %4178 = vmatpush2.bf16.msra.mxu0 %v6534_v2  ;;  %v6635_v1 = vld [vmem:[%s10036_s1 + $0x524] ss:$8 sps:$4 sm:$0xff]   ;;  %v6636_v2 = vld [vmem:[%s10037_s0 + $0x29c] ss:$108 sps:$4 sm:$0xff]  }
  0x6c   :  { %4291 = vmatpush2.bf16.msra.mxu1 %v6537_v3  ;;  %4179 = vmatprep.subr.bf16.mxu0 %v6542_v4  ;;  %v6638_v3 = vld [vmem:[%s10037_s0 + $0x2a4] ss:$108 sps:$4 sm:$0xff]   ;;  %v6630_v4 = vld [vmem:[%s10036_s1 + $0x420] ss:$8 sps:$4 sm:$0xff]  }
  0x6d   :  { %4292 = vmatprep.subr.bf16.mxu1 %v6545_v5  ;;  %4023 = vmatprep.mubr.bf16.mxu0 %v6546_v6  ;;  %v6633_v5 = vld [vmem:[%s10036_s1 + $0x520] ss:$8 sps:$4 sm:$0xff]   ;;  %v6644_v6 = vld [vmem:[%s10036_s1 + $0x414] ss:$8 sps:$4 sm:$0xff]  }
  0x6e   :  { %4136 = vmatprep.mubr.bf16.mxu1 %v6548_v7  ;;  %v6647_v7 = vld [vmem:[%s10036_s1 + $0x514] ss:$8 sps:$4 sm:$0xff]  }
  0x6f   :  { %4180 = vmatpush2.bf16.msra.mxu0 %v6540_v8  ;;  %v6640_v8 = vld [vmem:[%s10037_s0 + $0x298] ss:$108 sps:$4 sm:$0xff]  }
  0x70   :  { %4293 = vmatpush2.bf16.msra.mxu1 %v6543_v9  ;;  %4181 = vmatprep.subr.bf16.mxu0 %v6554_v10  ;;  %v6641_v9 = vld [vmem:[%s10037_s0 + $0x2a0] ss:$108 sps:$4 sm:$0xff]   ;;  %v6642_v10 = vld [vmem:[%s10036_s1 + $0x410] ss:$8 sps:$4 sm:$0xff]  }
  0x71   :  { %4294 = vmatprep.subr.bf16.mxu1 %v6557_v11  ;;  %v6645_v11 = vld [vmem:[%s10036_s1 + $0x510] ss:$8 sps:$4 sm:$0xff]  }
  0x72   :  { %4024 = vmatmul.mubr.bf16.gmra.mxu0 %v6550_v12  ;;  %v6650_v12 = vld [vmem:[%s10036_s1 + $0x404] ss:$8 sps:$4 sm:$0xff]  }
  0x73   :  { %4137 = vmatmul.mubr.bf16.gmra.mxu1 %v6551_v13  ;;  %4182 = vmatpush2.bf16.msra.mxu0 %v6552_v14  ;;  %v6653_v13 = vld [vmem:[%s10036_s1 + $0x504] ss:$8 sps:$4 sm:$0xff]   ;;  %v6654_v14 = vld [vmem:[%s10037_s0 + $0x374] ss:$108 sps:$4 sm:$0xff]  }
  0x74   :  { %4295 = vmatpush2.bf16.msra.mxu1 %v6555_v15  ;;  %4183 = vmatprep.subr.bf16.mxu0 %v6560_v16  ;;  %v6656_v15 = vld [vmem:[%s10037_s0 + $0x37c] ss:$108 sps:$4 sm:$0xff]  }
  0x75   :  { %4296 = vmatprep.subr.bf16.mxu1 %v6563_v17  ;;  %4033 = vmatprep.mubr.bf16.mxu0 %v6564_v18  ;;  %v6648_v16 = vld [vmem:[%s10036_s1 + $0x400] ss:$8 sps:$4 sm:$0xff]   ;;  %v6662_v18 = vld [vmem:[%s10036_s1 + $0x4f4] ss:$8 sps:$4 sm:$0xff]  }
  0x76   :  { %4146 = vmatprep.mubr.bf16.mxu1 %v6566_v19  ;;  %v6651_v17 = vld [vmem:[%s10036_s1 + $0x500] ss:$8 sps:$4 sm:$0xff]   ;;  %v6665_v19 = vld [vmem:[%s10036_s1 + $0x5f4] ss:$8 sps:$4 sm:$0xff]  }
  0x77   :  { %4184 = vmatpush2.bf16.msra.mxu0 %v6558_v20  ;;  %v6658_v20 = vld [vmem:[%s10037_s0 + $0x370] ss:$108 sps:$4 sm:$0xff]  }
  0x78   :  { %4297 = vmatpush2.bf16.msra.mxu1 %v6561_v21  ;;  %4185 = vmatprep.subr.bf16.mxu0 %v6572_v22  ;;  %v6659_v21 = vld [vmem:[%s10037_s0 + $0x378] ss:$108 sps:$4 sm:$0xff]  }
  0x79   :  { %4298 = vmatprep.subr.bf16.mxu1 %v6575_v23  ;;  %v6660_v22 = vld [vmem:[%s10036_s1 + $0x4f0] ss:$8 sps:$4 sm:$0xff]  }
  0x7a   :  { %4034 = vmatmul.mubr.bf16.gmra.mxu0 %v6568_v24  ;;  %v6663_v23 = vld [vmem:[%s10036_s1 + $0x5f0] ss:$8 sps:$4 sm:$0xff]   ;;  %v6668_v24 = vld [vmem:[%s10036_s1 + $0x4e4] ss:$8 sps:$4 sm:$0xff]  }
  0x7b   :  { %4147 = vmatmul.mubr.bf16.gmra.mxu1 %v6569_v25  ;;  %4186 = vmatpush2.bf16.msra.mxu0 %v6570_v26  ;;  %v6671_v25 = vld [vmem:[%s10036_s1 + $0x5e4] ss:$8 sps:$4 sm:$0xff]  }
  0x7c   :  { %4299 = vmatpush2.bf16.msra.mxu1 %v6573_v27  ;;  %4187 = vmatprep.subr.bf16.mxu0 %v6578_v28  ;;  %v6672_v26 = vld [vmem:[%s10037_s0 + $0x44c] ss:$108 sps:$4 sm:$0xff]   ;;  %v6674_v27 = vld [vmem:[%s10037_s0 + $0x454] ss:$108 sps:$4 sm:$0xff]  }
  0x7d   :  { %4300 = vmatprep.subr.bf16.mxu1 %v6581_v29  ;;  %4189 = vmatprep.mubr.bf16.mxu0 %v6584_v30  ;;  %v6666_v28 = vld [vmem:[%s10036_s1 + $0x4e0] ss:$8 sps:$4 sm:$0xff]   ;;  %v6680_v30 = vld [vmem:[%s10036_s1 + $0x4d4] ss:$8 sps:$4 sm:$0xff]  }
  0x7e   :  { %4302 = vmatprep.mubr.bf16.mxu1 %v6587_v31  ;;  %v6669_v29 = vld [vmem:[%s10036_s1 + $0x5e0] ss:$8 sps:$4 sm:$0xff]   ;;  %v6683_v31 = vld [vmem:[%s10036_s1 + $0x5d4] ss:$8 sps:$4 sm:$0xff]  }
  0x7f   :  { %4188 = vmatpush2.bf16.msra.mxu0 %v6576_v32  ;;  %v6676_v32 = vld [vmem:[%s10037_s0 + $0x448] ss:$108 sps:$4 sm:$0xff]  }
  0x80   :  { %4301 = vmatpush2.bf16.msra.mxu1 %v6579_v33  ;;  %4383 = vmatprep.subr.bf16.mxu0 %v6590_v34  ;;  %v6677_v33 = vld [vmem:[%s10037_s0 + $0x450] ss:$108 sps:$4 sm:$0xff]  }
  0x81   :  { %4496 = vmatprep.subr.bf16.mxu1 %v6593_v35  ;;  %v6678_v34 = vld [vmem:[%s10036_s1 + $0x4d0] ss:$8 sps:$4 sm:$0xff]  }
  0x82   :  { %4190 = vmatmul.mubr.bf16.vlgmr.msra.gmra.mxu0 %v6582_v36  ;;  %v6681_v35 = vld [vmem:[%s10036_s1 + $0x5d0] ss:$8 sps:$4 sm:$0xff]   ;;  %v6686_v36 = vld [vmem:[%s10036_s1 + $0x4c4] ss:$8 sps:$4 sm:$0xff]  }
  0x83   :  { %4303 = vmatmul.mubr.bf16.vlgmr.msra.gmra.mxu1 %v6585_v37  ;;  %4384 = vmatpush1.bf16.msra.mxu0 %v6588_v38  ;;  %v6689_v37 = vld [vmem:[%s10036_s1 + $0x5c4] ss:$8 sps:$4 sm:$0xff]  }
  0x84   :  { %4497 = vmatpush1.bf16.msra.mxu1 %v6591_v39  ;;  %4385 = vmatprep.subr.bf16.mxu0 %v6596_v40  ;;  %v6690_v38 = vld [vmem:[%s10037_s0 + $0x524] ss:$108 sps:$4 sm:$0xff]   ;;  %v6692_v39 = vld [vmem:[%s10037_s0 + $0x52c] ss:$108 sps:$4 sm:$0xff]   ;;  %v6684_v40 = vld [vmem:[%s10036_s1 + $0x4c0] ss:$8 sps:$4 sm:$0xff]  }
  0x85   :  { %4498 = vmatprep.subr.bf16.mxu1 %v6599_v41  ;;  %4199 = vmatprep.mubr.bf16.mxu0 %v6600_v42  ;;  %v6687_v41 = vld [vmem:[%s10036_s1 + $0x5c0] ss:$8 sps:$4 sm:$0xff]   ;;  %v6698_v42 = vld [vmem:[%s10036_s1 + $0x4b4] ss:$8 sps:$4 sm:$0xff]  }
  0x86   :  { %4312 = vmatprep.mubr.bf16.mxu1 %v6602_v43  ;;  %v6701_v43 = vld [vmem:[%s10036_s1 + $0x5b4] ss:$8 sps:$4 sm:$0xff]  }
  0x87   :  { %4386 = vmatpush1.bf16.msra.mxu0 %v6594_v44  ;;  %v6694_v44 = vld [vmem:[%s10037_s0 + $0x520] ss:$108 sps:$4 sm:$0xff]  }
  0x88   :  { %4499 = vmatpush1.bf16.msra.mxu1 %v6597_v45  ;;  %4387 = vmatprep.subr.bf16.mxu0 %v6608_v46  ;;  %v6695_v45 = vld [vmem:[%s10037_s0 + $0x528] ss:$108 sps:$4 sm:$0xff]   ;;  %v6696_v46 = vld [vmem:[%s10036_s1 + $0x4b0] ss:$8 sps:$4 sm:$0xff]  }
  0x89   :  { %4500 = vmatprep.subr.bf16.mxu1 %v6611_v47  ;;  %v6699_v47 = vld [vmem:[%s10036_s1 + $0x5b0] ss:$8 sps:$4 sm:$0xff]  }
  0x8a   :  { %4200 = vmatmul.mubr.bf16.gmra.mxu0 %v6604_v48  ;;  %v6704_v48 = vld [vmem:[%s10036_s1 + $0x4a4] ss:$8 sps:$4 sm:$0xff]  }
  0x8b   :  { %4313 = vmatmul.mubr.bf16.gmra.mxu1 %v6605_v49  ;;  %4388 = vmatpush1.bf16.msra.mxu0 %v6606_v50  ;;  %v6707_v49 = vld [vmem:[%s10036_s1 + $0x5a4] ss:$8 sps:$4 sm:$0xff]   ;;  %v6708_v50 = vld [vmem:[%s10037_s0 + $0x5fc] ss:$108 sps:$4 sm:$0xff]  }
  0x8c   :  { %4501 = vmatpush1.bf16.msra.mxu1 %v6609_v51  ;;  %4389 = vmatprep.subr.bf16.mxu0 %v6614_v52  ;;  %v6710_v51 = vld [vmem:[%s10037_s0 + $0x604] ss:$108 sps:$4 sm:$0xff]   ;;  %v6702_v52 = vld [vmem:[%s10036_s1 + $0x4a0] ss:$8 sps:$4 sm:$0xff]  }
  0x8d   :  { %4502 = vmatprep.subr.bf16.mxu1 %v6617_v53  ;;  %4209 = vmatprep.mubr.bf16.mxu0 %v6618_v54  ;;  %v6705_v53 = vld [vmem:[%s10036_s1 + $0x5a0] ss:$8 sps:$4 sm:$0xff]   ;;  %v6716_v54 = vld [vmem:[%s10036_s1 + $0x494] ss:$8 sps:$4 sm:$0xff]  }
  0x8e   :  { %4322 = vmatprep.mubr.bf16.mxu1 %v6620_v55  ;;  %v6719_v55 = vld [vmem:[%s10036_s1 + $0x594] ss:$8 sps:$4 sm:$0xff]  }
  0x8f   :  { %4390 = vmatpush1.bf16.msra.mxu0 %v6612_v56  ;;  %v6712_v56 = vld [vmem:[%s10037_s0 + $0x5f8] ss:$108 sps:$4 sm:$0xff]  }
  0x90   :  { %4503 = vmatpush1.bf16.msra.mxu1 %v6615_v57  ;;  %4391 = vmatprep.subr.bf16.mxu0 %v6626_v58  ;;  %v6713_v57 = vld [vmem:[%s10037_s0 + $0x600] ss:$108 sps:$4 sm:$0xff]   ;;  %v6714_v58 = vld [vmem:[%s10036_s1 + $0x490] ss:$8 sps:$4 sm:$0xff]  }
  0x91   :  { %4504 = vmatprep.subr.bf16.mxu1 %v6629_v59  ;;  %v6717_v59 = vld [vmem:[%s10036_s1 + $0x590] ss:$8 sps:$4 sm:$0xff]  }
  0x92   :  { %4210 = vmatmul.mubr.bf16.gmra.mxu0 %v6622_v60  ;;  %v6722_v60 = vld [vmem:[%s10036_s1 + $0x484] ss:$8 sps:$4 sm:$0xff]  }
  0x93   :  { %4323 = vmatmul.mubr.bf16.gmra.mxu1 %v6623_v61  ;;  %4392 = vmatpush1.bf16.msra.mxu0 %v6624_v62  ;;  %v6725_v61 = vld [vmem:[%s10036_s1 + $0x584] ss:$8 sps:$4 sm:$0xff]  }
  0x94   :  { %4505 = vmatpush1.bf16.msra.mxu1 %v6627_v63  ;;  %4393 = vmatprep.subr.bf16.mxu0 %v6632_v0  ;;  %v6728_v62 = vld [vmem:[%s10037_s0 + $0x24] ss:$108 sps:$4 sm:$0xff]   ;;  %v6731_v63 = vld [vmem:[%s10037_s0 + $0x2c] ss:$108 sps:$4 sm:$0xff]   ;;  %v6720_v0 = vld [vmem:[%s10036_s1 + $0x480] ss:$8 sps:$4 sm:$0xff]  }
  0x95   :  { %4506 = vmatprep.subr.bf16.mxu1 %v6635_v1  ;;  %4219 = vmatprep.mubr.bf16.mxu0 %v6636_v2  ;;  %v6723_v1 = vld [vmem:[%s10036_s1 + $0x580] ss:$8 sps:$4 sm:$0xff]   ;;  %v6734_v2 = vld [vmem:[%s10036_s1 + $0x674] ss:$8 sps:$4 sm:$0xff]  }
  0x96   :  { %4332 = vmatprep.mubr.bf16.mxu1 %v6638_v3  ;;  %v6737_v3 = vld [vmem:[%s10036_s1 + $0x774] ss:$8 sps:$4 sm:$0xff]  }
  0x97   :  { %4394 = vmatpush1.bf16.msra.mxu0 %v6630_v4  ;;  %v6726_v4 = vld [vmem:[%s10037_s0 + $0x20] ss:$108 sps:$4 sm:$0xff]  }
  0x98   :  { %4507 = vmatpush1.bf16.msra.mxu1 %v6633_v5  ;;  %4395 = vmatprep.subr.bf16.mxu0 %v6644_v6  ;;  %v6729_v5 = vld [vmem:[%s10037_s0 + $0x28] ss:$108 sps:$4 sm:$0xff]   ;;  %v6732_v6 = vld [vmem:[%s10036_s1 + $0x670] ss:$8 sps:$4 sm:$0xff]  }
  0x99   :  { %4508 = vmatprep.subr.bf16.mxu1 %v6647_v7  ;;  %v6735_v7 = vld [vmem:[%s10036_s1 + $0x770] ss:$8 sps:$4 sm:$0xff]  }
  0x9a   :  { %4220 = vmatmul.mubr.bf16.gmra.mxu0 %v6640_v8  ;;  %v6740_v8 = vld [vmem:[%s10036_s1 + $0x664] ss:$8 sps:$4 sm:$0xff]  }
  0x9b   :  { %4333 = vmatmul.mubr.bf16.gmra.mxu1 %v6641_v9  ;;  %4396 = vmatpush1.bf16.msra.mxu0 %v6642_v10  ;;  %v6743_v9 = vld [vmem:[%s10036_s1 + $0x764] ss:$8 sps:$4 sm:$0xff]   ;;  %v6744_v10 = vld [vmem:[%s10037_s0 + $0xfc] ss:$108 sps:$4 sm:$0xff]  }
  0x9c   :  { %4509 = vmatpush1.bf16.msra.mxu1 %v6645_v11  ;;  %4397 = vmatprep.subr.bf16.mxu0 %v6650_v12  ;;  %v6746_v11 = vld [vmem:[%s10037_s0 + $0x104] ss:$108 sps:$4 sm:$0xff]   ;;  %v6738_v12 = vld [vmem:[%s10036_s1 + $0x660] ss:$8 sps:$4 sm:$0xff]  }
  0x9d   :  { %4510 = vmatprep.subr.bf16.mxu1 %v6653_v13  ;;  %4229 = vmatprep.mubr.bf16.mxu0 %v6654_v14  ;;  %v6741_v13 = vld [vmem:[%s10036_s1 + $0x760] ss:$8 sps:$4 sm:$0xff]   ;;  %v6752_v14 = vld [vmem:[%s10036_s1 + $0x654] ss:$8 sps:$4 sm:$0xff]  }
  0x9e   :  { %4342 = vmatprep.mubr.bf16.mxu1 %v6656_v15  ;;  %v6755_v15 = vld [vmem:[%s10036_s1 + $0x754] ss:$8 sps:$4 sm:$0xff]  }
  0x9f   :  { %4398 = vmatpush1.bf16.msra.mxu0 %v6648_v16  ;;  %v6748_v16 = vld [vmem:[%s10037_s0 + $0xf8] ss:$108 sps:$4 sm:$0xff]  }
  0xa0   :  { %4511 = vmatpush1.bf16.msra.mxu1 %v6651_v17  ;;  %4399 = vmatprep.subr.bf16.mxu0 %v6662_v18  ;;  %v6749_v17 = vld [vmem:[%s10037_s0 + $0x100] ss:$108 sps:$4 sm:$0xff]   ;;  %v6750_v18 = vld [vmem:[%s10036_s1 + $0x650] ss:$8 sps:$4 sm:$0xff]  }
  0xa1   :  { %4512 = vmatprep.subr.bf16.mxu1 %v6665_v19  ;;  %v6753_v19 = vld [vmem:[%s10036_s1 + $0x750] ss:$8 sps:$4 sm:$0xff]  }
  0xa2   :  { %4230 = vmatmul.mubr.bf16.gmra.mxu0 %v6658_v20  ;;  %v6758_v20 = vld [vmem:[%s10036_s1 + $0x644] ss:$8 sps:$4 sm:$0xff]  }
  0xa3   :  { %4343 = vmatmul.mubr.bf16.gmra.mxu1 %v6659_v21  ;;  %4400 = vmatpush2.bf16.msra.mxu0 %v6660_v22  ;;  %v6761_v21 = vld [vmem:[%s10036_s1 + $0x744] ss:$8 sps:$4 sm:$0xff]   ;;  %v6762_v22 = vld [vmem:[%s10037_s0 + $0x1d4] ss:$108 sps:$4 sm:$0xff]  }
  0xa4   :  { %4513 = vmatpush2.bf16.msra.mxu1 %v6663_v23  ;;  %4401 = vmatprep.subr.bf16.mxu0 %v6668_v24  ;;  %v6764_v23 = vld [vmem:[%s10037_s0 + $0x1dc] ss:$108 sps:$4 sm:$0xff]  }
  0xa5   :  { %4514 = vmatprep.subr.bf16.mxu1 %v6671_v25  ;;  %4239 = vmatprep.mubr.bf16.mxu0 %v6672_v26  ;;  %v6756_v24 = vld [vmem:[%s10036_s1 + $0x640] ss:$8 sps:$4 sm:$0xff]   ;;  %v6770_v26 = vld [vmem:[%s10036_s1 + $0x634] ss:$8 sps:$4 sm:$0xff]  }
  0xa6   :  { %4352 = vmatprep.mubr.bf16.mxu1 %v6674_v27  ;;  %v6759_v25 = vld [vmem:[%s10036_s1 + $0x740] ss:$8 sps:$4 sm:$0xff]   ;;  %v6773_v27 = vld [vmem:[%s10036_s1 + $0x734] ss:$8 sps:$4 sm:$0xff]  }
  0xa7   :  { %4402 = vmatpush2.bf16.msra.mxu0 %v6666_v28  ;;  %v6766_v28 = vld [vmem:[%s10037_s0 + $0x1d0] ss:$108 sps:$4 sm:$0xff]  }
  0xa8   :  { %4515 = vmatpush2.bf16.msra.mxu1 %v6669_v29  ;;  %4403 = vmatprep.subr.bf16.mxu0 %v6680_v30  ;;  %v6767_v29 = vld [vmem:[%s10037_s0 + $0x1d8] ss:$108 sps:$4 sm:$0xff]  }
  0xa9   :  { %4516 = vmatprep.subr.bf16.mxu1 %v6683_v31  ;;  %v6768_v30 = vld [vmem:[%s10036_s1 + $0x630] ss:$8 sps:$4 sm:$0xff]  }
  0xaa   :  { %4240 = vmatmul.mubr.bf16.gmra.mxu0 %v6676_v32  ;;  %v6771_v31 = vld [vmem:[%s10036_s1 + $0x730] ss:$8 sps:$4 sm:$0xff]   ;;  %v6776_v32 = vld [vmem:[%s10036_s1 + $0x624] ss:$8 sps:$4 sm:$0xff]  }
  0xab   :  { %4353 = vmatmul.mubr.bf16.gmra.mxu1 %v6677_v33  ;;  %4404 = vmatpush2.bf16.msra.mxu0 %v6678_v34  ;;  %v6779_v33 = vld [vmem:[%s10036_s1 + $0x724] ss:$8 sps:$4 sm:$0xff]  }
  0xac   :  { %4517 = vmatpush2.bf16.msra.mxu1 %v6681_v35  ;;  %4405 = vmatprep.subr.bf16.mxu0 %v6686_v36  ;;  %v6780_v34 = vld [vmem:[%s10037_s0 + $0x2ac] ss:$108 sps:$4 sm:$0xff]   ;;  %v6782_v35 = vld [vmem:[%s10037_s0 + $0x2b4] ss:$108 sps:$4 sm:$0xff]  }
  0xad   :  { %4518 = vmatprep.subr.bf16.mxu1 %v6689_v37  ;;  %4249 = vmatprep.mubr.bf16.mxu0 %v6690_v38  ;;  %v6774_v36 = vld [vmem:[%s10036_s1 + $0x620] ss:$8 sps:$4 sm:$0xff]   ;;  %v6788_v38 = vld [vmem:[%s10036_s1 + $0x614] ss:$8 sps:$4 sm:$0xff]  }
  0xae   :  { %4362 = vmatprep.mubr.bf16.mxu1 %v6692_v39  ;;  %v6777_v37 = vld [vmem:[%s10036_s1 + $0x720] ss:$8 sps:$4 sm:$0xff]   ;;  %v6791_v39 = vld [vmem:[%s10036_s1 + $0x714] ss:$8 sps:$4 sm:$0xff]  }
  0xaf   :  { %4406 = vmatpush2.bf16.msra.mxu0 %v6684_v40  ;;  %v6784_v40 = vld [vmem:[%s10037_s0 + $0x2a8] ss:$108 sps:$4 sm:$0xff]  }
  0xb0   :  { %4519 = vmatpush2.bf16.msra.mxu1 %v6687_v41  ;;  %4407 = vmatprep.subr.bf16.mxu0 %v6698_v42  ;;  %v6785_v41 = vld [vmem:[%s10037_s0 + $0x2b0] ss:$108 sps:$4 sm:$0xff]  }
  0xb1   :  { %4520 = vmatprep.subr.bf16.mxu1 %v6701_v43  ;;  %v6786_v42 = vld [vmem:[%s10036_s1 + $0x610] ss:$8 sps:$4 sm:$0xff]  }
  0xb2   :  { %4250 = vmatmul.mubr.bf16.gmra.mxu0 %v6694_v44  ;;  %v6789_v43 = vld [vmem:[%s10036_s1 + $0x710] ss:$8 sps:$4 sm:$0xff]   ;;  %v6794_v44 = vld [vmem:[%s10036_s1 + $0x604] ss:$8 sps:$4 sm:$0xff]  }
  0xb3   :  { %4363 = vmatmul.mubr.bf16.gmra.mxu1 %v6695_v45  ;;  %4408 = vmatpush2.bf16.msra.mxu0 %v6696_v46  ;;  %v6797_v45 = vld [vmem:[%s10036_s1 + $0x704] ss:$8 sps:$4 sm:$0xff]  }
  0xb4   :  { %4521 = vmatpush2.bf16.msra.mxu1 %v6699_v47  ;;  %4409 = vmatprep.subr.bf16.mxu0 %v6704_v48  ;;  %v6798_v46 = vld [vmem:[%s10037_s0 + $0x384] ss:$108 sps:$4 sm:$0xff]   ;;  %v6800_v47 = vld [vmem:[%s10037_s0 + $0x38c] ss:$108 sps:$4 sm:$0xff]   ;;  %v6792_v48 = vld [vmem:[%s10036_s1 + $0x600] ss:$8 sps:$4 sm:$0xff]  }
  0xb5   :  { %4522 = vmatprep.subr.bf16.mxu1 %v6707_v49  ;;  %4259 = vmatprep.mubr.bf16.mxu0 %v6708_v50  ;;  %v6795_v49 = vld [vmem:[%s10036_s1 + $0x700] ss:$8 sps:$4 sm:$0xff]   ;;  %v6806_v50 = vld [vmem:[%s10036_s1 + $0x6f4] ss:$8 sps:$4 sm:$0xff]  }
  0xb6   :  { %4372 = vmatprep.mubr.bf16.mxu1 %v6710_v51  ;;  %v6809_v51 = vld [vmem:[%s10036_s1 + $0x7f4] ss:$8 sps:$4 sm:$0xff]  }
  0xb7   :  { %4410 = vmatpush2.bf16.msra.mxu0 %v6702_v52  ;;  %v6802_v52 = vld [vmem:[%s10037_s0 + $0x380] ss:$108 sps:$4 sm:$0xff]  }
  0xb8   :  { %4523 = vmatpush2.bf16.msra.mxu1 %v6705_v53  ;;  %4411 = vmatprep.subr.bf16.mxu0 %v6716_v54  ;;  %v6803_v53 = vld [vmem:[%s10037_s0 + $0x388] ss:$108 sps:$4 sm:$0xff]   ;;  %v6804_v54 = vld [vmem:[%s10036_s1 + $0x6f0] ss:$8 sps:$4 sm:$0xff]  }
  0xb9   :  { %4524 = vmatprep.subr.bf16.mxu1 %v6719_v55  ;;  %v6807_v55 = vld [vmem:[%s10036_s1 + $0x7f0] ss:$8 sps:$4 sm:$0xff]  }
  0xba   :  { %4260 = vmatmul.mubr.bf16.gmra.mxu0 %v6712_v56  ;;  %v6812_v56 = vld [vmem:[%s10036_s1 + $0x6e4] ss:$8 sps:$4 sm:$0xff]  }
  0xbb   :  { %4373 = vmatmul.mubr.bf16.gmra.mxu1 %v6713_v57  ;;  %4412 = vmatpush2.bf16.msra.mxu0 %v6714_v58  ;;  %v6815_v57 = vld [vmem:[%s10036_s1 + $0x7e4] ss:$8 sps:$4 sm:$0xff]   ;;  %v6816_v58 = vld [vmem:[%s10037_s0 + $0x45c] ss:$108 sps:$4 sm:$0xff]  }
  0xbc   :  { %4525 = vmatpush2.bf16.msra.mxu1 %v6717_v59  ;;  %4413 = vmatprep.subr.bf16.mxu0 %v6722_v60  ;;  %v6818_v59 = vld [vmem:[%s10037_s0 + $0x464] ss:$108 sps:$4 sm:$0xff]   ;;  %v6810_v60 = vld [vmem:[%s10036_s1 + $0x6e0] ss:$8 sps:$4 sm:$0xff]  }
  0xbd   :  { %4526 = vmatprep.subr.bf16.mxu1 %v6725_v61  ;;  %4415 = vmatprep.mubr.bf16.mxu0 %v6728_v62  ;;  %v6813_v61 = vld [vmem:[%s10036_s1 + $0x7e0] ss:$8 sps:$4 sm:$0xff]   ;;  %v6824_v62 = vld [vmem:[%s10036_s1 + $0x6d4] ss:$8 sps:$4 sm:$0xff]  }
  0xbe   :  { %4528 = vmatprep.mubr.bf16.mxu1 %v6731_v63  ;;  %v6827_v63 = vld [vmem:[%s10036_s1 + $0x7d4] ss:$8 sps:$4 sm:$0xff]  }
  0xbf   :  { %4414 = vmatpush2.bf16.msra.mxu0 %v6720_v0  ;;  %v6820_v0 = vld [vmem:[%s10037_s0 + $0x458] ss:$108 sps:$4 sm:$0xff]  }
  0xc0   :  { %4527 = vmatpush2.bf16.msra.mxu1 %v6723_v1  ;;  %4609 = vmatprep.subr.bf16.mxu0 %v6734_v2  ;;  %v6821_v1 = vld [vmem:[%s10037_s0 + $0x460] ss:$108 sps:$4 sm:$0xff]   ;;  %v6822_v2 = vld [vmem:[%s10036_s1 + $0x6d0] ss:$8 sps:$4 sm:$0xff]  }
  0xc1   :  { %4722 = vmatprep.subr.bf16.mxu1 %v6737_v3  ;;  %v6825_v3 = vld [vmem:[%s10036_s1 + $0x7d0] ss:$8 sps:$4 sm:$0xff]  }
  0xc2   :  { %4416 = vmatmul.mubr.bf16.vlgmr.msra.gmra.mxu0 %v6726_v4  ;;  %v6830_v4 = vld [vmem:[%s10036_s1 + $0x6c4] ss:$8 sps:$4 sm:$0xff]  }
  0xc3   :  { %4529 = vmatmul.mubr.bf16.vlgmr.msra.gmra.mxu1 %v6729_v5  ;;  %4610 = vmatpush1.bf16.msra.mxu0 %v6732_v6  ;;  %v6833_v5 = vld [vmem:[%s10036_s1 + $0x7c4] ss:$8 sps:$4 sm:$0xff]   ;;  %v6834_v6 = vld [vmem:[%s10037_s0 + $0x534] ss:$108 sps:$4 sm:$0xff]  }
  0xc4   :  { %4723 = vmatpush1.bf16.msra.mxu1 %v6735_v7  ;;  %4611 = vmatprep.subr.bf16.mxu0 %v6740_v8  ;;  %v6836_v7 = vld [vmem:[%s10037_s0 + $0x53c] ss:$108 sps:$4 sm:$0xff]  }
  0xc5   :  { %4724 = vmatprep.subr.bf16.mxu1 %v6743_v9  ;;  %4425 = vmatprep.mubr.bf16.mxu0 %v6744_v10  ;;  %v6828_v8 = vld [vmem:[%s10036_s1 + $0x6c0] ss:$8 sps:$4 sm:$0xff]   ;;  %v6842_v10 = vld [vmem:[%s10036_s1 + $0x6b4] ss:$8 sps:$4 sm:$0xff]  }
  0xc6   :  { %4538 = vmatprep.mubr.bf16.mxu1 %v6746_v11  ;;  %v6831_v9 = vld [vmem:[%s10036_s1 + $0x7c0] ss:$8 sps:$4 sm:$0xff]   ;;  %v6845_v11 = vld [vmem:[%s10036_s1 + $0x7b4] ss:$8 sps:$4 sm:$0xff]  }
  0xc7   :  { %4612 = vmatpush1.bf16.msra.mxu0 %v6738_v12  ;;  %v6838_v12 = vld [vmem:[%s10037_s0 + $0x530] ss:$108 sps:$4 sm:$0xff]  }
  0xc8   :  { %4725 = vmatpush1.bf16.msra.mxu1 %v6741_v13  ;;  %4613 = vmatprep.subr.bf16.mxu0 %v6752_v14  ;;  %v6839_v13 = vld [vmem:[%s10037_s0 + $0x538] ss:$108 sps:$4 sm:$0xff]  }
  0xc9   :  { %4726 = vmatprep.subr.bf16.mxu1 %v6755_v15  ;;  %v6840_v14 = vld [vmem:[%s10036_s1 + $0x6b0] ss:$8 sps:$4 sm:$0xff]  }
  0xca   :  { %4426 = vmatmul.mubr.bf16.gmra.mxu0 %v6748_v16  ;;  %v6843_v15 = vld [vmem:[%s10036_s1 + $0x7b0] ss:$8 sps:$4 sm:$0xff]   ;;  %v6848_v16 = vld [vmem:[%s10036_s1 + $0x6a4] ss:$8 sps:$4 sm:$0xff]  }
  0xcb   :  { %4539 = vmatmul.mubr.bf16.gmra.mxu1 %v6749_v17  ;;  %4614 = vmatpush1.bf16.msra.mxu0 %v6750_v18  ;;  %v6851_v17 = vld [vmem:[%s10036_s1 + $0x7a4] ss:$8 sps:$4 sm:$0xff]  }
  0xcc   :  { %4727 = vmatpush1.bf16.msra.mxu1 %v6753_v19  ;;  %4615 = vmatprep.subr.bf16.mxu0 %v6758_v20  ;;  %v6852_v18 = vld [vmem:[%s10037_s0 + $0x60c] ss:$108 sps:$4 sm:$0xff]   ;;  %v6854_v19 = vld [vmem:[%s10037_s0 + $0x614] ss:$108 sps:$4 sm:$0xff]  }
  0xcd   :  { %4728 = vmatprep.subr.bf16.mxu1 %v6761_v21  ;;  %4435 = vmatprep.mubr.bf16.mxu0 %v6762_v22  ;;  %v6846_v20 = vld [vmem:[%s10036_s1 + $0x6a0] ss:$8 sps:$4 sm:$0xff]   ;;  %v673_v22 = vlaneseq }
  0xce   :  { %4548 = vmatprep.mubr.bf16.mxu1 %v6764_v23  ;;  %v6849_v21 = vld [vmem:[%s10036_s1 + $0x7a0] ss:$8 sps:$4 sm:$0xff]   ;;  %v6860_v23 = vld [vmem:[%s10036_s1 + $0x694] ss:$8 sps:$4 sm:$0xff]  }
  0xcf   :  { %4616 = vmatpush1.bf16.msra.mxu0 %v6756_v24  ;;  %v6863_v24 = vld [vmem:[%s10036_s1 + $0x794] ss:$8 sps:$4 sm:$0xff]  }
  0xd0   :  { %4729 = vmatpush1.bf16.msra.mxu1 %v6759_v25  ;;  %4617 = vmatprep.subr.bf16.mxu0 %v6770_v26  ;;  %v6856_v25 = vld [vmem:[%s10037_s0 + $0x608] ss:$108 sps:$4 sm:$0xff]   ;;  %v6857_v26 = vld [vmem:[%s10037_s0 + $0x610] ss:$108 sps:$4 sm:$0xff]  }
  0xd1   :  { %4730 = vmatprep.subr.bf16.mxu1 %v6773_v27  ;;  %v6858_v27 = vld [vmem:[%s10036_s1 + $0x690] ss:$8 sps:$4 sm:$0xff]  }
  0xd2   :  { %4436 = vmatmul.mubr.bf16.gmra.mxu0 %v6766_v28  ;;  %v6861_v28 = vld [vmem:[%s10036_s1 + $0x790] ss:$8 sps:$4 sm:$0xff]  }
  0xd3   :  { %4549 = vmatmul.mubr.bf16.gmra.mxu1 %v6767_v29  ;;  %4618 = vmatpush1.bf16.msra.mxu0 %v6768_v30  ;;  %v674_v29 = vshrl.u32 %v673_v22, 7  ;;  %v6866_v30 = vld [vmem:[%s10036_s1 + $0x684] ss:$8 sps:$4 sm:$0xff]   ;;  %v6914_v22 = vld [vmem:[%s10036_s1 + $0x834] ss:$8 sps:$4 sm:$0xff]  }
  0xd4   :  { %4731 = vmatpush1.bf16.msra.mxu1 %v6771_v31  ;;  %4619 = vmatprep.subr.bf16.mxu0 %v6776_v32  ;;  %v6869_v31 = vld [vmem:[%s10036_s1 + $0x784] ss:$8 sps:$4 sm:$0xff]   ;;  %v6864_v32 = vld [vmem:[%s10036_s1 + $0x680] ss:$8 sps:$4 sm:$0xff]  }
  0xd5   :  { %4732 = vmatprep.subr.bf16.mxu1 %v6779_v33  ;;  %4445 = vmatprep.mubr.bf16.mxu0 %v6780_v34  ;;  %v6872_v33 = vld [vmem:[%s10037_s0 + $0x34] ss:$108 sps:$4 sm:$0xff]   ;;  %v6875_v34 = vld [vmem:[%s10037_s0 + $0x3c] ss:$108 sps:$4 sm:$0xff]  }
  0xd6   :  { %4558 = vmatprep.mubr.bf16.mxu1 %v6782_v35  ;;  %v6867_v35 = vld [vmem:[%s10036_s1 + $0x780] ss:$8 sps:$4 sm:$0xff]  }
  0xd7   :  { %4620 = vmatpush1.bf16.msra.mxu0 %v6774_v36  ;;  %v671_v36 = vld [vmem:[%s10038_s2] sm:$0x3] }
  0xd8   :  { %4733 = vmatpush1.bf16.msra.mxu1 %v6777_v37  ;;  %4621 = vmatprep.subr.bf16.mxu0 %v6788_v38  ;;  %v675_v37 = vsub.s32 0, %v674_v29  ;;  %v6878_v38 = vld [vmem:[%s10036_s1 + $0x874] ss:$8 sps:$4 sm:$0xff]  }
  0xd9   :  { %4734 = vmatprep.subr.bf16.mxu1 %v6791_v39  ;;  %v6881_v39 = vld [vmem:[%s10036_s1 + $0x974] ss:$8 sps:$4 sm:$0xff]  }
  0xda   :  { %4446 = vmatmul.mubr.bf16.gmra.mxu0 %v6784_v40  ;;  %v6870_v40 = vld [vmem:[%s10037_s0 + $0x30] ss:$108 sps:$4 sm:$0xff]  }
  0xdb   :  { %4559 = vmatmul.mubr.bf16.gmra.mxu1 %v6785_v41  ;;  %4622 = vmatpush1.bf16.msra.mxu0 %v6786_v42  ;;  %v6873_v41 = vld [vmem:[%s10037_s0 + $0x38] ss:$108 sps:$4 sm:$0xff]   ;;  %v679_v42 = vsub.s32 1, %v674_v29 }
  0xdc   :  { %4735 = vmatpush1.bf16.msra.mxu1 %v6789_v43  ;;  %4623 = vmatprep.subr.bf16.mxu0 %v6794_v44  ;;  %v6876_v43 = vld [vmem:[%s10036_s1 + $0x870] ss:$8 sps:$4 sm:$0xff]   ;;  %v8411_v44 = vrot.slane %v671_v36, %v675_v37  ;;  %v6923_v37 = vld [vmem:[%s10036_s1 + $0x924] ss:$8 sps:$4 sm:$0xff]  }
  0xdd   :  { %4736 = vmatprep.subr.bf16.mxu1 %v6797_v45  ;;  %4455 = vmatprep.mubr.bf16.mxu0 %v6798_v46  ;;  %v6879_v45 = vld [vmem:[%s10036_s1 + $0x970] ss:$8 sps:$4 sm:$0xff]   ;;  %v6884_v46 = vld [vmem:[%s10036_s1 + $0x864] ss:$8 sps:$4 sm:$0xff]  }
  0xde   :  { %4568 = vmatprep.mubr.bf16.mxu1 %v6800_v47  ;;  %v6887_v47 = vld [vmem:[%s10036_s1 + $0x964] ss:$8 sps:$4 sm:$0xff]  }
  0xdf   :  { %4624 = vmatpush1.bf16.msra.mxu0 %v6792_v48  ;;  %v8422_v48 = vrot.slane %v671_v36, %v679_v42  ;;  %v6920_v36 = vld [vmem:[%s10036_s1 + $0x824] ss:$8 sps:$4 sm:$0xff]  }
  0xe0   :  { %4737 = vmatpush1.bf16.msra.mxu1 %v6795_v49  ;;  %4625 = vmatprep.subr.bf16.mxu0 %v6806_v50  ;;  %v6888_v49 = vld [vmem:[%s10037_s0 + $0x10c] ss:$108 sps:$4 sm:$0xff]   ;;  %v6890_v50 = vld [vmem:[%s10037_s0 + $0x114] ss:$108 sps:$4 sm:$0xff]  }
  0xe1   :  { %4738 = vmatprep.subr.bf16.mxu1 %v6809_v51 }
  0xe2   :  { %4456 = vmatmul.mubr.bf16.gmra.mxu0 %v6802_v52 }
  0xe3   :  { %4569 = vmatmul.mubr.bf16.gmra.mxu1 %v6803_v53  ;;  %4626 = vmatpush2.bf16.msra.mxu0 %v6804_v54  ;;  %v6882_v53 = vld [vmem:[%s10036_s1 + $0x860] ss:$8 sps:$4 sm:$0xff]  }
  0xe4   :  { %4739 = vmatpush2.bf16.msra.mxu1 %v6807_v55  ;;  %4627 = vmatprep.subr.bf16.mxu0 %v6812_v56  ;;  %v6885_v55 = vld [vmem:[%s10036_s1 + $0x960] ss:$8 sps:$4 sm:$0xff]  }
  0xe5   :  { %4740 = vmatprep.subr.bf16.mxu1 %v6815_v57  ;;  %4465 = vmatprep.mubr.bf16.mxu0 %v6816_v58  ;;  %v6896_v58 = vld [vmem:[%s10036_s1 + $0x854] ss:$8 sps:$4 sm:$0xff]  }
  0xe6   :  { %4578 = vmatprep.mubr.bf16.mxu1 %v6818_v59  ;;  %v6899_v59 = vld [vmem:[%s10036_s1 + $0x954] ss:$8 sps:$4 sm:$0xff]  }
  0xe7   :  { %4628 = vmatpush2.bf16.msra.mxu0 %v6810_v60 }
  0xe8   :  { %4741 = vmatpush2.bf16.msra.mxu1 %v6813_v61  ;;  %4629 = vmatprep.subr.bf16.mxu0 %v6824_v62  ;;  %v6892_v62 = vld [vmem:[%s10037_s0 + $0x108] ss:$108 sps:$4 sm:$0xff]  }
  0xe9   :  { %4742 = vmatprep.subr.bf16.mxu1 %v6827_v63  ;;  %v6893_v63 = vld [vmem:[%s10037_s0 + $0x110] ss:$108 sps:$4 sm:$0xff]  }
  0xea   :  { %4466 = vmatmul.mubr.bf16.gmra.mxu0 %v6820_v0 }
  0xeb   :  { %4579 = vmatmul.mubr.bf16.gmra.mxu1 %v6821_v1  ;;  %4630 = vmatpush2.bf16.msra.mxu0 %v6822_v2  ;;  %v6894_v2 = vld [vmem:[%s10036_s1 + $0x850] ss:$8 sps:$4 sm:$0xff]  }
  0xec   :  { %4743 = vmatpush2.bf16.msra.mxu1 %v6825_v3  ;;  %4631 = vmatprep.subr.bf16.mxu0 %v6830_v4 }
  0xed   :  { %4744 = vmatprep.subr.bf16.mxu1 %v6833_v5  ;;  %4475 = vmatprep.mubr.bf16.mxu0 %v6834_v6  ;;  %v6897_v5 = vld [vmem:[%s10036_s1 + $0x950] ss:$8 sps:$4 sm:$0xff]  }
  0xee   :  { %4588 = vmatprep.mubr.bf16.mxu1 %v6836_v7 }
  0xef   :  { %4632 = vmatpush2.bf16.msra.mxu0 %v6828_v8  ;;  %v6902_v8 = vld [vmem:[%s10036_s1 + $0x844] ss:$8 sps:$4 sm:$0xff]  }
  0xf0   :  { %4745 = vmatpush2.bf16.msra.mxu1 %v6831_v9  ;;  %4633 = vmatprep.subr.bf16.mxu0 %v6842_v10  ;;  %v6905_v9 = vld [vmem:[%s10036_s1 + $0x944] ss:$8 sps:$4 sm:$0xff]  }
  0xf1   :  { %4746 = vmatprep.subr.bf16.mxu1 %v6845_v11 }
  0xf2   :  { %4476 = vmatmul.mubr.bf16.gmra.mxu0 %v6838_v12  ;;  %v6906_v12 = vld [vmem:[%s10037_s0 + $0x1e4] ss:$108 sps:$4 sm:$0xff]  }
  0xf3   :  { %4589 = vmatmul.mubr.bf16.gmra.mxu1 %v6839_v13  ;;  %4634 = vmatpush2.bf16.msra.mxu0 %v6840_v14  ;;  %v6908_v13 = vld [vmem:[%s10037_s0 + $0x1ec] ss:$108 sps:$4 sm:$0xff]  }
  0xf4   :  { %4747 = vmatpush2.bf16.msra.mxu1 %v6843_v15  ;;  %4635 = vmatprep.subr.bf16.mxu0 %v6848_v16  ;;  %v6900_v16 = vld [vmem:[%s10036_s1 + $0x840] ss:$8 sps:$4 sm:$0xff]  }
  0xf5   :  { %4748 = vmatprep.subr.bf16.mxu1 %v6851_v17  ;;  %4485 = vmatprep.mubr.bf16.mxu0 %v6852_v18 }
  0xf6   :  { %4598 = vmatprep.mubr.bf16.mxu1 %v6854_v19  ;;  %v6903_v19 = vld [vmem:[%s10036_s1 + $0x940] ss:$8 sps:$4 sm:$0xff]  }
  0xf7   :  { %4636 = vmatpush2.bf16.msra.mxu0 %v6846_v20 }
  0xf8   :  { %4749 = vmatpush2.bf16.msra.mxu1 %v6849_v21  ;;  %4637 = vmatprep.subr.bf16.mxu0 %v6860_v23  ;;  %v6917_v23 = vld [vmem:[%s10036_s1 + $0x934] ss:$8 sps:$4 sm:$0xff]  }
  0xf9   :  { %4750 = vmatprep.subr.bf16.mxu1 %v6863_v24 }
  0xfa   :  { %4486 = vmatmul.mubr.bf16.gmra.mxu0 %v6856_v25 }
  0xfb   :  { %4599 = vmatmul.mubr.bf16.gmra.mxu1 %v6857_v26  ;;  %4638 = vmatpush2.bf16.msra.mxu0 %v6858_v27  ;;  %v6910_v26 = vld [vmem:[%s10037_s0 + $0x1e0] ss:$108 sps:$4 sm:$0xff]   ;;  %v6911_v27 = vld [vmem:[%s10037_s0 + $0x1e8] ss:$108 sps:$4 sm:$0xff]  }
  0xfc   :  { %4751 = vmatpush2.bf16.msra.mxu1 %v6861_v28  ;;  %4639 = vmatprep.subr.bf16.mxu0 %v6866_v30  ;;  %v6912_v30 = vld [vmem:[%s10036_s1 + $0x830] ss:$8 sps:$4 sm:$0xff]  }
  0xfd   :  { %4752 = vmatprep.subr.bf16.mxu1 %v6869_v31  ;;  %4641 = vmatprep.mubr.bf16.mxu0 %v6872_v33  ;;  %v6915_v33 = vld [vmem:[%s10036_s1 + $0x930] ss:$8 sps:$4 sm:$0xff]  }
  0xfe   :  { %4754 = vmatprep.mubr.bf16.mxu1 %v6875_v34 }
  0xff   :  { %4640 = vmatpush2.bf16.msra.mxu0 %v6864_v32 }
 0x100   :  { %4753 = vmatpush2.bf16.msra.mxu1 %v6867_v35  ;;  %4835 = vmatprep.subr.bf16.mxu0 %v6878_v38 }
 0x101   :  { %4948 = vmatprep.subr.bf16.mxu1 %v6881_v39 }
 0x102   :  { %v3965_v51 = vpop.f32.mrf.mxu0  ;;  %4642 = vmatmul.mubr.bf16.vlgmr.msra.gmra.mxu0 %v6870_v40  ;;  %v6924_v40 = vld [vmem:[%s10037_s0 + $0x2bc] ss:$108 sps:$4 sm:$0xff]  }
 0x103   :  { %v4078_v52 = vpop.f32.mrf.mxu1  ;;  %4755 = vmatmul.mubr.bf16.vlgmr.msra.gmra.mxu1 %v6873_v41  ;;  %v3966_v54 = vadd.f32 %v3965_v51, %v8411_v44  ;;  %4836 = vmatpush1.bf16.msra.mxu0 %v6876_v43  ;;  %v6926_v41 = vld [vmem:[%s10037_s0 + $0x2c4] ss:$108 sps:$4 sm:$0xff]  }
 0x104   :  { %4949 = vmatpush1.bf16.msra.mxu1 %v6879_v45  ;;  %v3967_v56 = vpop.f32.mrf.mxu0  ;;  %4837 = vmatprep.subr.bf16.mxu0 %v6884_v46  ;;  %v6918_v45 = vld [vmem:[%s10036_s1 + $0x820] ss:$8 sps:$4 sm:$0xff]  }
 0x105   :  { %v4080_v57 = vpop.f32.mrf.mxu1  ;;  %4950 = vmatprep.subr.bf16.mxu1 %v6887_v47  ;;  %v8443_v60 = vadd.f32 %v4078_v52, %v3966_v54  ;;  %v3968_v61 = vadd.f32 %v3967_v56, %v8422_v48  ;;  %4651 = vmatprep.mubr.bf16.mxu0 %v6888_v49  ;;  %v6921_v49 = vld [vmem:[%s10036_s1 + $0x920] ss:$8 sps:$4 sm:$0xff]   ;;  %v6932_v52 = vld [vmem:[%s10036_s1 + $0x814] ss:$8 sps:$4 sm:$0xff]   ;;  %v6928_v56 = vld [vmem:[%s10037_s0 + $0x2b8] ss:$108 sps:$4 sm:$0xff]  }
 0x106   :  { %4764 = vmatprep.mubr.bf16.mxu1 %v6890_v50  ;;  %v3969_v0 = vpop.f32.mrf.mxu0 }
 0x107   :  { %v4082_v1 = vpop.f32.mrf.mxu1  ;;  %v8455_v3 = vadd.f32 %v4080_v57, %v3968_v61  ;;  %v3970_v4 = vadd.f32 %v3969_v0, %v8411_v44  ;;  %4838 = vmatpush1.bf16.msra.mxu0 %v6882_v53  ;;  %v6935_v53 = vld [vmem:[%s10036_s1 + $0x914] ss:$8 sps:$4 sm:$0xff]   ;;  %v6929_v57 = vld [vmem:[%s10037_s0 + $0x2c0] ss:$108 sps:$4 sm:$0xff]   ;;  %v6930_v61 = vld [vmem:[%s10036_s1 + $0x810] ss:$8 sps:$4 sm:$0xff]  }
 0x108   :  { %4951 = vmatpush1.bf16.msra.mxu1 %v6885_v55  ;;  %v3971_v6 = vpop.f32.mrf.mxu0  ;;  %4839 = vmatprep.subr.bf16.mxu0 %v6896_v58  ;;  %v6933_v0 = vld [vmem:[%s10036_s1 + $0x910] ss:$8 sps:$4 sm:$0xff]  }
 0x109   :  { %v4084_v7 = vpop.f32.mrf.mxu1  ;;  %4952 = vmatprep.subr.bf16.mxu1 %v6899_v59  ;;  %v8467_v10 = vadd.f32 %v4082_v1, %v3970_v4  ;;  %v3972_v11 = vadd.f32 %v3971_v6, %v8422_v48  ;;  %v6938_v4 = vld [vmem:[%s10036_s1 + $0x804] ss:$8 sps:$4 sm:$0xff]  }
 0x10a   :  { %v3975_v14 = vpop.f32.mrf.mxu0  ;;  %4652 = vmatmul.mubr.bf16.gmra.mxu0 %v6892_v62 }
 0x10b   :  { %v4088_v15 = vpop.f32.mrf.mxu1  ;;  %4765 = vmatmul.mubr.bf16.gmra.mxu1 %v6893_v63  ;;  %v8479_v17 = vadd.f32 %v4084_v7, %v3972_v11  ;;  %v3976_v18 = vadd.f32 %v3975_v14, %v8411_v44  ;;  %4840 = vmatpush1.bf16.msra.mxu0 %v6894_v2 }
 0x10c   :  { %4953 = vmatpush1.bf16.msra.mxu1 %v6897_v5  ;;  %v3977_v20 = vpop.f32.mrf.mxu0  ;;  %4841 = vmatprep.subr.bf16.mxu0 %v6902_v8  ;;  %v6941_v5 = vld [vmem:[%s10036_s1 + $0x904] ss:$8 sps:$4 sm:$0xff]   ;;  %v6944_v8 = vld [vmem:[%s10037_s0 + $0x394] ss:$108 sps:$4 sm:$0xff]  }
 0x10d   :  { %v4090_v21 = vpop.f32.mrf.mxu1  ;;  %4954 = vmatprep.subr.bf16.mxu1 %v6905_v9  ;;  %v8491_v24 = vadd.f32 %v4088_v15, %v3976_v18  ;;  %v3978_v25 = vadd.f32 %v3977_v20, %v8422_v48  ;;  %4661 = vmatprep.mubr.bf16.mxu0 %v6906_v12  ;;  %v6947_v9 = vld [vmem:[%s10037_s0 + $0x39c] ss:$108 sps:$4 sm:$0xff]  }
 0x10e   :  { %4774 = vmatprep.mubr.bf16.mxu1 %v6908_v13  ;;  %v3979_v28 = vpop.f32.mrf.mxu0  ;;  %v6936_v13 = vld [vmem:[%s10036_s1 + $0x800] ss:$8 sps:$4 sm:$0xff]   ;;  %v6950_v20 = vld [vmem:[%s10036_s1 + $0x8f4] ss:$8 sps:$4 sm:$0xff]  }
 0x10f   :  { %v4092_v29 = vpop.f32.mrf.mxu1  ;;  %v8503_v31 = vadd.f32 %v4090_v21, %v3978_v25  ;;  %v3980_v32 = vadd.f32 %v3979_v28, %v8411_v44  ;;  %4842 = vmatpush1.bf16.msra.mxu0 %v6900_v16  ;;  %v6939_v16 = vld [vmem:[%s10036_s1 + $0x900] ss:$8 sps:$4 sm:$0xff]   ;;  %v6953_v21 = vld [vmem:[%s10036_s1 + $0x9f4] ss:$8 sps:$4 sm:$0xff]  }
 0x110   :  { %4955 = vmatpush1.bf16.msra.mxu1 %v6903_v19  ;;  %v3981_v34 = vpop.f32.mrf.mxu0  ;;  %4843 = vmatprep.subr.bf16.mxu0 %v6914_v22  ;;  %v6942_v25 = vld [vmem:[%s10037_s0 + $0x390] ss:$108 sps:$4 sm:$0xff]  }
 0x111   :  { %v4094_v35 = vpop.f32.mrf.mxu1  ;;  %4956 = vmatprep.subr.bf16.mxu1 %v6917_v23  ;;  %v8515_v38 = vadd.f32 %v4092_v29, %v3980_v32  ;;  %v3982_v39 = vadd.f32 %v3981_v34, %v8422_v48  ;;  %v6948_v29 = vld [vmem:[%s10036_s1 + $0x8f0] ss:$8 sps:$4 sm:$0xff]  }
 0x112   :  { %v3985_v42 = vpop.f32.mrf.mxu0  ;;  %4662 = vmatmul.mubr.bf16.gmra.mxu0 %v6910_v26  ;;  %v6945_v26 = vld [vmem:[%s10037_s0 + $0x398] ss:$108 sps:$4 sm:$0xff]  }
 0x113   :  { %v4098_v43 = vpop.f32.mrf.mxu1  ;;  %4775 = vmatmul.mubr.bf16.gmra.mxu1 %v6911_v27  ;;  %v8527_v46 = vadd.f32 %v4094_v35, %v3982_v39  ;;  %v3986_v47 = vadd.f32 %v3985_v42, %v8411_v44  ;;  %4844 = vmatpush1.bf16.msra.mxu0 %v6912_v30  ;;  %v6965_v42 = vld [vmem:[%s10037_s0 + $0x474] ss:$108 sps:$4 sm:$0xff]  }
 0x114   :  { %4957 = vmatpush1.bf16.msra.mxu1 %v6915_v33  ;;  %v3987_v50 = vpop.f32.mrf.mxu0  ;;  %4845 = vmatprep.subr.bf16.mxu0 %v6920_v36  ;;  %v6951_v33 = vld [vmem:[%s10036_s1 + $0x9f0] ss:$8 sps:$4 sm:$0xff]   ;;  %v6956_v36 = vld [vmem:[%s10036_s1 + $0x8e4] ss:$8 sps:$4 sm:$0xff]  }
 0x115   :  { %v4100_v51 = vpop.f32.mrf.mxu1  ;;  %4958 = vmatprep.subr.bf16.mxu1 %v6923_v37  ;;  %v8539_v54 = vadd.f32 %v4098_v43, %v3986_v47  ;;  %v3988_v55 = vadd.f32 %v3987_v50, %v8422_v48  ;;  %4671 = vmatprep.mubr.bf16.mxu0 %v6924_v40  ;;  %v6959_v37 = vld [vmem:[%s10036_s1 + $0x9e4] ss:$8 sps:$4 sm:$0xff]   ;;  %v6954_v47 = vld [vmem:[%s10036_s1 + $0x8e0] ss:$8 sps:$4 sm:$0xff]  }
 0x116   :  { %4784 = vmatprep.mubr.bf16.mxu1 %v6926_v41  ;;  %v3989_v58 = vpop.f32.mrf.mxu0  ;;  %v6962_v41 = vld [vmem:[%s10037_s0 + $0x46c] ss:$108 sps:$4 sm:$0xff]  }
 0x117   :  { %v4102_v59 = vpop.f32.mrf.mxu1  ;;  %v8551_v62 = vadd.f32 %v4100_v51, %v3988_v55  ;;  %v3990_v63 = vadd.f32 %v3989_v58, %v8411_v44  ;;  %4846 = vmatpush1.bf16.msra.mxu0 %v6918_v45  ;;  %v6957_v51 = vld [vmem:[%s10036_s1 + $0x9e0] ss:$8 sps:$4 sm:$0xff]   ;;  %v6968_v55 = vld [vmem:[%s10036_s1 + $0x8d4] ss:$8 sps:$4 sm:$0xff]  }
 0x118   :  { %4959 = vmatpush1.bf16.msra.mxu1 %v6921_v49  ;;  %v3991_v1 = vpop.f32.mrf.mxu0  ;;  %4847 = vmatprep.subr.bf16.mxu0 %v6932_v52 }
 0x119   :  { %v4104_v2 = vpop.f32.mrf.mxu1  ;;  %4960 = vmatprep.subr.bf16.mxu1 %v6935_v53  ;;  %v8563_v6 = vadd.f32 %v4102_v59, %v3990_v63  ;;  %v3992_v7 = vadd.f32 %v3991_v1, %v8422_v48  ;;  %v6960_v59 = vld [vmem:[%s10037_s0 + $0x468] ss:$108 sps:$4 sm:$0xff]   ;;  %v6966_v1 = vld [vmem:[%s10036_s1 + $0x8d0] ss:$8 sps:$4 sm:$0xff]  }
 0x11a   :  { %v3995_v11 = vpop.f32.mrf.mxu0  ;;  %4672 = vmatmul.mubr.bf16.gmra.mxu0 %v6928_v56  ;;  %v6971_v56 = vld [vmem:[%s10036_s1 + $0x9d4] ss:$8 sps:$4 sm:$0xff]  }
 0x11b   :  { %v4108_v12 = vpop.f32.mrf.mxu1  ;;  %4785 = vmatmul.mubr.bf16.gmra.mxu1 %v6929_v57  ;;  %v8575_v14 = vadd.f32 %v4104_v2, %v3992_v7  ;;  %v3996_v15 = vadd.f32 %v3995_v11, %v8411_v44  ;;  %4848 = vmatpush1.bf16.msra.mxu0 %v6930_v61  ;;  %v6963_v61 = vld [vmem:[%s10037_s0 + $0x470] ss:$108 sps:$4 sm:$0xff]   ;;  %v6977_v11 = vld [vmem:[%s10036_s1 + $0x9c4] ss:$8 sps:$4 sm:$0xff]  }
 0x11c   :  { %4961 = vmatpush1.bf16.msra.mxu1 %v6933_v0  ;;  %v3997_v18 = vpop.f32.mrf.mxu0  ;;  %4849 = vmatprep.subr.bf16.mxu0 %v6938_v4 }
 0x11d   :  { %v4110_v19 = vpop.f32.mrf.mxu1  ;;  %4962 = vmatprep.subr.bf16.mxu1 %v6941_v5  ;;  %v8587_v22 = vadd.f32 %v4108_v12, %v3996_v15  ;;  %v3998_v23 = vadd.f32 %v3997_v18, %v8422_v48  ;;  %4681 = vmatprep.mubr.bf16.mxu0 %v6944_v8  ;;  %v6969_v5 = vld [vmem:[%s10036_s1 + $0x9d0] ss:$8 sps:$4 sm:$0xff]  }
 0x11e   :  { %4794 = vmatprep.mubr.bf16.mxu1 %v6947_v9  ;;  %v3999_v27 = vpop.f32.mrf.mxu0  ;;  %v6974_v9 = vld [vmem:[%s10036_s1 + $0x8c4] ss:$8 sps:$4 sm:$0xff]  }
 0x11f   :  { %v4112_v28 = vpop.f32.mrf.mxu1  ;;  %v8599_v30 = vadd.f32 %v4110_v19, %v3998_v23  ;;  %v4000_v32 = vadd.f32 %v3999_v27, %v8411_v44  ;;  %4850 = vmatpush1.bf16.msra.mxu0 %v6936_v13  ;;  %v6980_v15 = vld [vmem:[%s10037_s0 + $0x544] ss:$108 sps:$4 sm:$0xff]  }
 0x120   :  { %4963 = vmatpush1.bf16.msra.mxu1 %v6939_v16  ;;  %v4001_v34 = vpop.f32.mrf.mxu0  ;;  %4851 = vmatprep.subr.bf16.mxu0 %v6950_v20  ;;  %v6983_v16 = vld [vmem:[%s10037_s0 + $0x54c] ss:$108 sps:$4 sm:$0xff]   ;;  %v6972_v20 = vld [vmem:[%s10036_s1 + $0x8c0] ss:$8 sps:$4 sm:$0xff]  }
 0x121   :  { %v4114_v35 = vpop.f32.mrf.mxu1  ;;  %4964 = vmatprep.subr.bf16.mxu1 %v6953_v21  ;;  %v8611_v39 = vadd.f32 %v4112_v28, %v4000_v32  ;;  %v4002_v40 = vadd.f32 %v4001_v34, %v8422_v48  ;;  %v6986_v28 = vld [vmem:[%s10036_s1 + $0x8b4] ss:$8 sps:$4 sm:$0xff]   ;;  %v6978_v34 = vld [vmem:[%s10037_s0 + $0x540] ss:$108 sps:$4 sm:$0xff]  }
 0x122   :  { %v4005_v43 = vpop.f32.mrf.mxu0  ;;  %4682 = vmatmul.mubr.bf16.gmra.mxu0 %v6942_v25  ;;  %v6975_v25 = vld [vmem:[%s10036_s1 + $0x9c0] ss:$8 sps:$4 sm:$0xff]  }
 0x123   :  { %v4118_v45 = vpop.f32.mrf.mxu1  ;;  %4795 = vmatmul.mubr.bf16.gmra.mxu1 %v6945_v26  ;;  %v8623_v49 = vadd.f32 %v4114_v35, %v4002_v40  ;;  %v4006_v50 = vadd.f32 %v4005_v43, %v8411_v44  ;;  %4852 = vmatpush2.bf16.msra.mxu0 %v6948_v29  ;;  %v6989_v29 = vld [vmem:[%s10036_s1 + $0x9b4] ss:$8 sps:$4 sm:$0xff]   ;;  %v6984_v40 = vld [vmem:[%s10036_s1 + $0x8b0] ss:$8 sps:$4 sm:$0xff]  }
 0x124   :  { %4965 = vmatpush2.bf16.msra.mxu1 %v6951_v33  ;;  %v4007_v52 = vpop.f32.mrf.mxu0  ;;  %4853 = vmatprep.subr.bf16.mxu0 %v6956_v36  ;;  %v6981_v35 = vld [vmem:[%s10037_s0 + $0x548] ss:$108 sps:$4 sm:$0xff]   ;;  %v6987_v43 = vld [vmem:[%s10036_s1 + $0x9b0] ss:$8 sps:$4 sm:$0xff]  }
 0x125   :  { %v4120_v53 = vpop.f32.mrf.mxu1  ;;  %4966 = vmatprep.subr.bf16.mxu1 %v6959_v37  ;;  %v8635_v57 = vadd.f32 %v4118_v45, %v4006_v50  ;;  %v4008_v58 = vadd.f32 %v4007_v52, %v8422_v48  ;;  %4691 = vmatprep.mubr.bf16.mxu0 %v6962_v41  ;;  %v6992_v50 = vld [vmem:[%s10036_s1 + $0x8a4] ss:$8 sps:$4 sm:$0xff]  }
 0x126   :  { %4804 = vmatprep.mubr.bf16.mxu1 %v6965_v42  ;;  %v4009_v63 = vpop.f32.mrf.mxu0 }
 0x127   :  { %v4122_v0 = vpop.f32.mrf.mxu1  ;;  %v8647_v2 = vadd.f32 %v4120_v53, %v4008_v58  ;;  %v4010_v4 = vadd.f32 %v4009_v63, %v8411_v44  ;;  %4854 = vmatpush2.bf16.msra.mxu0 %v6954_v47 }
 0x128   :  { %4967 = vmatpush2.bf16.msra.mxu1 %v6957_v51  ;;  %v4011_v7 = vpop.f32.mrf.mxu0  ;;  %4855 = vmatprep.subr.bf16.mxu0 %v6968_v55  ;;  %v6995_v51 = vld [vmem:[%s10036_s1 + $0x9a4] ss:$8 sps:$4 sm:$0xff]   ;;  %v6998_v55 = vld [vmem:[%s10037_s0 + $0x61c] ss:$108 sps:$4 sm:$0xff]  }
 0x129   :  { %v4124_v8 = vpop.f32.mrf.mxu1  ;;  %4968 = vmatprep.subr.bf16.mxu1 %v6971_v56  ;;  %v8659_v12 = vadd.f32 %v4122_v0, %v4010_v4  ;;  %v4012_v13 = vadd.f32 %v4011_v7, %v8422_v48  ;;  %v7001_v56 = vld [vmem:[%s10037_s0 + $0x624] ss:$108 sps:$4 sm:$0xff]   ;;  %v7004_v7 = vld [vmem:[%s10036_s1 + $0x894] ss:$8 sps:$4 sm:$0xff]  }
 0x12a   :  { %v4015_v18 = vpop.f32.mrf.mxu0  ;;  %4692 = vmatmul.mubr.bf16.gmra.mxu0 %v6960_v59 }
 0x12b   :  { %v4128_v19 = vpop.f32.mrf.mxu1  ;;  %4805 = vmatmul.mubr.bf16.gmra.mxu1 %v6963_v61  ;;  %v8671_v21 = vadd.f32 %v4124_v8, %v4012_v13  ;;  %v4016_v23 = vadd.f32 %v4015_v18, %v8411_v44  ;;  %4856 = vmatpush2.bf16.msra.mxu0 %v6966_v1  ;;  %v6990_v61 = vld [vmem:[%s10036_s1 + $0x8a0] ss:$8 sps:$4 sm:$0xff]   ;;  %v7007_v8 = vld [vmem:[%s10036_s1 + $0x994] ss:$8 sps:$4 sm:$0xff]   ;;  %v6996_v13 = vld [vmem:[%s10037_s0 + $0x618] ss:$108 sps:$4 sm:$0xff]  }
 0x12c   :  { %4969 = vmatpush2.bf16.msra.mxu1 %v6969_v5  ;;  %v4017_v26 = vpop.f32.mrf.mxu0  ;;  %4857 = vmatprep.subr.bf16.mxu0 %v6974_v9  ;;  %v6993_v1 = vld [vmem:[%s10036_s1 + $0x9a0] ss:$8 sps:$4 sm:$0xff]  }
 0x12d   :  { %v4130_v27 = vpop.f32.mrf.mxu1  ;;  %4970 = vmatprep.subr.bf16.mxu1 %v6977_v11  ;;  %v8683_v32 = vadd.f32 %v4128_v19, %v4016_v23  ;;  %v4018_v33 = vadd.f32 %v4017_v26, %v8422_v48  ;;  %4701 = vmatprep.mubr.bf16.mxu0 %v6980_v15  ;;  %v6999_v15 = vld [vmem:[%s10037_s0 + $0x620] ss:$108 sps:$4 sm:$0xff]   ;;  %v7002_v19 = vld [vmem:[%s10036_s1 + $0x890] ss:$8 sps:$4 sm:$0xff]  }
 0x12e   :  { %4814 = vmatprep.mubr.bf16.mxu1 %v6983_v16  ;;  %v4019_v36 = vpop.f32.mrf.mxu0 }
 0x12f   :  { %v4132_v37 = vpop.f32.mrf.mxu1  ;;  %v8695_v41 = vadd.f32 %v4130_v27, %v4018_v33  ;;  %v4020_v42 = vadd.f32 %v4019_v36, %v8411_v44  ;;  %4858 = vmatpush2.bf16.msra.mxu0 %v6972_v20  ;;  %v7019_v36 = vld [vmem:[%s10037_s0 + $0x4c] ss:$108 sps:$4 sm:$0xff]  }
 0x130   :  { %4971 = vmatpush2.bf16.msra.mxu1 %v6975_v25  ;;  %v4021_v45 = vpop.f32.mrf.mxu0  ;;  %4859 = vmatprep.subr.bf16.mxu0 %v6986_v28  ;;  %v7005_v25 = vld [vmem:[%s10036_s1 + $0x990] ss:$8 sps:$4 sm:$0xff]   ;;  %v7010_v28 = vld [vmem:[%s10036_s1 + $0x884] ss:$8 sps:$4 sm:$0xff]  }
 0x131   :  { %v4134_v47 = vpop.f32.mrf.mxu1  ;;  %4972 = vmatprep.subr.bf16.mxu1 %v6989_v29  ;;  %v8707_v52 = vadd.f32 %v4132_v37, %v4020_v42  ;;  %v4022_v53 = vadd.f32 %v4021_v45, %v8422_v48  ;;  %v7013_v29 = vld [vmem:[%s10036_s1 + $0x984] ss:$8 sps:$4 sm:$0xff]   ;;  %v7008_v42 = vld [vmem:[%s10036_s1 + $0x880] ss:$8 sps:$4 sm:$0xff]  }
 0x132   :  { %v4025_v58 = vpop.f32.mrf.mxu0  ;;  %4702 = vmatmul.mubr.bf16.gmra.mxu0 %v6978_v34 }
 0x133   :  { %v4138_v59 = vpop.f32.mrf.mxu1  ;;  %4815 = vmatmul.mubr.bf16.gmra.mxu1 %v6981_v35  ;;  %v8719_v63 = vadd.f32 %v4134_v47, %v4022_v53  ;;  %v4026_v0 = vadd.f32 %v4025_v58, %v8411_v44  ;;  %4860 = vmatpush2.bf16.msra.mxu0 %v6984_v40  ;;  %v7016_v35 = vld [vmem:[%s10037_s0 + $0x44] ss:$108 sps:$4 sm:$0xff]   ;;  %v7011_v47 = vld [vmem:[%s10036_s1 + $0x980] ss:$8 sps:$4 sm:$0xff]   ;;  %v7022_v53 = vld [vmem:[%s10036_s1 + $0xa74] ss:$8 sps:$4 sm:$0xff]  }
 0x134   :  { %4973 = vmatpush2.bf16.msra.mxu1 %v6987_v43  ;;  %v4027_v4 = vpop.f32.mrf.mxu0  ;;  %4861 = vmatprep.subr.bf16.mxu0 %v6992_v50 }
 0x135   :  { %v4140_v5 = vpop.f32.mrf.mxu1  ;;  %4974 = vmatprep.subr.bf16.mxu1 %v6995_v51  ;;  %v8731_v9 = vadd.f32 %v4138_v59, %v4026_v0  ;;  %v4028_v11 = vadd.f32 %v4027_v4, %v8422_v48  ;;  %4711 = vmatprep.mubr.bf16.mxu0 %v6998_v55  ;;  %v7025_v55 = vld [vmem:[%s10036_s1 + $0xb74] ss:$8 sps:$4 sm:$0xff]   ;;  %v7014_v59 = vld [vmem:[%s10037_s0 + $0x40] ss:$108 sps:$4 sm:$0xff]   ;;  %v7020_v4 = vld [vmem:[%s10036_s1 + $0xa70] ss:$8 sps:$4 sm:$0xff]  }
 0x136   :  { %4824 = vmatprep.mubr.bf16.mxu1 %v7001_v56  ;;  %v4029_v16 = vpop.f32.mrf.mxu0 }
 0x137   :  { %v4142_v18 = vpop.f32.mrf.mxu1  ;;  %v8743_v20 = vadd.f32 %v4140_v5, %v4028_v11  ;;  %v4030_v23 = vadd.f32 %v4029_v16, %v8411_v44  ;;  %4862 = vmatpush2.bf16.msra.mxu0 %v6990_v61  ;;  %v7017_v61 = vld [vmem:[%s10037_s0 + $0x48] ss:$108 sps:$4 sm:$0xff]   ;;  %v7031_v16 = vld [vmem:[%s10036_s1 + $0xb64] ss:$8 sps:$4 sm:$0xff]  }
 0x138   :  { %4975 = vmatpush2.bf16.msra.mxu1 %v6993_v1  ;;  %v4031_v26 = vpop.f32.mrf.mxu0  ;;  %4863 = vmatprep.subr.bf16.mxu0 %v7004_v7 }
 0x139   :  { %v4144_v27 = vpop.f32.mrf.mxu1  ;;  %4976 = vmatprep.subr.bf16.mxu1 %v7007_v8  ;;  %v8755_v33 = vadd.f32 %v4142_v18, %v4030_v23  ;;  %v4032_v34 = vadd.f32 %v4031_v26, %v8422_v48  ;;  %v7023_v8 = vld [vmem:[%s10036_s1 + $0xb70] ss:$8 sps:$4 sm:$0xff]  }
 0x13a   :  { %v4035_v37 = vpop.f32.mrf.mxu0  ;;  %4712 = vmatmul.mubr.bf16.gmra.mxu0 %v6996_v13  ;;  %v7037_v23 = vld [vmem:[%s10037_s0 + $0x124] ss:$108 sps:$4 sm:$0xff]  }
 0x13b   :  { %v4148_v40 = vpop.f32.mrf.mxu1  ;;  %4825 = vmatmul.mubr.bf16.gmra.mxu1 %v6999_v15  ;;  %v8767_v43 = vadd.f32 %v4144_v27, %v4032_v34  ;;  %v4036_v45 = vadd.f32 %v4035_v37, %v8411_v44  ;;  %4864 = vmatpush2.bf16.msra.mxu0 %v7002_v19  ;;  %v7028_v15 = vld [vmem:[%s10036_s1 + $0xa64] ss:$8 sps:$4 sm:$0xff]   ;;  %v7034_v19 = vld [vmem:[%s10037_s0 + $0x11c] ss:$108 sps:$4 sm:$0xff]  }
 0x13c   :  { %4977 = vmatpush2.bf16.msra.mxu1 %v7005_v25  ;;  %v4037_v50 = vpop.f32.mrf.mxu0  ;;  %4865 = vmatprep.subr.bf16.mxu0 %v7010_v28  ;;  %v7026_v27 = vld [vmem:[%s10036_s1 + $0xa60] ss:$8 sps:$4 sm:$0xff]   ;;  %v7043_v37 = vld [vmem:[%s10036_s1 + $0xb54] ss:$8 sps:$4 sm:$0xff]  }
 0x13d   :  { %v4150_v51 = vpop.f32.mrf.mxu1  ;;  %4978 = vmatprep.subr.bf16.mxu1 %v7013_v29  ;;  %v8779_v56 = vadd.f32 %v4148_v40, %v4036_v45  ;;  %v4038_v58 = vadd.f32 %v4037_v50, %v8422_v48  ;;  %4867 = vmatprep.mubr.bf16.mxu0 %v7016_v35  ;;  %v7029_v29 = vld [vmem:[%s10036_s1 + $0xb60] ss:$8 sps:$4 sm:$0xff]  }
 0x13e   :  { %4980 = vmatprep.mubr.bf16.mxu1 %v7019_v36  ;;  %v4039_v0 = vpop.f32.mrf.mxu0  ;;  %v7040_v36 = vld [vmem:[%s10036_s1 + $0xa54] ss:$8 sps:$4 sm:$0xff]   ;;  %v7035_v45 = vld [vmem:[%s10037_s0 + $0x120] ss:$108 sps:$4 sm:$0xff]  }
 0x13f   :  { %v4152_v1 = vpop.f32.mrf.mxu1  ;;  %v8791_v5 = vadd.f32 %v4150_v51, %v4038_v58  ;;  %v4040_v7 = vadd.f32 %v4039_v0, %v8411_v44  ;;  %4866 = vmatpush2.bf16.msra.mxu0 %v7008_v42  ;;  %v7032_v42 = vld [vmem:[%s10037_s0 + $0x118] ss:$108 sps:$4 sm:$0xff]  }
 0x140   :  { %4979 = vmatpush2.bf16.msra.mxu1 %v7011_v47  ;;  %v4041_v11 = vpop.f32.mrf.mxu0  ;;  %5061 = vmatprep.subr.bf16.mxu0 %v7022_v53  ;;  %v7038_v51 = vld [vmem:[%s10036_s1 + $0xa50] ss:$8 sps:$4 sm:$0xff]   ;;  %v7049_v0 = vld [vmem:[%s10036_s1 + $0xb44] ss:$8 sps:$4 sm:$0xff]  }
 0x141   :  { %v4154_v13 = vpop.f32.mrf.mxu1  ;;  %5174 = vmatprep.subr.bf16.mxu1 %v7025_v55  ;;  %v8803_v18 = vadd.f32 %v4152_v1, %v4040_v7  ;;  %v4042_v44 = vadd.f32 %v4041_v11, %v8422_v48  ;;  %v7041_v55 = vld [vmem:[%s10036_s1 + $0xb50] ss:$8 sps:$4 sm:$0xff]   ;;  %v7055_v7 = vld [vmem:[%s10037_s0 + $0x1fc] ss:$108 sps:$4 sm:$0xff]  }
 0x142   :  { %v4191_v25 = vpop.f32.mrf.mxu0  ;;  %4868 = vmatmul.mubr.bf16.vlgmr.msra.gmra.mxu0 %v7014_v59 }
 0x143   :  { %v4304_v26 = vpop.f32.mrf.mxu1  ;;  %4981 = vmatmul.mubr.bf16.vlgmr.msra.gmra.mxu1 %v7017_v61  ;;  %v8815_v28 = vadd.f32 %v4154_v13, %v4042_v44  ;;  %v4192_v48 = vadd.f32 %v4191_v25, %v8443_v60  ;;  %5062 = vmatpush1.bf16.msra.mxu0 %v7020_v4  ;;  %v7046_v61 = vld [vmem:[%s10036_s1 + $0xa44] ss:$8 sps:$4 sm:$0xff]   ;;  %v7052_v4 = vld [vmem:[%s10037_s0 + $0x1f4] ss:$108 sps:$4 sm:$0xff]  }
 0x144   :  { %5175 = vmatpush1.bf16.msra.mxu1 %v7023_v8  ;;  %v4193_v34 = vpop.f32.mrf.mxu0  ;;  %5063 = vmatprep.subr.bf16.mxu0 %v7028_v15  ;;  %v7044_v13 = vld [vmem:[%s10036_s1 + $0xa40] ss:$8 sps:$4 sm:$0xff]   ;;  %v7061_v25 = vld [vmem:[%s10036_s1 + $0xb34] ss:$8 sps:$4 sm:$0xff]  }
 0x145   :  { %v4306_v35 = vpop.f32.mrf.mxu1  ;;  %5176 = vmatprep.subr.bf16.mxu1 %v7031_v16  ;;  %v8827_v40 = vadd.f32 %v4304_v26, %v4192_v48  ;;  %v4194_v60 = vadd.f32 %v4193_v34, %v8455_v3  ;;  %4877 = vmatprep.mubr.bf16.mxu0 %v7034_v19  ;;  %v7047_v16 = vld [vmem:[%s10036_s1 + $0xb40] ss:$8 sps:$4 sm:$0xff]   ;;  %v7053_v48 = vld [vmem:[%s10037_s0 + $0x1f8] ss:$108 sps:$4 sm:$0xff]  }
 0x146   :  { %4990 = vmatprep.mubr.bf16.mxu1 %v7037_v23  ;;  %v4195_v47 = vpop.f32.mrf.mxu0  ;;  %v7058_v23 = vld [vmem:[%s10036_s1 + $0xa34] ss:$8 sps:$4 sm:$0xff]  }
 0x147   :  { %v4308_v50 = vpop.f32.mrf.mxu1  ;;  %v8839_v53 = vadd.f32 %v4306_v35, %v4194_v60  ;;  %v4196_v3 = vadd.f32 %v4195_v47, %v8467_v10  ;;  %5064 = vmatpush1.bf16.msra.mxu0 %v7026_v27  ;;  %v7050_v27 = vld [vmem:[%s10037_s0 + $0x1f0] ss:$108 sps:$4 sm:$0xff]   ;;  %v7067_v47 = vld [vmem:[%s10036_s1 + $0xb24] ss:$8 sps:$4 sm:$0xff]  }
 0x148   :  { %5177 = vmatpush1.bf16.msra.mxu1 %v7029_v29  ;;  %v4197_v58 = vpop.f32.mrf.mxu0  ;;  %5065 = vmatprep.subr.bf16.mxu0 %v7040_v36  ;;  %v7056_v35 = vld [vmem:[%s10036_s1 + $0xa30] ss:$8 sps:$4 sm:$0xff]  }
 0x149   :  { %v4310_v59 = vpop.f32.mrf.mxu1  ;;  %5178 = vmatprep.subr.bf16.mxu1 %v7043_v37  ;;  %v8851_v1 = vadd.f32 %v4308_v50, %v4196_v3  ;;  %v4198_v10 = vadd.f32 %v4197_v58, %v8479_v17  ;;  %v7059_v37 = vld [vmem:[%s10036_s1 + $0xb30] ss:$8 sps:$4 sm:$0xff]   ;;  %v7073_v3 = vld [vmem:[%s10037_s0 + $0x2d4] ss:$108 sps:$4 sm:$0xff]  }
 0x14a   :  { %v4201_v8 = vpop.f32.mrf.mxu0  ;;  %4878 = vmatmul.mubr.bf16.gmra.mxu0 %v7032_v42 }
 0x14b   :  { %v4314_v11 = vpop.f32.mrf.mxu1  ;;  %4991 = vmatmul.mubr.bf16.gmra.mxu1 %v7035_v45  ;;  %v8863_v15 = vadd.f32 %v4310_v59, %v4198_v10  ;;  %v4202_v17 = vadd.f32 %v4201_v8, %v8491_v24  ;;  %5066 = vmatpush1.bf16.msra.mxu0 %v7038_v51  ;;  %v7064_v45 = vld [vmem:[%s10036_s1 + $0xa24] ss:$8 sps:$4 sm:$0xff]   ;;  %v7062_v59 = vld [vmem:[%s10036_s1 + $0xa20] ss:$8 sps:$4 sm:$0xff]   ;;  %v7079_v8 = vld [vmem:[%s10036_s1 + $0xb14] ss:$8 sps:$4 sm:$0xff]  }
 0x14c   :  { %5179 = vmatpush1.bf16.msra.mxu1 %v7041_v55  ;;  %v4203_v44 = vpop.f32.mrf.mxu0  ;;  %5067 = vmatprep.subr.bf16.mxu0 %v7046_v61  ;;  %v7070_v51 = vld [vmem:[%s10037_s0 + $0x2cc] ss:$108 sps:$4 sm:$0xff]  }
 0x14d   :  { %v4316_v19 = vpop.f32.mrf.mxu1  ;;  %5180 = vmatprep.subr.bf16.mxu1 %v7049_v0  ;;  %v8875_v26 = vadd.f32 %v4314_v11, %v4202_v17  ;;  %v4204_v24 = vadd.f32 %v4203_v44, %v8503_v31  ;;  %4887 = vmatprep.mubr.bf16.mxu0 %v7052_v4  ;;  %v7065_v0 = vld [vmem:[%s10036_s1 + $0xb20] ss:$8 sps:$4 sm:$0xff]   ;;  %v7071_v17 = vld [vmem:[%s10037_s0 + $0x2d0] ss:$108 sps:$4 sm:$0xff]  }
 0x14e   :  { %5000 = vmatprep.mubr.bf16.mxu1 %v7055_v7  ;;  %v4205_v29 = vpop.f32.mrf.mxu0  ;;  %v7076_v7 = vld [vmem:[%s10036_s1 + $0xa14] ss:$8 sps:$4 sm:$0xff]  }
 0x14f   :  { %v4318_v34 = vpop.f32.mrf.mxu1  ;;  %v8887_v36 = vadd.f32 %v4316_v19, %v4204_v24  ;;  %v4206_v31 = vadd.f32 %v4205_v29, %v8515_v38  ;;  %5068 = vmatpush1.bf16.msra.mxu0 %v7044_v13  ;;  %v7068_v13 = vld [vmem:[%s10037_s0 + $0x2c8] ss:$108 sps:$4 sm:$0xff]   ;;  %v7074_v19 = vld [vmem:[%s10036_s1 + $0xa10] ss:$8 sps:$4 sm:$0xff]   ;;  %v7085_v29 = vld [vmem:[%s10036_s1 + $0xb04] ss:$8 sps:$4 sm:$0xff]  }
 0x150   :  { %5181 = vmatpush1.bf16.msra.mxu1 %v7047_v16  ;;  %v4207_v60 = vpop.f32.mrf.mxu0  ;;  %5069 = vmatprep.subr.bf16.mxu0 %v7058_v23 }
 0x151   :  { %v4320_v42 = vpop.f32.mrf.mxu1  ;;  %5182 = vmatprep.subr.bf16.mxu1 %v7061_v25  ;;  %v8899_v50 = vadd.f32 %v4318_v34, %v4206_v31  ;;  %v4208_v38 = vadd.f32 %v4207_v60, %v8527_v46  ;;  %v7077_v25 = vld [vmem:[%s10036_s1 + $0xb10] ss:$8 sps:$4 sm:$0xff]  }
 0x152   :  { %v4211_v55 = vpop.f32.mrf.mxu0  ;;  %4888 = vmatmul.mubr.bf16.gmra.mxu0 %v7050_v27  ;;  %v7091_v31 = vld [vmem:[%s10037_s0 + $0x3ac] ss:$108 sps:$4 sm:$0xff]  }
 0x153   :  { %v4324_v58 = vpop.f32.mrf.mxu1  ;;  %5001 = vmatmul.mubr.bf16.gmra.mxu1 %v7053_v48  ;;  %v8911_v61 = vadd.f32 %v4320_v42, %v4208_v38  ;;  %v4212_v46 = vadd.f32 %v4211_v55, %v8539_v54  ;;  %5070 = vmatpush1.bf16.msra.mxu0 %v7056_v35  ;;  %v7082_v48 = vld [vmem:[%s10036_s1 + $0xa04] ss:$8 sps:$4 sm:$0xff]   ;;  %v7080_v42 = vld [vmem:[%s10036_s1 + $0xa00] ss:$8 sps:$4 sm:$0xff]   ;;  %v7097_v55 = vld [vmem:[%s10036_s1 + $0xbf4] ss:$8 sps:$4 sm:$0xff]  }
 0x154   :  { %5183 = vmatpush1.bf16.msra.mxu1 %v7059_v37  ;;  %v4213_v10 = vpop.f32.mrf.mxu0  ;;  %5071 = vmatprep.subr.bf16.mxu0 %v7064_v45  ;;  %v7088_v35 = vld [vmem:[%s10037_s0 + $0x3a4] ss:$108 sps:$4 sm:$0xff]  }
 0x155   :  { %v4326_v4 = vpop.f32.mrf.mxu1  ;;  %5184 = vmatprep.subr.bf16.mxu1 %v7067_v47  ;;  %v8923_v11 = vadd.f32 %v4324_v58, %v4212_v46  ;;  %v4214_v54 = vadd.f32 %v4213_v10, %v8551_v62  ;;  %4897 = vmatprep.mubr.bf16.mxu0 %v7070_v51  ;;  %v7083_v47 = vld [vmem:[%s10036_s1 + $0xb00] ss:$8 sps:$4 sm:$0xff]  }
 0x156   :  { %5010 = vmatprep.mubr.bf16.mxu1 %v7073_v3  ;;  %v4215_v16 = vpop.f32.mrf.mxu0  ;;  %v7094_v3 = vld [vmem:[%s10036_s1 + $0xaf4] ss:$8 sps:$4 sm:$0xff]  }
 0x157   :  { %v4328_v44 = vpop.f32.mrf.mxu1  ;;  %v8935_v23 = vadd.f32 %v4326_v4, %v4214_v54  ;;  %v4216_v62 = vadd.f32 %v4215_v16, %v8563_v6  ;;  %5072 = vmatpush1.bf16.msra.mxu0 %v7062_v59  ;;  %v7086_v59 = vld [vmem:[%s10037_s0 + $0x3a0] ss:$108 sps:$4 sm:$0xff]   ;;  %v7089_v46 = vld [vmem:[%s10037_s0 + $0x3a8] ss:$108 sps:$4 sm:$0xff]   ;;  %v7092_v4 = vld [vmem:[%s10036_s1 + $0xaf0] ss:$8 sps:$4 sm:$0xff]  }
 0x158   :  { %5185 = vmatpush1.bf16.msra.mxu1 %v7065_v0  ;;  %v4217_v24 = vpop.f32.mrf.mxu0  ;;  %5073 = vmatprep.subr.bf16.mxu0 %v7076_v7  ;;  %v7103_v16 = vld [vmem:[%s10036_s1 + $0xbe4] ss:$8 sps:$4 sm:$0xff]  }
 0x159   :  { %v4330_v27 = vpop.f32.mrf.mxu1  ;;  %5186 = vmatprep.subr.bf16.mxu1 %v7079_v8  ;;  %v8947_v34 = vadd.f32 %v4328_v44, %v4216_v62  ;;  %v4218_v6 = vadd.f32 %v4217_v24, %v8575_v14  ;;  %v7095_v8 = vld [vmem:[%s10036_s1 + $0xbf0] ss:$8 sps:$4 sm:$0xff]  }
 0x15a   :  { %v4221_v37 = vpop.f32.mrf.mxu0  ;;  %4898 = vmatmul.mubr.bf16.gmra.mxu0 %v7068_v13  ;;  %v7109_v62 = vld [vmem:[%s10037_s0 + $0x484] ss:$108 sps:$4 sm:$0xff]  }
 0x15b   :  { %v4334_v60 = vpop.f32.mrf.mxu1  ;;  %5011 = vmatmul.mubr.bf16.gmra.mxu1 %v7071_v17  ;;  %v8959_v45 = vadd.f32 %v4330_v27, %v4218_v6  ;;  %v4222_v14 = vadd.f32 %v4221_v37, %v8587_v22  ;;  %5074 = vmatpush1.bf16.msra.mxu0 %v7074_v19  ;;  %v7100_v17 = vld [vmem:[%s10036_s1 + $0xae4] ss:$8 sps:$4 sm:$0xff]   ;;  %v7106_v19 = vld [vmem:[%s10037_s0 + $0x47c] ss:$108 sps:$4 sm:$0xff]  }
 0x15c   :  { %5187 = vmatpush1.bf16.msra.mxu1 %v7077_v25  ;;  %v4223_v38 = vpop.f32.mrf.mxu0  ;;  %5075 = vmatprep.subr.bf16.mxu0 %v7082_v48  ;;  %v7098_v27 = vld [vmem:[%s10036_s1 + $0xae0] ss:$8 sps:$4 sm:$0xff]   ;;  %v7115_v37 = vld [vmem:[%s10036_s1 + $0xbd4] ss:$8 sps:$4 sm:$0xff]  }
 0x15d   :  { %v4336_v51 = vpop.f32.mrf.mxu1  ;;  %5188 = vmatprep.subr.bf16.mxu1 %v7085_v29  ;;  %v8971_v58 = vadd.f32 %v4334_v60, %v4222_v14  ;;  %v4224_v22 = vadd.f32 %v4223_v38, %v8599_v30  ;;  %4907 = vmatprep.mubr.bf16.mxu0 %v7088_v35  ;;  %v7101_v29 = vld [vmem:[%s10036_s1 + $0xbe0] ss:$8 sps:$4 sm:$0xff]  }
 0x15e   :  { %5020 = vmatprep.mubr.bf16.mxu1 %v7091_v31  ;;  %v4225_v0 = vpop.f32.mrf.mxu0  ;;  %v7112_v31 = vld [vmem:[%s10036_s1 + $0xad4] ss:$8 sps:$4 sm:$0xff]   ;;  %v7107_v14 = vld [vmem:[%s10037_s0 + $0x480] ss:$108 sps:$4 sm:$0xff]  }
 0x15f   :  { %v4338_v10 = vpop.f32.mrf.mxu1  ;;  %v8983_v7 = vadd.f32 %v4336_v51, %v4224_v22  ;;  %v4226_v30 = vadd.f32 %v4225_v0, %v8611_v39  ;;  %5076 = vmatpush1.bf16.msra.mxu0 %v7080_v42  ;;  %v7104_v42 = vld [vmem:[%s10037_s0 + $0x478] ss:$108 sps:$4 sm:$0xff]  }
 0x160   :  { %5189 = vmatpush1.bf16.msra.mxu1 %v7083_v47  ;;  %v4227_v54 = vpop.f32.mrf.mxu0  ;;  %5077 = vmatprep.subr.bf16.mxu0 %v7094_v3  ;;  %v7110_v51 = vld [vmem:[%s10036_s1 + $0xad0] ss:$8 sps:$4 sm:$0xff]   ;;  %v7121_v0 = vld [vmem:[%s10036_s1 + $0xbc4] ss:$8 sps:$4 sm:$0xff]  }
 0x161   :  { %v4340_v13 = vpop.f32.mrf.mxu1  ;;  %5190 = vmatprep.subr.bf16.mxu1 %v7097_v55  ;;  %v8995_v44 = vadd.f32 %v4338_v10, %v4226_v30  ;;  %v4228_v39 = vadd.f32 %v4227_v54, %v8623_v49  ;;  %v7113_v55 = vld [vmem:[%s10036_s1 + $0xbd0] ss:$8 sps:$4 sm:$0xff]   ;;  %v7127_v30 = vld [vmem:[%s10037_s0 + $0x55c] ss:$108 sps:$4 sm:$0xff]  }
 0x162   :  { %v4231_v25 = vpop.f32.mrf.mxu0  ;;  %4908 = vmatmul.mubr.bf16.gmra.mxu0 %v7086_v59 }
 0x163   :  { %v4344_v24 = vpop.f32.mrf.mxu1  ;;  %5021 = vmatmul.mubr.bf16.gmra.mxu1 %v7089_v46  ;;  %v9007_v48 = vadd.f32 %v4340_v13, %v4228_v39  ;;  %v4232_v49 = vadd.f32 %v4231_v25, %v8635_v57  ;;  %5078 = vmatpush2.bf16.msra.mxu0 %v7092_v4  ;;  %v7118_v46 = vld [vmem:[%s10036_s1 + $0xac4] ss:$8 sps:$4 sm:$0xff]   ;;  %v7124_v4 = vld [vmem:[%s10037_s0 + $0x554] ss:$108 sps:$4 sm:$0xff]  }
 0x164   :  { %5191 = vmatpush2.bf16.msra.mxu1 %v7095_v8  ;;  %v4233_v6 = vpop.f32.mrf.mxu0  ;;  %5079 = vmatprep.subr.bf16.mxu0 %v7100_v17  ;;  %v7116_v13 = vld [vmem:[%s10036_s1 + $0xac0] ss:$8 sps:$4 sm:$0xff]   ;;  %v7133_v25 = vld [vmem:[%s10036_s1 + $0xbb4] ss:$8 sps:$4 sm:$0xff]  }
 0x165   :  { %v4346_v35 = vpop.f32.mrf.mxu1  ;;  %5192 = vmatprep.subr.bf16.mxu1 %v7103_v16  ;;  %v9019_v60 = vadd.f32 %v4344_v24, %v4232_v49  ;;  %v4234_v57 = vadd.f32 %v4233_v6, %v8647_v2  ;;  %4917 = vmatprep.mubr.bf16.mxu0 %v7106_v19  ;;  %v7119_v16 = vld [vmem:[%s10036_s1 + $0xbc0] ss:$8 sps:$4 sm:$0xff]   ;;  %v7125_v49 = vld [vmem:[%s10037_s0 + $0x558] ss:$108 sps:$4 sm:$0xff]  }
 0x166   :  { %5030 = vmatprep.mubr.bf16.mxu1 %v7109_v62  ;;  %v4235_v47 = vpop.f32.mrf.mxu0  ;;  %v7130_v62 = vld [vmem:[%s10036_s1 + $0xab4] ss:$8 sps:$4 sm:$0xff]  }
 0x167   :  { %v4348_v38 = vpop.f32.mrf.mxu1  ;;  %v9031_v3 = vadd.f32 %v4346_v35, %v4234_v57  ;;  %v4236_v2 = vadd.f32 %v4235_v47, %v8659_v12  ;;  %5080 = vmatpush2.bf16.msra.mxu0 %v7098_v27  ;;  %v7122_v27 = vld [vmem:[%s10037_s0 + $0x550] ss:$108 sps:$4 sm:$0xff]   ;;  %v7139_v47 = vld [vmem:[%s10036_s1 + $0xba4] ss:$8 sps:$4 sm:$0xff]  }
 0x168   :  { %5193 = vmatpush2.bf16.msra.mxu1 %v7101_v29  ;;  %v4237_v22 = vpop.f32.mrf.mxu0  ;;  %5081 = vmatprep.subr.bf16.mxu0 %v7112_v31  ;;  %v7128_v35 = vld [vmem:[%s10036_s1 + $0xab0] ss:$8 sps:$4 sm:$0xff]  }
 0x169   :  { %v4350_v59 = vpop.f32.mrf.mxu1  ;;  %5194 = vmatprep.subr.bf16.mxu1 %v7115_v37  ;;  %v9043_v10 = vadd.f32 %v4348_v38, %v4236_v2  ;;  %v4238_v12 = vadd.f32 %v4237_v22, %v8671_v21  ;;  %v7131_v37 = vld [vmem:[%s10036_s1 + $0xbb0] ss:$8 sps:$4 sm:$0xff]   ;;  %v7145_v2 = vld [vmem:[%s10037_s0 + $0x634] ss:$108 sps:$4 sm:$0xff]  }
 0x16a   :  { %v4241_v8 = vpop.f32.mrf.mxu0  ;;  %4918 = vmatmul.mubr.bf16.gmra.mxu0 %v7104_v42 }
 0x16b   :  { %v4354_v54 = vpop.f32.mrf.mxu1  ;;  %5031 = vmatmul.mubr.bf16.gmra.mxu1 %v7107_v14  ;;  %v9055_v17 = vadd.f32 %v4350_v59, %v4238_v12  ;;  %v4242_v21 = vadd.f32 %v4241_v8, %v8683_v32  ;;  %5082 = vmatpush2.bf16.msra.mxu0 %v7110_v51  ;;  %v7136_v14 = vld [vmem:[%s10036_s1 + $0xaa4] ss:$8 sps:$4 sm:$0xff]   ;;  %v7134_v59 = vld [vmem:[%s10036_s1 + $0xaa0] ss:$8 sps:$4 sm:$0xff]   ;;  %v7151_v8 = vld [vmem:[%s10036_s1 + $0xb94] ss:$8 sps:$4 sm:$0xff]  }
 0x16c   :  { %5195 = vmatpush2.bf16.msra.mxu1 %v7113_v55  ;;  %v4243_v39 = vpop.f32.mrf.mxu0  ;;  %5083 = vmatprep.subr.bf16.mxu0 %v7118_v46  ;;  %v7142_v51 = vld [vmem:[%s10037_s0 + $0x62c] ss:$108 sps:$4 sm:$0xff]  }
 0x16d   :  { %v4356_v19 = vpop.f32.mrf.mxu1  ;;  %5196 = vmatprep.subr.bf16.mxu1 %v7121_v0  ;;  %v9067_v24 = vadd.f32 %v4354_v54, %v4242_v21  ;;  %v4244_v32 = vadd.f32 %v4243_v39, %v8695_v41  ;;  %4927 = vmatprep.mubr.bf16.mxu0 %v7124_v4  ;;  %v7137_v0 = vld [vmem:[%s10036_s1 + $0xba0] ss:$8 sps:$4 sm:$0xff]   ;;  %v7143_v21 = vld [vmem:[%s10037_s0 + $0x630] ss:$108 sps:$4 sm:$0xff]  }
 0x16e   :  { %5040 = vmatprep.mubr.bf16.mxu1 %v7127_v30  ;;  %v4245_v29 = vpop.f32.mrf.mxu0  ;;  %v7148_v30 = vld [vmem:[%s10036_s1 + $0xa94] ss:$8 sps:$4 sm:$0xff]  }
 0x16f   :  { %v4358_v6 = vpop.f32.mrf.mxu1  ;;  %v9079_v31 = vadd.f32 %v4356_v19, %v4244_v32  ;;  %v4246_v41 = vadd.f32 %v4245_v29, %v8707_v52  ;;  %5084 = vmatpush2.bf16.msra.mxu0 %v7116_v13  ;;  %v7140_v13 = vld [vmem:[%s10037_s0 + $0x628] ss:$108 sps:$4 sm:$0xff]   ;;  %v7146_v19 = vld [vmem:[%s10036_s1 + $0xa90] ss:$8 sps:$4 sm:$0xff]   ;;  %v7157_v29 = vld [vmem:[%s10036_s1 + $0xb84] ss:$8 sps:$4 sm:$0xff]  }
 0x170   :  { %5197 = vmatpush2.bf16.msra.mxu1 %v7119_v16  ;;  %v4247_v57 = vpop.f32.mrf.mxu0  ;;  %5085 = vmatprep.subr.bf16.mxu0 %v7130_v62 }
 0x171   :  { %v4360_v42 = vpop.f32.mrf.mxu1  ;;  %5198 = vmatprep.subr.bf16.mxu1 %v7133_v25  ;;  %v9091_v38 = vadd.f32 %v4358_v6, %v4246_v41  ;;  %v4248_v52 = vadd.f32 %v4247_v57, %v8719_v63  ;;  %v7149_v25 = vld [vmem:[%s10036_s1 + $0xb90] ss:$8 sps:$4 sm:$0xff]   ;;  %v7163_v41 = vld [vmem:[%s10037_s0 + $0x5c] ss:$108 sps:$4 sm:$0xff]  }
 0x172   :  { %v4251_v55 = vpop.f32.mrf.mxu0  ;;  %4928 = vmatmul.mubr.bf16.gmra.mxu0 %v7122_v27 }
 0x173   :  { %v4364_v22 = vpop.f32.mrf.mxu1  ;;  %5041 = vmatmul.mubr.bf16.gmra.mxu1 %v7125_v49  ;;  %v9103_v46 = vadd.f32 %v4360_v42, %v4248_v52  ;;  %v4252_v63 = vadd.f32 %v4251_v55, %v8731_v9  ;;  %5086 = vmatpush2.bf16.msra.mxu0 %v7128_v35  ;;  %v7154_v49 = vld [vmem:[%s10036_s1 + $0xa84] ss:$8 sps:$4 sm:$0xff]   ;;  %v7160_v35 = vld [vmem:[%s10037_s0 + $0x54] ss:$108 sps:$4 sm:$0xff]  }
 0x174   :  { %5199 = vmatpush2.bf16.msra.mxu1 %v7131_v37  ;;  %v4253_v12 = vpop.f32.mrf.mxu0  ;;  %5087 = vmatprep.subr.bf16.mxu0 %v7136_v14  ;;  %v7152_v42 = vld [vmem:[%s10036_s1 + $0xa80] ss:$8 sps:$4 sm:$0xff]   ;;  %v7169_v55 = vld [vmem:[%s10036_s1 + $0xd74] ss:$8 sps:$4 sm:$0xff]  }
 0x175   :  { %v4366_v4 = vpop.f32.mrf.mxu1  ;;  %5200 = vmatprep.subr.bf16.mxu1 %v7139_v47  ;;  %v9115_v54 = vadd.f32 %v4364_v22, %v4252_v63  ;;  %v4254_v9 = vadd.f32 %v4253_v12, %v8743_v20  ;;  %4937 = vmatprep.mubr.bf16.mxu0 %v7142_v51  ;;  %v7155_v47 = vld [vmem:[%s10036_s1 + $0xb80] ss:$8 sps:$4 sm:$0xff]   ;;  %v7161_v63 = vld [vmem:[%s10037_s0 + $0x58] ss:$108 sps:$4 sm:$0xff]  }
 0x176   :  { %5050 = vmatprep.mubr.bf16.mxu1 %v7145_v2  ;;  %v4255_v16 = vpop.f32.mrf.mxu0  ;;  %v7166_v2 = vld [vmem:[%s10036_s1 + $0xc74] ss:$8 sps:$4 sm:$0xff]  }
 0x177   :  { %v4368_v39 = vpop.f32.mrf.mxu1  ;;  %v9127_v62 = vadd.f32 %v4366_v4, %v4254_v9  ;;  %v4256_v20 = vadd.f32 %v4255_v16, %v8755_v33  ;;  %5088 = vmatpush2.bf16.msra.mxu0 %v7134_v59  ;;  %v7158_v59 = vld [vmem:[%s10037_s0 + $0x50] ss:$108 sps:$4 sm:$0xff]   ;;  %v7175_v16 = vld [vmem:[%s10037_s0 + $0x12c] ss:$108 sps:$4 sm:$0xff]  }
 0x178   :  { %5201 = vmatpush2.bf16.msra.mxu1 %v7137_v0  ;;  %v4257_v32 = vpop.f32.mrf.mxu0  ;;  %5089 = vmatprep.subr.bf16.mxu0 %v7148_v30  ;;  %v7164_v4 = vld [vmem:[%s10036_s1 + $0xc70] ss:$8 sps:$4 sm:$0xff]  }
 0x179   :  { %v4370_v27 = vpop.f32.mrf.mxu1  ;;  %5202 = vmatprep.subr.bf16.mxu1 %v7151_v8  ;;  %v9139_v6 = vadd.f32 %v4368_v39, %v4256_v20  ;;  %v4258_v33 = vadd.f32 %v4257_v32, %v8767_v43  ;;  %v7167_v8 = vld [vmem:[%s10036_s1 + $0xd70] ss:$8 sps:$4 sm:$0xff]   ;;  %v7184_v20 = vld [vmem:[%s10036_s1 + $0xd64] ss:$8 sps:$4 sm:$0xff]  }
 0x17a   :  { %v4261_v37 = vpop.f32.mrf.mxu0  ;;  %4938 = vmatmul.mubr.bf16.gmra.mxu0 %v7140_v13 }
 0x17b   :  { %v4374_v57 = vpop.f32.mrf.mxu1  ;;  %5051 = vmatmul.mubr.bf16.gmra.mxu1 %v7143_v21  ;;  %v9151_v14 = vadd.f32 %v4370_v27, %v4258_v33  ;;  %v4262_v43 = vadd.f32 %v4261_v37, %v8779_v56  ;;  %5090 = vmatpush2.bf16.msra.mxu0 %v7146_v19  ;;  %v7172_v21 = vld [vmem:[%s10036_s1 + $0xc64] ss:$8 sps:$4 sm:$0xff]   ;;  %v7178_v19 = vld [vmem:[%s10037_s0 + $0x134] ss:$108 sps:$4 sm:$0xff]  }
 0x17c   :  { %5203 = vmatpush2.bf16.msra.mxu1 %v7149_v25  ;;  %v4263_v52 = vpop.f32.mrf.mxu0  ;;  %5091 = vmatprep.subr.bf16.mxu0 %v7154_v49  ;;  %v7170_v27 = vld [vmem:[%s10036_s1 + $0xc60] ss:$8 sps:$4 sm:$0xff]   ;;  %v7199_v37 = vld [vmem:[%s10036_s1 + $0xd54] ss:$8 sps:$4 sm:$0xff]  }
 0x17d   :  { %v4376_v51 = vpop.f32.mrf.mxu1  ;;  %5204 = vmatprep.subr.bf16.mxu1 %v7157_v29  ;;  %v9163_v22 = vadd.f32 %v4374_v57, %v4262_v43  ;;  %v4264_v56 = vadd.f32 %v4263_v52, %v8791_v5  ;;  %5093 = vmatprep.mubr.bf16.mxu0 %v7160_v35  ;;  %v7182_v29 = vld [vmem:[%s10036_s1 + $0xd60] ss:$8 sps:$4 sm:$0xff]   ;;  %v7176_v43 = vld [vmem:[%s10037_s0 + $0x130] ss:$108 sps:$4 sm:$0xff]  }
 0x17e   :  { %5206 = vmatprep.mubr.bf16.mxu1 %v7163_v41  ;;  %v4265_v0 = vpop.f32.mrf.mxu0  ;;  %v7181_v41 = vld [vmem:[%s10036_s1 + $0xc54] ss:$8 sps:$4 sm:$0xff]  }
 0x17f   :  { %v4378_v12 = vpop.f32.mrf.mxu1  ;;  %v9175_v30 = vadd.f32 %v4376_v51, %v4264_v56  ;;  %v4266_v5 = vadd.f32 %v4265_v0, %v8803_v18  ;;  %5092 = vmatpush2.bf16.msra.mxu0 %v7152_v42  ;;  %v7173_v42 = vld [vmem:[%s10037_s0 + $0x128] ss:$108 sps:$4 sm:$0xff]   ;;  %v7179_v51 = vld [vmem:[%s10036_s1 + $0xc50] ss:$8 sps:$4 sm:$0xff]  }
 0x180   :  { %5205 = vmatpush2.bf16.msra.mxu1 %v7155_v47  ;;  %v4267_v9 = vpop.f32.mrf.mxu0  ;;  %5287 = vmatprep.subr.bf16.mxu0 %v7166_v2  ;;  %v7193_v0 = vld [vmem:[%s10037_s0 + $0x20c] ss:$108 sps:$4 sm:$0xff]  }
 0x181   :  { %v4380_v13 = vpop.f32.mrf.mxu1  ;;  %5400 = vmatprep.subr.bf16.mxu1 %v7169_v55  ;;  %v9187_v39 = vadd.f32 %v4378_v12, %v4266_v5  ;;  %v4268_v18 = vadd.f32 %v4267_v9, %v8815_v28  ;;  %v7190_v55 = vld [vmem:[%s10037_s0 + $0x204] ss:$108 sps:$4 sm:$0xff]  }
 0x182   :  { %v4417_v25 = vpop.f32.mrf.mxu0  ;;  %5094 = vmatmul.mubr.bf16.vlgmr.msra.gmra.mxu0 %v7158_v59  ;;  %v7214_v9 = vld [vmem:[%s10036_s1 + $0xd44] ss:$8 sps:$4 sm:$0xff]  }
 0x183   :  { %v4530_v32 = vpop.f32.mrf.mxu1  ;;  %5207 = vmatmul.mubr.bf16.vlgmr.msra.gmra.mxu1 %v7161_v63  ;;  %v9199_v49 = vadd.f32 %v4380_v13, %v4268_v18  ;;  %v4418_v28 = vadd.f32 %v4417_v25, %v8827_v40  ;;  %5288 = vmatpush1.bf16.msra.mxu0 %v7164_v4  ;;  %v7187_v63 = vld [vmem:[%s10036_s1 + $0xc44] ss:$8 sps:$4 sm:$0xff]   ;;  %v7197_v4 = vld [vmem:[%s10036_s1 + $0xd50] ss:$8 sps:$4 sm:$0xff]  }
 0x184   :  { %5401 = vmatpush1.bf16.msra.mxu1 %v7167_v8  ;;  %v4419_v33 = vpop.f32.mrf.mxu0  ;;  %5289 = vmatprep.subr.bf16.mxu0 %v7172_v21 }
 0x185   :  { %v4532_v35 = vpop.f32.mrf.mxu1  ;;  %5103 = vmatprep.mubr.bf16.mxu0 %v7175_v16  ;;  %v9211_v57 = vadd.f32 %v4530_v32, %v4418_v28  ;;  %v4420_v40 = vadd.f32 %v4419_v33, %v8839_v53  ;;  %5216 = vmatprep.mubr.bf16.mxu1 %v7178_v19  ;;  %v7188_v19 = vld [vmem:[%s10037_s0 + $0x200] ss:$108 sps:$4 sm:$0xff]   ;;  %v7191_v32 = vld [vmem:[%s10037_s0 + $0x208] ss:$108 sps:$4 sm:$0xff]   ;;  %v7194_v33 = vld [vmem:[%s10036_s1 + $0xc30] ss:$8 sps:$4 sm:$0xff]  }
 0x186   :  { %5402 = vmatprep.subr.bf16.mxu1 %v7184_v20  ;;  %v4421_v47 = vpop.f32.mrf.mxu0  ;;  %v7196_v20 = vld [vmem:[%s10036_s1 + $0xc34] ss:$8 sps:$4 sm:$0xff]  }
 0x187   :  { %v4534_v52 = vpop.f32.mrf.mxu1  ;;  %v9223_v2 = vadd.f32 %v4532_v35, %v4420_v40  ;;  %v4422_v53 = vadd.f32 %v4421_v47, %v8851_v1  ;;  %5290 = vmatpush1.bf16.msra.mxu0 %v7170_v27  ;;  %v7212_v27 = vld [vmem:[%s10036_s1 + $0xd40] ss:$8 sps:$4 sm:$0xff]  }
 0x188   :  { %5403 = vmatpush1.bf16.msra.mxu1 %v7182_v29  ;;  %v4423_v56 = vpop.f32.mrf.mxu0  ;;  %5291 = vmatprep.subr.bf16.mxu0 %v7181_v41  ;;  %v7205_v41 = vld [vmem:[%s10037_s0 + $0x2dc] ss:$108 sps:$4 sm:$0xff]  }
 0x189   :  { %v4536_v59 = vpop.f32.mrf.mxu1  ;;  %5404 = vmatprep.subr.bf16.mxu1 %v7199_v37  ;;  %v9235_v12 = vadd.f32 %v4534_v52, %v4422_v53  ;;  %v4424_v1 = vadd.f32 %v4423_v56, %v8863_v15  ;;  %v7185_v15 = vld [vmem:[%s10036_s1 + $0xc40] ss:$8 sps:$4 sm:$0xff]   ;;  %v7227_v56 = vld [vmem:[%s10036_s1 + $0xd30] ss:$8 sps:$4 sm:$0xff]  }
 0x18a   :  { %v4427_v5 = vpop.f32.mrf.mxu0  ;;  %5104 = vmatmul.mubr.bf16.gmra.mxu0 %v7173_v42  ;;  %v7202_v42 = vld [vmem:[%s10036_s1 + $0xc24] ss:$8 sps:$4 sm:$0xff]   ;;  %v7200_v52 = vld [vmem:[%s10036_s1 + $0xc20] ss:$8 sps:$4 sm:$0xff]  }
 0x18b   :  { %v4540_v8 = vpop.f32.mrf.mxu1  ;;  %5217 = vmatmul.mubr.bf16.gmra.mxu1 %v7176_v43  ;;  %v9244_v13 = vadd.f32 %v4536_v59, %v4424_v1  ;;  %v4428_v21 = vadd.f32 %v4427_v5, %v8875_v26  ;;  %5292 = vmatpush1.bf16.msra.mxu0 %v7179_v51  ;;  %v7208_v43 = vld [vmem:[%s10037_s0 + $0x2e4] ss:$108 sps:$4 sm:$0xff]   ;;  %v7229_v51 = vld [vmem:[%s10036_s1 + $0xd34] ss:$8 sps:$4 sm:$0xff]  }
 0x18c   :  { %5113 = vmatprep.mubr.bf16.mxu0 %v7190_v55  ;;  %v4429_v16 = vpop.f32.mrf.mxu0  ;;  %5293 = vmatprep.subr.bf16.mxu0 %v7187_v63  ;;  %v7244_v63 = vld [vmem:[%s10036_s1 + $0xd24] ss:$8 sps:$4 sm:$0xff]  }
 0x18d   :  { %v4542_v18 = vpop.f32.mrf.mxu1  ;;  %5226 = vmatprep.mubr.bf16.mxu1 %v7193_v0  ;;  %v9256_v25 = vadd.f32 %v4540_v8, %v4428_v21  ;;  %v4430_v26 = vadd.f32 %v4429_v16, %v8887_v36  ;;  %5405 = vmatpush1.bf16.msra.mxu1 %v7197_v4  ;;  %v7211_v4 = vld [vmem:[%s10036_s1 + $0xc14] ss:$8 sps:$4 sm:$0xff]   ;;  %v7209_v16 = vld [vmem:[%s10036_s1 + $0xc10] ss:$8 sps:$4 sm:$0xff]  }
 0x18e   :  { %v4431_v28 = vpop.f32.mrf.mxu0  ;;  %5406 = vmatprep.subr.bf16.mxu1 %v7214_v9  ;;  %v7206_v9 = vld [vmem:[%s10037_s0 + $0x2e0] ss:$108 sps:$4 sm:$0xff]  }
 0x18f   :  { %v4544_v29 = vpop.f32.mrf.mxu1  ;;  %v9268_v35 = vadd.f32 %v4542_v18, %v4430_v26  ;;  %v4432_v36 = vadd.f32 %v4431_v28, %v8899_v50  ;;  %5294 = vmatpush1.bf16.msra.mxu0 %v7185_v15 }
 0x190   :  { %v4433_v37 = vpop.f32.mrf.mxu0  ;;  %5295 = vmatprep.subr.bf16.mxu0 %v7196_v20 }
 0x191   :  { %v4546_v40 = vpop.f32.mrf.mxu1  ;;  %v9280_v47 = vadd.f32 %v4544_v29, %v4432_v36  ;;  %v4434_v50 = vadd.f32 %v4433_v37, %v8911_v61  ;;  %5407 = vmatpush1.bf16.msra.mxu1 %v7212_v27  ;;  %v7223_v27 = vld [vmem:[%s10037_s0 + $0x3bc] ss:$108 sps:$4 sm:$0xff]  }
 0x192   :  { %v4437_v53 = vpop.f32.mrf.mxu0  ;;  %5114 = vmatmul.mubr.bf16.gmra.mxu0 %v7188_v19  ;;  %5408 = vmatprep.subr.bf16.mxu1 %v7229_v51  ;;  %v7220_v19 = vld [vmem:[%s10037_s0 + $0x3b4] ss:$108 sps:$4 sm:$0xff]  }
 0x193   :  { %v4550_v55 = vpop.f32.mrf.mxu1  ;;  %5227 = vmatmul.mubr.bf16.gmra.mxu1 %v7191_v32  ;;  %v9292_v59 = vadd.f32 %v4546_v40, %v4434_v50  ;;  %v4438_v61 = vadd.f32 %v4437_v53, %v8923_v11  ;;  %5296 = vmatpush1.bf16.msra.mxu0 %v7194_v33  ;;  %v7203_v11 = vld [vmem:[%s10037_s0 + $0x2d8] ss:$108 sps:$4 sm:$0xff]   ;;  %v7242_v29 = vld [vmem:[%s10036_s1 + $0xd20] ss:$8 sps:$4 sm:$0xff]   ;;  %v7218_v50 = vld [vmem:[%s10037_s0 + $0x3b0] ss:$108 sps:$4 sm:$0xff]  }
 0x194   :  { %5123 = vmatprep.mubr.bf16.mxu0 %v7205_v41  ;;  %v4439_v0 = vpop.f32.mrf.mxu0  ;;  %5297 = vmatprep.subr.bf16.mxu0 %v7202_v42  ;;  %v7217_v32 = vld [vmem:[%s10036_s1 + $0xc04] ss:$8 sps:$4 sm:$0xff]   ;;  %v7259_v41 = vld [vmem:[%s10036_s1 + $0xd14] ss:$8 sps:$4 sm:$0xff]  }
 0x195   :  { %v4552_v1 = vpop.f32.mrf.mxu1  ;;  %5236 = vmatprep.mubr.bf16.mxu1 %v7208_v43  ;;  %v9301_v5 = vadd.f32 %v4550_v55, %v4438_v61  ;;  %v4440_v8 = vadd.f32 %v4439_v0, %v8935_v23  ;;  %5409 = vmatpush1.bf16.msra.mxu1 %v7227_v56  ;;  %v7221_v53 = vld [vmem:[%s10037_s0 + $0x3b8] ss:$108 sps:$4 sm:$0xff]  }
 0x196   :  { %v4441_v21 = vpop.f32.mrf.mxu0  ;;  %5410 = vmatprep.subr.bf16.mxu1 %v7244_v63  ;;  %v7257_v55 = vld [vmem:[%s10036_s1 + $0xd10] ss:$8 sps:$4 sm:$0xff]  }
 0x197   :  { %v4554_v15 = vpop.f32.mrf.mxu1  ;;  %v9313_v18 = vadd.f32 %v4552_v1, %v4440_v8  ;;  %v4442_v23 = vadd.f32 %v4441_v21, %v8947_v34  ;;  %5298 = vmatpush1.bf16.msra.mxu0 %v7200_v52  ;;  %v7226_v52 = vld [vmem:[%s10036_s1 + $0xcf4] ss:$8 sps:$4 sm:$0xff]   ;;  %v7224_v63 = vld [vmem:[%s10036_s1 + $0xcf0] ss:$8 sps:$4 sm:$0xff]  }
 0x198   :  { %v4443_v20 = vpop.f32.mrf.mxu0  ;;  %5299 = vmatprep.subr.bf16.mxu0 %v7211_v4  ;;  %v7235_v1 = vld [vmem:[%s10037_s0 + $0x48c] ss:$108 sps:$4 sm:$0xff]  }
 0x199   :  { %v4556_v26 = vpop.f32.mrf.mxu1  ;;  %v9325_v28 = vadd.f32 %v4554_v15, %v4442_v23  ;;  %v4444_v34 = vadd.f32 %v4443_v20, %v8959_v45  ;;  %v7215_v45 = vld [vmem:[%s10036_s1 + $0xc00] ss:$8 sps:$4 sm:$0xff]   ;;  %5411 = vmatpush1.bf16.msra.mxu1 %v7242_v29  ;;  %v7274_v15 = vld [vmem:[%s10036_s1 + $0xd04] ss:$8 sps:$4 sm:$0xff]   ;;  %v7241_v29 = vld [vmem:[%s10036_s1 + $0xcd4] ss:$8 sps:$4 sm:$0xff]  }
 0x19a   :  { %v4447_v33 = vpop.f32.mrf.mxu0  ;;  %5124 = vmatmul.mubr.bf16.gmra.mxu0 %v7203_v11  ;;  %5412 = vmatprep.subr.bf16.mxu1 %v7259_v41  ;;  %v7232_v11 = vld [vmem:[%s10036_s1 + $0xce4] ss:$8 sps:$4 sm:$0xff]  }
 0x19b   :  { %v4560_v36 = vpop.f32.mrf.mxu1  ;;  %5237 = vmatmul.mubr.bf16.gmra.mxu1 %v7206_v9  ;;  %v9334_v37 = vadd.f32 %v4556_v26, %v4444_v34  ;;  %v4448_v40 = vadd.f32 %v4447_v33, %v8971_v58  ;;  %5300 = vmatpush1.bf16.msra.mxu0 %v7209_v16  ;;  %v7238_v9 = vld [vmem:[%s10037_s0 + $0x494] ss:$108 sps:$4 sm:$0xff]  }
 0x19c   :  { %5133 = vmatprep.mubr.bf16.mxu0 %v7220_v19  ;;  %v4449_v42 = vpop.f32.mrf.mxu0  ;;  %5301 = vmatprep.subr.bf16.mxu0 %v7217_v32  ;;  %v7272_v19 = vld [vmem:[%s10036_s1 + $0xd00] ss:$8 sps:$4 sm:$0xff]  }
 0x19d   :  { %v4562_v43 = vpop.f32.mrf.mxu1  ;;  %5246 = vmatprep.mubr.bf16.mxu1 %v7223_v27  ;;  %v9346_v51 = vadd.f32 %v4560_v36, %v4448_v40  ;;  %v4450_v58 = vadd.f32 %v4449_v42, %v8983_v7  ;;  %5413 = vmatpush1.bf16.msra.mxu1 %v7257_v55  ;;  %v7233_v34 = vld [vmem:[%s10037_s0 + $0x488] ss:$108 sps:$4 sm:$0xff]   ;;  %v7236_v36 = vld [vmem:[%s10037_s0 + $0x490] ss:$108 sps:$4 sm:$0xff]  }
 0x19e   :  { %v4451_v56 = vpop.f32.mrf.mxu0  ;;  %5414 = vmatprep.subr.bf16.mxu1 %v7274_v15 }
 0x19f   :  { %v4564_v61 = vpop.f32.mrf.mxu1  ;;  %v9358_v0 = vadd.f32 %v4562_v43, %v4450_v58  ;;  %v4452_v7 = vadd.f32 %v4451_v56, %v8995_v44  ;;  %5302 = vmatpush1.bf16.msra.mxu0 %v7215_v45  ;;  %v7239_v45 = vld [vmem:[%s10036_s1 + $0xcd0] ss:$8 sps:$4 sm:$0xff]  }
 0x1a0   :  { %v4453_v4 = vpop.f32.mrf.mxu0  ;;  %5303 = vmatprep.subr.bf16.mxu0 %v7226_v52 }
 0x1a1   :  { %v4566_v8 = vpop.f32.mrf.mxu1  ;;  %v9370_v21 = vadd.f32 %v4564_v61, %v4452_v7  ;;  %v4454_v44 = vadd.f32 %v4453_v4, %v9007_v48  ;;  %v7230_v48 = vld [vmem:[%s10036_s1 + $0xce0] ss:$8 sps:$4 sm:$0xff]   ;;  %5415 = vmatpush1.bf16.msra.mxu1 %v7272_v19 }
 0x1a2   :  { %v4457_v16 = vpop.f32.mrf.mxu0  ;;  %5134 = vmatmul.mubr.bf16.gmra.mxu0 %v7218_v50  ;;  %v7250_v50 = vld [vmem:[%s10037_s0 + $0x564] ss:$108 sps:$4 sm:$0xff]  }
 0x1a3   :  { %v4570_v23 = vpop.f32.mrf.mxu1  ;;  %5247 = vmatmul.mubr.bf16.gmra.mxu1 %v7221_v53  ;;  %v9379_v20 = vadd.f32 %v4566_v8, %v4454_v44  ;;  %v4458_v26 = vadd.f32 %v4457_v16, %v9019_v60  ;;  %5304 = vmatpush2.bf16.msra.mxu0 %v7224_v63  ;;  %v7253_v53 = vld [vmem:[%s10037_s0 + $0x56c] ss:$108 sps:$4 sm:$0xff]   ;;  %v7251_v16 = vld [vmem:[%s10037_s0 + $0x568] ss:$108 sps:$4 sm:$0xff]  }
 0x1a4   :  { %5143 = vmatprep.mubr.bf16.mxu0 %v7235_v1  ;;  %v4459_v32 = vpop.f32.mrf.mxu0  ;;  %5305 = vmatprep.subr.bf16.mxu0 %v7232_v11  ;;  %v7245_v1 = vld [vmem:[%s10036_s1 + $0xcc0] ss:$8 sps:$4 sm:$0xff]  }
 0x1a5   :  { %v4572_v27 = vpop.f32.mrf.mxu1  ;;  %5256 = vmatprep.mubr.bf16.mxu1 %v7238_v9  ;;  %v9391_v33 = vadd.f32 %v4570_v23, %v4458_v26  ;;  %v4460_v60 = vadd.f32 %v4459_v32, %v9031_v3  ;;  %v7247_v3 = vld [vmem:[%s10036_s1 + $0xcc4] ss:$8 sps:$4 sm:$0xff]   ;;  %v7254_v23 = vld [vmem:[%s10036_s1 + $0xcb0] ss:$8 sps:$4 sm:$0xff]  }
 0x1a6   :  { %v4461_v41 = vpop.f32.mrf.mxu0 }
 0x1a7   :  { %v4574_v40 = vpop.f32.mrf.mxu1  ;;  %v9400_v42 = vadd.f32 %v4572_v27, %v4460_v60  ;;  %v4462_v43 = vadd.f32 %v4461_v41, %v9043_v10  ;;  %5306 = vmatpush2.bf16.msra.mxu0 %v7230_v48  ;;  %v7262_v27 = vld [vmem:[%s10036_s1 + $0xca4] ss:$8 sps:$4 sm:$0xff]  }
 0x1a8   :  { %v4463_v52 = vpop.f32.mrf.mxu0  ;;  %5307 = vmatprep.subr.bf16.mxu0 %v7241_v29 }
 0x1a9   :  { %v4576_v58 = vpop.f32.mrf.mxu1  ;;  %v9412_v55 = vadd.f32 %v4574_v40, %v4462_v43  ;;  %v4464_v10 = vadd.f32 %v4463_v52, %v9055_v17  ;;  %v7256_v17 = vld [vmem:[%s10036_s1 + $0xcb4] ss:$8 sps:$4 sm:$0xff]  }
 0x1aa   :  { %v4467_v56 = vpop.f32.mrf.mxu0  ;;  %5144 = vmatmul.mubr.bf16.gmra.mxu0 %v7233_v34  ;;  %v7268_v34 = vld [vmem:[%s10037_s0 + $0x644] ss:$108 sps:$4 sm:$0xff]  }
 0x1ab   :  { %v4580_v61 = vpop.f32.mrf.mxu1  ;;  %5257 = vmatmul.mubr.bf16.gmra.mxu1 %v7236_v36  ;;  %v9415_v63 = vadd.f32 %v4576_v58, %v4464_v10  ;;  %v4468_v7 = vadd.f32 %v4467_v56, %v9067_v24  ;;  %5308 = vmatpush2.bf16.msra.mxu0 %v7239_v45  ;;  %v7248_v24 = vld [vmem:[%s10037_s0 + $0x560] ss:$108 sps:$4 sm:$0xff]  }
 0x1ac   :  { %5153 = vmatprep.mubr.bf16.mxu0 %v7250_v50  ;;  %v4469_v4 = vpop.f32.mrf.mxu0  ;;  %5309 = vmatprep.subr.bf16.mxu0 %v7247_v3  ;;  %v7260_v45 = vld [vmem:[%s10036_s1 + $0xca0] ss:$8 sps:$4 sm:$0xff]  }
 0x1ad   :  { %v4582_v8 = vpop.f32.mrf.mxu1  ;;  %5266 = vmatprep.mubr.bf16.mxu1 %v7253_v53  ;;  %v9424_v11 = vadd.f32 %v4580_v61, %v4468_v7  ;;  %v4470_v9 = vadd.f32 %v4469_v4, %v9079_v31  ;;  %v7265_v31 = vld [vmem:[%s10037_s0 + $0x63c] ss:$108 sps:$4 sm:$0xff]   ;;  %v7263_v53 = vld [vmem:[%s10037_s0 + $0x638] ss:$108 sps:$4 sm:$0xff]   ;;  %v7266_v10 = vld [vmem:[%s10037_s0 + $0x640] ss:$108 sps:$4 sm:$0xff]  }
 0x1ae   :  { %v4471_v44 = vpop.f32.mrf.mxu0  ;;  %v7269_v7 = vld [vmem:[%s10036_s1 + $0xc90] ss:$8 sps:$4 sm:$0xff]  }
 0x1af   :  { %v4584_v15 = vpop.f32.mrf.mxu1  ;;  %v9436_v19 = vadd.f32 %v4582_v8, %v4470_v9  ;;  %v4472_v26 = vadd.f32 %v4471_v44, %v9091_v38  ;;  %5310 = vmatpush2.bf16.msra.mxu0 %v7245_v1  ;;  %v7277_v8 = vld [vmem:[%s10036_s1 + $0xc84] ss:$8 sps:$4 sm:$0xff]  }
 0x1b0   :  { %v4473_v48 = vpop.f32.mrf.mxu0  ;;  %5311 = vmatprep.subr.bf16.mxu0 %v7256_v17 }
 0x1b1   :  { %v4586_v32 = vpop.f32.mrf.mxu1  ;;  %v9448_v29 = vadd.f32 %v4584_v15, %v4472_v26  ;;  %v4474_v38 = vadd.f32 %v4473_v48, %v9103_v46  ;;  %v7271_v46 = vld [vmem:[%s10036_s1 + $0xc94] ss:$8 sps:$4 sm:$0xff]  }
 0x1b2   :  { %v4477_v60 = vpop.f32.mrf.mxu0  ;;  %5154 = vmatmul.mubr.bf16.gmra.mxu0 %v7248_v24 }
 0x1b3   :  { %v4590_v36 = vpop.f32.mrf.mxu1  ;;  %5267 = vmatmul.mubr.bf16.gmra.mxu1 %v7251_v16  ;;  %v9451_v41 = vadd.f32 %v4586_v32, %v4474_v38  ;;  %v4478_v40 = vadd.f32 %v4477_v60, %v9115_v54  ;;  %5312 = vmatpush2.bf16.msra.mxu0 %v7254_v23  ;;  %v7275_v16 = vld [vmem:[%s10036_s1 + $0xc80] ss:$8 sps:$4 sm:$0xff]  }
 0x1b4   :  { %5163 = vmatprep.mubr.bf16.mxu0 %v7265_v31  ;;  %v4479_v43 = vpop.f32.mrf.mxu0  ;;  %5313 = vmatprep.subr.bf16.mxu0 %v7262_v27  ;;  %v7310_v31 = vmov 0  }
 0x1b5   :  { %v4592_v3 = vpop.f32.mrf.mxu1  ;;  %5276 = vmatprep.mubr.bf16.mxu1 %v7268_v34  ;;  %v9460_v50 = vadd.f32 %v4590_v36, %v4478_v40  ;;  %v4480_v52 = vadd.f32 %v4479_v43, %v9127_v62  ;;  %v7280_v62 = vld [vmem:[%s10037_s0 + $0x64] ss:$108 sps:$4 sm:$0xff]   ;;  %v7281_v34 = vld [vmem:[%s10037_s0 + $0x68] ss:$108 sps:$4 sm:$0xff]  }
 0x1b6   :  { %v4481_v58 = vpop.f32.mrf.mxu0  ;;  %v7284_v36 = vld [vmem:[%s10037_s0 + $0x13c] ss:$108 sps:$4 sm:$0xff]  }
 0x1b7   :  { %v4594_v54 = vpop.f32.mrf.mxu1  ;;  %v9469_v56 = vadd.f32 %v4592_v3, %v4480_v52  ;;  %v4482_v61 = vadd.f32 %v4481_v58, %v9139_v6  ;;  %5314 = vmatpush2.bf16.msra.mxu0 %v7260_v45 }
 0x1b8   :  { %v4483_v1 = vpop.f32.mrf.mxu0  ;;  %5315 = vmatprep.subr.bf16.mxu0 %v7271_v46 }
 0x1b9   :  { %v4596_v4 = vpop.f32.mrf.mxu1  ;;  %v9481_v17 = vadd.f32 %v4594_v54, %v4482_v61  ;;  %v4484_v6 = vadd.f32 %v4483_v1, %v9151_v14 }
 0x1ba   :  { %v4487_v9 = vpop.f32.mrf.mxu0  ;;  %5164 = vmatmul.mubr.bf16.gmra.mxu0 %v7263_v53 }
 0x1bb   :  { %v4600_v24 = vpop.f32.mrf.mxu1  ;;  %5277 = vmatmul.mubr.bf16.gmra.mxu1 %v7266_v10  ;;  %v9484_v44 = vadd.f32 %v4596_v4, %v4484_v6  ;;  %v4488_v15 = vadd.f32 %v4487_v9, %v9163_v22  ;;  %5316 = vmatpush2.bf16.msra.mxu0 %v7269_v7  ;;  %v7278_v22 = vld [vmem:[%s10037_s0 + $0x60] ss:$108 sps:$4 sm:$0xff]  }
 0x1bc   :  { %5319 = vmatprep.mubr.bf16.mxu0 %v7280_v62  ;;  %v4489_v23 = vpop.f32.mrf.mxu0  ;;  %5317 = vmatprep.subr.bf16.mxu0 %v7277_v8  ;;  %v7285_v62 = vld [vmem:[%s10037_s0 + $0x140] ss:$108 sps:$4 sm:$0xff]  }
 0x1bd   :  { %v4602_v26 = vpop.f32.mrf.mxu1  ;;  %5432 = vmatprep.mubr.bf16.mxu1 %v7310_v31  ;;  %v9491_v14 = vadd.f32 %v4600_v24, %v4488_v15  ;;  %v4490_v48 = vadd.f32 %v4489_v23, %v9175_v30  ;;  %v7288_v4 = vld [vmem:[%s10037_s0 + $0x214] ss:$108 sps:$4 sm:$0xff]  }
 0x1be   :  { %v4491_v32 = vpop.f32.mrf.mxu0 }
 0x1bf   :  { %v4604_v27 = vpop.f32.mrf.mxu1  ;;  %v9500_v38 = vadd.f32 %v4602_v26, %v4490_v48  ;;  %v4492_v60 = vadd.f32 %v4491_v32, %v9187_v39  ;;  %5318 = vmatpush2.bf16.msra.mxu0 %v7275_v16 }
 0x1c0   :  { %v4493_v30 = vpop.f32.mrf.mxu0 }
 0x1c1   :  { %v4606_v40 = vpop.f32.mrf.mxu1  ;;  %v9506_v45 = vadd.f32 %v4604_v27, %v4492_v60  ;;  %v4494_v43 = vadd.f32 %v4493_v30, %v9199_v49  ;;  %v7282_v49 = vld [vmem:[%s10037_s0 + $0x138] ss:$108 sps:$4 sm:$0xff]  }
 0x1c2   :  { %v4643_v3 = vpop.f32.mrf.mxu0  ;;  %5320 = vmatmul.mubr.bf16.vlgmr.msra.gmra.mxu0 %v7278_v22 }
 0x1c3   :  { %v4756_v46 = vpop.f32.mrf.mxu1  ;;  %5433 = vmatmul.mubr.bf16.vlgmr.msra.gmra.mxu1 %v7281_v34  ;;  %v9509_v52 = vadd.f32 %v4606_v40, %v4494_v43  ;;  %v4644_v58 = vadd.f32 %v4643_v3, %v9211_v57  ;;  %5329 = vmatprep.mubr.bf16.mxu0 %v7284_v36  ;;  %v7289_v34 = vld [vmem:[%s10037_s0 + $0x218] ss:$108 sps:$4 sm:$0xff]  }
 0x1c4   :  { %5442 = vmatprep.mubr.bf16.mxu1 %v7310_v31  ;;  %v4645_v39 = vpop.f32.mrf.mxu0  ;;  %v7292_v36 = vld [vmem:[%s10037_s0 + $0x2ec] ss:$108 sps:$4 sm:$0xff]  }
 0x1c5   :  { %v4758_v54 = vpop.f32.mrf.mxu1  ;;  %v9513_v53 = vadd.f32 %v4756_v46, %v4644_v58  ;;  %v4646_v10 = vadd.f32 %v4645_v39, %v9223_v2 }
 0x1c6   :  { %v4647_v61 = vpop.f32.mrf.mxu0 }
 0x1c7   :  { %v4760_v7 = vpop.f32.mrf.mxu1  ;;  %v9522_v57 = vadd.f32 %v4758_v54, %v4646_v10  ;;  %v4648_v1 = vadd.f32 %v4647_v61, %v9235_v12 }
 0x1c8   :  { %v4649_v8 = vpop.f32.mrf.mxu0 }
 0x1c9   :  { %v4762_v2 = vpop.f32.mrf.mxu1  ;;  %v9528_v6 = vadd.f32 %v4760_v7, %v4648_v1  ;;  %v4650_v9 = vadd.f32 %v4649_v8, %v9244_v13  ;;  %v7286_v13 = vld [vmem:[%s10037_s0 + $0x210] ss:$108 sps:$4 sm:$0xff]  }
 0x1ca   :  { %v4653_v24 = vpop.f32.mrf.mxu0  ;;  %5330 = vmatmul.mubr.bf16.gmra.mxu0 %v7282_v49 }
 0x1cb   :  { %v4766_v15 = vpop.f32.mrf.mxu1  ;;  %5443 = vmatmul.mubr.bf16.gmra.mxu1 %v7285_v62  ;;  %v9531_v16 = vadd.f32 %v4762_v2, %v4650_v9  ;;  %v4654_v23 = vadd.f32 %v4653_v24, %v9256_v25  ;;  %5339 = vmatprep.mubr.bf16.mxu0 %v7288_v4  ;;  %v7293_v62 = vld [vmem:[%s10037_s0 + $0x2f0] ss:$108 sps:$4 sm:$0xff]  }
 0x1cc   :  { %5452 = vmatprep.mubr.bf16.mxu1 %v7310_v31  ;;  %v4655_v12 = vpop.f32.mrf.mxu0  ;;  %v7296_v4 = vld [vmem:[%s10037_s0 + $0x3c4] ss:$108 sps:$4 sm:$0xff]  }
 0x1cd   :  { %v4768_v26 = vpop.f32.mrf.mxu1  ;;  %v9535_v48 = vadd.f32 %v4766_v15, %v4654_v23  ;;  %v4656_v32 = vadd.f32 %v4655_v12, %v9268_v35 }
 0x1ce   :  { %v4657_v27 = vpop.f32.mrf.mxu0 }
 0x1cf   :  { %v4770_v22 = vpop.f32.mrf.mxu1  ;;  %v9544_v25 = vadd.f32 %v4768_v26, %v4656_v32  ;;  %v4658_v60 = vadd.f32 %v4657_v27, %v9280_v47 }
 0x1d0   :  { %v4659_v30 = vpop.f32.mrf.mxu0 }
 0x1d1   :  { %v4772_v35 = vpop.f32.mrf.mxu1  ;;  %v9550_v40 = vadd.f32 %v4770_v22, %v4658_v60  ;;  %v4660_v43 = vadd.f32 %v4659_v30, %v9292_v59  ;;  %v7290_v59 = vld [vmem:[%s10037_s0 + $0x2e8] ss:$108 sps:$4 sm:$0xff]  }
 0x1d2   :  { %v4663_v3 = vpop.f32.mrf.mxu0  ;;  %5340 = vmatmul.mubr.bf16.gmra.mxu0 %v7286_v13 }
 0x1d3   :  { %v4776_v46 = vpop.f32.mrf.mxu1  ;;  %5453 = vmatmul.mubr.bf16.gmra.mxu1 %v7289_v34  ;;  %v9553_v58 = vadd.f32 %v4772_v35, %v4660_v43  ;;  %v4664_v39 = vadd.f32 %v4663_v3, %v9301_v5  ;;  %5349 = vmatprep.mubr.bf16.mxu0 %v7292_v36  ;;  %v7297_v34 = vld [vmem:[%s10037_s0 + $0x3c8] ss:$108 sps:$4 sm:$0xff]  }
 0x1d4   :  { %5462 = vmatprep.mubr.bf16.mxu1 %v7310_v31  ;;  %v4665_v47 = vpop.f32.mrf.mxu0  ;;  %v7300_v36 = vld [vmem:[%s10037_s0 + $0x49c] ss:$108 sps:$4 sm:$0xff]  }
 0x1d5   :  { %v4778_v54 = vpop.f32.mrf.mxu1  ;;  %v9557_v10 = vadd.f32 %v4776_v46, %v4664_v39  ;;  %v4666_v61 = vadd.f32 %v4665_v47, %v9313_v18 }
 0x1d6   :  { %v4667_v7 = vpop.f32.mrf.mxu0 }
 0x1d7   :  { %v4780_v49 = vpop.f32.mrf.mxu1  ;;  %v9566_v5 = vadd.f32 %v4778_v54, %v4666_v61  ;;  %v4668_v1 = vadd.f32 %v4667_v7, %v9325_v28 }
 0x1d8   :  { %v4669_v8 = vpop.f32.mrf.mxu0 }
 0x1d9   :  { %v4782_v18 = vpop.f32.mrf.mxu1  ;;  %v9572_v2 = vadd.f32 %v4780_v49, %v4668_v1  ;;  %v4670_v9 = vadd.f32 %v4669_v8, %v9334_v37  ;;  %v7294_v37 = vld [vmem:[%s10037_s0 + $0x3c0] ss:$108 sps:$4 sm:$0xff]  }
 0x1da   :  { %v4673_v24 = vpop.f32.mrf.mxu0  ;;  %5350 = vmatmul.mubr.bf16.gmra.mxu0 %v7290_v59 }
 0x1db   :  { %v4786_v15 = vpop.f32.mrf.mxu1  ;;  %5463 = vmatmul.mubr.bf16.gmra.mxu1 %v7293_v62  ;;  %v9575_v23 = vadd.f32 %v4782_v18, %v4670_v9  ;;  %v4674_v12 = vadd.f32 %v4673_v24, %v9346_v51  ;;  %5359 = vmatprep.mubr.bf16.mxu0 %v7296_v4  ;;  %v7301_v62 = vld [vmem:[%s10037_s0 + $0x4a0] ss:$108 sps:$4 sm:$0xff]  }
 0x1dc   :  { %5472 = vmatprep.mubr.bf16.mxu1 %v7310_v31  ;;  %v4675_v28 = vpop.f32.mrf.mxu0  ;;  %v7304_v4 = vld [vmem:[%s10037_s0 + $0x574] ss:$108 sps:$4 sm:$0xff]  }
 0x1dd   :  { %v4788_v26 = vpop.f32.mrf.mxu1  ;;  %v9579_v32 = vadd.f32 %v4786_v15, %v4674_v12  ;;  %v4676_v27 = vadd.f32 %v4675_v28, %v9358_v0 }
 0x1de   :  { %v4677_v22 = vpop.f32.mrf.mxu0 }
 0x1df   :  { %v4790_v13 = vpop.f32.mrf.mxu1  ;;  %v9588_v51 = vadd.f32 %v4788_v26, %v4676_v27  ;;  %v4678_v60 = vadd.f32 %v4677_v22, %v9370_v21 }
 0x1e0   :  { %v4679_v30 = vpop.f32.mrf.mxu0 }
 0x1e1   :  { %v4792_v0 = vpop.f32.mrf.mxu1  ;;  %v9594_v35 = vadd.f32 %v4790_v13, %v4678_v60  ;;  %v4680_v43 = vadd.f32 %v4679_v30, %v9379_v20  ;;  %v7298_v20 = vld [vmem:[%s10037_s0 + $0x498] ss:$108 sps:$4 sm:$0xff]  }
 0x1e2   :  { %v4683_v3 = vpop.f32.mrf.mxu0  ;;  %5360 = vmatmul.mubr.bf16.gmra.mxu0 %v7294_v37 }
 0x1e3   :  { %v4796_v46 = vpop.f32.mrf.mxu1  ;;  %5473 = vmatmul.mubr.bf16.gmra.mxu1 %v7297_v34  ;;  %v9597_v39 = vadd.f32 %v4792_v0, %v4680_v43  ;;  %v4684_v47 = vadd.f32 %v4683_v3, %v9391_v33  ;;  %5369 = vmatprep.mubr.bf16.mxu0 %v7300_v36  ;;  %v7305_v34 = vld [vmem:[%s10037_s0 + $0x578] ss:$108 sps:$4 sm:$0xff]  }
 0x1e4   :  { %5482 = vmatprep.mubr.bf16.mxu1 %v7310_v31  ;;  %v4685_v21 = vpop.f32.mrf.mxu0  ;;  %v7308_v36 = vld [vmem:[%s10037_s0 + $0x64c] ss:$108 sps:$4 sm:$0xff]  }
 0x1e5   :  { %v4798_v54 = vpop.f32.mrf.mxu1  ;;  %v9601_v61 = vadd.f32 %v4796_v46, %v4684_v47  ;;  %v4686_v7 = vadd.f32 %v4685_v21, %v9400_v42 }
 0x1e6   :  { %v4687_v49 = vpop.f32.mrf.mxu0 }
 0x1e7   :  { %v4800_v59 = vpop.f32.mrf.mxu1  ;;  %v9610_v33 = vadd.f32 %v4798_v54, %v4686_v7  ;;  %v4688_v1 = vadd.f32 %v4687_v49, %v9412_v55 }
 0x1e8   :  { %v4689_v8 = vpop.f32.mrf.mxu0 }
 0x1e9   :  { %v4802_v42 = vpop.f32.mrf.mxu1  ;;  %v9616_v18 = vadd.f32 %v4800_v59, %v4688_v1  ;;  %v4690_v9 = vadd.f32 %v4689_v8, %v9415_v63  ;;  %v7302_v63 = vld [vmem:[%s10037_s0 + $0x570] ss:$108 sps:$4 sm:$0xff]  }
 0x1ea   :  { %v4693_v24 = vpop.f32.mrf.mxu0  ;;  %5370 = vmatmul.mubr.bf16.gmra.mxu0 %v7298_v20 }
 0x1eb   :  { %v4806_v15 = vpop.f32.mrf.mxu1  ;;  %5483 = vmatmul.mubr.bf16.gmra.mxu1 %v7301_v62  ;;  %v9619_v12 = vadd.f32 %v4802_v42, %v4690_v9  ;;  %v4694_v28 = vadd.f32 %v4693_v24, %v9424_v11  ;;  %5379 = vmatprep.mubr.bf16.mxu0 %v7304_v4  ;;  %v7309_v62 = vld [vmem:[%s10037_s0 + $0x650] ss:$108 sps:$4 sm:$0xff]  }
 0x1ec   :  { %5492 = vmatprep.mubr.bf16.mxu1 %v7310_v31  ;;  %v4695_v55 = vpop.f32.mrf.mxu0 }
 0x1ed   :  { %v4808_v26 = vpop.f32.mrf.mxu1  ;;  %v9623_v27 = vadd.f32 %v4806_v15, %v4694_v28  ;;  %v4696_v22 = vadd.f32 %v4695_v55, %v9436_v19 }
 0x1ee   :  { %v4697_v13 = vpop.f32.mrf.mxu0 }
 0x1ef   :  { %v4810_v37 = vpop.f32.mrf.mxu1  ;;  %v9632_v11 = vadd.f32 %v4808_v26, %v4696_v22  ;;  %v4698_v60 = vadd.f32 %v4697_v13, %v9448_v29 }
 0x1f0   :  { %v4699_v30 = vpop.f32.mrf.mxu0 }
 0x1f1   :  { %v4812_v19 = vpop.f32.mrf.mxu1  ;;  %v9638_v0 = vadd.f32 %v4810_v37, %v4698_v60  ;;  %v4700_v43 = vadd.f32 %v4699_v30, %v9451_v41  ;;  %v7306_v41 = vld [vmem:[%s10037_s0 + $0x648] ss:$108 sps:$4 sm:$0xff]  }
 0x1f2   :  { %v4703_v3 = vpop.f32.mrf.mxu0  ;;  %5380 = vmatmul.mubr.bf16.gmra.mxu0 %v7302_v63 }
 0x1f3   :  { %v4816_v46 = vpop.f32.mrf.mxu1  ;;  %5493 = vmatmul.mubr.bf16.gmra.mxu1 %v7305_v34  ;;  %v9641_v47 = vadd.f32 %v4812_v19, %v4700_v43  ;;  %v4704_v21 = vadd.f32 %v4703_v3, %v9460_v50  ;;  %5389 = vmatprep.mubr.bf16.mxu0 %v7308_v36 }
 0x1f4   :  { %5502 = vmatprep.mubr.bf16.mxu1 %v7310_v31  ;;  %v4705_v29 = vpop.f32.mrf.mxu0 }
 0x1f5   :  { %v4818_v54 = vpop.f32.mrf.mxu1  ;;  %v9645_v7 = vadd.f32 %v4816_v46, %v4704_v21  ;;  %v4706_v49 = vadd.f32 %v4705_v29, %v9469_v56 }
 0x1f6   :  { %v4707_v59 = vpop.f32.mrf.mxu0 }
 0x1f7   :  { %v4820_v20 = vpop.f32.mrf.mxu1  ;;  %v9654_v50 = vadd.f32 %v4818_v54, %v4706_v49  ;;  %v4708_v31 = vadd.f32 %v4707_v59, %v9481_v17 }
 0x1f8   :  { %v4709_v1 = vpop.f32.mrf.mxu0 }
 0x1f9   :  { %v4822_v4 = vpop.f32.mrf.mxu1  ;;  %v9657_v8 = vadd.f32 %v4820_v20, %v4708_v31  ;;  %v4710_v56 = vadd.f32 %v4709_v1, %v9484_v44 }
 0x1fa   :  { %v4713_v42 = vpop.f32.mrf.mxu0  ;;  %5390 = vmatmul.mubr.bf16.gmra.mxu0 %v7306_v41 }
 0x1fb   :  { %v4826_v9 = vpop.f32.mrf.mxu1  ;;  %5503 = vmatmul.mubr.bf16.gmra.mxu1 %v7309_v62  ;;  %v9660_v24 = vadd.f32 %v4822_v4, %v4710_v56  ;;  %v4714_v15 = vadd.f32 %v4713_v42, %v9491_v14 }
 0x1fc   :  { %v4715_v28 = vpop.f32.mrf.mxu0 }
 0x1fd   :  { %v4828_v55 = vpop.f32.mrf.mxu1  ;;  %v9663_v26 = vadd.f32 %v4826_v9, %v4714_v15  ;;  %v4716_v17 = vadd.f32 %v4715_v28, %v9500_v38 }
 0x1fe   :  { %v4717_v22 = vpop.f32.mrf.mxu0 }
 0x1ff   :  { %v4830_v13 = vpop.f32.mrf.mxu1  ;;  %v9666_v37 = vadd.f32 %v4828_v55, %v4716_v17  ;;  %v4718_v44 = vadd.f32 %v4717_v22, %v9506_v45 }
 0x200   :  { %v4719_v63 = vpop.f32.mrf.mxu0 }
 0x201   :  { %v4832_v34 = vpop.f32.mrf.mxu1  ;;  %v9669_v60 = vadd.f32 %v4830_v13, %v4718_v44  ;;  %v4720_v36 = vadd.f32 %v4719_v63, %v9509_v52 }
 0x202   :  { %v4869_v30 = vpop.f32.mrf.mxu0 }
 0x203   :  { %v4982_v14 = vpop.f32.mrf.mxu1  ;;  %v9672_v19 = vadd.f32 %v4832_v34, %v4720_v36  ;;  %v4870_v43 = vadd.f32 %v4869_v30, %v9513_v53 }
 0x204   :  { %v4871_v3 = vpop.f32.mrf.mxu0 }
 0x205   :  { %v4984_v38 = vpop.f32.mrf.mxu1  ;;  %v9675_v46 = vadd.f32 %v4982_v14, %v4870_v43  ;;  %v4872_v21 = vadd.f32 %v4871_v3, %v9522_v57 }
 0x206   :  { %v4873_v29 = vpop.f32.mrf.mxu0 }
 0x207   :  { %v4986_v45 = vpop.f32.mrf.mxu1  ;;  %v9678_v54 = vadd.f32 %v4984_v38, %v4872_v21  ;;  %v4874_v49 = vadd.f32 %v4873_v29, %v9528_v6 }
 0x208   :  { %v4875_v59 = vpop.f32.mrf.mxu0 }
 0x209   :  { %v4988_v52 = vpop.f32.mrf.mxu1  ;;  %v9681_v20 = vadd.f32 %v4986_v45, %v4874_v49  ;;  %v4876_v41 = vadd.f32 %v4875_v59, %v9531_v16 }
 0x20a   :  { %v4879_v62 = vpop.f32.mrf.mxu0 }
 0x20b   :  { %v4992_v53 = vpop.f32.mrf.mxu1  ;;  %v9684_v31 = vadd.f32 %v4988_v52, %v4876_v41  ;;  %v4880_v1 = vadd.f32 %v4879_v62, %v9535_v48 }
 0x20c   :  { %v4881_v4 = vpop.f32.mrf.mxu0 }
 0x20d   :  { %v4994_v57 = vpop.f32.mrf.mxu1  ;;  %v9687_v56 = vadd.f32 %v4992_v53, %v4880_v1  ;;  %v4882_v42 = vadd.f32 %v4881_v4, %v9544_v25 }
 0x20e   :  { %v4883_v9 = vpop.f32.mrf.mxu0 }
 0x20f   :  { %v4996_v6 = vpop.f32.mrf.mxu1  ;;  %v9690_v15 = vadd.f32 %v4994_v57, %v4882_v42  ;;  %v4884_v28 = vadd.f32 %v4883_v9, %v9550_v40 }
 0x210   :  { %v4885_v55 = vpop.f32.mrf.mxu0 }
 0x211   :  { %v4998_v16 = vpop.f32.mrf.mxu1  ;;  %v9693_v17 = vadd.f32 %v4996_v6, %v4884_v28  ;;  %v4886_v22 = vadd.f32 %v4885_v55, %v9553_v58 }
 0x212   :  { %v4889_v13 = vpop.f32.mrf.mxu0 }
 0x213   :  { %v5002_v48 = vpop.f32.mrf.mxu1  ;;  %v9696_v44 = vadd.f32 %v4998_v16, %v4886_v22  ;;  %v4890_v63 = vadd.f32 %v4889_v13, %v9557_v10 }
 0x214   :  { %v4891_v34 = vpop.f32.mrf.mxu0 }
 0x215   :  { %v5004_v25 = vpop.f32.mrf.mxu1  ;;  %v9699_v36 = vadd.f32 %v5002_v48, %v4890_v63  ;;  %v4892_v30 = vadd.f32 %v4891_v34, %v9566_v5 }
 0x216   :  { %v4893_v14 = vpop.f32.mrf.mxu0 }
 0x217   :  { %v5006_v40 = vpop.f32.mrf.mxu1  ;;  %v9702_v43 = vadd.f32 %v5004_v25, %v4892_v30  ;;  %v4894_v3 = vadd.f32 %v4893_v14, %v9572_v2 }
 0x218   :  { %v4895_v38 = vpop.f32.mrf.mxu0 }
 0x219   :  { %v5008_v58 = vpop.f32.mrf.mxu1  ;;  %v9705_v21 = vadd.f32 %v5006_v40, %v4894_v3  ;;  %v4896_v29 = vadd.f32 %v4895_v38, %v9575_v23 }
 0x21a   :  { %v4899_v45 = vpop.f32.mrf.mxu0 }
 0x21b   :  { %v5012_v10 = vpop.f32.mrf.mxu1  ;;  %v9708_v49 = vadd.f32 %v5008_v58, %v4896_v29  ;;  %v4900_v59 = vadd.f32 %v4899_v45, %v9579_v32 }
 0x21c   :  { %v4901_v52 = vpop.f32.mrf.mxu0 }
 0x21d   :  { %v5014_v5 = vpop.f32.mrf.mxu1  ;;  %v9711_v41 = vadd.f32 %v5012_v10, %v4900_v59  ;;  %v4902_v62 = vadd.f32 %v4901_v52, %v9588_v51 }
 0x21e   :  { %v4903_v53 = vpop.f32.mrf.mxu0 }
 0x21f   :  { %v5016_v2 = vpop.f32.mrf.mxu1  ;;  %v9714_v1 = vadd.f32 %v5014_v5, %v4902_v62  ;;  %v4904_v4 = vadd.f32 %v4903_v53, %v9594_v35 }
 0x220   :  { %v4905_v57 = vpop.f32.mrf.mxu0 }
 0x221   :  { %v5018_v23 = vpop.f32.mrf.mxu1  ;;  %v9717_v42 = vadd.f32 %v5016_v2, %v4904_v4  ;;  %v4906_v9 = vadd.f32 %v4905_v57, %v9597_v39 }
 0x222   :  { %v4909_v6 = vpop.f32.mrf.mxu0 }
 0x223   :  { %v5022_v32 = vpop.f32.mrf.mxu1  ;;  %v9720_v28 = vadd.f32 %v5018_v23, %v4906_v9  ;;  %v4910_v55 = vadd.f32 %v4909_v6, %v9601_v61 }
 0x224   :  { %v4911_v16 = vpop.f32.mrf.mxu0 }
 0x225   :  { %v5024_v51 = vpop.f32.mrf.mxu1  ;;  %v9723_v22 = vadd.f32 %v5022_v32, %v4910_v55  ;;  %v4912_v13 = vadd.f32 %v4911_v16, %v9610_v33 }
 0x226   :  { %v4913_v48 = vpop.f32.mrf.mxu0 }
 0x227   :  { %v5026_v35 = vpop.f32.mrf.mxu1  ;;  %v9726_v63 = vadd.f32 %v5024_v51, %v4912_v13  ;;  %v4914_v34 = vadd.f32 %v4913_v48, %v9616_v18 }
 0x228   :  { %v4915_v25 = vpop.f32.mrf.mxu0 }
 0x229   :  { %v5028_v39 = vpop.f32.mrf.mxu1  ;;  %v9729_v30 = vadd.f32 %v5026_v35, %v4914_v34  ;;  %v4916_v14 = vadd.f32 %v4915_v25, %v9619_v12 }
 0x22a   :  { %v4919_v40 = vpop.f32.mrf.mxu0 }
 0x22b   :  { %10040 = vst [vmem:[#allocation2_spill] sm:$0xff] %v9729_v30  ;;  %v5032_v61 = vpop.f32.mrf.mxu1  ;;  %v9732_v3 = vadd.f32 %v5028_v39, %v4916_v14  ;;  %v4920_v38 = vadd.f32 %v4919_v40, %v9623_v27 }
 0x22c   :  { %v4921_v58 = vpop.f32.mrf.mxu0 }
 0x22d   :  { %10041 = vst [vmem:[#allocation3_spill] sm:$0xff] %v9732_v3  ;;  %v5034_v33 = vpop.f32.mrf.mxu1  ;;  %v9735_v29 = vadd.f32 %v5032_v61, %v4920_v38  ;;  %v4922_v45 = vadd.f32 %v4921_v58, %v9632_v11 }
 0x22e   :  { %v4923_v10 = vpop.f32.mrf.mxu0 }
 0x22f   :  { %10042 = vst [vmem:[#allocation4_spill] sm:$0xff] %v9735_v29  ;;  %v5036_v18 = vpop.f32.mrf.mxu1  ;;  %v9738_v59 = vadd.f32 %v5034_v33, %v4922_v45  ;;  %v4924_v52 = vadd.f32 %v4923_v10, %v9638_v0 }
 0x230   :  { %v4925_v5 = vpop.f32.mrf.mxu0 }
 0x231   :  { %10043 = vst [vmem:[#allocation5_spill] sm:$0xff] %v9738_v59  ;;  %v5038_v12 = vpop.f32.mrf.mxu1  ;;  %v9741_v62 = vadd.f32 %v5036_v18, %v4924_v52  ;;  %v4926_v53 = vadd.f32 %v4925_v5, %v9641_v47 }
 0x232   :  { %v4929_v2 = vpop.f32.mrf.mxu0 }
 0x233   :  { %10044 = vst [vmem:[#allocation6_spill] sm:$0xff] %v9741_v62  ;;  %v5042_v27 = vpop.f32.mrf.mxu1  ;;  %v9744_v4 = vadd.f32 %v5038_v12, %v4926_v53  ;;  %v4930_v57 = vadd.f32 %v4929_v2, %v9645_v7 }
 0x234   :  { %v4931_v23 = vpop.f32.mrf.mxu0 }
 0x235   :  { %10045 = vst [vmem:[#allocation7_spill] sm:$0xff] %v9744_v4  ;;  %v5044_v11 = vpop.f32.mrf.mxu1  ;;  %v9747_v9 = vadd.f32 %v5042_v27, %v4930_v57  ;;  %v4932_v6 = vadd.f32 %v4931_v23, %v9654_v50 }
 0x236   :  { %v4933_v32 = vpop.f32.mrf.mxu0 }
 0x237   :  { %10046 = vst [vmem:[#allocation8_spill] sm:$0xff] %v9747_v9  ;;  %v5046_v0 = vpop.f32.mrf.mxu1  ;;  %v9750_v55 = vadd.f32 %v5044_v11, %v4932_v6  ;;  %v4934_v16 = vadd.f32 %v4933_v32, %v9657_v8 }
 0x238   :  { %v4935_v51 = vpop.f32.mrf.mxu0 }
 0x239   :  { %10047 = vst [vmem:[#allocation9_spill] sm:$0xff] %v9750_v55  ;;  %v5048_v47 = vpop.f32.mrf.mxu1  ;;  %v9753_v13 = vadd.f32 %v5046_v0, %v4934_v16  ;;  %v4936_v48 = vadd.f32 %v4935_v51, %v9660_v24 }
 0x23a   :  { %v4939_v35 = vpop.f32.mrf.mxu0 }
 0x23b   :  { %10048 = vst [vmem:[#allocation10_spill] sm:$0xff] %v9753_v13  ;;  %v5052_v7 = vpop.f32.mrf.mxu1  ;;  %v9756_v34 = vadd.f32 %v5048_v47, %v4936_v48  ;;  %v4940_v25 = vadd.f32 %v4939_v35, %v9663_v26 }
 0x23c   :  { %v4941_v39 = vpop.f32.mrf.mxu0 }
 0x23d   :  { %10049 = vst [vmem:[#allocation11_spill] sm:$0xff] %v9756_v34  ;;  %v5054_v50 = vpop.f32.mrf.mxu1  ;;  %v9759_v14 = vadd.f32 %v5052_v7, %v4940_v25  ;;  %v4942_v40 = vadd.f32 %v4941_v39, %v9666_v37 }
 0x23e   :  { %v4943_v61 = vpop.f32.mrf.mxu0 }
 0x23f   :  { %10050 = vst [vmem:[#allocation12_spill] sm:$0xff] %v9759_v14  ;;  %v5056_v8 = vpop.f32.mrf.mxu1  ;;  %v9762_v38 = vadd.f32 %v5054_v50, %v4942_v40  ;;  %v4944_v58 = vadd.f32 %v4943_v61, %v9669_v60 }
 0x240   :  { %v4945_v33 = vpop.f32.mrf.mxu0 }
 0x241   :  { %10051 = vst [vmem:[#allocation13_spill] sm:$0xff] %v9762_v38  ;;  %v5058_v24 = vpop.f32.mrf.mxu1  ;;  %v9765_v45 = vadd.f32 %v5056_v8, %v4944_v58  ;;  %v4946_v10 = vadd.f32 %v4945_v33, %v9672_v19 }
 0x242   :  { %v5095_v18 = vpop.f32.mrf.mxu0 }
 0x243   :  { %10052 = vst [vmem:[#allocation14_spill] sm:$0xff] %v9765_v45  ;;  %v9768_v26 = vpop.f32.mrf.mxu1  ;;  %v9770_v52 = vadd.f32 %v5058_v24, %v4946_v10 }
 0x244   :  { %v5097_v5 = vpop.f32.mrf.mxu0 }
 0x245   :  { %10053 = vst [vmem:[#allocation15_spill] sm:$0xff] %v9770_v52  ;;  %v9772_v12 = vpop.f32.mrf.mxu1 }
 0x246   :  { %v9774_v37 = vpop.f32.mrf.mxu0 }
 0x247   :  { %v9776_v53 = vpop.f32.mrf.mxu1 }
 0x248   :  { %v9778_v2 = vpop.f32.mrf.mxu0 }
 0x249   :  { %v9780_v60 = vpop.f32.mrf.mxu1 }
 0x24a   :  { %v9782_v27 = vpop.f32.mrf.mxu0 }
 0x24b   :  { %v9784_v57 = vpop.f32.mrf.mxu1 }
 0x24c   :  { %v9786_v19 = vpop.f32.mrf.mxu0 }
 0x24d   :  { %v9788_v23 = vpop.f32.mrf.mxu1 }
 0x24e   :  { %v9790_v11 = vpop.f32.mrf.mxu0 }
 0x24f   :  { %v9792_v6 = vpop.f32.mrf.mxu1 }
 0x250   :  { %v9794_v32 = vpop.f32.mrf.mxu0 }
 0x251   :  { %v9796_v0 = vpop.f32.mrf.mxu1 }
 0x252   :  { %v9798_v16 = vpop.f32.mrf.mxu0 }
 0x253   :  { %v9800_v51 = vpop.f32.mrf.mxu1 }
 0x254   :  { %v9802_v47 = vpop.f32.mrf.mxu0 }
 0x255   :  { %v9804_v48 = vpop.f32.mrf.mxu1 }
 0x256   :  { %v9806_v35 = vpop.f32.mrf.mxu0 }
 0x257   :  { %v9808_v7 = vpop.f32.mrf.mxu1 }
 0x258   :  { %v9810_v25 = vpop.f32.mrf.mxu0 }
 0x259   :  { %v9812_v39 = vpop.f32.mrf.mxu1 }
 0x25a   :  { %v9814_v50 = vpop.f32.mrf.mxu0 }
 0x25b   :  { %v9816_v40 = vpop.f32.mrf.mxu1 }
 0x25c   :  { %v9818_v61 = vpop.f32.mrf.mxu0 }
 0x25d   :  { %v9820_v8 = vpop.f32.mrf.mxu1 }
 0x25e   :  { %v9822_v58 = vpop.f32.mrf.mxu0 }
 0x25f   :  { %v9824_v33 = vpop.f32.mrf.mxu1 }
 0x260   :  { %v9826_v24 = vpop.f32.mrf.mxu0 }
 0x261   :  { %v9828_v10 = vpop.f32.mrf.mxu1 }
 0x262   :  { %v9830_v52 = vpop.f32.mrf.mxu0 }
 0x263   :  { %v9832_v45 = vpop.f32.mrf.mxu1 }
 0x264   :  { %v9834_v38 = vpop.f32.mrf.mxu0 }
 0x265   :  { %v9836_v14 = vpop.f32.mrf.mxu1 }
 0x266   :  { %10054 = vst [vmem:[#allocation16_spill] sm:$0xff] %v9836_v14  ;;  %v9838_v34 = vpop.f32.mrf.mxu0 }
 0x267   :  { %10055 = vst [vmem:[#allocation17_spill] sm:$0xff] %v9838_v34  ;;  %v9840_v13 = vpop.f32.mrf.mxu1 }
 0x268   :  { %10056 = vst [vmem:[#allocation18_spill] sm:$0xff] %v9840_v13  ;;  %v9842_v55 = vpop.f32.mrf.mxu0 }
 0x269   :  { %10057 = vst [vmem:[#allocation19_spill] sm:$0xff] %v9842_v55  ;;  %v9844_v9 = vpop.f32.mrf.mxu1 }
 0x26a   :  { %10058 = vst [vmem:[#allocation20_spill] sm:$0xff] %v9844_v9  ;;  %v9846_v4 = vpop.f32.mrf.mxu0 }
 0x26b   :  { %10059 = vst [vmem:[#allocation21_spill] sm:$0xff] %v9846_v4  ;;  %v9848_v62 = vpop.f32.mrf.mxu1 }
 0x26c   :  { %10060 = vst [vmem:[#allocation22_spill] sm:$0xff] %v9848_v62  ;;  %v9850_v59 = vpop.f32.mrf.mxu0 }
 0x26d   :  { %10061 = vst [vmem:[#allocation23_spill] sm:$0xff] %v9850_v59  ;;  %v9852_v29 = vpop.f32.mrf.mxu1 }
 0x26e   :  { %10062 = vst [vmem:[#allocation24_spill] sm:$0xff] %v9852_v29  ;;  %v9854_v3 = vpop.f32.mrf.mxu0 }
 0x26f   :  { %10063 = vst [vmem:[#allocation25_spill] sm:$0xff] %v9854_v3  ;;  %v9856_v30 = vpop.f32.mrf.mxu1 }
 0x270   :  { %10064 = vst [vmem:[#allocation26_spill] sm:$0xff] %v9856_v30  ;;  %v9858_v14 = vpop.f32.mrf.mxu0 }
 0x271   :  { %10065 = vst [vmem:[#allocation27_spill] sm:$0xff] %v9858_v14  ;;  %v9860_v34 = vpop.f32.mrf.mxu1 }
 0x272   :  { %10066 = vst [vmem:[#allocation28_spill] sm:$0xff] %v9860_v34  ;;  %v9862_v13 = vpop.f32.mrf.mxu0 }
 0x273   :  { %10067 = vst [vmem:[#allocation29_spill] sm:$0xff] %v9862_v13  ;;  %v9864_v55 = vpop.f32.mrf.mxu1 }
 0x274   :  { %10068 = vst [vmem:[#allocation30_spill] sm:$0xff] %v9864_v55  ;;  %v9866_v9 = vpop.f32.mrf.mxu0  ;;  %v5096_v55 = vadd.f32 %v5095_v18, %v9675_v46  ;;  %v5102_v46 = vadd.f32 %v9778_v2, %v9684_v31 }
 0x275   :  { %10069 = vst [vmem:[#allocation31_spill] sm:$0xff] %v9866_v9  ;;  %v9868_v4 = vpop.f32.mrf.mxu1 }
 0x276   :  { %10070 = vst [vmem:[#allocation32_spill] sm:$0xff] %v9868_v4  ;;  %v9870_v62 = vpop.f32.mrf.mxu0 }
 0x277   :  { %10071 = vst [vmem:[#allocation33_spill] sm:$0xff] %v9870_v62  ;;  %v9872_v59 = vpop.f32.mrf.mxu1 }
 0x278   :  { %10072 = vst [vmem:[#allocation34_spill] sm:$0xff] %v9872_v59  ;;  %v9874_v29 = vpop.f32.mrf.mxu0  ;;  %v5098_v59 = vadd.f32 %v5097_v5, %v9678_v54  ;;  %v5106_v54 = vadd.f32 %v9782_v27, %v9687_v56  ;;  %v5110_v56 = vadd.f32 %v9790_v11, %v9693_v17  ;;  %v5116_v17 = vadd.f32 %v9798_v16, %v9699_v36 }
 0x279   :  { %10073 = vst [vmem:[#allocation35_spill] sm:$0xff] %v9874_v29  ;;  %v9876_v3 = vpop.f32.mrf.mxu1 }
 0x27a   :  { %10074 = vst [vmem:[#allocation36_spill] sm:$0xff] %v9876_v3  ;;  %v9878_v30 = vpop.f32.mrf.mxu0  ;;  %v5209_v3 = vadd.f32 %v9768_v26, %v5096_v55  ;;  %v5219_v31 = vadd.f32 %v9784_v57, %v5106_v54  ;;  %v5223_v57 = vadd.f32 %v9792_v6, %v5110_v56  ;;  %v5229_v16 = vadd.f32 %v9800_v51, %v5116_v17 }
 0x27b   :  { %10075 = vst [vmem:[#allocation37_spill] sm:$0xff] %v9878_v30  ;;  %v9880_v14 = vpop.f32.mrf.mxu1  ;;  %v5122_v51 = vadd.f32 %v9810_v25, %v9708_v49  ;;  %v5128_v49 = vadd.f32 %v9818_v61, %v9714_v1 }
 0x27c   :  { %10076 = vst [vmem:[#allocation38_spill] sm:$0xff] %v9880_v14  ;;  %v9882_v34 = vpop.f32.mrf.mxu0  ;;  %v5100_v14 = vadd.f32 %v9774_v37, %v9681_v20  ;;  %v5108_v20 = vadd.f32 %v9786_v19, %v9690_v15 }
 0x27d   :  { %10077 = vst [vmem:[#allocation39_spill] sm:$0xff] %v9882_v34  ;;  %v9884_v13 = vpop.f32.mrf.mxu1 }
 0x27e   :  { %10078 = vst [vmem:[#allocation40_spill] sm:$0xff] %v9884_v13  ;;  %v9887_v9 = vpop.f32.mrf.mxu0  ;;  %v5211_v13 = vadd.f32 %v9772_v12, %v5098_v59  ;;  %v5215_v59 = vadd.f32 %v9780_v60, %v5102_v46  ;;  %v5112_v60 = vadd.f32 %v9794_v32, %v9696_v44  ;;  %v5118_v44 = vadd.f32 %v9802_v47, %v9702_v43 }
 0x27f   :  { %10079 = vst [vmem:[#allocation41_spill] sm:$0xff] %v9887_v9  ;;  %v9889_v4 = vpop.f32.mrf.mxu1 }
 0x280   :  { %10080 = vst [vmem:[#allocation42_spill] sm:$0xff] %v9889_v4  ;;  %v9892_v62 = vpop.f32.mrf.mxu0  ;;  %v5225_v6 = vadd.f32 %v9796_v0, %v5112_v60  ;;  %v5231_v0 = vadd.f32 %v9804_v48, %v5118_v44 }
 0x281   :  { %10081 = vst [vmem:[#allocation43_spill] sm:$0xff] %v9892_v62  ;;  %v9894_v29 = vpop.f32.mrf.mxu1 }
 0x282   :  { %10082 = vst [vmem:[#allocation44_spill] sm:$0xff] %v9894_v29  ;;  %v5321_v34 = vpop.f32.mrf.mxu0  ;;  %v5213_v29 = vadd.f32 %v9776_v53, %v5100_v14  ;;  %v5221_v53 = vadd.f32 %v9788_v23, %v5108_v20  ;;  %v5120_v20 = vadd.f32 %v9806_v35, %v9705_v21 }
 0x283   :  { %v5434_v30 = vpop.f32.mrf.mxu1  ;;  %v5322_v18 = vadd.f32 %v5321_v34, %v5209_v3 }
 0x284   :  { %v5323_v5 = vpop.f32.mrf.mxu0  ;;  %v5233_v35 = vadd.f32 %v9808_v7, %v5120_v20  ;;  %v5235_v7 = vadd.f32 %v9812_v39, %v5122_v51  ;;  %v5241_v39 = vadd.f32 %v9820_v8, %v5128_v49  ;;  %v10083_v20 = vld [vmem:[#allocation2_spill] sm:$0xff]  ;;  %v10086_v51 = vld [vmem:[#allocation3_spill] sm:$0xff] }
 0x285   :  { %v5436_v4 = vpop.f32.mrf.mxu1  ;;  %v5435_v62 = vadd.f32 %v5434_v30, %v5322_v18  ;;  %v5324_v55 = vadd.f32 %v5323_v5, %v5211_v13 }
 0x286   :  { %v5325_v26 = vpop.f32.mrf.mxu0 }
 0x287   :  { %v5438_v37 = vpop.f32.mrf.mxu1  ;;  %v5437_v12 = vadd.f32 %v5436_v4, %v5324_v55  ;;  %v5326_v9 = vadd.f32 %v5325_v26, %v5213_v29  ;;  %v5513_v2 = vmax.f32 %v5435_v62, 0.0 }
 0x288   :  { %v5327_v3 = vpop.f32.mrf.mxu0 }
 0x289   :  { %v5440_v34 = vpop.f32.mrf.mxu1  ;;  %v5514_v14 = vmax.f32 %v5437_v12, 0.0  ;;  %v5439_v30 = vadd.f32 %v5438_v37, %v5326_v9  ;;  %v5328_v13 = vadd.f32 %v5327_v3, %v5215_v59 }
 0x28a   :  { %v5331_v15 = vpop.f32.mrf.mxu0 }
 0x28b   :  { %v5444_v27 = vpop.f32.mrf.mxu1  ;;  %v6325_v4 = vpack.c.bf16 %v5514_v14, %v5513_v2  ;;  %v5441_v29 = vadd.f32 %v5440_v34, %v5328_v13  ;;  %v5332_v19 = vadd.f32 %v5331_v15, %v5219_v31  ;;  %v5515_v9 = vmax.f32 %v5439_v30, 0.0 }
 0x28c   :  { %v5333_v11 = vpop.f32.mrf.mxu0  ;;  %v5126_v2 = vadd.f32 %v9814_v50, %v9711_v41 }
 0x28d   :  { %v5446_v62 = vpop.f32.mrf.mxu1  ;;  %5641 = vst [vmem:[%s10039_s3] sm:$0xff] %v6325_v4  ;;  %v5516_v23 = vmax.f32 %v5441_v29, 0.0  ;;  %v5445_v46 = vadd.f32 %v5444_v27, %v5332_v19  ;;  %v5334_v18 = vadd.f32 %v5333_v11, %v5221_v53  ;;  %v5130_v29 = vadd.f32 %v9822_v58, %v9717_v42 }
 0x28e   :  { %v5335_v32 = vpop.f32.mrf.mxu0  ;;  %v5239_v50 = vadd.f32 %v9816_v40, %v5126_v2  ;;  %v5132_v40 = vadd.f32 %v9826_v24, %v9720_v28  ;;  %v5138_v28 = vadd.f32 %v9834_v38, %v9726_v63  ;;  %v10088_v2 = vld [vmem:[#allocation18_spill] sm:$0xff] }
 0x28f   :  { %v5448_v54 = vpop.f32.mrf.mxu1  ;;  %v6326_v5 = vpack.c.bf16 %v5516_v23, %v5515_v9  ;;  %v5447_v55 = vadd.f32 %v5446_v62, %v5334_v18  ;;  %v5336_v36 = vadd.f32 %v5335_v32, %v5223_v57  ;;  %v5517_v59 = vmax.f32 %v5445_v46, 0.0 }
 0x290   :  { %v5337_v26 = vpop.f32.mrf.mxu0  ;;  %v5243_v58 = vadd.f32 %v9824_v33, %v5130_v29  ;;  %v5136_v18 = vadd.f32 %v9830_v52, %v9723_v22  ;;  %v5245_v33 = vadd.f32 %v9828_v10, %v5132_v40 }
 0x291   :  { %v5450_v37 = vpop.f32.mrf.mxu1  ;;  %5642 = vst [vmem:[%s10039_s3 + $0x8] sm:$0xff] %v6326_v5  ;;  %v5518_v43 = vmax.f32 %v5447_v55, 0.0  ;;  %v5449_v47 = vadd.f32 %v5448_v54, %v5336_v36  ;;  %v5338_v12 = vadd.f32 %v5337_v26, %v5225_v6  ;;  %v10084_v26 = vld [vmem:[#allocation17_spill] sm:$0xff] }
 0x292   :  { %v5341_v31 = vpop.f32.mrf.mxu0  ;;  %v5249_v52 = vadd.f32 %v9832_v45, %v5136_v18 }
 0x293   :  { %v5454_v56 = vpop.f32.mrf.mxu1  ;;  %v6327_v3 = vpack.c.bf16 %v5518_v43, %v5517_v59  ;;  %v5451_v34 = vadd.f32 %v5450_v37, %v5338_v12  ;;  %v5342_v21 = vadd.f32 %v5341_v31, %v5229_v16  ;;  %v5519_v48 = vmax.f32 %v5449_v47, 0.0 }
 0x294   :  { %v5343_v14 = vpop.f32.mrf.mxu0  ;;  %v5140_v37 = vadd.f32 %v10084_v26, %v10083_v20  ;;  %v10102_v20 = vld [vmem:[#allocation29_spill] sm:$0xff] }
 0x295   :  { %v5456_v30 = vpop.f32.mrf.mxu1  ;;  %5643 = vst [vmem:[%s10039_s3 + $0x10] sm:$0xff] %v6327_v3  ;;  %v5520_v13 = vmax.f32 %v5451_v34, 0.0  ;;  %v5455_v53 = vadd.f32 %v5454_v56, %v5342_v21  ;;  %v5344_v15 = vadd.f32 %v5343_v14, %v5231_v0  ;;  %v10085_v0 = vld [vmem:[#allocation16_spill] sm:$0xff]  ;;  %v10087_v3 = vld [vmem:[#allocation19_spill] sm:$0xff] }
 0x296   :  { %v5345_v25 = vpop.f32.mrf.mxu0  ;;  %v5251_v10 = vadd.f32 %v10085_v0, %v5138_v28  ;;  %v5142_v45 = vadd.f32 %v10087_v3, %v10086_v51  ;;  %v5253_v14 = vadd.f32 %v10088_v2, %v5140_v37  ;;  %v10099_v28 = vld [vmem:[#allocation27_spill] sm:$0xff]  ;;  %v10105_v51 = vld [vmem:[#allocation28_spill] sm:$0xff] }
 0x297   :  { %v5458_v27 = vpop.f32.mrf.mxu1  ;;  %v6328_v60 = vpack.c.bf16 %v5520_v13, %v5519_v48  ;;  %v5457_v4 = vadd.f32 %v5456_v30, %v5344_v15  ;;  %v5346_v41 = vadd.f32 %v5345_v25, %v5233_v35  ;;  %v5521_v17 = vmax.f32 %v5455_v53, 0.0  ;;  %v10089_v30 = vld [vmem:[#allocation4_spill] sm:$0xff]  ;;  %v10090_v48 = vld [vmem:[#allocation21_spill] sm:$0xff]  ;;  %v10104_v0 = vld [vmem:[#allocation31_spill] sm:$0xff] }
 0x298   :  { %v5347_v19 = vpop.f32.mrf.mxu0  ;;  %v5146_v13 = vadd.f32 %v10090_v48, %v10089_v30  ;;  %v10108_v30 = vld [vmem:[#allocation33_spill] sm:$0xff] }
 0x299   :  { %v5460_v57 = vpop.f32.mrf.mxu1  ;;  %5644 = vst [vmem:[%s10039_s3 + $0x18] sm:$0xff] %v6328_v60  ;;  %v5522_v1 = vmax.f32 %v5457_v4, 0.0  ;;  %v5459_v61 = vadd.f32 %v5458_v27, %v5346_v41  ;;  %v5348_v11 = vadd.f32 %v5347_v19, %v5235_v7  ;;  %v10091_v60 = vld [vmem:[#allocation5_spill] sm:$0xff]  ;;  %v10092_v4 = vld [vmem:[#allocation23_spill] sm:$0xff]  ;;  %v10093_v19 = vld [vmem:[#allocation20_spill] sm:$0xff] }
 0x29a   :  { %v5351_v62 = vpop.f32.mrf.mxu0  ;;  %v5148_v41 = vadd.f32 %v10092_v4, %v10091_v60 }
 0x29b   :  { %v5464_v9 = vpop.f32.mrf.mxu1  ;;  %v6329_v23 = vpack.c.bf16 %v5522_v1, %v5521_v17  ;;  %v5461_v46 = vadd.f32 %v5460_v57, %v5348_v11  ;;  %v5352_v42 = vadd.f32 %v5351_v62, %v5239_v50  ;;  %v5523_v8 = vmax.f32 %v5459_v61, 0.0  ;;  %v10094_v11 = vld [vmem:[#allocation22_spill] sm:$0xff] }
 0x29c   :  { %v5353_v44 = vpop.f32.mrf.mxu0  ;;  %v5255_v57 = vadd.f32 %v10093_v19, %v5142_v45  ;;  %v10095_v62 = vld [vmem:[#allocation6_spill] sm:$0xff] }
 0x29d   :  { %v5466_v32 = vpop.f32.mrf.mxu1  ;;  %5645 = vst [vmem:[%s10039_s3 + $0x20] sm:$0xff] %v6329_v23  ;;  %v5524_v54 = vmax.f32 %v5461_v46, 0.0  ;;  %v5465_v6 = vadd.f32 %v5464_v9, %v5352_v42  ;;  %v5354_v5 = vadd.f32 %v5353_v44, %v5241_v39  ;;  %v5259_v39 = vadd.f32 %v10094_v11, %v5146_v13  ;;  %v10096_v9 = vld [vmem:[#allocation25_spill] sm:$0xff] }
 0x29e   :  { %v5355_v24 = vpop.f32.mrf.mxu0  ;;  %v5150_v40 = vadd.f32 %v10096_v9, %v10095_v62  ;;  %v10114_v62 = vld [vmem:[#allocation37_spill] sm:$0xff] }
 0x29f   :  { %v5468_v55 = vpop.f32.mrf.mxu1  ;;  %v6330_v36 = vpack.c.bf16 %v5524_v54, %v5523_v8  ;;  %v5467_v16 = vadd.f32 %v5466_v32, %v5354_v5  ;;  %v5356_v22 = vadd.f32 %v5355_v24, %v5243_v58  ;;  %v5525_v47 = vmax.f32 %v5465_v6, 0.0  ;;  %v10097_v32 = vld [vmem:[#allocation24_spill] sm:$0xff]  ;;  %v10098_v5 = vld [vmem:[#allocation7_spill] sm:$0xff] }
 0x2a0   :  { %v5357_v59 = vpop.f32.mrf.mxu0  ;;  %v5261_v8 = vadd.f32 %v10097_v32, %v5148_v41  ;;  %v5152_v24 = vadd.f32 %v10099_v28, %v10098_v5  ;;  %v10116_v32 = vld [vmem:[#allocation39_spill] sm:$0xff]  ;;  %v10117_v5 = vld [vmem:[#allocation36_spill] sm:$0xff] }
 0x2a1   :  { %v5470_v43 = vpop.f32.mrf.mxu1  ;;  %5646 = vst [vmem:[%s10039_s3 + $0x28] sm:$0xff] %v6330_v36  ;;  %v5526_v63 = vmax.f32 %v5467_v16, 0.0  ;;  %v5469_v38 = vadd.f32 %v5468_v55, %v5356_v22  ;;  %v5358_v12 = vadd.f32 %v5357_v59, %v5245_v33  ;;  %v10100_v16 = vld [vmem:[#allocation26_spill] sm:$0xff] }
 0x2a2   :  { %v5361_v31 = vpop.f32.mrf.mxu0  ;;  %v5263_v22 = vadd.f32 %v10100_v16, %v5150_v40  ;;  %v5265_v3 = vadd.f32 %v10105_v51, %v5152_v24 }
 0x2a3   :  { %v5474_v56 = vpop.f32.mrf.mxu1  ;;  %v6331_v34 = vpack.c.bf16 %v5526_v63, %v5525_v47  ;;  %v5471_v21 = vadd.f32 %v5470_v43, %v5358_v12  ;;  %v5362_v35 = vadd.f32 %v5361_v31, %v5249_v52  ;;  %v5527_v49 = vmax.f32 %v5469_v38, 0.0  ;;  %v10101_v52 = vld [vmem:[#allocation8_spill] sm:$0xff]  ;;  %v10103_v12 = vld [vmem:[#allocation9_spill] sm:$0xff] }
 0x2a4   :  { %v5363_v53 = vpop.f32.mrf.mxu0  ;;  %v5156_v26 = vadd.f32 %v10102_v20, %v10101_v52  ;;  %v10120_v52 = vld [vmem:[#allocation41_spill] sm:$0xff] }
 0x2a5   :  { %v5476_v15 = vpop.f32.mrf.mxu1  ;;  %5647 = vst [vmem:[%s10039_s3 + $0x30] sm:$0xff] %v6331_v34  ;;  %v5528_v25 = vmax.f32 %v5471_v21, 0.0  ;;  %v5475_v27 = vadd.f32 %v5474_v56, %v5362_v35  ;;  %v5364_v7 = vadd.f32 %v5363_v53, %v5251_v10  ;;  %v5158_v10 = vadd.f32 %v10104_v0, %v10103_v12  ;;  %v10106_v35 = vld [vmem:[#allocation30_spill] sm:$0xff] }
 0x2a6   :  { %v5365_v50 = vpop.f32.mrf.mxu0  ;;  %v5269_v2 = vadd.f32 %v10106_v35, %v5156_v26 }
 0x2a7   :  { %v5478_v29 = vpop.f32.mrf.mxu1  ;;  %v6332_v17 = vpack.c.bf16 %v5528_v25, %v5527_v49  ;;  %v5477_v1 = vadd.f32 %v5476_v15, %v5364_v7  ;;  %v5366_v61 = vadd.f32 %v5365_v50, %v5253_v14  ;;  %v5529_v42 = vmax.f32 %v5475_v27, 0.0  ;;  %v10107_v14 = vld [vmem:[#allocation10_spill] sm:$0xff]  ;;  %v10109_v7 = vld [vmem:[#allocation32_spill] sm:$0xff]  ;;  %v10110_v50 = vld [vmem:[#allocation11_spill] sm:$0xff] }
 0x2a8   :  { %v5367_v23 = vpop.f32.mrf.mxu0  ;;  %v5160_v48 = vadd.f32 %v10108_v30, %v10107_v14  ;;  %v5271_v60 = vadd.f32 %v10109_v7, %v5158_v10 }
 0x2a9   :  { %v5480_v46 = vpop.f32.mrf.mxu1  ;;  %5648 = vst [vmem:[%s10039_s3 + $0x38] sm:$0xff] %v6332_v17  ;;  %v5530_v58 = vmax.f32 %v5477_v1, 0.0  ;;  %v5479_v18 = vadd.f32 %v5478_v29, %v5366_v61  ;;  %v5368_v44 = vadd.f32 %v5367_v23, %v5255_v57  ;;  %v10111_v29 = vld [vmem:[#allocation35_spill] sm:$0xff]  ;;  %v10112_v61 = vld [vmem:[#allocation34_spill] sm:$0xff] }
 0x2aa   :  { %v5371_v54 = vpop.f32.mrf.mxu0  ;;  %v5162_v19 = vadd.f32 %v10111_v29, %v10110_v50  ;;  %v5273_v11 = vadd.f32 %v10112_v61, %v5160_v48 }
 0x2ab   :  { %v5484_v6 = vpop.f32.mrf.mxu1  ;;  %v6333_v55 = vpack.c.bf16 %v5530_v58, %v5529_v42  ;;  %v5481_v33 = vadd.f32 %v5480_v46, %v5368_v44  ;;  %v5372_v36 = vadd.f32 %v5371_v54, %v5259_v39  ;;  %v5531_v43 = vmax.f32 %v5479_v18, 0.0  ;;  %v10113_v39 = vld [vmem:[#allocation12_spill] sm:$0xff]  ;;  %v10115_v44 = vld [vmem:[#allocation13_spill] sm:$0xff] }
 0x2ac   :  { %v5373_v37 = vpop.f32.mrf.mxu0  ;;  %v5166_v9 = vadd.f32 %v10114_v62, %v10113_v39  ;;  %v5275_v28 = vadd.f32 %v10117_v5, %v5162_v19 }
 0x2ad   :  { %v5486_v59 = vpop.f32.mrf.mxu1  ;;  %5649 = vst [vmem:[%s10039_s3 + $0x40] sm:$0xff] %v6333_v55  ;;  %v5532_v47 = vmax.f32 %v5481_v33, 0.0  ;;  %v5485_v63 = vadd.f32 %v5484_v6, %v5372_v36  ;;  %v5374_v38 = vadd.f32 %v5373_v37, %v5261_v8  ;;  %v5168_v8 = vadd.f32 %v10116_v32, %v10115_v44  ;;  %v10118_v36 = vld [vmem:[#allocation38_spill] sm:$0xff] }
 0x2ae   :  { %v5375_v31 = vpop.f32.mrf.mxu0  ;;  %v5279_v16 = vadd.f32 %v10118_v36, %v5166_v9 }
 0x2af   :  { %v5488_v56 = vpop.f32.mrf.mxu1  ;;  %v6334_v45 = vpack.c.bf16 %v5532_v47, %v5531_v43  ;;  %v5487_v34 = vadd.f32 %v5486_v59, %v5374_v38  ;;  %v5376_v21 = vadd.f32 %v5375_v31, %v5263_v22  ;;  %v5533_v15 = vmax.f32 %v5485_v63, 0.0  ;;  %v10119_v22 = vld [vmem:[#allocation14_spill] sm:$0xff]  ;;  %v10121_v38 = vld [vmem:[#allocation40_spill] sm:$0xff]  ;;  %v10122_v31 = vld [vmem:[#allocation15_spill] sm:$0xff] }
 0x2b0   :  { %v5377_v13 = vpop.f32.mrf.mxu0  ;;  %v5170_v20 = vadd.f32 %v10120_v52, %v10119_v22  ;;  %v5281_v12 = vadd.f32 %v10121_v38, %v5168_v8 }
 0x2b1   :  { %v5490_v53 = vpop.f32.mrf.mxu1  ;;  %5650 = vst [vmem:[%s10039_s3 + $0x48] sm:$0xff] %v6334_v45  ;;  %v5534_v49 = vmax.f32 %v5487_v34, 0.0  ;;  %v5489_v25 = vadd.f32 %v5488_v56, %v5376_v21  ;;  %v5378_v27 = vadd.f32 %v5377_v13, %v5265_v3  ;;  %v10123_v56 = vld [vmem:[#allocation43_spill] sm:$0xff]  ;;  %v10124_v21 = vld [vmem:[#allocation42_spill] sm:$0xff] }
 0x2b2   :  { %v5381_v4 = vpop.f32.mrf.mxu0  ;;  %v5172_v51 = vadd.f32 %v10123_v56, %v10122_v31  ;;  %v5283_v35 = vadd.f32 %v10124_v21, %v5170_v20 }
 0x2b3   :  { %v5494_v41 = vpop.f32.mrf.mxu1  ;;  %v6335_v57 = vpack.c.bf16 %v5534_v49, %v5533_v15  ;;  %v5491_v17 = vadd.f32 %v5490_v53, %v5378_v27  ;;  %v5382_v1 = vadd.f32 %v5381_v4, %v5269_v2  ;;  %v5535_v46 = vmax.f32 %v5489_v25, 0.0  ;;  %v10125_v25 = vld [vmem:[#allocation44_spill] sm:$0xff] }
 0x2b4   :  { %v5383_v40 = vpop.f32.mrf.mxu0  ;;  %v5285_v27 = vadd.f32 %v10125_v25, %v5172_v51 }
 0x2b5   :  { %v5496_v23 = vpop.f32.mrf.mxu1  ;;  %5651 = vst [vmem:[%s10039_s3 + $0x50] sm:$0xff] %v6335_v57  ;;  %v5536_v42 = vmax.f32 %v5491_v17, 0.0  ;;  %v5495_v58 = vadd.f32 %v5494_v41, %v5382_v1  ;;  %v5384_v18 = vadd.f32 %v5383_v40, %v5271_v60 }
 0x2b6   :  { %v5385_v54 = vpop.f32.mrf.mxu0 }
 0x2b7   :  { %v5498_v6 = vpop.f32.mrf.mxu1  ;;  %v6336_v24 = vpack.c.bf16 %v5536_v42, %v5535_v46  ;;  %v5497_v55 = vadd.f32 %v5496_v23, %v5384_v18  ;;  %v5386_v33 = vadd.f32 %v5385_v54, %v5273_v11  ;;  %v5537_v59 = vmax.f32 %v5495_v58, 0.0 }
 0x2b8   :  { %v5387_v26 = vpop.f32.mrf.mxu0 }
 0x2b9   :  { %v5500_v37 = vpop.f32.mrf.mxu1  ;;  %5652 = vst [vmem:[%s10039_s3 + $0x58] sm:$0xff] %v6336_v24  ;;  %v5538_v43 = vmax.f32 %v5497_v55, 0.0  ;;  %v5499_v47 = vadd.f32 %v5498_v6, %v5386_v33  ;;  %v5388_v63 = vadd.f32 %v5387_v26, %v5275_v28 }
 0x2ba   :  { %v5391_v0 = vpop.f32.mrf.mxu0 }
 0x2bb   :  { %v5504_v10 = vpop.f32.mrf.mxu1  ;;  %v6337_v3 = vpack.c.bf16 %v5538_v43, %v5537_v59  ;;  %v5501_v45 = vadd.f32 %v5500_v37, %v5388_v63  ;;  %v5392_v34 = vadd.f32 %v5391_v0, %v5279_v16  ;;  %v5539_v30 = vmax.f32 %v5499_v47, 0.0 }
 0x2bc   :  { %v5393_v2 = vpop.f32.mrf.mxu0 }
 0x2bd   :  { %v5506_v14 = vpop.f32.mrf.mxu1  ;;  %5653 = vst [vmem:[%s10039_s3 + $0x60] sm:$0xff] %v6337_v3  ;;  %v5540_v48 = vmax.f32 %v5501_v45, 0.0  ;;  %v5505_v13 = vadd.f32 %v5504_v10, %v5392_v34  ;;  %v5394_v53 = vadd.f32 %v5393_v2, %v5281_v12 }
 0x2be   :  { %v5395_v15 = vpop.f32.mrf.mxu0 }
 0x2bf   :  { %v5508_v49 = vpop.f32.mrf.mxu1  ;;  %v6338_v7 = vpack.c.bf16 %v5540_v48, %v5539_v30  ;;  %v5507_v60 = vadd.f32 %v5506_v14, %v5394_v53  ;;  %v5396_v4 = vadd.f32 %v5395_v15, %v5283_v35  ;;  %v5541_v50 = vmax.f32 %v5505_v13, 0.0 }
 0x2c0   :  { %v5397_v41 = vpop.f32.mrf.mxu0 }
 0x2c1   :  { %5654 = vst [vmem:[%s10039_s3 + $0x68] sm:$0xff] %v6338_v7  ;;  %v5542_v29 = vmax.f32 %v5507_v60, 0.0  ;;  %v5509_v19 = vadd.f32 %v5508_v49, %v5396_v4  ;;  %v5398_v57 = vadd.f32 %v5397_v41, %v5285_v27  ;;  %v5510_v17 = vpop.f32.mrf.mxu1 }
 0x2c3   :  { %v6339_v1 = vpack.c.bf16 %v5542_v29, %v5541_v50  ;;  %v5511_v61 = vadd.f32 %v5510_v17, %v5398_v57  ;;  %v5543_v11 = vmax.f32 %v5509_v19, 0.0 }
 0x2c5   :  { %5655 = vst [vmem:[%s10039_s3 + $0x70] sm:$0xff] %v6339_v1  ;;  %v5544_v39 = vmax.f32 %v5511_v61, 0.0 }
 0x2c7   :  { %v6340_v62 = vpack.c.bf16 %v5544_v39, %v5543_v11 }
 0x2c9   :  { %5656 = vst [vmem:[%s10039_s3 + $0x78] sm:$0xff] %v6340_v62 }

// kernel: deeplab3d_forward.21
= control target key start
LH: loop header
LB: loop body
LE: loop exit
PB: predicated region body
PF: predicated region fallthrough
CT: control target
= control target key end

     0   :  { %s1173_s6 = smov 0   ;;  %s1841_s0 = inlined_call_operand.vmem [shape: f32[8192,128], index: 0, kind: input, shape index: {}]   ;;  %s1842_s1 = inlined_call_operand.vmem [shape: f32[8192,128], index: 1, kind: output, shape index: {}]  }
   0x1 LB: > { %s880_s7 = sadd.s32 4294967295, %s1161_s6   ;;  %p884_p0 = scmp.ge.s32.totalorder %s1161_s6, 1  ;;  %s1161_s6 = sphi %s1173_s6, %s11_s6  }
   0x2   : > { %p88_p1 = scmp.lt.s32.totalorder %s1161_s6, 17 }
   0x4   : > { %p89_p2 = pnand %p884_p0, %p88_p1 }
   0x6   : > { %92 = sbr.rel (%p89_p2) target bundleno = 457 (0x1c9), region = 24 }
   0xb   : > { %s885_s8 = sshll.u32 %s880_s7, 6 }
   0xc   : > { %p109_p3 = scmp.lt.s32.totalorder %s885_s8, 1023 }
   0xe   : > { %s1922_s8 = smov (!%p109_p3, %s885_s8), 1023 }
   0xf   : > { %s886_s9 = sshll.u32 %s1922_s8, 3 }
  0x10   : > { %s1189_s12 = scalar_lea.vmem %s1841_s0, %s886_s9  ;;  %s1708_s15 = scalar_lea.vmem %s1842_s1, %s886_s9 }
  0x11   : > { %v1192_v0 = vld [vmem:[%s1189_s12] sm:$0xff]  ;;  %v1195_v1 = vld [vmem:[%s1189_s12 + $0x10] sm:$0xff]  ;;  %v1200_v2 = vld [vmem:[%s1189_s12 + $0x8] sm:$0xff] }
  0x12   : > { %184 = vmax.xlane.f32.xlu0 %v1192_v0  ;;  %188 = vmax.xlane.f32.xlu1 %v1195_v1  ;;  %v1203_v3 = vld [vmem:[%s1189_s12 + $0x18] sm:$0xff]  ;;  %v1208_v4 = vld [vmem:[%s1189_s12 + $0x20] sm:$0xff]  ;;  %v1211_v5 = vld [vmem:[%s1189_s12 + $0x28] sm:$0xff] }
  0x13   : > { %v1216_v6 = vld [vmem:[%s1189_s12 + $0x30] sm:$0xff]  ;;  %v1219_v7 = vld [vmem:[%s1189_s12 + $0x38] sm:$0xff]  ;;  %v1224_v8 = vld [vmem:[%s1189_s12 + $0x40] sm:$0xff] }
  0x14   : > { %v1227_v9 = vld [vmem:[%s1189_s12 + $0x48] sm:$0xff]  ;;  %v1232_v10 = vld [vmem:[%s1189_s12 + $0x50] sm:$0xff]  ;;  %v1235_v11 = vld [vmem:[%s1189_s12 + $0x58] sm:$0xff] }
  0x15   : > { %v1240_v12 = vld [vmem:[%s1189_s12 + $0x60] sm:$0xff]  ;;  %v1243_v13 = vld [vmem:[%s1189_s12 + $0x68] sm:$0xff]  ;;  %v1248_v14 = vld [vmem:[%s1189_s12 + $0x70] sm:$0xff] }
  0x16   : > { %186 = vmax.xlane.f32.xlu0 %v1200_v2  ;;  %190 = vmax.xlane.f32.xlu1 %v1203_v3  ;;  %v1251_v15 = vld [vmem:[%s1189_s12 + $0x78] sm:$0xff]  ;;  %v1256_v16 = vld [vmem:[%s1189_s12 + $0x80] sm:$0xff]  ;;  %v1259_v17 = vld [vmem:[%s1189_s12 + $0x88] sm:$0xff] }
  0x17   : > { %v1264_v18 = vld [vmem:[%s1189_s12 + $0x90] sm:$0xff]  ;;  %v1267_v19 = vld [vmem:[%s1189_s12 + $0x98] sm:$0xff]  ;;  %v1272_v20 = vld [vmem:[%s1189_s12 + $0xa0] sm:$0xff] }
  0x18   : > { %v1275_v21 = vld [vmem:[%s1189_s12 + $0xa8] sm:$0xff]  ;;  %v1280_v22 = vld [vmem:[%s1189_s12 + $0xb0] sm:$0xff]  ;;  %v1283_v23 = vld [vmem:[%s1189_s12 + $0xb8] sm:$0xff] }
  0x19   : > { %v1288_v24 = vld [vmem:[%s1189_s12 + $0xc0] sm:$0xff]  ;;  %v1291_v25 = vld [vmem:[%s1189_s12 + $0xc8] sm:$0xff]  ;;  %v1296_v26 = vld [vmem:[%s1189_s12 + $0xd0] sm:$0xff] }
  0x1a   : > { %192 = vmax.xlane.f32.xlu0 %v1208_v4  ;;  %194 = vmax.xlane.f32.xlu1 %v1211_v5  ;;  %v1299_v27 = vld [vmem:[%s1189_s12 + $0xd8] sm:$0xff]  ;;  %v1304_v28 = vld [vmem:[%s1189_s12 + $0xe0] sm:$0xff]  ;;  %v1307_v29 = vld [vmem:[%s1189_s12 + $0xe8] sm:$0xff] }
  0x1b   : > { %v1312_v30 = vld [vmem:[%s1189_s12 + $0xf0] sm:$0xff]  ;;  %v1315_v31 = vld [vmem:[%s1189_s12 + $0xf8] sm:$0xff]  ;;  %v1320_v32 = vld [vmem:[%s1189_s12 + $0x100] sm:$0xff] }
  0x1c   : > { %v1323_v33 = vld [vmem:[%s1189_s12 + $0x108] sm:$0xff]  ;;  %v1328_v34 = vld [vmem:[%s1189_s12 + $0x110] sm:$0xff]  ;;  %v1331_v35 = vld [vmem:[%s1189_s12 + $0x118] sm:$0xff] }
  0x1d   : > { %v1336_v36 = vld [vmem:[%s1189_s12 + $0x120] sm:$0xff]  ;;  %v1339_v37 = vld [vmem:[%s1189_s12 + $0x128] sm:$0xff]  ;;  %v1344_v38 = vld [vmem:[%s1189_s12 + $0x130] sm:$0xff] }
  0x1e   : > { %196 = vmax.xlane.f32.xlu0 %v1216_v6  ;;  %198 = vmax.xlane.f32.xlu1 %v1219_v7  ;;  %v1347_v39 = vld [vmem:[%s1189_s12 + $0x138] sm:$0xff]  ;;  %v1352_v40 = vld [vmem:[%s1189_s12 + $0x140] sm:$0xff]  ;;  %v1355_v41 = vld [vmem:[%s1189_s12 + $0x148] sm:$0xff] }
  0x1f   : > { %v1360_v42 = vld [vmem:[%s1189_s12 + $0x150] sm:$0xff]  ;;  %v1363_v43 = vld [vmem:[%s1189_s12 + $0x158] sm:$0xff]  ;;  %v1368_v44 = vld [vmem:[%s1189_s12 + $0x160] sm:$0xff] }
  0x20   : > { %v1371_v45 = vld [vmem:[%s1189_s12 + $0x168] sm:$0xff]  ;;  %v1376_v46 = vld [vmem:[%s1189_s12 + $0x170] sm:$0xff]  ;;  %v1379_v47 = vld [vmem:[%s1189_s12 + $0x178] sm:$0xff] }
  0x21   : > { %v1384_v48 = vld [vmem:[%s1189_s12 + $0x180] sm:$0xff]  ;;  %v1387_v49 = vld [vmem:[%s1189_s12 + $0x188] sm:$0xff]  ;;  %v1392_v50 = vld [vmem:[%s1189_s12 + $0x190] sm:$0xff] }
  0x22   : > { %200 = vmax.xlane.f32.xlu0 %v1224_v8  ;;  %202 = vmax.xlane.f32.xlu1 %v1227_v9  ;;  %1869 = vst [vmem:[#allocation2_spill] sm:$0xff] %v1387_v49  ;;  %1870 = vst [vmem:[#allocation3_spill] sm:$0xff] %v1392_v50  ;;  %v1395_v51 = vld [vmem:[%s1189_s12 + $0x198] sm:$0xff]  ;;  %v1400_v52 = vld [vmem:[%s1189_s12 + $0x1a0] sm:$0xff] }
  0x23   : > { %1871 = vst [vmem:[#allocation4_spill] sm:$0xff] %v1395_v51  ;;  %1872 = vst [vmem:[#allocation5_spill] sm:$0xff] %v1400_v52  ;;  %v1403_v53 = vld [vmem:[%s1189_s12 + $0x1a8] sm:$0xff]  ;;  %v1408_v54 = vld [vmem:[%s1189_s12 + $0x1b0] sm:$0xff] }
  0x24   : > { %1873 = vst [vmem:[#allocation6_spill] sm:$0xff] %v1403_v53  ;;  %1874 = vst [vmem:[#allocation7_spill] sm:$0xff] %v1408_v54  ;;  %v1411_v55 = vld [vmem:[%s1189_s12 + $0x1b8] sm:$0xff]  ;;  %v1416_v56 = vld [vmem:[%s1189_s12 + $0x1c0] sm:$0xff] }
  0x25   : > { %1875 = vst [vmem:[#allocation8_spill] sm:$0xff] %v1411_v55  ;;  %1876 = vst [vmem:[#allocation9_spill] sm:$0xff] %v1416_v56  ;;  %v1419_v57 = vld [vmem:[%s1189_s12 + $0x1c8] sm:$0xff]  ;;  %v1424_v58 = vld [vmem:[%s1189_s12 + $0x1d0] sm:$0xff] }
  0x26   : > { %204 = vmax.xlane.f32.xlu0 %v1232_v10  ;;  %206 = vmax.xlane.f32.xlu1 %v1235_v11  ;;  %1877 = vst [vmem:[#allocation10_spill] sm:$0xff] %v1419_v57  ;;  %1878 = vst [vmem:[#allocation11_spill] sm:$0xff] %v1424_v58  ;;  %v1427_v59 = vld [vmem:[%s1189_s12 + $0x1d8] sm:$0xff]  ;;  %v1432_v60 = vld [vmem:[%s1189_s12 + $0x1e0] sm:$0xff] }
  0x27   : > { %1879 = vst [vmem:[#allocation12_spill] sm:$0xff] %v1427_v59  ;;  %1880 = vst [vmem:[#allocation13_spill] sm:$0xff] %v1432_v60  ;;  %v1435_v61 = vld [vmem:[%s1189_s12 + $0x1e8] sm:$0xff]  ;;  %v1440_v62 = vld [vmem:[%s1189_s12 + $0x1f0] sm:$0xff] }
  0x28   : > { %1881 = vst [vmem:[#allocation14_spill] sm:$0xff] %v1435_v61  ;;  %1882 = vst [vmem:[#allocation15_spill] sm:$0xff] %v1440_v62  ;;  %v1443_v63 = vld [vmem:[%s1189_s12 + $0x1f8] sm:$0xff] }
  0x29   : > { %1883 = vst [vmem:[#allocation16_spill] sm:$0xff] %v1443_v63 }
  0x2a   : > { %208 = vmax.xlane.f32.xlu0 %v1240_v12  ;;  %210 = vmax.xlane.f32.xlu1 %v1243_v13 }
  0x2e   : > { %212 = vmax.xlane.f32.xlu0 %v1248_v14  ;;  %214 = vmax.xlane.f32.xlu1 %v1251_v15 }
  0x32   : > { %216 = vmax.xlane.f32.xlu0 %v1256_v16  ;;  %218 = vmax.xlane.f32.xlu1 %v1259_v17 }
  0x36   : > { %220 = vmax.xlane.f32.xlu0 %v1264_v18  ;;  %222 = vmax.xlane.f32.xlu1 %v1267_v19 }
  0x3a   : > { %224 = vmax.xlane.f32.xlu0 %v1272_v20  ;;  %226 = vmax.xlane.f32.xlu1 %v1275_v21 }
  0x3e   : > { %228 = vmax.xlane.f32.xlu0 %v1280_v22  ;;  %230 = vmax.xlane.f32.xlu1 %v1283_v23 }
  0x42   : > { %232 = vmax.xlane.f32.xlu0 %v1288_v24  ;;  %234 = vmax.xlane.f32.xlu1 %v1291_v25 }
  0x46   : > { %236 = vmax.xlane.f32.xlu0 %v1296_v26  ;;  %238 = vmax.xlane.f32.xlu1 %v1299_v27 }
  0x4a   : > { %240 = vmax.xlane.f32.xlu0 %v1304_v28  ;;  %242 = vmax.xlane.f32.xlu1 %v1307_v29 }
  0x4e   : > { %244 = vmax.xlane.f32.xlu0 %v1312_v30  ;;  %246 = vmax.xlane.f32.xlu1 %v1315_v31 }
  0x52   : > { %248 = vmax.xlane.f32.xlu0 %v1320_v32  ;;  %250 = vmax.xlane.f32.xlu1 %v1323_v33 }
  0x56   : > { %252 = vmax.xlane.f32.xlu0 %v1328_v34  ;;  %254 = vmax.xlane.f32.xlu1 %v1331_v35 }
  0x5a   : > { %256 = vmax.xlane.f32.xlu0 %v1336_v36  ;;  %258 = vmax.xlane.f32.xlu1 %v1339_v37 }
  0x5e   : > { %260 = vmax.xlane.f32.xlu0 %v1344_v38  ;;  %262 = vmax.xlane.f32.xlu1 %v1347_v39 }
  0x62   : > { %264 = vmax.xlane.f32.xlu0 %v1352_v40  ;;  %266 = vmax.xlane.f32.xlu1 %v1355_v41 }
  0x66   : > { %268 = vmax.xlane.f32.xlu0 %v1360_v42  ;;  %270 = vmax.xlane.f32.xlu1 %v1363_v43 }
  0x6a   : > { %272 = vmax.xlane.f32.xlu0 %v1368_v44  ;;  %274 = vmax.xlane.f32.xlu1 %v1371_v45 }
  0x6e   : > { %276 = vmax.xlane.f32.xlu0 %v1376_v46  ;;  %278 = vmax.xlane.f32.xlu1 %v1379_v47 }
  0x72   : > { %280 = vmax.xlane.f32.xlu0 %v1384_v48  ;;  %282 = vmax.xlane.f32.xlu1 %v1387_v49 }
  0x76   : > { %284 = vmax.xlane.f32.xlu0 %v1392_v50  ;;  %286 = vmax.xlane.f32.xlu1 %v1395_v51 }
  0x7a   : > { %288 = vmax.xlane.f32.xlu0 %v1400_v52  ;;  %290 = vmax.xlane.f32.xlu1 %v1403_v53 }
  0x7e   : > { %292 = vmax.xlane.f32.xlu0 %v1408_v54  ;;  %294 = vmax.xlane.f32.xlu1 %v1411_v55 }
  0x82   : > { %296 = vmax.xlane.f32.xlu0 %v1416_v56  ;;  %298 = vmax.xlane.f32.xlu1 %v1419_v57 }
  0x86   : > { %300 = vmax.xlane.f32.xlu0 %v1424_v58  ;;  %302 = vmax.xlane.f32.xlu1 %v1427_v59 }
  0x8a   : > { %304 = vmax.xlane.f32.xlu0 %v1432_v60  ;;  %306 = vmax.xlane.f32.xlu1 %v1435_v61 }
  0x8e   : > { %308 = vmax.xlane.f32.xlu0 %v1440_v62  ;;  %310 = vmax.xlane.f32.xlu1 %v1443_v63 }
  0x9b   : > { %v185_v57 = vpop.xlane.xlu0 %184  ;;  %v189_v58 = vpop.xlane.xlu1 %188 }
  0x9c   : > { %v312_v59 = vsub.f32 %v1192_v0, %v185_v57  ;;  %v314_v56 = vsub.f32 %v1195_v1, %v189_v58 }
  0x9e   : > { %v376_v55 = vmul.f32 1.442695, %v312_v59  ;;  %v380_v54 = vmul.f32 1.442695, %v314_v56 }
  0x9f   : > { %v187_v53 = vpop.xlane.xlu0 %186  ;;  %v191_v60 = vpop.xlane.xlu1 %190 }
  0xa0   : > { %899 = vpow2.f32 %v376_v55  ;;  %v313_v61 = vsub.f32 %v1200_v2, %v187_v53  ;;  %v315_v52 = vsub.f32 %v1203_v3, %v191_v60 }
  0xa1   : > { %901 = vpow2.f32 %v380_v54 }
  0xa2   : > { %v378_v51 = vmul.f32 1.442695, %v313_v61  ;;  %v382_v62 = vmul.f32 1.442695, %v315_v52 }
  0xa3   : > { %v193_v50 = vpop.xlane.xlu0 %192  ;;  %v195_v63 = vpop.xlane.xlu1 %194 }
  0xa4   : > { %903 = vpow2.f32 %v378_v51  ;;  %v316_v49 = vsub.f32 %v1208_v4, %v193_v50  ;;  %v317_v0 = vsub.f32 %v1211_v5, %v195_v63 }
  0xa5   : > { %905 = vpow2.f32 %v382_v62 }
  0xa6   : > { %v384_v1 = vmul.f32 1.442695, %v316_v49  ;;  %v386_v56 = vmul.f32 1.442695, %v317_v0 }
  0xa7   : > { %v197_v57 = vpop.xlane.xlu0 %196  ;;  %v199_v58 = vpop.xlane.xlu1 %198 }
  0xa8   : > { %907 = vpow2.f32 %v384_v1  ;;  %v318_v2 = vsub.f32 %v1216_v6, %v197_v57  ;;  %v319_v3 = vsub.f32 %v1219_v7, %v199_v58 }
  0xa9   : > { %909 = vpow2.f32 %v386_v56 }
  0xaa   : > { %v388_v53 = vmul.f32 1.442695, %v318_v2  ;;  %v390_v52 = vmul.f32 1.442695, %v319_v3 }
  0xab   : > { %v201_v54 = vpop.xlane.xlu0 %200  ;;  %v203_v55 = vpop.xlane.xlu1 %202 }
  0xac   : > { %911 = vpow2.f32 %v388_v53  ;;  %v320_v4 = vsub.f32 %v1224_v8, %v201_v54  ;;  %v321_v5 = vsub.f32 %v1227_v9, %v203_v55 }
  0xad   : > { %v1457_v50 = vpop.eup %899  ;;  %913 = vpow2.f32 %v390_v52 }
  0xae   : > { %v392_v49 = vmul.f32 1.442695, %v320_v4  ;;  %504 = vadd.xlane.f32.xlu0 %v1457_v50  ;;  %v394_v51 = vmul.f32 1.442695, %v321_v5  ;;  %v1460_v6 = vpop.eup %901 }
  0xaf   : > { %v205_v7 = vpop.xlane.xlu0 %204  ;;  %v207_v59 = vpop.xlane.xlu1 %206 }
  0xb0   : > { %915 = vpow2.f32 %v392_v49  ;;  %v322_v60 = vsub.f32 %v1232_v10, %v205_v7  ;;  %v323_v61 = vsub.f32 %v1235_v11, %v207_v59 }
  0xb1   : > { %v1464_v62 = vpop.eup %903  ;;  %917 = vpow2.f32 %v394_v51 }
  0xb2   : > { %v396_v8 = vmul.f32 1.442695, %v322_v60  ;;  %508 = vadd.xlane.f32.xlu0 %v1460_v6  ;;  %506 = vadd.xlane.f32.xlu1 %v1464_v62  ;;  %v398_v9 = vmul.f32 1.442695, %v323_v61  ;;  %v1468_v63 = vpop.eup %905 }
  0xb3   : > { %v209_v0 = vpop.xlane.xlu0 %208  ;;  %v211_v1 = vpop.xlane.xlu1 %210 }
  0xb4   : > { %919 = vpow2.f32 %v396_v8  ;;  %v324_v56 = vsub.f32 %v1240_v12, %v209_v0  ;;  %v325_v10 = vsub.f32 %v1243_v13, %v211_v1 }
  0xb5   : > { %v1472_v57 = vpop.eup %907  ;;  %921 = vpow2.f32 %v398_v9 }
  0xb6   : > { %v400_v11 = vmul.f32 1.442695, %v324_v56  ;;  %510 = vadd.xlane.f32.xlu1 %v1468_v63  ;;  %512 = vadd.xlane.f32.xlu0 %v1472_v57  ;;  %v402_v58 = vmul.f32 1.442695, %v325_v10  ;;  %v1476_v2 = vpop.eup %909 }
  0xb7   : > { %v213_v3 = vpop.xlane.xlu0 %212  ;;  %v215_v53 = vpop.xlane.xlu1 %214 }
  0xb8   : > { %923 = vpow2.f32 %v400_v11  ;;  %v326_v52 = vsub.f32 %v1248_v14, %v213_v3  ;;  %v327_v12 = vsub.f32 %v1251_v15, %v215_v53 }
  0xb9   : > { %v1480_v54 = vpop.eup %911  ;;  %925 = vpow2.f32 %v402_v58 }
  0xba   : > { %v404_v13 = vmul.f32 1.442695, %v326_v52  ;;  %514 = vadd.xlane.f32.xlu1 %v1476_v2  ;;  %516 = vadd.xlane.f32.xlu0 %v1480_v54  ;;  %v406_v55 = vmul.f32 1.442695, %v327_v12  ;;  %v1484_v4 = vpop.eup %913 }
  0xbb   : > { %v217_v5 = vpop.xlane.xlu0 %216  ;;  %v219_v49 = vpop.xlane.xlu1 %218 }
  0xbc   : > { %927 = vpow2.f32 %v404_v13  ;;  %v328_v51 = vsub.f32 %v1256_v16, %v217_v5  ;;  %v329_v14 = vsub.f32 %v1259_v17, %v219_v49 }
  0xbd   : > { %v1488_v7 = vpop.eup %915  ;;  %929 = vpow2.f32 %v406_v55 }
  0xbe   : > { %v408_v15 = vmul.f32 1.442695, %v328_v51  ;;  %518 = vadd.xlane.f32.xlu1 %v1484_v4  ;;  %520 = vadd.xlane.f32.xlu0 %v1488_v7  ;;  %v410_v59 = vmul.f32 1.442695, %v329_v14  ;;  %v1492_v60 = vpop.eup %917 }
  0xbf   : > { %v221_v61 = vpop.xlane.xlu0 %220  ;;  %v223_v8 = vpop.xlane.xlu1 %222 }
  0xc0   : > { %931 = vpow2.f32 %v408_v15  ;;  %v330_v9 = vsub.f32 %v1264_v18, %v221_v61  ;;  %v331_v16 = vsub.f32 %v1267_v19, %v223_v8 }
  0xc1   : > { %v1496_v0 = vpop.eup %919  ;;  %933 = vpow2.f32 %v410_v59 }
  0xc2   : > { %v412_v17 = vmul.f32 1.442695, %v330_v9  ;;  %522 = vadd.xlane.f32.xlu1 %v1492_v60  ;;  %524 = vadd.xlane.f32.xlu0 %v1496_v0  ;;  %v414_v1 = vmul.f32 1.442695, %v331_v16  ;;  %v1500_v56 = vpop.eup %921 }
  0xc3   : > { %v225_v10 = vpop.xlane.xlu0 %224  ;;  %v227_v11 = vpop.xlane.xlu1 %226 }
  0xc4   : > { %935 = vpow2.f32 %v412_v17  ;;  %v332_v58 = vsub.f32 %v1272_v20, %v225_v10  ;;  %v333_v18 = vsub.f32 %v1275_v21, %v227_v11 }
  0xc5   : > { %v1504_v3 = vpop.eup %923  ;;  %937 = vpow2.f32 %v414_v1 }
  0xc6   : > { %v416_v19 = vmul.f32 1.442695, %v332_v58  ;;  %526 = vadd.xlane.f32.xlu1 %v1500_v56  ;;  %528 = vadd.xlane.f32.xlu0 %v1504_v3  ;;  %v418_v53 = vmul.f32 1.442695, %v333_v18  ;;  %v1508_v52 = vpop.eup %925 }
  0xc7   : > { %v229_v12 = vpop.xlane.xlu0 %228  ;;  %v231_v13 = vpop.xlane.xlu1 %230 }
  0xc8   : > { %939 = vpow2.f32 %v416_v19  ;;  %v334_v55 = vsub.f32 %v1280_v22, %v229_v12  ;;  %v335_v20 = vsub.f32 %v1283_v23, %v231_v13 }
  0xc9   : > { %v1512_v5 = vpop.eup %927  ;;  %941 = vpow2.f32 %v418_v53 }
  0xca   : > { %v420_v21 = vmul.f32 1.442695, %v334_v55  ;;  %530 = vadd.xlane.f32.xlu1 %v1508_v52  ;;  %532 = vadd.xlane.f32.xlu0 %v1512_v5  ;;  %v422_v49 = vmul.f32 1.442695, %v335_v20  ;;  %v1516_v51 = vpop.eup %929 }
  0xcb   : > { %v233_v14 = vpop.xlane.xlu0 %232  ;;  %v235_v15 = vpop.xlane.xlu1 %234 }
  0xcc   : > { %943 = vpow2.f32 %v420_v21  ;;  %v336_v59 = vsub.f32 %v1288_v24, %v233_v14  ;;  %v337_v22 = vsub.f32 %v1291_v25, %v235_v15 }
  0xcd   : > { %v1520_v61 = vpop.eup %931  ;;  %945 = vpow2.f32 %v422_v49 }
  0xce   : > { %v424_v23 = vmul.f32 1.442695, %v336_v59  ;;  %534 = vadd.xlane.f32.xlu1 %v1516_v51  ;;  %536 = vadd.xlane.f32.xlu0 %v1520_v61  ;;  %v426_v8 = vmul.f32 1.442695, %v337_v22  ;;  %v1524_v9 = vpop.eup %933 }
  0xcf   : > { %v237_v16 = vpop.xlane.xlu0 %236  ;;  %v239_v17 = vpop.xlane.xlu1 %238 }
  0xd0   : > { %947 = vpow2.f32 %v424_v23  ;;  %v338_v1 = vsub.f32 %v1296_v26, %v237_v16  ;;  %v339_v24 = vsub.f32 %v1299_v27, %v239_v17 }
  0xd1   : > { %v1528_v10 = vpop.eup %935  ;;  %949 = vpow2.f32 %v426_v8 }
  0xd2   : > { %v428_v25 = vmul.f32 1.442695, %v338_v1  ;;  %538 = vadd.xlane.f32.xlu1 %v1524_v9  ;;  %540 = vadd.xlane.f32.xlu0 %v1528_v10  ;;  %v430_v11 = vmul.f32 1.442695, %v339_v24  ;;  %v1532_v58 = vpop.eup %937 }
  0xd3   : > { %v241_v18 = vpop.xlane.xlu0 %240  ;;  %v243_v19 = vpop.xlane.xlu1 %242 }
  0xd4   : > { %951 = vpow2.f32 %v428_v25  ;;  %v340_v53 = vsub.f32 %v1304_v28, %v241_v18  ;;  %v341_v26 = vsub.f32 %v1307_v29, %v243_v19 }
  0xd5   : > { %v1536_v12 = vpop.eup %939  ;;  %953 = vpow2.f32 %v430_v11 }
  0xd6   : > { %v432_v27 = vmul.f32 1.442695, %v340_v53  ;;  %542 = vadd.xlane.f32.xlu1 %v1532_v58  ;;  %544 = vadd.xlane.f32.xlu0 %v1536_v12  ;;  %v434_v13 = vmul.f32 1.442695, %v341_v26  ;;  %v1540_v55 = vpop.eup %941 }
  0xd7   : > { %v245_v20 = vpop.xlane.xlu0 %244  ;;  %v247_v21 = vpop.xlane.xlu1 %246 }
  0xd8   : > { %955 = vpow2.f32 %v432_v27  ;;  %v342_v49 = vsub.f32 %v1312_v30, %v245_v20  ;;  %v343_v28 = vsub.f32 %v1315_v31, %v247_v21 }
  0xd9   : > { %v1544_v14 = vpop.eup %943  ;;  %957 = vpow2.f32 %v434_v13 }
  0xda   : > { %v436_v29 = vmul.f32 1.442695, %v342_v49  ;;  %546 = vadd.xlane.f32.xlu1 %v1540_v55  ;;  %548 = vadd.xlane.f32.xlu0 %v1544_v14  ;;  %v438_v15 = vmul.f32 1.442695, %v343_v28  ;;  %v1548_v59 = vpop.eup %945 }
  0xdb   : > { %v249_v22 = vpop.xlane.xlu0 %248  ;;  %v251_v23 = vpop.xlane.xlu1 %250 }
  0xdc   : > { %959 = vpow2.f32 %v436_v29  ;;  %v344_v8 = vsub.f32 %v1320_v32, %v249_v22  ;;  %v345_v30 = vsub.f32 %v1323_v33, %v251_v23 }
  0xdd   : > { %v1552_v16 = vpop.eup %947  ;;  %961 = vpow2.f32 %v438_v15 }
  0xde   : > { %v440_v31 = vmul.f32 1.442695, %v344_v8  ;;  %550 = vadd.xlane.f32.xlu1 %v1548_v59  ;;  %552 = vadd.xlane.f32.xlu0 %v1552_v16  ;;  %v442_v17 = vmul.f32 1.442695, %v345_v30  ;;  %v1556_v1 = vpop.eup %949 }
  0xdf   : > { %v253_v24 = vpop.xlane.xlu0 %252  ;;  %v255_v25 = vpop.xlane.xlu1 %254 }
  0xe0   : > { %963 = vpow2.f32 %v440_v31  ;;  %v346_v11 = vsub.f32 %v1328_v34, %v253_v24  ;;  %v347_v32 = vsub.f32 %v1331_v35, %v255_v25 }
  0xe1   : > { %v1560_v18 = vpop.eup %951  ;;  %965 = vpow2.f32 %v442_v17 }
  0xe2   : > { %v444_v33 = vmul.f32 1.442695, %v346_v11  ;;  %554 = vadd.xlane.f32.xlu1 %v1556_v1  ;;  %556 = vadd.xlane.f32.xlu0 %v1560_v18  ;;  %v446_v19 = vmul.f32 1.442695, %v347_v32  ;;  %v1564_v53 = vpop.eup %953 }
  0xe3   : > { %v257_v26 = vpop.xlane.xlu0 %256  ;;  %v259_v27 = vpop.xlane.xlu1 %258 }
  0xe4   : > { %967 = vpow2.f32 %v444_v33  ;;  %v348_v13 = vsub.f32 %v1336_v36, %v257_v26  ;;  %v349_v34 = vsub.f32 %v1339_v37, %v259_v27 }
  0xe5   : > { %v1568_v20 = vpop.eup %955  ;;  %969 = vpow2.f32 %v446_v19 }
  0xe6   : > { %v448_v35 = vmul.f32 1.442695, %v348_v13  ;;  %558 = vadd.xlane.f32.xlu1 %v1564_v53  ;;  %560 = vadd.xlane.f32.xlu0 %v1568_v20  ;;  %v450_v21 = vmul.f32 1.442695, %v349_v34  ;;  %v1572_v49 = vpop.eup %957 }
  0xe7   : > { %v261_v28 = vpop.xlane.xlu0 %260  ;;  %v263_v29 = vpop.xlane.xlu1 %262 }
  0xe8   : > { %971 = vpow2.f32 %v448_v35  ;;  %v350_v15 = vsub.f32 %v1344_v38, %v261_v28  ;;  %v351_v36 = vsub.f32 %v1347_v39, %v263_v29 }
  0xe9   : > { %v1576_v22 = vpop.eup %959  ;;  %973 = vpow2.f32 %v450_v21 }
  0xea   : > { %v452_v37 = vmul.f32 1.442695, %v350_v15  ;;  %562 = vadd.xlane.f32.xlu1 %v1572_v49  ;;  %564 = vadd.xlane.f32.xlu0 %v1576_v22  ;;  %v454_v23 = vmul.f32 1.442695, %v351_v36  ;;  %v1580_v8 = vpop.eup %961 }
  0xeb   : > { %v265_v30 = vpop.xlane.xlu0 %264  ;;  %v267_v31 = vpop.xlane.xlu1 %266 }
  0xec   : > { %975 = vpow2.f32 %v452_v37  ;;  %v352_v17 = vsub.f32 %v1352_v40, %v265_v30  ;;  %v353_v38 = vsub.f32 %v1355_v41, %v267_v31 }
  0xed   : > { %v1584_v24 = vpop.eup %963  ;;  %977 = vpow2.f32 %v454_v23 }
  0xee   : > { %v456_v39 = vmul.f32 1.442695, %v352_v17  ;;  %566 = vadd.xlane.f32.xlu1 %v1580_v8  ;;  %568 = vadd.xlane.f32.xlu0 %v1584_v24  ;;  %v458_v25 = vmul.f32 1.442695, %v353_v38  ;;  %v1588_v11 = vpop.eup %965 }
  0xef   : > { %v269_v32 = vpop.xlane.xlu0 %268  ;;  %v271_v33 = vpop.xlane.xlu1 %270 }
  0xf0   : > { %979 = vpow2.f32 %v456_v39  ;;  %v354_v19 = vsub.f32 %v1360_v42, %v269_v32  ;;  %v355_v40 = vsub.f32 %v1363_v43, %v271_v33  ;;  %v1884_v32 = vld [vmem:[#allocation2_spill] sm:$0xff] }
  0xf1   : > { %v1592_v26 = vpop.eup %967  ;;  %981 = vpow2.f32 %v458_v25 }
  0xf2   : > { %v460_v41 = vmul.f32 1.442695, %v354_v19  ;;  %570 = vadd.xlane.f32.xlu1 %v1588_v11  ;;  %572 = vadd.xlane.f32.xlu0 %v1592_v26  ;;  %v462_v27 = vmul.f32 1.442695, %v355_v40  ;;  %v1596_v13 = vpop.eup %969 }
  0xf3   : > { %v273_v34 = vpop.xlane.xlu0 %272  ;;  %v275_v35 = vpop.xlane.xlu1 %274 }
  0xf4   : > { %983 = vpow2.f32 %v460_v41  ;;  %v356_v21 = vsub.f32 %v1368_v44, %v273_v34  ;;  %v357_v42 = vsub.f32 %v1371_v45, %v275_v35  ;;  %v1885_v34 = vld [vmem:[#allocation3_spill] sm:$0xff] }
  0xf5   : > { %v1600_v28 = vpop.eup %971  ;;  %985 = vpow2.f32 %v462_v27 }
  0xf6   : > { %v464_v43 = vmul.f32 1.442695, %v356_v21  ;;  %574 = vadd.xlane.f32.xlu1 %v1596_v13  ;;  %576 = vadd.xlane.f32.xlu0 %v1600_v28  ;;  %v466_v29 = vmul.f32 1.442695, %v357_v42  ;;  %v1604_v15 = vpop.eup %973  ;;  %v1886_v21 = vld [vmem:[#allocation4_spill] sm:$0xff] }
  0xf7   : > { %v277_v36 = vpop.xlane.xlu0 %276  ;;  %v279_v37 = vpop.xlane.xlu1 %278 }
  0xf8   : > { %987 = vpow2.f32 %v464_v43  ;;  %v358_v23 = vsub.f32 %v1376_v46, %v277_v36  ;;  %v359_v44 = vsub.f32 %v1379_v47, %v279_v37 }
  0xf9   : > { %v1608_v30 = vpop.eup %975  ;;  %989 = vpow2.f32 %v466_v29 }
  0xfa   : > { %v468_v45 = vmul.f32 1.442695, %v358_v23  ;;  %578 = vadd.xlane.f32.xlu1 %v1604_v15  ;;  %580 = vadd.xlane.f32.xlu0 %v1608_v30  ;;  %v470_v31 = vmul.f32 1.442695, %v359_v44  ;;  %v1612_v17 = vpop.eup %977  ;;  %v1887_v44 = vld [vmem:[#allocation5_spill] sm:$0xff] }
  0xfb   : > { %v281_v38 = vpop.xlane.xlu0 %280  ;;  %v283_v39 = vpop.xlane.xlu1 %282 }
  0xfc   : > { %991 = vpow2.f32 %v468_v45  ;;  %v360_v25 = vsub.f32 %v1384_v48, %v281_v38  ;;  %v361_v46 = vsub.f32 %v1884_v32, %v283_v39 }
  0xfd   : > { %v1616_v33 = vpop.eup %979  ;;  %993 = vpow2.f32 %v470_v31  ;;  %v1888_v31 = vld [vmem:[#allocation6_spill] sm:$0xff] }
  0xfe   : > { %v472_v47 = vmul.f32 1.442695, %v360_v25  ;;  %582 = vadd.xlane.f32.xlu1 %v1612_v17  ;;  %584 = vadd.xlane.f32.xlu0 %v1616_v33  ;;  %v474_v19 = vmul.f32 1.442695, %v361_v46  ;;  %v1620_v40 = vpop.eup %981 }
  0xff   : > { %v285_v41 = vpop.xlane.xlu0 %284  ;;  %v287_v27 = vpop.xlane.xlu1 %286 }
 0x100   : > { %995 = vpow2.f32 %v472_v47  ;;  %v362_v35 = vsub.f32 %v1885_v34, %v285_v41  ;;  %v363_v48 = vsub.f32 %v1886_v21, %v287_v27  ;;  %v1889_v41 = vld [vmem:[#allocation7_spill] sm:$0xff]  ;;  %v1890_v34 = vld [vmem:[#allocation8_spill] sm:$0xff] }
 0x101   : > { %v1624_v42 = vpop.eup %983  ;;  %997 = vpow2.f32 %v474_v19 }
 0x102   : > { %v476_v43 = vmul.f32 1.442695, %v362_v35  ;;  %586 = vadd.xlane.f32.xlu1 %v1620_v40  ;;  %588 = vadd.xlane.f32.xlu0 %v1624_v42  ;;  %v478_v29 = vmul.f32 1.442695, %v363_v48  ;;  %v1628_v36 = vpop.eup %985 }
 0x103   : > { %v289_v37 = vpop.xlane.xlu0 %288  ;;  %v291_v23 = vpop.xlane.xlu1 %290 }
 0x104   : > { %999 = vpow2.f32 %v476_v43  ;;  %v364_v45 = vsub.f32 %v1887_v44, %v289_v37  ;;  %v365_v38 = vsub.f32 %v1888_v31, %v291_v23  ;;  %v1892_v44 = vld [vmem:[#allocation9_spill] sm:$0xff]  ;;  %v1893_v31 = vld [vmem:[#allocation10_spill] sm:$0xff] }
 0x105   : > { %v1632_v39 = vpop.eup %987  ;;  %1001 = vpow2.f32 %v478_v29 }
 0x106   : > { %v480_v25 = vmul.f32 1.442695, %v364_v45  ;;  %590 = vadd.xlane.f32.xlu1 %v1628_v36  ;;  %592 = vadd.xlane.f32.xlu0 %v1632_v39  ;;  %v482_v32 = vmul.f32 1.442695, %v365_v38  ;;  %v1636_v46 = vpop.eup %989 }
 0x107   : > { %v293_v47 = vpop.xlane.xlu0 %292  ;;  %v295_v19 = vpop.xlane.xlu1 %294 }
 0x108   : > { %1003 = vpow2.f32 %v480_v25  ;;  %v366_v27 = vsub.f32 %v1889_v41, %v293_v47  ;;  %v367_v35 = vsub.f32 %v1890_v34, %v295_v19  ;;  %v1896_v34 = vld [vmem:[#allocation11_spill] sm:$0xff] }
 0x109   : > { %v1640_v21 = vpop.eup %991  ;;  %1005 = vpow2.f32 %v482_v32 }
 0x10a   : > { %v484_v48 = vmul.f32 1.442695, %v366_v27  ;;  %594 = vadd.xlane.f32.xlu1 %v1636_v46  ;;  %596 = vadd.xlane.f32.xlu0 %v1640_v21  ;;  %v486_v43 = vmul.f32 1.442695, %v367_v35  ;;  %v1644_v29 = vpop.eup %993 }
 0x10b   : > { %1891 = vst [vmem:[#allocation2_spill] sm:$0xff] %v1644_v29  ;;  %v297_v37 = vpop.xlane.xlu0 %296  ;;  %v299_v23 = vpop.xlane.xlu1 %298 }
 0x10c   : > { %1007 = vpow2.f32 %v484_v48  ;;  %v368_v45 = vsub.f32 %v1892_v44, %v297_v37  ;;  %v369_v38 = vsub.f32 %v1893_v31, %v299_v23  ;;  %v1897_v48 = vld [vmem:[#allocation12_spill] sm:$0xff] }
 0x10d   : > { %v1648_v25 = vpop.eup %995  ;;  %1009 = vpow2.f32 %v486_v43 }
 0x10e   : > { %1894 = vst [vmem:[#allocation3_spill] sm:$0xff] %v1648_v25  ;;  %v488_v47 = vmul.f32 1.442695, %v368_v45  ;;  %598 = vadd.xlane.f32.xlu1 %v1644_v29  ;;  %600 = vadd.xlane.f32.xlu0 %v1648_v25  ;;  %v490_v32 = vmul.f32 1.442695, %v369_v38  ;;  %v1652_v19 = vpop.eup %997  ;;  %v1899_v25 = vld [vmem:[#allocation13_spill] sm:$0xff] }
 0x10f   : > { %1895 = vst [vmem:[#allocation4_spill] sm:$0xff] %v1652_v19  ;;  %v301_v41 = vpop.xlane.xlu0 %300  ;;  %v303_v27 = vpop.xlane.xlu1 %302  ;;  %v1900_v29 = vld [vmem:[#allocation14_spill] sm:$0xff] }
 0x110   : > { %1011 = vpow2.f32 %v488_v47  ;;  %v370_v35 = vsub.f32 %v1896_v34, %v301_v41  ;;  %v371_v37 = vsub.f32 %v1897_v48, %v303_v27 }
 0x111   : > { %v1656_v44 = vpop.eup %999  ;;  %1013 = vpow2.f32 %v490_v32 }
 0x112   : > { %1898 = vst [vmem:[#allocation5_spill] sm:$0xff] %v1656_v44  ;;  %v492_v23 = vmul.f32 1.442695, %v370_v35  ;;  %602 = vadd.xlane.f32.xlu1 %v1652_v19  ;;  %604 = vadd.xlane.f32.xlu0 %v1656_v44  ;;  %v494_v43 = vmul.f32 1.442695, %v371_v37  ;;  %v1660_v45 = vpop.eup %1001  ;;  %v1901_v44 = vld [vmem:[#allocation15_spill] sm:$0xff] }
 0x113   : > { %v305_v31 = vpop.xlane.xlu0 %304  ;;  %v307_v38 = vpop.xlane.xlu1 %306  ;;  %v1902_v19 = vld [vmem:[#allocation16_spill] sm:$0xff] }
 0x114   : > { %1015 = vpow2.f32 %v492_v23  ;;  %v372_v47 = vsub.f32 %v1899_v25, %v305_v31  ;;  %v373_v41 = vsub.f32 %v1900_v29, %v307_v38 }
 0x115   : > { %v1664_v34 = vpop.eup %1003  ;;  %1017 = vpow2.f32 %v494_v43 }
 0x116   : > { %v496_v27 = vmul.f32 1.442695, %v372_v47  ;;  %606 = vadd.xlane.f32.xlu1 %v1660_v45  ;;  %608 = vadd.xlane.f32.xlu0 %v1664_v34  ;;  %v498_v32 = vmul.f32 1.442695, %v373_v41  ;;  %v1668_v35 = vpop.eup %1005 }
 0x117   : > { %v309_v48 = vpop.xlane.xlu0 %308  ;;  %v311_v37 = vpop.xlane.xlu1 %310 }
 0x118   : > { %1019 = vpow2.f32 %v496_v27  ;;  %v374_v23 = vsub.f32 %v1901_v44, %v309_v48  ;;  %v375_v25 = vsub.f32 %v1902_v19, %v311_v37 }
 0x119   : > { %v1672_v31 = vpop.eup %1007  ;;  %1021 = vpow2.f32 %v498_v32 }
 0x11a   : > { %v500_v29 = vmul.f32 1.442695, %v374_v23  ;;  %610 = vadd.xlane.f32.xlu1 %v1668_v35  ;;  %612 = vadd.xlane.f32.xlu0 %v1672_v31  ;;  %v502_v43 = vmul.f32 1.442695, %v375_v25  ;;  %v1676_v38 = vpop.eup %1009 }
 0x11c   : > { %1023 = vpow2.f32 %v500_v29 }
 0x11d   : > { %v1678_v47 = vpop.eup %1011  ;;  %1025 = vpow2.f32 %v502_v43 }
 0x11e   : > { %614 = vadd.xlane.f32.xlu1 %v1676_v38  ;;  %616 = vadd.xlane.f32.xlu0 %v1678_v47  ;;  %v1682_v19 = vpop.eup %1013 }
 0x11f   : > { %1903 = vst [vmem:[#allocation6_spill] sm:$0xff] %v1682_v19 }
 0x121   : > { %v1684_v44 = vpop.eup %1015 }
 0x122   : > { %1904 = vst [vmem:[#allocation7_spill] sm:$0xff] %v1684_v44  ;;  %618 = vadd.xlane.f32.xlu1 %v1682_v19  ;;  %620 = vadd.xlane.f32.xlu0 %v1684_v44  ;;  %v1688_v41 = vpop.eup %1017 }
 0x123   : > { %1905 = vst [vmem:[#allocation8_spill] sm:$0xff] %v1688_v41 }
 0x125   : > { %v1690_v27 = vpop.eup %1019 }
 0x126   : > { %1906 = vst [vmem:[#allocation9_spill] sm:$0xff] %v1690_v27  ;;  %622 = vadd.xlane.f32.xlu1 %v1688_v41  ;;  %624 = vadd.xlane.f32.xlu0 %v1690_v27  ;;  %v1694_v32 = vpop.eup %1021 }
 0x127   : > { %1907 = vst [vmem:[#allocation10_spill] sm:$0xff] %v1694_v32 }
 0x129   : > { %v1696_v48 = vpop.eup %1023 }
 0x12a   : > { %1908 = vst [vmem:[#allocation11_spill] sm:$0xff] %v1696_v48  ;;  %626 = vadd.xlane.f32.xlu1 %v1694_v32  ;;  %628 = vadd.xlane.f32.xlu0 %v1696_v48  ;;  %v1700_v37 = vpop.eup %1025 }
 0x12b   : > { %1909 = vst [vmem:[#allocation12_spill] sm:$0xff] %v1700_v37 }
 0x12e   : > { %630 = vadd.xlane.f32.xlu1 %v1700_v37 }
 0x137   : > { %v505_v23 = vpop.xlane.xlu0 %504 }
 0x138   : > { %1027 = vrcp.f32 %v505_v23 }
 0x13b   : > { %v507_v25 = vpop.xlane.xlu1 %506  ;;  %v509_v29 = vpop.xlane.xlu0 %508 }
 0x13c   : > { %1029 = vrcp.f32 %v507_v25 }
 0x13d   : > { %1031 = vrcp.f32 %v509_v29 }
 0x13f   : > { %v511_v43 = vpop.xlane.xlu1 %510  ;;  %v513_v27 = vpop.xlane.xlu0 %512 }
 0x140   : > { %1033 = vrcp.f32 %v511_v43 }
 0x141   : > { %1035 = vrcp.f32 %v513_v27 }
 0x143   : > { %v515_v41 = vpop.xlane.xlu1 %514  ;;  %v517_v44 = vpop.xlane.xlu0 %516 }
 0x144   : > { %1037 = vrcp.f32 %v515_v41 }
 0x145   : > { %v1028_v32 = vpop.eup %1027  ;;  %1039 = vrcp.f32 %v517_v44 }
 0x146   : > { %v696_v23 = vmul.f32 %v1028_v32, %v1457_v50 }
 0x147   : > { %v519_v25 = vpop.xlane.xlu1 %518  ;;  %v521_v29 = vpop.xlane.xlu0 %520 }
 0x148   : > { %760 = vst [vmem:[%s1708_s15] sm:$0xff] %v696_v23  ;;  %1041 = vrcp.f32 %v519_v25 }
 0x149   : > { %v1030_v27 = vpop.eup %1029  ;;  %1043 = vrcp.f32 %v521_v29 }
 0x14a   : > { %v1032_v41 = vpop.eup %1031  ;;  %v697_v43 = vmul.f32 %v1030_v27, %v1464_v62 }
 0x14b   : > { %v698_v37 = vmul.f32 %v1032_v41, %v1460_v6  ;;  %v523_v48 = vpop.xlane.xlu1 %522  ;;  %v525_v19 = vpop.xlane.xlu0 %524 }
 0x14c   : > { %761 = vst [vmem:[%s1708_s15 + $0x8] sm:$0xff] %v697_v43  ;;  %1045 = vrcp.f32 %v523_v48 }
 0x14d   : > { %v1034_v44 = vpop.eup %1033  ;;  %762 = vst [vmem:[%s1708_s15 + $0x10] sm:$0xff] %v698_v37  ;;  %1047 = vrcp.f32 %v525_v19 }
 0x14e   : > { %v1036_v50 = vpop.eup %1035  ;;  %v699_v32 = vmul.f32 %v1034_v44, %v1468_v63 }
 0x14f   : > { %v700_v23 = vmul.f32 %v1036_v50, %v1472_v57  ;;  %v527_v25 = vpop.xlane.xlu1 %526  ;;  %v529_v29 = vpop.xlane.xlu0 %528 }
 0x150   : > { %763 = vst [vmem:[%s1708_s15 + $0x18] sm:$0xff] %v699_v32  ;;  %1049 = vrcp.f32 %v527_v25 }
 0x151   : > { %v1038_v6 = vpop.eup %1037  ;;  %764 = vst [vmem:[%s1708_s15 + $0x20] sm:$0xff] %v700_v23  ;;  %1051 = vrcp.f32 %v529_v29 }
 0x152   : > { %v1040_v62 = vpop.eup %1039  ;;  %v701_v48 = vmul.f32 %v1038_v6, %v1476_v2 }
 0x153   : > { %v702_v19 = vmul.f32 %v1040_v62, %v1480_v54  ;;  %v531_v37 = vpop.xlane.xlu1 %530  ;;  %v533_v27 = vpop.xlane.xlu0 %532 }
 0x154   : > { %765 = vst [vmem:[%s1708_s15 + $0x28] sm:$0xff] %v701_v48  ;;  %1053 = vrcp.f32 %v531_v37 }
 0x155   : > { %v1042_v63 = vpop.eup %1041  ;;  %766 = vst [vmem:[%s1708_s15 + $0x30] sm:$0xff] %v702_v19  ;;  %1055 = vrcp.f32 %v533_v27 }
 0x156   : > { %v1044_v57 = vpop.eup %1043  ;;  %v703_v41 = vmul.f32 %v1042_v63, %v1484_v4 }
 0x157   : > { %v704_v43 = vmul.f32 %v1044_v57, %v1488_v7  ;;  %v535_v44 = vpop.xlane.xlu1 %534  ;;  %v537_v50 = vpop.xlane.xlu0 %536 }
 0x158   : > { %767 = vst [vmem:[%s1708_s15 + $0x38] sm:$0xff] %v703_v41  ;;  %1057 = vrcp.f32 %v535_v44 }
 0x159   : > { %v1046_v2 = vpop.eup %1045  ;;  %768 = vst [vmem:[%s1708_s15 + $0x40] sm:$0xff] %v704_v43  ;;  %1059 = vrcp.f32 %v537_v50 }
 0x15a   : > { %v1048_v54 = vpop.eup %1047  ;;  %v705_v32 = vmul.f32 %v1046_v2, %v1492_v60 }
 0x15b   : > { %v706_v23 = vmul.f32 %v1048_v54, %v1496_v0  ;;  %v539_v25 = vpop.xlane.xlu1 %538  ;;  %v541_v29 = vpop.xlane.xlu0 %540 }
 0x15c   : > { %769 = vst [vmem:[%s1708_s15 + $0x48] sm:$0xff] %v705_v32  ;;  %1061 = vrcp.f32 %v539_v25 }
 0x15d   : > { %v1050_v4 = vpop.eup %1049  ;;  %770 = vst [vmem:[%s1708_s15 + $0x50] sm:$0xff] %v706_v23  ;;  %1063 = vrcp.f32 %v541_v29 }
 0x15e   : > { %v1052_v7 = vpop.eup %1051  ;;  %v707_v6 = vmul.f32 %v1050_v4, %v1500_v56 }
 0x15f   : > { %v708_v62 = vmul.f32 %v1052_v7, %v1504_v3  ;;  %v543_v48 = vpop.xlane.xlu1 %542  ;;  %v545_v19 = vpop.xlane.xlu0 %544 }
 0x160   : > { %771 = vst [vmem:[%s1708_s15 + $0x58] sm:$0xff] %v707_v6  ;;  %1065 = vrcp.f32 %v543_v48 }
 0x161   : > { %v1054_v60 = vpop.eup %1053  ;;  %772 = vst [vmem:[%s1708_s15 + $0x60] sm:$0xff] %v708_v62  ;;  %1067 = vrcp.f32 %v545_v19 }
 0x162   : > { %v1056_v0 = vpop.eup %1055  ;;  %v709_v37 = vmul.f32 %v1054_v60, %v1508_v52 }
 0x163   : > { %v710_v27 = vmul.f32 %v1056_v0, %v1512_v5  ;;  %v547_v63 = vpop.xlane.xlu1 %546  ;;  %v549_v57 = vpop.xlane.xlu0 %548 }
 0x164   : > { %773 = vst [vmem:[%s1708_s15 + $0x68] sm:$0xff] %v709_v37  ;;  %1069 = vrcp.f32 %v547_v63 }
 0x165   : > { %v1058_v56 = vpop.eup %1057  ;;  %774 = vst [vmem:[%s1708_s15 + $0x70] sm:$0xff] %v710_v27  ;;  %1071 = vrcp.f32 %v549_v57 }
 0x166   : > { %v1060_v3 = vpop.eup %1059  ;;  %v711_v41 = vmul.f32 %v1058_v56, %v1516_v51 }
 0x167   : > { %v712_v43 = vmul.f32 %v1060_v3, %v1520_v61  ;;  %v551_v44 = vpop.xlane.xlu1 %550  ;;  %v553_v50 = vpop.xlane.xlu0 %552 }
 0x168   : > { %775 = vst [vmem:[%s1708_s15 + $0x78] sm:$0xff] %v711_v41  ;;  %1073 = vrcp.f32 %v551_v44 }
 0x169   : > { %v1062_v52 = vpop.eup %1061  ;;  %776 = vst [vmem:[%s1708_s15 + $0x80] sm:$0xff] %v712_v43  ;;  %1075 = vrcp.f32 %v553_v50 }
 0x16a   : > { %v1064_v5 = vpop.eup %1063  ;;  %v713_v2 = vmul.f32 %v1062_v52, %v1524_v9 }
 0x16b   : > { %v714_v54 = vmul.f32 %v1064_v5, %v1528_v10  ;;  %v555_v32 = vpop.xlane.xlu1 %554  ;;  %v557_v23 = vpop.xlane.xlu0 %556 }
 0x16c   : > { %777 = vst [vmem:[%s1708_s15 + $0x88] sm:$0xff] %v713_v2  ;;  %1077 = vrcp.f32 %v555_v32 }
 0x16d   : > { %v1066_v51 = vpop.eup %1065  ;;  %778 = vst [vmem:[%s1708_s15 + $0x90] sm:$0xff] %v714_v54  ;;  %1079 = vrcp.f32 %v557_v23 }
 0x16e   : > { %v1068_v61 = vpop.eup %1067  ;;  %v715_v25 = vmul.f32 %v1066_v51, %v1532_v58 }
 0x16f   : > { %v716_v29 = vmul.f32 %v1068_v61, %v1536_v12  ;;  %v559_v4 = vpop.xlane.xlu1 %558  ;;  %v561_v7 = vpop.xlane.xlu0 %560 }
 0x170   : > { %779 = vst [vmem:[%s1708_s15 + $0x98] sm:$0xff] %v715_v25  ;;  %1081 = vrcp.f32 %v559_v4 }
 0x171   : > { %v1070_v9 = vpop.eup %1069  ;;  %780 = vst [vmem:[%s1708_s15 + $0xa0] sm:$0xff] %v716_v29  ;;  %1083 = vrcp.f32 %v561_v7 }
 0x172   : > { %v1072_v10 = vpop.eup %1071  ;;  %v717_v6 = vmul.f32 %v1070_v9, %v1540_v55 }
 0x173   : > { %v718_v62 = vmul.f32 %v1072_v10, %v1544_v14  ;;  %v563_v48 = vpop.xlane.xlu1 %562  ;;  %v565_v19 = vpop.xlane.xlu0 %564 }
 0x174   : > { %781 = vst [vmem:[%s1708_s15 + $0xa8] sm:$0xff] %v717_v6  ;;  %1085 = vrcp.f32 %v563_v48 }
 0x175   : > { %v1074_v58 = vpop.eup %1073  ;;  %782 = vst [vmem:[%s1708_s15 + $0xb0] sm:$0xff] %v718_v62  ;;  %1087 = vrcp.f32 %v565_v19 }
 0x176   : > { %v1076_v12 = vpop.eup %1075  ;;  %v719_v60 = vmul.f32 %v1074_v58, %v1548_v59 }
 0x177   : > { %v720_v0 = vmul.f32 %v1076_v12, %v1552_v16  ;;  %v567_v37 = vpop.xlane.xlu1 %566  ;;  %v569_v27 = vpop.xlane.xlu0 %568 }
 0x178   : > { %783 = vst [vmem:[%s1708_s15 + $0xb8] sm:$0xff] %v719_v60  ;;  %1089 = vrcp.f32 %v567_v37 }
 0x179   : > { %v1078_v55 = vpop.eup %1077  ;;  %784 = vst [vmem:[%s1708_s15 + $0xc0] sm:$0xff] %v720_v0  ;;  %1091 = vrcp.f32 %v569_v27 }
 0x17a   : > { %v1080_v14 = vpop.eup %1079  ;;  %v721_v63 = vmul.f32 %v1078_v55, %v1556_v1 }
 0x17b   : > { %v722_v57 = vmul.f32 %v1080_v14, %v1560_v18  ;;  %v571_v56 = vpop.xlane.xlu1 %570  ;;  %v573_v3 = vpop.xlane.xlu0 %572 }
 0x17c   : > { %785 = vst [vmem:[%s1708_s15 + $0xc8] sm:$0xff] %v721_v63  ;;  %1093 = vrcp.f32 %v571_v56 }
 0x17d   : > { %v1082_v59 = vpop.eup %1081  ;;  %786 = vst [vmem:[%s1708_s15 + $0xd0] sm:$0xff] %v722_v57  ;;  %1095 = vrcp.f32 %v573_v3 }
 0x17e   : > { %v1084_v16 = vpop.eup %1083  ;;  %v723_v41 = vmul.f32 %v1082_v59, %v1564_v53 }
 0x17f   : > { %v724_v43 = vmul.f32 %v1084_v16, %v1568_v20  ;;  %v575_v44 = vpop.xlane.xlu1 %574  ;;  %v577_v50 = vpop.xlane.xlu0 %576 }
 0x180   : > { %787 = vst [vmem:[%s1708_s15 + $0xd8] sm:$0xff] %v723_v41  ;;  %1097 = vrcp.f32 %v575_v44 }
 0x181   : > { %v1086_v1 = vpop.eup %1085  ;;  %788 = vst [vmem:[%s1708_s15 + $0xe0] sm:$0xff] %v724_v43  ;;  %1099 = vrcp.f32 %v577_v50 }
 0x182   : > { %v1088_v18 = vpop.eup %1087  ;;  %v725_v52 = vmul.f32 %v1086_v1, %v1572_v49  ;;  %v1910_v1 = vld [vmem:[#allocation2_spill] sm:$0xff] }
 0x183   : > { %v726_v5 = vmul.f32 %v1088_v18, %v1576_v22  ;;  %v579_v2 = vpop.xlane.xlu1 %578  ;;  %v581_v54 = vpop.xlane.xlu0 %580 }
 0x184   : > { %789 = vst [vmem:[%s1708_s15 + $0xe8] sm:$0xff] %v725_v52  ;;  %1101 = vrcp.f32 %v579_v2  ;;  %v1911_v52 = vld [vmem:[#allocation3_spill] sm:$0xff] }
 0x185   : > { %v1090_v53 = vpop.eup %1089  ;;  %790 = vst [vmem:[%s1708_s15 + $0xf0] sm:$0xff] %v726_v5  ;;  %1103 = vrcp.f32 %v581_v54 }
 0x186   : > { %v1092_v20 = vpop.eup %1091  ;;  %v727_v32 = vmul.f32 %v1090_v53, %v1580_v8  ;;  %v1912_v53 = vld [vmem:[#allocation4_spill] sm:$0xff] }
 0x187   : > { %v728_v23 = vmul.f32 %v1092_v20, %v1584_v24  ;;  %v583_v51 = vpop.xlane.xlu1 %582  ;;  %v585_v61 = vpop.xlane.xlu0 %584 }
 0x188   : > { %791 = vst [vmem:[%s1708_s15 + $0xf8] sm:$0xff] %v727_v32  ;;  %1105 = vrcp.f32 %v583_v51  ;;  %v1913_v32 = vld [vmem:[#allocation5_spill] sm:$0xff] }
 0x189   : > { %v1094_v49 = vpop.eup %1093  ;;  %792 = vst [vmem:[%s1708_s15 + $0x100] sm:$0xff] %v728_v23  ;;  %1107 = vrcp.f32 %v585_v61 }
 0x18a   : > { %v1096_v22 = vpop.eup %1095  ;;  %v729_v25 = vmul.f32 %v1094_v49, %v1588_v11 }
 0x18b   : > { %v730_v29 = vmul.f32 %v1096_v22, %v1592_v26  ;;  %v587_v4 = vpop.xlane.xlu1 %586  ;;  %v589_v7 = vpop.xlane.xlu0 %588 }
 0x18c   : > { %793 = vst [vmem:[%s1708_s15 + $0x108] sm:$0xff] %v729_v25  ;;  %1109 = vrcp.f32 %v587_v4 }
 0x18d   : > { %v1098_v8 = vpop.eup %1097  ;;  %794 = vst [vmem:[%s1708_s15 + $0x110] sm:$0xff] %v730_v29  ;;  %1111 = vrcp.f32 %v589_v7 }
 0x18e   : > { %v1100_v24 = vpop.eup %1099  ;;  %v731_v9 = vmul.f32 %v1098_v8, %v1596_v13 }
 0x18f   : > { %v732_v10 = vmul.f32 %v1100_v24, %v1600_v28  ;;  %v591_v6 = vpop.xlane.xlu1 %590  ;;  %v593_v62 = vpop.xlane.xlu0 %592 }
 0x190   : > { %795 = vst [vmem:[%s1708_s15 + $0x118] sm:$0xff] %v731_v9  ;;  %1113 = vrcp.f32 %v591_v6 }
 0x191   : > { %v1102_v11 = vpop.eup %1101  ;;  %796 = vst [vmem:[%s1708_s15 + $0x120] sm:$0xff] %v732_v10  ;;  %1115 = vrcp.f32 %v593_v62 }
 0x192   : > { %v1104_v26 = vpop.eup %1103  ;;  %v733_v48 = vmul.f32 %v1102_v11, %v1604_v15 }
 0x193   : > { %v734_v19 = vmul.f32 %v1104_v26, %v1608_v30  ;;  %v595_v58 = vpop.xlane.xlu1 %594  ;;  %v597_v12 = vpop.xlane.xlu0 %596 }
 0x194   : > { %797 = vst [vmem:[%s1708_s15 + $0x128] sm:$0xff] %v733_v48  ;;  %1117 = vrcp.f32 %v595_v58 }
 0x195   : > { %v1106_v13 = vpop.eup %1105  ;;  %798 = vst [vmem:[%s1708_s15 + $0x130] sm:$0xff] %v734_v19  ;;  %1119 = vrcp.f32 %v597_v12  ;;  %v1914_v19 = vld [vmem:[#allocation6_spill] sm:$0xff]  ;;  %v1915_v12 = vld [vmem:[#allocation7_spill] sm:$0xff] }
 0x196   : > { %v1108_v28 = vpop.eup %1107  ;;  %v735_v60 = vmul.f32 %v1106_v13, %v1612_v17 }
 0x197   : > { %v736_v0 = vmul.f32 %v1108_v28, %v1616_v33  ;;  %v599_v37 = vpop.xlane.xlu1 %598  ;;  %v601_v27 = vpop.xlane.xlu0 %600 }
 0x198   : > { %799 = vst [vmem:[%s1708_s15 + $0x138] sm:$0xff] %v735_v60  ;;  %1121 = vrcp.f32 %v599_v37  ;;  %v1916_v60 = vld [vmem:[#allocation8_spill] sm:$0xff] }
 0x199   : > { %v1110_v15 = vpop.eup %1109  ;;  %800 = vst [vmem:[%s1708_s15 + $0x140] sm:$0xff] %v736_v0  ;;  %1123 = vrcp.f32 %v601_v27  ;;  %v1917_v0 = vld [vmem:[#allocation9_spill] sm:$0xff] }
 0x19a   : > { %v1112_v30 = vpop.eup %1111  ;;  %v737_v55 = vmul.f32 %v1110_v15, %v1620_v40 }
 0x19b   : > { %v738_v14 = vmul.f32 %v1112_v30, %v1624_v42  ;;  %v603_v63 = vpop.xlane.xlu1 %602  ;;  %v605_v57 = vpop.xlane.xlu0 %604  ;;  %v1918_v30 = vld [vmem:[#allocation10_spill] sm:$0xff] }
 0x19c   : > { %801 = vst [vmem:[%s1708_s15 + $0x148] sm:$0xff] %v737_v55  ;;  %1125 = vrcp.f32 %v603_v63 }
 0x19d   : > { %v1114_v17 = vpop.eup %1113  ;;  %802 = vst [vmem:[%s1708_s15 + $0x150] sm:$0xff] %v738_v14  ;;  %1127 = vrcp.f32 %v605_v57  ;;  %v1919_v14 = vld [vmem:[#allocation11_spill] sm:$0xff] }
 0x19e   : > { %v1116_v33 = vpop.eup %1115  ;;  %v739_v56 = vmul.f32 %v1114_v17, %v1628_v36  ;;  %v1920_v17 = vld [vmem:[#allocation12_spill] sm:$0xff] }
 0x19f   : > { %v740_v3 = vmul.f32 %v1116_v33, %v1632_v39  ;;  %v607_v59 = vpop.xlane.xlu1 %606  ;;  %v609_v16 = vpop.xlane.xlu0 %608 }
 0x1a0   : > { %803 = vst [vmem:[%s1708_s15 + $0x158] sm:$0xff] %v739_v56  ;;  %1129 = vrcp.f32 %v607_v59 }
 0x1a1   : > { %v1118_v40 = vpop.eup %1117  ;;  %804 = vst [vmem:[%s1708_s15 + $0x160] sm:$0xff] %v740_v3  ;;  %1131 = vrcp.f32 %v609_v16 }
 0x1a2   : > { %v1120_v42 = vpop.eup %1119  ;;  %v741_v41 = vmul.f32 %v1118_v40, %v1636_v46 }
 0x1a3   : > { %v742_v43 = vmul.f32 %v1120_v42, %v1640_v21  ;;  %v611_v44 = vpop.xlane.xlu1 %610  ;;  %v613_v50 = vpop.xlane.xlu0 %612 }
 0x1a4   : > { %805 = vst [vmem:[%s1708_s15 + $0x168] sm:$0xff] %v741_v41  ;;  %1133 = vrcp.f32 %v611_v44 }
 0x1a5   : > { %v1122_v36 = vpop.eup %1121  ;;  %806 = vst [vmem:[%s1708_s15 + $0x170] sm:$0xff] %v742_v43  ;;  %1135 = vrcp.f32 %v613_v50 }
 0x1a6   : > { %v1124_v39 = vpop.eup %1123  ;;  %v743_v18 = vmul.f32 %v1122_v36, %v1910_v1 }
 0x1a7   : > { %v744_v5 = vmul.f32 %v1124_v39, %v1911_v52  ;;  %v615_v2 = vpop.xlane.xlu1 %614  ;;  %v617_v54 = vpop.xlane.xlu0 %616 }
 0x1a8   : > { %807 = vst [vmem:[%s1708_s15 + $0x178] sm:$0xff] %v743_v18  ;;  %1137 = vrcp.f32 %v615_v2 }
 0x1a9   : > { %v1126_v46 = vpop.eup %1125  ;;  %808 = vst [vmem:[%s1708_s15 + $0x180] sm:$0xff] %v744_v5  ;;  %1139 = vrcp.f32 %v617_v54 }
 0x1aa   : > { %v1128_v21 = vpop.eup %1127  ;;  %v745_v20 = vmul.f32 %v1126_v46, %v1912_v53 }
 0x1ab   : > { %v746_v23 = vmul.f32 %v1128_v21, %v1913_v32  ;;  %v619_v51 = vpop.xlane.xlu1 %618  ;;  %v621_v61 = vpop.xlane.xlu0 %620 }
 0x1ac   : > { %809 = vst [vmem:[%s1708_s15 + $0x188] sm:$0xff] %v745_v20  ;;  %1141 = vrcp.f32 %v619_v51 }
 0x1ad   : > { %v1130_v49 = vpop.eup %1129  ;;  %810 = vst [vmem:[%s1708_s15 + $0x190] sm:$0xff] %v746_v23  ;;  %1143 = vrcp.f32 %v621_v61 }
 0x1ae   : > { %v1132_v22 = vpop.eup %1131  ;;  %v747_v25 = vmul.f32 %v1130_v49, %v1660_v45 }
 0x1af   : > { %v748_v29 = vmul.f32 %v1132_v22, %v1664_v34  ;;  %v623_v4 = vpop.xlane.xlu1 %622  ;;  %v625_v7 = vpop.xlane.xlu0 %624 }
 0x1b0   : > { %811 = vst [vmem:[%s1708_s15 + $0x198] sm:$0xff] %v747_v25  ;;  %1145 = vrcp.f32 %v623_v4 }
 0x1b1   : > { %v1134_v8 = vpop.eup %1133  ;;  %812 = vst [vmem:[%s1708_s15 + $0x1a0] sm:$0xff] %v748_v29  ;;  %1147 = vrcp.f32 %v625_v7 }
 0x1b2   : > { %v1136_v24 = vpop.eup %1135  ;;  %v749_v9 = vmul.f32 %v1134_v8, %v1668_v35 }
 0x1b3   : > { %v750_v10 = vmul.f32 %v1136_v24, %v1672_v31  ;;  %v627_v6 = vpop.xlane.xlu1 %626  ;;  %v629_v62 = vpop.xlane.xlu0 %628 }
 0x1b4   : > { %813 = vst [vmem:[%s1708_s15 + $0x1a8] sm:$0xff] %v749_v9  ;;  %1149 = vrcp.f32 %v627_v6 }
 0x1b5   : > { %v1138_v45 = vpop.eup %1137  ;;  %814 = vst [vmem:[%s1708_s15 + $0x1b0] sm:$0xff] %v750_v10  ;;  %1151 = vrcp.f32 %v629_v62 }
 0x1b6   : > { %v1140_v34 = vpop.eup %1139  ;;  %v751_v11 = vmul.f32 %v1138_v45, %v1676_v38 }
 0x1b7   : > { %v752_v26 = vmul.f32 %v1140_v34, %v1678_v47  ;;  %v631_v48 = vpop.xlane.xlu1 %630 }
 0x1b8   : > { %815 = vst [vmem:[%s1708_s15 + $0x1b8] sm:$0xff] %v751_v11  ;;  %1153 = vrcp.f32 %v631_v48 }
 0x1b9   : > { %v1142_v35 = vpop.eup %1141  ;;  %816 = vst [vmem:[%s1708_s15 + $0x1c0] sm:$0xff] %v752_v26 }
 0x1ba   : > { %v1144_v31 = vpop.eup %1143  ;;  %v753_v58 = vmul.f32 %v1142_v35, %v1914_v19 }
 0x1bb   : > { %v754_v13 = vmul.f32 %v1144_v31, %v1915_v12 }
 0x1bc   : > { %817 = vst [vmem:[%s1708_s15 + $0x1c8] sm:$0xff] %v753_v58 }
 0x1bd   : > { %v1146_v28 = vpop.eup %1145  ;;  %818 = vst [vmem:[%s1708_s15 + $0x1d0] sm:$0xff] %v754_v13 }
 0x1be   : > { %v1148_v38 = vpop.eup %1147  ;;  %v755_v47 = vmul.f32 %v1146_v28, %v1916_v60 }
 0x1bf   : > { %v756_v37 = vmul.f32 %v1148_v38, %v1917_v0 }
 0x1c0   : > { %819 = vst [vmem:[%s1708_s15 + $0x1d8] sm:$0xff] %v755_v47 }
 0x1c1   : > { %v1150_v27 = vpop.eup %1149  ;;  %820 = vst [vmem:[%s1708_s15 + $0x1e0] sm:$0xff] %v756_v37 }
 0x1c2   : > { %v1152_v15 = vpop.eup %1151  ;;  %v757_v55 = vmul.f32 %v1150_v27, %v1918_v30 }
 0x1c3   : > { %v758_v63 = vmul.f32 %v1152_v15, %v1919_v14 }
 0x1c4   : > { %821 = vst [vmem:[%s1708_s15 + $0x1e8] sm:$0xff] %v757_v55 }
 0x1c5   : > { %v1154_v57 = vpop.eup %1153  ;;  %822 = vst [vmem:[%s1708_s15 + $0x1f0] sm:$0xff] %v758_v63 }
 0x1c6   : > { %v759_v33 = vmul.f32 %v1154_v57, %v1920_v17 }
 0x1c8   : > { %823 = vst [vmem:[%s1708_s15 + $0x1f8] sm:$0xff] %v759_v33 }
 0x1c9 PF: > { %s11_s6 = sadd.s32 1, %s1161_s6  }
 0x1ca   : > { %p8_p4 = scmp.ge.s32.totalorder %s11_s6, 18  }
 0x1cc   :  { %10 = sbr.rel (!%p8_p4) target bundleno = 1 (0x1), region = 54 }

// kernel: deeplab3d_forward.20
= control target key start
LH: loop header
LB: loop body
LE: loop exit
PB: predicated region body
PF: predicated region fallthrough
CT: control target
= control target key end

     0   :  { %vm4909_vm0 = vcmask 23552   ;;  %s8210_s1 = inlined_call_operand.vmem [shape: bf16[1,6912,3], index: 1, kind: input, shape index: {}]   ;;  %s8211_s0 = inlined_call_operand.vmem [shape: bf16[1,16,6912], index: 0, kind: input, shape index: {}]   ;;  %s8212_s2 = inlined_call_operand.vmem [shape: f32[1,1,3], index: 2, kind: input, shape index: {}]   ;;  %s8213_s3 = inlined_call_operand.vmem [shape: f32[1,16,3], index: 3, kind: output, shape index: {}]  }
   0x1   :  { %v5997_v0 = vld [vmem:[%s8210_s1 + $0x78] sm:$0xff]   ;;  %v6001_v4 = vld [vmem:[%s8210_s1 + $0x70] sm:$0xff]   ;;  %v6005_v8 = vld [vmem:[%s8210_s1 + $0x68] sm:$0xff]  }
   0x2   :  { %v5998_v1 = vld [vmem:[%s8210_s1 + $0x38] sm:$0xff]   ;;  %5403 = vmatprep.subr.bf16.mxu0 %v5997_v0  ;;  %v6002_v5 = vld [vmem:[%s8210_s1 + $0x30] sm:$0xff]   ;;  %v6006_v9 = vld [vmem:[%s8210_s1 + $0x28] sm:$0xff]  }
   0x3   :  { %v5999_v2 = vld [vmem:[%s8210_s1 + $0xf8] sm:$0xff]   ;;  %5404 = vmatpush3.bf16.msra.mxu0 %v5998_v1  ;;  %v6003_v6 = vld [vmem:[%s8210_s1 + $0xf0] sm:$0xff]   ;;  %v6007_v10 = vld [vmem:[%s8210_s1 + $0xe8] sm:$0xff]  }
   0x4   :  { %v6000_v3 = vld [vmem:[%s8210_s1 + $0xb8] sm:$0xff]   ;;  %5425 = vmatprep.subr.bf16.mxu1 %v5999_v2  ;;  %5405 = vmatprep.subr.bf16.mxu0 %v6001_v4  ;;  %v6004_v7 = vld [vmem:[%s8210_s1 + $0xb0] sm:$0xff]   ;;  %v6008_v11 = vld [vmem:[%s8210_s1 + $0xa8] sm:$0xff]  }
   0x5   :  { %5426 = vmatpush3.bf16.msra.mxu1 %v6000_v3  ;;  %v6009_v12 = vld [vmem:[%s8210_s1 + $0x60] sm:$0xff]   ;;  %v6013_v16 = vld [vmem:[%s8210_s1 + $0x58] sm:$0xff]   ;;  %v6017_v20 = vld [vmem:[%s8210_s1 + $0x50] sm:$0xff]  }
   0x6   :  { %5427 = vmatprep.subr.bf16.mxu1 %v6003_v6  ;;  %v6010_v13 = vld [vmem:[%s8210_s1 + $0x20] sm:$0xff]   ;;  %v6014_v17 = vld [vmem:[%s8210_s1 + $0x18] sm:$0xff]   ;;  %v6018_v21 = vld [vmem:[%s8210_s1 + $0x10] sm:$0xff]  }
   0x7   :  { %5406 = vmatpush3.bf16.msra.mxu0 %v6002_v5  ;;  %v6011_v14 = vld [vmem:[%s8210_s1 + $0xe0] sm:$0xff]   ;;  %v6015_v18 = vld [vmem:[%s8210_s1 + $0xd8] sm:$0xff]   ;;  %v6019_v22 = vld [vmem:[%s8210_s1 + $0xd0] sm:$0xff]  }
   0x8   :  { %5407 = vmatprep.subr.bf16.mxu0 %v6005_v8  ;;  %v6012_v15 = vld [vmem:[%s8210_s1 + $0xa0] sm:$0xff]   ;;  %v6016_v19 = vld [vmem:[%s8210_s1 + $0x98] sm:$0xff]   ;;  %v6020_v23 = vld [vmem:[%s8210_s1 + $0x90] sm:$0xff]  }
   0x9   :  { %5428 = vmatpush3.bf16.msra.mxu1 %v6004_v7  ;;  %v6021_v24 = vld [vmem:[%s8210_s1 + $0x48] sm:$0xff]   ;;  %v6025_v28 = vld [vmem:[%s8210_s1 + $0x40] sm:$0xff]   ;;  %v6032_v34 = vld [vmem:[%s8210_s1 + $0x178] sm:$0xff]  }
   0xa   :  { %5429 = vmatprep.subr.bf16.mxu1 %v6007_v10  ;;  %v6022_v25 = vld [vmem:[%s8210_s1 + $0x8] sm:$0xff]   ;;  %v6026_v29 = vld [vmem:[%s8210_s1] sm:$0xff]   ;;  %v6036_v37 = vld [vmem:[%s8210_s1 + $0x138] sm:$0xff]  }
   0xb   :  { %5408 = vmatpush3.bf16.msra.mxu0 %v6006_v9  ;;  %v6023_v26 = vld [vmem:[%s8210_s1 + $0xc8] sm:$0xff]   ;;  %v6027_v30 = vld [vmem:[%s8210_s1 + $0xc0] sm:$0xff]   ;;  %v6037_v38 = vld [vmem:[%s8210_s1 + $0x1f8] sm:$0xff]  }
   0xc   :  { %5409 = vmatprep.subr.bf16.mxu0 %v6009_v12  ;;  %v6024_v27 = vld [vmem:[%s8210_s1 + $0x88] sm:$0xff]   ;;  %v6028_v31 = vld [vmem:[%s8211_s0] ss:$216 sps:$4 sm:$0xff]   ;;  %v6030_v32 = vld [vmem:[%s8211_s0 + $0x4] ss:$216 sps:$4 sm:$0xff]  }
   0xd   :  { %5430 = vmatpush3.bf16.msra.mxu1 %v6008_v11  ;;  %v6031_v33 = vld [vmem:[%s8210_s1 + $0x80] sm:$0xff]   ;;  %3834 = vmatprep.mubr.bf16.mxu0 %v6030_v32  ;;  %v6038_v39 = vld [vmem:[%s8210_s1 + $0x1b8] sm:$0xff]   ;;  %v6039_v40 = vld [vmem:[%s8210_s1 + $0x170] sm:$0xff]  }
   0xe   :  { %5431 = vmatprep.subr.bf16.mxu1 %v6011_v14  ;;  %v6033_v35 = vld [vmem:[%s8211_s0 + $0x8] ss:$216 sps:$4 sm:$0xff]   ;;  %v6035_v36 = vld [vmem:[%s8211_s0 + $0xc] ss:$216 sps:$4 sm:$0xff]   ;;  %v6040_v41 = vld [vmem:[%s8210_s1 + $0x130] sm:$0xff]  }
   0xf   :  { %5410 = vmatpush3.bf16.msra.mxu0 %v6010_v13  ;;  %3875 = vmatprep.mubr.bf16.mxu1 %v6035_v36  ;;  %v6041_v42 = vld [vmem:[%s8210_s1 + $0x1f0] sm:$0xff]   ;;  %v6043_v44 = vld [vmem:[%s8210_s1 + $0x168] sm:$0xff]   ;;  %v6047_v48 = vld [vmem:[%s8210_s1 + $0x160] sm:$0xff]  }
  0x10   :  { %5411 = vmatprep.subr.bf16.mxu0 %v6013_v16  ;;  %v6042_v43 = vld [vmem:[%s8210_s1 + $0x1b0] sm:$0xff]   ;;  %v6044_v45 = vld [vmem:[%s8210_s1 + $0x128] sm:$0xff]   ;;  %v6048_v49 = vld [vmem:[%s8210_s1 + $0x120] sm:$0xff]  }
  0x11   :  { %5432 = vmatpush3.bf16.msra.mxu1 %v6012_v15  ;;  %v6045_v46 = vld [vmem:[%s8210_s1 + $0x1e8] sm:$0xff]   ;;  %v6049_v50 = vld [vmem:[%s8210_s1 + $0x1e0] sm:$0xff]   ;;  %v6051_v52 = vld [vmem:[%s8210_s1 + $0x158] sm:$0xff]  }
  0x12   :  { %5433 = vmatprep.subr.bf16.mxu1 %v6015_v18  ;;  %v6046_v47 = vld [vmem:[%s8210_s1 + $0x1a8] sm:$0xff]   ;;  %v6050_v51 = vld [vmem:[%s8210_s1 + $0x1a0] sm:$0xff]   ;;  %v6052_v53 = vld [vmem:[%s8210_s1 + $0x118] sm:$0xff]  }
  0x13   :  { %5412 = vmatpush3.bf16.msra.mxu0 %v6014_v17  ;;  %v6053_v54 = vld [vmem:[%s8210_s1 + $0x1d8] sm:$0xff]   ;;  %v6055_v56 = vld [vmem:[%s8210_s1 + $0x150] sm:$0xff]   ;;  %v6059_v60 = vld [vmem:[%s8210_s1 + $0x148] sm:$0xff]  }
  0x14   :  { %5413 = vmatprep.subr.bf16.mxu0 %v6017_v20  ;;  %v6054_v55 = vld [vmem:[%s8210_s1 + $0x198] sm:$0xff]   ;;  %v6056_v57 = vld [vmem:[%s8210_s1 + $0x110] sm:$0xff]   ;;  %v6060_v61 = vld [vmem:[%s8210_s1 + $0x108] sm:$0xff]  }
  0x15   :  { %5434 = vmatpush3.bf16.msra.mxu1 %v6016_v19  ;;  %v6057_v58 = vld [vmem:[%s8210_s1 + $0x1d0] sm:$0xff]   ;;  %v6061_v62 = vld [vmem:[%s8210_s1 + $0x1c8] sm:$0xff]   ;;  %v6063_v0 = vld [vmem:[%s8210_s1 + $0x140] sm:$0xff]  }
  0x16   :  { %5435 = vmatprep.subr.bf16.mxu1 %v6019_v22  ;;  %v6058_v59 = vld [vmem:[%s8210_s1 + $0x190] sm:$0xff]   ;;  %v6062_v63 = vld [vmem:[%s8210_s1 + $0x188] sm:$0xff]   ;;  %v6064_v1 = vld [vmem:[%s8210_s1 + $0x100] sm:$0xff]  }
  0x17   :  { %5414 = vmatpush3.bf16.msra.mxu0 %v6018_v21  ;;  %v6065_v2 = vld [vmem:[%s8210_s1 + $0x1c0] sm:$0xff]   ;;  %v6066_v3 = vld [vmem:[%s8211_s0 + $0x10] ss:$216 sps:$4 sm:$0xff]   ;;  %v6068_v4 = vld [vmem:[%s8211_s0 + $0x14] ss:$216 sps:$4 sm:$0xff]  }
  0x18   :  { %5415 = vmatprep.subr.bf16.mxu0 %v6021_v24  ;;  %v6069_v5 = vld [vmem:[%s8210_s1 + $0x180] sm:$0xff]   ;;  %v6070_v6 = vld [vmem:[%s8210_s1 + $0x278] sm:$0xff]   ;;  %v6077_v12 = vld [vmem:[%s8210_s1 + $0x270] sm:$0xff]  }
  0x19   :  { %5436 = vmatpush3.bf16.msra.mxu1 %v6020_v23  ;;  %v6071_v7 = vld [vmem:[%s8211_s0 + $0x18] ss:$216 sps:$4 sm:$0xff]   ;;  %v6073_v8 = vld [vmem:[%s8211_s0 + $0x1c] ss:$216 sps:$4 sm:$0xff]   ;;  %v6081_v16 = vld [vmem:[%s8210_s1 + $0x268] sm:$0xff]  }
  0x1a   :  { %5437 = vmatprep.subr.bf16.mxu1 %v6023_v26  ;;  %v6074_v9 = vld [vmem:[%s8210_s1 + $0x238] sm:$0xff]   ;;  %v6078_v13 = vld [vmem:[%s8210_s1 + $0x230] sm:$0xff]   ;;  %v6082_v17 = vld [vmem:[%s8210_s1 + $0x228] sm:$0xff]  }
  0x1b   :  { %5416 = vmatpush3.bf16.msra.mxu0 %v6022_v25  ;;  %v6075_v10 = vld [vmem:[%s8210_s1 + $0x2f8] sm:$0xff]   ;;  %v6079_v14 = vld [vmem:[%s8210_s1 + $0x2f0] sm:$0xff]   ;;  %v6083_v18 = vld [vmem:[%s8210_s1 + $0x2e8] sm:$0xff]  }
  0x1c   :  { %5417 = vmatprep.subr.bf16.mxu0 %v6025_v28  ;;  %v6076_v11 = vld [vmem:[%s8210_s1 + $0x2b8] sm:$0xff]   ;;  %v6080_v15 = vld [vmem:[%s8210_s1 + $0x2b0] sm:$0xff]   ;;  %v6084_v19 = vld [vmem:[%s8210_s1 + $0x2a8] sm:$0xff]  }
  0x1d   :  { %5438 = vmatpush3.bf16.msra.mxu1 %v6024_v27  ;;  %v6085_v20 = vld [vmem:[%s8210_s1 + $0x260] sm:$0xff]   ;;  %v6089_v24 = vld [vmem:[%s8210_s1 + $0x258] sm:$0xff]   ;;  %v6093_v28 = vld [vmem:[%s8210_s1 + $0x250] sm:$0xff]  }
  0x1e   :  { %5439 = vmatprep.subr.bf16.mxu1 %v6027_v30  ;;  %v6086_v21 = vld [vmem:[%s8210_s1 + $0x220] sm:$0xff]   ;;  %v6090_v25 = vld [vmem:[%s8210_s1 + $0x218] sm:$0xff]   ;;  %v6095_v30 = vld [vmem:[%s8210_s1 + $0x2d0] sm:$0xff]  }
  0x1f   :  { %5418 = vmatpush3.bf16.msra.mxu0 %v6026_v29  ;;  %v6087_v22 = vld [vmem:[%s8210_s1 + $0x2e0] sm:$0xff]   ;;  %v6091_v26 = vld [vmem:[%s8210_s1 + $0x2d8] sm:$0xff]   ;;  %v6094_v29 = vld [vmem:[%s8210_s1 + $0x210] sm:$0xff]  }
  0x20   :  { %5447 = vmatprep.subr.bf16.mxu0 %v6032_v34  ;;  %v6088_v23 = vld [vmem:[%s8210_s1 + $0x2a0] sm:$0xff]   ;;  %v6092_v27 = vld [vmem:[%s8210_s1 + $0x298] sm:$0xff]   ;;  %v6097_v32 = vld [vmem:[%s8210_s1 + $0x248] sm:$0xff]  }
  0x21   :  { %5440 = vmatpush3.bf16.msra.mxu1 %v6031_v33  ;;  %v6098_v33 = vld [vmem:[%s8210_s1 + $0x208] sm:$0xff]   ;;  %v6101_v36 = vld [vmem:[%s8210_s1 + $0x240] sm:$0xff]  }
  0x22   :  { %3835 = vmatmul.mubr.bf16.vlgmr.msra.gmra.mxu0 %v6028_v31  ;;  %5469 = vmatprep.subr.bf16.mxu1 %v6037_v38  ;;  %v6096_v31 = vld [vmem:[%s8210_s1 + $0x290] sm:$0xff]   ;;  %v6099_v34 = vld [vmem:[%s8210_s1 + $0x2c8] sm:$0xff]   ;;  %v6103_v38 = vld [vmem:[%s8210_s1 + $0x2c0] sm:$0xff]  }
  0x23   :  { %5448 = vmatpush3.bf16.msra.mxu0 %v6036_v37  ;;  %3916 = vmatprep.mubr.bf16.mxu0 %v6068_v4  ;;  %v6102_v37 = vld [vmem:[%s8210_s1 + $0x200] sm:$0xff]   ;;  %v6135_v4 = vld [vmem:[%s8210_s1 + $0x348] sm:$0xff]  }
  0x24   :  { %3876 = vmatmul.mubr.bf16.vlgmr.msra.gmra.mxu1 %v6033_v35  ;;  %5449 = vmatprep.subr.bf16.mxu0 %v6039_v40  ;;  %v6100_v35 = vld [vmem:[%s8210_s1 + $0x288] sm:$0xff]   ;;  %v6106_v40 = vld [vmem:[%s8211_s0 + $0x24] ss:$216 sps:$4 sm:$0xff]  }
  0x25   :  { %5470 = vmatpush3.bf16.msra.mxu1 %v6038_v39  ;;  %3957 = vmatprep.mubr.bf16.mxu1 %v6073_v8  ;;  %v6104_v39 = vld [vmem:[%s8211_s0 + $0x20] ss:$216 sps:$4 sm:$0xff]  }
  0x26   :  { %5471 = vmatprep.subr.bf16.mxu1 %v6041_v42  ;;  %v6108_v42 = vld [vmem:[%s8210_s1 + $0x378] sm:$0xff]   ;;  %v6139_v8 = vld [vmem:[%s8210_s1 + $0x340] sm:$0xff]  }
  0x27   :  { %5450 = vmatpush3.bf16.msra.mxu0 %v6040_v41  ;;  %v6107_v41 = vld [vmem:[%s8210_s1 + $0x280] sm:$0xff]  }
  0x28   :  { %5451 = vmatprep.subr.bf16.mxu0 %v6043_v44  ;;  %v6111_v44 = vld [vmem:[%s8211_s0 + $0x2c] ss:$216 sps:$4 sm:$0xff]  }
  0x29   :  { %5472 = vmatpush3.bf16.msra.mxu1 %v6042_v43  ;;  %v6109_v43 = vld [vmem:[%s8211_s0 + $0x28] ss:$216 sps:$4 sm:$0xff]  }
  0x2a   :  { %5473 = vmatprep.subr.bf16.mxu1 %v6045_v46  ;;  %v6113_v46 = vld [vmem:[%s8210_s1 + $0x3f8] sm:$0xff]  }
  0x2b   :  { %5452 = vmatpush3.bf16.msra.mxu0 %v6044_v45  ;;  %v6112_v45 = vld [vmem:[%s8210_s1 + $0x338] sm:$0xff]  }
  0x2c   :  { %5453 = vmatprep.subr.bf16.mxu0 %v6047_v48  ;;  %v6115_v48 = vld [vmem:[%s8210_s1 + $0x370] sm:$0xff]  }
  0x2d   :  { %5474 = vmatpush3.bf16.msra.mxu1 %v6046_v47  ;;  %v6114_v47 = vld [vmem:[%s8210_s1 + $0x3b8] sm:$0xff]  }
  0x2e   :  { %5475 = vmatprep.subr.bf16.mxu1 %v6049_v50  ;;  %v6117_v50 = vld [vmem:[%s8210_s1 + $0x3f0] sm:$0xff]  }
  0x2f   :  { %5454 = vmatpush3.bf16.msra.mxu0 %v6048_v49  ;;  %v6116_v49 = vld [vmem:[%s8210_s1 + $0x330] sm:$0xff]  }
  0x30   :  { %5455 = vmatprep.subr.bf16.mxu0 %v6051_v52  ;;  %v6119_v52 = vld [vmem:[%s8210_s1 + $0x368] sm:$0xff]  }
  0x31   :  { %5476 = vmatpush3.bf16.msra.mxu1 %v6050_v51  ;;  %v6118_v51 = vld [vmem:[%s8210_s1 + $0x3b0] sm:$0xff]  }
  0x32   :  { %5477 = vmatprep.subr.bf16.mxu1 %v6053_v54  ;;  %v6121_v54 = vld [vmem:[%s8210_s1 + $0x3e8] sm:$0xff]  }
  0x33   :  { %5456 = vmatpush3.bf16.msra.mxu0 %v6052_v53  ;;  %v6120_v53 = vld [vmem:[%s8210_s1 + $0x328] sm:$0xff]  }
  0x34   :  { %5457 = vmatprep.subr.bf16.mxu0 %v6055_v56  ;;  %v6123_v56 = vld [vmem:[%s8210_s1 + $0x360] sm:$0xff]  }
  0x35   :  { %5478 = vmatpush3.bf16.msra.mxu1 %v6054_v55  ;;  %v6122_v55 = vld [vmem:[%s8210_s1 + $0x3a8] sm:$0xff]  }
  0x36   :  { %5479 = vmatprep.subr.bf16.mxu1 %v6057_v58  ;;  %v6125_v58 = vld [vmem:[%s8210_s1 + $0x3e0] sm:$0xff]  }
  0x37   :  { %5458 = vmatpush3.bf16.msra.mxu0 %v6056_v57  ;;  %v6124_v57 = vld [vmem:[%s8210_s1 + $0x320] sm:$0xff]  }
  0x38   :  { %5459 = vmatprep.subr.bf16.mxu0 %v6059_v60  ;;  %v6127_v60 = vld [vmem:[%s8210_s1 + $0x358] sm:$0xff]  }
  0x39   :  { %5480 = vmatpush3.bf16.msra.mxu1 %v6058_v59  ;;  %v6126_v59 = vld [vmem:[%s8210_s1 + $0x3a0] sm:$0xff]  }
  0x3a   :  { %5481 = vmatprep.subr.bf16.mxu1 %v6061_v62  ;;  %v6129_v62 = vld [vmem:[%s8210_s1 + $0x3d8] sm:$0xff]  }
  0x3b   :  { %5460 = vmatpush3.bf16.msra.mxu0 %v6060_v61  ;;  %v6128_v61 = vld [vmem:[%s8210_s1 + $0x318] sm:$0xff]  }
  0x3c   :  { %5461 = vmatprep.subr.bf16.mxu0 %v6063_v0  ;;  %v6131_v0 = vld [vmem:[%s8210_s1 + $0x350] sm:$0xff]  }
  0x3d   :  { %5482 = vmatpush3.bf16.msra.mxu1 %v6062_v63  ;;  %v6130_v63 = vld [vmem:[%s8210_s1 + $0x398] sm:$0xff]  }
  0x3e   :  { %5483 = vmatprep.subr.bf16.mxu1 %v6065_v2  ;;  %v6133_v2 = vld [vmem:[%s8210_s1 + $0x3d0] sm:$0xff]  }
  0x3f   :  { %5462 = vmatpush3.bf16.msra.mxu0 %v6064_v1  ;;  %v6132_v1 = vld [vmem:[%s8210_s1 + $0x310] sm:$0xff]  }
  0x40   :  { %5491 = vmatprep.subr.bf16.mxu0 %v6070_v6  ;;  %v6137_v6 = vld [vmem:[%s8210_s1 + $0x3c8] sm:$0xff]  }
  0x41   :  { %5484 = vmatpush3.bf16.msra.mxu1 %v6069_v5  ;;  %v6136_v5 = vld [vmem:[%s8210_s1 + $0x308] sm:$0xff]  }
  0x42   :  { %3917 = vmatmul.mubr.bf16.vlgmr.msra.gmra.mxu0 %v6066_v3  ;;  %5513 = vmatprep.subr.bf16.mxu1 %v6075_v10  ;;  %v6134_v3 = vld [vmem:[%s8210_s1 + $0x390] sm:$0xff]   ;;  %v6141_v10 = vld [vmem:[%s8210_s1 + $0x3c0] sm:$0xff]  }
  0x43   :  { %5492 = vmatpush3.bf16.msra.mxu0 %v6074_v9  ;;  %3998 = vmatprep.mubr.bf16.mxu0 %v6106_v40  ;;  %v6140_v9 = vld [vmem:[%s8210_s1 + $0x300] sm:$0xff]   ;;  %v6173_v40 = vld [vmem:[%s8210_s1 + $0x448] sm:$0xff]  }
  0x44   :  { %3958 = vmatmul.mubr.bf16.vlgmr.msra.gmra.mxu1 %v6071_v7  ;;  %5493 = vmatprep.subr.bf16.mxu0 %v6077_v12  ;;  %v6138_v7 = vld [vmem:[%s8210_s1 + $0x388] sm:$0xff]  }
  0x45   :  { %5514 = vmatpush3.bf16.msra.mxu1 %v6076_v11  ;;  %4039 = vmatprep.mubr.bf16.mxu1 %v6111_v44  ;;  %v6142_v11 = vld [vmem:[%s8211_s0 + $0x30] ss:$216 sps:$4 sm:$0xff]   ;;  %v6144_v12 = vld [vmem:[%s8211_s0 + $0x34] ss:$216 sps:$4 sm:$0xff]   ;;  %v6177_v44 = vld [vmem:[%s8210_s1 + $0x440] sm:$0xff]  }
  0x46   :  { %5515 = vmatprep.subr.bf16.mxu1 %v6079_v14  ;;  %v6146_v14 = vld [vmem:[%s8210_s1 + $0x478] sm:$0xff]  }
  0x47   :  { %5494 = vmatpush3.bf16.msra.mxu0 %v6078_v13  ;;  %v6145_v13 = vld [vmem:[%s8210_s1 + $0x380] sm:$0xff]  }
  0x48   :  { %5495 = vmatprep.subr.bf16.mxu0 %v6081_v16  ;;  %v6149_v16 = vld [vmem:[%s8211_s0 + $0x3c] ss:$216 sps:$4 sm:$0xff]  }
  0x49   :  { %5516 = vmatpush3.bf16.msra.mxu1 %v6080_v15  ;;  %v6147_v15 = vld [vmem:[%s8211_s0 + $0x38] ss:$216 sps:$4 sm:$0xff]  }
  0x4a   :  { %5517 = vmatprep.subr.bf16.mxu1 %v6083_v18  ;;  %v6151_v18 = vld [vmem:[%s8210_s1 + $0x4f8] sm:$0xff]  }
  0x4b   :  { %5496 = vmatpush3.bf16.msra.mxu0 %v6082_v17  ;;  %v6150_v17 = vld [vmem:[%s8210_s1 + $0x438] sm:$0xff]  }
  0x4c   :  { %5497 = vmatprep.subr.bf16.mxu0 %v6085_v20  ;;  %v6153_v20 = vld [vmem:[%s8210_s1 + $0x470] sm:$0xff]  }
  0x4d   :  { %5518 = vmatpush3.bf16.msra.mxu1 %v6084_v19  ;;  %v6152_v19 = vld [vmem:[%s8210_s1 + $0x4b8] sm:$0xff]  }
  0x4e   :  { %5519 = vmatprep.subr.bf16.mxu1 %v6087_v22  ;;  %v6155_v22 = vld [vmem:[%s8210_s1 + $0x4f0] sm:$0xff]  }
  0x4f   :  { %5498 = vmatpush3.bf16.msra.mxu0 %v6086_v21  ;;  %v6154_v21 = vld [vmem:[%s8210_s1 + $0x430] sm:$0xff]  }
  0x50   :  { %5499 = vmatprep.subr.bf16.mxu0 %v6089_v24  ;;  %v6157_v24 = vld [vmem:[%s8210_s1 + $0x468] sm:$0xff]  }
  0x51   :  { %5520 = vmatpush3.bf16.msra.mxu1 %v6088_v23  ;;  %v6156_v23 = vld [vmem:[%s8210_s1 + $0x4b0] sm:$0xff]  }
  0x52   :  { %5521 = vmatprep.subr.bf16.mxu1 %v6091_v26  ;;  %v6159_v26 = vld [vmem:[%s8210_s1 + $0x4e8] sm:$0xff]  }
  0x53   :  { %5500 = vmatpush3.bf16.msra.mxu0 %v6090_v25  ;;  %v6158_v25 = vld [vmem:[%s8210_s1 + $0x428] sm:$0xff]  }
  0x54   :  { %5501 = vmatprep.subr.bf16.mxu0 %v6093_v28  ;;  %v6161_v28 = vld [vmem:[%s8210_s1 + $0x460] sm:$0xff]  }
  0x55   :  { %5522 = vmatpush3.bf16.msra.mxu1 %v6092_v27  ;;  %v6160_v27 = vld [vmem:[%s8210_s1 + $0x4a8] sm:$0xff]  }
  0x56   :  { %5523 = vmatprep.subr.bf16.mxu1 %v6095_v30  ;;  %v6163_v30 = vld [vmem:[%s8210_s1 + $0x4e0] sm:$0xff]  }
  0x57   :  { %5502 = vmatpush3.bf16.msra.mxu0 %v6094_v29  ;;  %v6162_v29 = vld [vmem:[%s8210_s1 + $0x420] sm:$0xff]  }
  0x58   :  { %5503 = vmatprep.subr.bf16.mxu0 %v6097_v32  ;;  %v6165_v32 = vld [vmem:[%s8210_s1 + $0x458] sm:$0xff]  }
  0x59   :  { %5524 = vmatpush3.bf16.msra.mxu1 %v6096_v31  ;;  %v6164_v31 = vld [vmem:[%s8210_s1 + $0x4a0] sm:$0xff]  }
  0x5a   :  { %5525 = vmatprep.subr.bf16.mxu1 %v6099_v34  ;;  %v6167_v34 = vld [vmem:[%s8210_s1 + $0x4d8] sm:$0xff]  }
  0x5b   :  { %5504 = vmatpush3.bf16.msra.mxu0 %v6098_v33  ;;  %v6166_v33 = vld [vmem:[%s8210_s1 + $0x418] sm:$0xff]  }
  0x5c   :  { %5505 = vmatprep.subr.bf16.mxu0 %v6101_v36  ;;  %v6169_v36 = vld [vmem:[%s8210_s1 + $0x450] sm:$0xff]  }
  0x5d   :  { %5526 = vmatpush3.bf16.msra.mxu1 %v6100_v35  ;;  %v6168_v35 = vld [vmem:[%s8210_s1 + $0x498] sm:$0xff]  }
  0x5e   :  { %5527 = vmatprep.subr.bf16.mxu1 %v6103_v38  ;;  %v6171_v38 = vld [vmem:[%s8210_s1 + $0x4d0] sm:$0xff]  }
  0x5f   :  { %5506 = vmatpush3.bf16.msra.mxu0 %v6102_v37  ;;  %v6170_v37 = vld [vmem:[%s8210_s1 + $0x410] sm:$0xff]  }
  0x60   :  { %5535 = vmatprep.subr.bf16.mxu0 %v6108_v42  ;;  %v6175_v42 = vld [vmem:[%s8210_s1 + $0x4c8] sm:$0xff]  }
  0x61   :  { %5528 = vmatpush3.bf16.msra.mxu1 %v6107_v41  ;;  %v6174_v41 = vld [vmem:[%s8210_s1 + $0x408] sm:$0xff]  }
  0x62   :  { %3999 = vmatmul.mubr.bf16.vlgmr.msra.gmra.mxu0 %v6104_v39  ;;  %5557 = vmatprep.subr.bf16.mxu1 %v6113_v46  ;;  %v6172_v39 = vld [vmem:[%s8210_s1 + $0x490] sm:$0xff]   ;;  %v6179_v46 = vld [vmem:[%s8210_s1 + $0x4c0] sm:$0xff]  }
  0x63   :  { %5536 = vmatpush3.bf16.msra.mxu0 %v6112_v45  ;;  %4080 = vmatprep.mubr.bf16.mxu0 %v6144_v12  ;;  %v6178_v45 = vld [vmem:[%s8210_s1 + $0x400] sm:$0xff]   ;;  %v6211_v12 = vld [vmem:[%s8210_s1 + $0x548] sm:$0xff]  }
  0x64   :  { %4040 = vmatmul.mubr.bf16.vlgmr.msra.gmra.mxu1 %v6109_v43  ;;  %5537 = vmatprep.subr.bf16.mxu0 %v6115_v48  ;;  %v6176_v43 = vld [vmem:[%s8210_s1 + $0x488] sm:$0xff]   ;;  %v6182_v48 = vld [vmem:[%s8211_s0 + $0x44] ss:$216 sps:$4 sm:$0xff]  }
  0x65   :  { %5558 = vmatpush3.bf16.msra.mxu1 %v6114_v47  ;;  %4121 = vmatprep.mubr.bf16.mxu1 %v6149_v16  ;;  %v6180_v47 = vld [vmem:[%s8211_s0 + $0x40] ss:$216 sps:$4 sm:$0xff]  }
  0x66   :  { %5559 = vmatprep.subr.bf16.mxu1 %v6117_v50  ;;  %v6184_v50 = vld [vmem:[%s8210_s1 + $0x578] sm:$0xff]   ;;  %v6215_v16 = vld [vmem:[%s8210_s1 + $0x540] sm:$0xff]  }
  0x67   :  { %5538 = vmatpush3.bf16.msra.mxu0 %v6116_v49  ;;  %v6183_v49 = vld [vmem:[%s8210_s1 + $0x480] sm:$0xff]  }
  0x68   :  { %5539 = vmatprep.subr.bf16.mxu0 %v6119_v52  ;;  %v6187_v52 = vld [vmem:[%s8211_s0 + $0x4c] ss:$216 sps:$4 sm:$0xff]  }
  0x69   :  { %5560 = vmatpush3.bf16.msra.mxu1 %v6118_v51  ;;  %v6185_v51 = vld [vmem:[%s8211_s0 + $0x48] ss:$216 sps:$4 sm:$0xff]  }
  0x6a   :  { %5561 = vmatprep.subr.bf16.mxu1 %v6121_v54  ;;  %v6189_v54 = vld [vmem:[%s8210_s1 + $0x5f8] sm:$0xff]  }
  0x6b   :  { %5540 = vmatpush3.bf16.msra.mxu0 %v6120_v53  ;;  %v6188_v53 = vld [vmem:[%s8210_s1 + $0x538] sm:$0xff]  }
  0x6c   :  { %5541 = vmatprep.subr.bf16.mxu0 %v6123_v56  ;;  %v6191_v56 = vld [vmem:[%s8210_s1 + $0x570] sm:$0xff]  }
  0x6d   :  { %5562 = vmatpush3.bf16.msra.mxu1 %v6122_v55  ;;  %v6190_v55 = vld [vmem:[%s8210_s1 + $0x5b8] sm:$0xff]  }
  0x6e   :  { %5563 = vmatprep.subr.bf16.mxu1 %v6125_v58  ;;  %v6193_v58 = vld [vmem:[%s8210_s1 + $0x5f0] sm:$0xff]  }
  0x6f   :  { %5542 = vmatpush3.bf16.msra.mxu0 %v6124_v57  ;;  %v6192_v57 = vld [vmem:[%s8210_s1 + $0x530] sm:$0xff]  }
  0x70   :  { %5543 = vmatprep.subr.bf16.mxu0 %v6127_v60  ;;  %v6195_v60 = vld [vmem:[%s8210_s1 + $0x568] sm:$0xff]  }
  0x71   :  { %5564 = vmatpush3.bf16.msra.mxu1 %v6126_v59  ;;  %v6194_v59 = vld [vmem:[%s8210_s1 + $0x5b0] sm:$0xff]  }
  0x72   :  { %5565 = vmatprep.subr.bf16.mxu1 %v6129_v62  ;;  %v6197_v62 = vld [vmem:[%s8210_s1 + $0x5e8] sm:$0xff]  }
  0x73   :  { %5544 = vmatpush3.bf16.msra.mxu0 %v6128_v61  ;;  %v6196_v61 = vld [vmem:[%s8210_s1 + $0x528] sm:$0xff]  }
  0x74   :  { %5545 = vmatprep.subr.bf16.mxu0 %v6131_v0  ;;  %v6199_v0 = vld [vmem:[%s8210_s1 + $0x560] sm:$0xff]  }
  0x75   :  { %5566 = vmatpush3.bf16.msra.mxu1 %v6130_v63  ;;  %v6198_v63 = vld [vmem:[%s8210_s1 + $0x5a8] sm:$0xff]  }
  0x76   :  { %5567 = vmatprep.subr.bf16.mxu1 %v6133_v2  ;;  %v6201_v2 = vld [vmem:[%s8210_s1 + $0x5e0] sm:$0xff]  }
  0x77   :  { %5546 = vmatpush3.bf16.msra.mxu0 %v6132_v1  ;;  %v6200_v1 = vld [vmem:[%s8210_s1 + $0x520] sm:$0xff]  }
  0x78   :  { %5547 = vmatprep.subr.bf16.mxu0 %v6135_v4  ;;  %v6203_v4 = vld [vmem:[%s8210_s1 + $0x558] sm:$0xff]  }
  0x79   :  { %5568 = vmatpush3.bf16.msra.mxu1 %v6134_v3  ;;  %v6202_v3 = vld [vmem:[%s8210_s1 + $0x5a0] sm:$0xff]  }
  0x7a   :  { %5569 = vmatprep.subr.bf16.mxu1 %v6137_v6  ;;  %v6205_v6 = vld [vmem:[%s8210_s1 + $0x5d8] sm:$0xff]  }
  0x7b   :  { %5548 = vmatpush3.bf16.msra.mxu0 %v6136_v5  ;;  %v6204_v5 = vld [vmem:[%s8210_s1 + $0x518] sm:$0xff]  }
  0x7c   :  { %5549 = vmatprep.subr.bf16.mxu0 %v6139_v8  ;;  %v6207_v8 = vld [vmem:[%s8210_s1 + $0x550] sm:$0xff]  }
  0x7d   :  { %5570 = vmatpush3.bf16.msra.mxu1 %v6138_v7  ;;  %v6206_v7 = vld [vmem:[%s8210_s1 + $0x598] sm:$0xff]  }
  0x7e   :  { %5571 = vmatprep.subr.bf16.mxu1 %v6141_v10  ;;  %v6209_v10 = vld [vmem:[%s8210_s1 + $0x5d0] sm:$0xff]  }
  0x7f   :  { %5550 = vmatpush3.bf16.msra.mxu0 %v6140_v9  ;;  %v6208_v9 = vld [vmem:[%s8210_s1 + $0x510] sm:$0xff]  }
  0x80   :  { %5579 = vmatprep.subr.bf16.mxu0 %v6146_v14  ;;  %v6213_v14 = vld [vmem:[%s8210_s1 + $0x5c8] sm:$0xff]  }
  0x81   :  { %5572 = vmatpush3.bf16.msra.mxu1 %v6145_v13  ;;  %v6212_v13 = vld [vmem:[%s8210_s1 + $0x508] sm:$0xff]  }
  0x82   :  { %4081 = vmatmul.mubr.bf16.vlgmr.msra.gmra.mxu0 %v6142_v11  ;;  %5601 = vmatprep.subr.bf16.mxu1 %v6151_v18  ;;  %v6210_v11 = vld [vmem:[%s8210_s1 + $0x590] sm:$0xff]   ;;  %v6217_v18 = vld [vmem:[%s8210_s1 + $0x5c0] sm:$0xff]  }
  0x83   :  { %5580 = vmatpush3.bf16.msra.mxu0 %v6150_v17  ;;  %4162 = vmatprep.mubr.bf16.mxu0 %v6182_v48  ;;  %v6216_v17 = vld [vmem:[%s8210_s1 + $0x500] sm:$0xff]   ;;  %v6249_v48 = vld [vmem:[%s8210_s1 + $0x648] sm:$0xff]  }
  0x84   :  { %4122 = vmatmul.mubr.bf16.vlgmr.msra.gmra.mxu1 %v6147_v15  ;;  %5581 = vmatprep.subr.bf16.mxu0 %v6153_v20  ;;  %v6214_v15 = vld [vmem:[%s8210_s1 + $0x588] sm:$0xff]  }
  0x85   :  { %5602 = vmatpush3.bf16.msra.mxu1 %v6152_v19  ;;  %4203 = vmatprep.mubr.bf16.mxu1 %v6187_v52  ;;  %v6218_v19 = vld [vmem:[%s8211_s0 + $0x50] ss:$216 sps:$4 sm:$0xff]   ;;  %v6220_v20 = vld [vmem:[%s8211_s0 + $0x54] ss:$216 sps:$4 sm:$0xff]   ;;  %v6253_v52 = vld [vmem:[%s8210_s1 + $0x640] sm:$0xff]  }
  0x86   :  { %5603 = vmatprep.subr.bf16.mxu1 %v6155_v22  ;;  %v6222_v22 = vld [vmem:[%s8210_s1 + $0x678] sm:$0xff]  }
  0x87   :  { %5582 = vmatpush3.bf16.msra.mxu0 %v6154_v21  ;;  %v6221_v21 = vld [vmem:[%s8210_s1 + $0x580] sm:$0xff]  }
  0x88   :  { %5583 = vmatprep.subr.bf16.mxu0 %v6157_v24  ;;  %v6225_v24 = vld [vmem:[%s8211_s0 + $0x5c] ss:$216 sps:$4 sm:$0xff]  }
  0x89   :  { %5604 = vmatpush3.bf16.msra.mxu1 %v6156_v23  ;;  %v6223_v23 = vld [vmem:[%s8211_s0 + $0x58] ss:$216 sps:$4 sm:$0xff]  }
  0x8a   :  { %5605 = vmatprep.subr.bf16.mxu1 %v6159_v26  ;;  %v6227_v26 = vld [vmem:[%s8210_s1 + $0x6f8] sm:$0xff]  }
  0x8b   :  { %5584 = vmatpush3.bf16.msra.mxu0 %v6158_v25  ;;  %v6226_v25 = vld [vmem:[%s8210_s1 + $0x638] sm:$0xff]  }
  0x8c   :  { %5585 = vmatprep.subr.bf16.mxu0 %v6161_v28  ;;  %v6229_v28 = vld [vmem:[%s8210_s1 + $0x670] sm:$0xff]  }
  0x8d   :  { %5606 = vmatpush3.bf16.msra.mxu1 %v6160_v27  ;;  %v6228_v27 = vld [vmem:[%s8210_s1 + $0x6b8] sm:$0xff]  }
  0x8e   :  { %5607 = vmatprep.subr.bf16.mxu1 %v6163_v30  ;;  %v6231_v30 = vld [vmem:[%s8210_s1 + $0x6f0] sm:$0xff]  }
  0x8f   :  { %5586 = vmatpush3.bf16.msra.mxu0 %v6162_v29  ;;  %v6230_v29 = vld [vmem:[%s8210_s1 + $0x630] sm:$0xff]  }
  0x90   :  { %5587 = vmatprep.subr.bf16.mxu0 %v6165_v32  ;;  %v6233_v32 = vld [vmem:[%s8210_s1 + $0x668] sm:$0xff]  }
  0x91   :  { %5608 = vmatpush3.bf16.msra.mxu1 %v6164_v31  ;;  %v6232_v31 = vld [vmem:[%s8210_s1 + $0x6b0] sm:$0xff]  }
  0x92   :  { %5609 = vmatprep.subr.bf16.mxu1 %v6167_v34  ;;  %v6235_v34 = vld [vmem:[%s8210_s1 + $0x6e8] sm:$0xff]  }
  0x93   :  { %5588 = vmatpush3.bf16.msra.mxu0 %v6166_v33  ;;  %v6234_v33 = vld [vmem:[%s8210_s1 + $0x628] sm:$0xff]  }
  0x94   :  { %5589 = vmatprep.subr.bf16.mxu0 %v6169_v36  ;;  %v6237_v36 = vld [vmem:[%s8210_s1 + $0x660] sm:$0xff]  }
  0x95   :  { %5610 = vmatpush3.bf16.msra.mxu1 %v6168_v35  ;;  %v6236_v35 = vld [vmem:[%s8210_s1 + $0x6a8] sm:$0xff]  }
  0x96   :  { %5611 = vmatprep.subr.bf16.mxu1 %v6171_v38  ;;  %v6239_v38 = vld [vmem:[%s8210_s1 + $0x6e0] sm:$0xff]  }
  0x97   :  { %5590 = vmatpush3.bf16.msra.mxu0 %v6170_v37  ;;  %v6238_v37 = vld [vmem:[%s8210_s1 + $0x620] sm:$0xff]  }
  0x98   :  { %5591 = vmatprep.subr.bf16.mxu0 %v6173_v40  ;;  %v6241_v40 = vld [vmem:[%s8210_s1 + $0x658] sm:$0xff]  }
  0x99   :  { %5612 = vmatpush3.bf16.msra.mxu1 %v6172_v39  ;;  %v6240_v39 = vld [vmem:[%s8210_s1 + $0x6a0] sm:$0xff]  }
  0x9a   :  { %5613 = vmatprep.subr.bf16.mxu1 %v6175_v42  ;;  %v6243_v42 = vld [vmem:[%s8210_s1 + $0x6d8] sm:$0xff]  }
  0x9b   :  { %5592 = vmatpush3.bf16.msra.mxu0 %v6174_v41  ;;  %v6242_v41 = vld [vmem:[%s8210_s1 + $0x618] sm:$0xff]  }
  0x9c   :  { %5593 = vmatprep.subr.bf16.mxu0 %v6177_v44  ;;  %v6245_v44 = vld [vmem:[%s8210_s1 + $0x650] sm:$0xff]  }
  0x9d   :  { %5614 = vmatpush3.bf16.msra.mxu1 %v6176_v43  ;;  %v6244_v43 = vld [vmem:[%s8210_s1 + $0x698] sm:$0xff]  }
  0x9e   :  { %5615 = vmatprep.subr.bf16.mxu1 %v6179_v46  ;;  %v6247_v46 = vld [vmem:[%s8210_s1 + $0x6d0] sm:$0xff]  }
  0x9f   :  { %5594 = vmatpush3.bf16.msra.mxu0 %v6178_v45  ;;  %v6246_v45 = vld [vmem:[%s8210_s1 + $0x610] sm:$0xff]  }
  0xa0   :  { %5623 = vmatprep.subr.bf16.mxu0 %v6184_v50  ;;  %v6251_v50 = vld [vmem:[%s8210_s1 + $0x6c8] sm:$0xff]  }
  0xa1   :  { %5616 = vmatpush3.bf16.msra.mxu1 %v6183_v49  ;;  %v6250_v49 = vld [vmem:[%s8210_s1 + $0x608] sm:$0xff]  }
  0xa2   :  { %4163 = vmatmul.mubr.bf16.vlgmr.msra.gmra.mxu0 %v6180_v47  ;;  %5645 = vmatprep.subr.bf16.mxu1 %v6189_v54  ;;  %v6248_v47 = vld [vmem:[%s8210_s1 + $0x690] sm:$0xff]   ;;  %v6255_v54 = vld [vmem:[%s8210_s1 + $0x6c0] sm:$0xff]  }
  0xa3   :  { %5624 = vmatpush3.bf16.msra.mxu0 %v6188_v53  ;;  %4244 = vmatprep.mubr.bf16.mxu0 %v6220_v20  ;;  %v6254_v53 = vld [vmem:[%s8210_s1 + $0x600] sm:$0xff]   ;;  %v6287_v20 = vld [vmem:[%s8210_s1 + $0x748] sm:$0xff]  }
  0xa4   :  { %4204 = vmatmul.mubr.bf16.vlgmr.msra.gmra.mxu1 %v6185_v51  ;;  %5625 = vmatprep.subr.bf16.mxu0 %v6191_v56  ;;  %v6252_v51 = vld [vmem:[%s8210_s1 + $0x688] sm:$0xff]   ;;  %v6258_v56 = vld [vmem:[%s8211_s0 + $0x64] ss:$216 sps:$4 sm:$0xff]  }
  0xa5   :  { %5646 = vmatpush3.bf16.msra.mxu1 %v6190_v55  ;;  %4285 = vmatprep.mubr.bf16.mxu1 %v6225_v24  ;;  %v6256_v55 = vld [vmem:[%s8211_s0 + $0x60] ss:$216 sps:$4 sm:$0xff]  }
  0xa6   :  { %5647 = vmatprep.subr.bf16.mxu1 %v6193_v58  ;;  %v6260_v58 = vld [vmem:[%s8210_s1 + $0x778] sm:$0xff]   ;;  %v6291_v24 = vld [vmem:[%s8210_s1 + $0x740] sm:$0xff]  }
  0xa7   :  { %5626 = vmatpush3.bf16.msra.mxu0 %v6192_v57  ;;  %v6259_v57 = vld [vmem:[%s8210_s1 + $0x680] sm:$0xff]  }
  0xa8   :  { %5627 = vmatprep.subr.bf16.mxu0 %v6195_v60  ;;  %v6263_v60 = vld [vmem:[%s8211_s0 + $0x6c] ss:$216 sps:$4 sm:$0xff]  }
  0xa9   :  { %5648 = vmatpush3.bf16.msra.mxu1 %v6194_v59  ;;  %v6261_v59 = vld [vmem:[%s8211_s0 + $0x68] ss:$216 sps:$4 sm:$0xff]  }
  0xaa   :  { %5649 = vmatprep.subr.bf16.mxu1 %v6197_v62  ;;  %v6265_v62 = vld [vmem:[%s8210_s1 + $0x7f8] sm:$0xff]  }
  0xab   :  { %5628 = vmatpush3.bf16.msra.mxu0 %v6196_v61  ;;  %v6264_v61 = vld [vmem:[%s8210_s1 + $0x738] sm:$0xff]  }
  0xac   :  { %5629 = vmatprep.subr.bf16.mxu0 %v6199_v0  ;;  %v6267_v0 = vld [vmem:[%s8210_s1 + $0x770] sm:$0xff]  }
  0xad   :  { %5650 = vmatpush3.bf16.msra.mxu1 %v6198_v63  ;;  %v6266_v63 = vld [vmem:[%s8210_s1 + $0x7b8] sm:$0xff]  }
  0xae   :  { %5651 = vmatprep.subr.bf16.mxu1 %v6201_v2  ;;  %v6269_v2 = vld [vmem:[%s8210_s1 + $0x7f0] sm:$0xff]  }
  0xaf   :  { %5630 = vmatpush3.bf16.msra.mxu0 %v6200_v1  ;;  %v6268_v1 = vld [vmem:[%s8210_s1 + $0x730] sm:$0xff]  }
  0xb0   :  { %5631 = vmatprep.subr.bf16.mxu0 %v6203_v4  ;;  %v6271_v4 = vld [vmem:[%s8210_s1 + $0x768] sm:$0xff]  }
  0xb1   :  { %5652 = vmatpush3.bf16.msra.mxu1 %v6202_v3  ;;  %v6270_v3 = vld [vmem:[%s8210_s1 + $0x7b0] sm:$0xff]  }
  0xb2   :  { %5653 = vmatprep.subr.bf16.mxu1 %v6205_v6  ;;  %v6273_v6 = vld [vmem:[%s8210_s1 + $0x7e8] sm:$0xff]  }
  0xb3   :  { %5632 = vmatpush3.bf16.msra.mxu0 %v6204_v5  ;;  %v6272_v5 = vld [vmem:[%s8210_s1 + $0x728] sm:$0xff]  }
  0xb4   :  { %5633 = vmatprep.subr.bf16.mxu0 %v6207_v8  ;;  %v6275_v8 = vld [vmem:[%s8210_s1 + $0x760] sm:$0xff]  }
  0xb5   :  { %5654 = vmatpush3.bf16.msra.mxu1 %v6206_v7  ;;  %v6274_v7 = vld [vmem:[%s8210_s1 + $0x7a8] sm:$0xff]  }
  0xb6   :  { %5655 = vmatprep.subr.bf16.mxu1 %v6209_v10  ;;  %v6277_v10 = vld [vmem:[%s8210_s1 + $0x7e0] sm:$0xff]  }
  0xb7   :  { %5634 = vmatpush3.bf16.msra.mxu0 %v6208_v9  ;;  %v6276_v9 = vld [vmem:[%s8210_s1 + $0x720] sm:$0xff]  }
  0xb8   :  { %5635 = vmatprep.subr.bf16.mxu0 %v6211_v12  ;;  %v6279_v12 = vld [vmem:[%s8210_s1 + $0x758] sm:$0xff]  }
  0xb9   :  { %5656 = vmatpush3.bf16.msra.mxu1 %v6210_v11  ;;  %v6278_v11 = vld [vmem:[%s8210_s1 + $0x7a0] sm:$0xff]  }
  0xba   :  { %5657 = vmatprep.subr.bf16.mxu1 %v6213_v14  ;;  %v6281_v14 = vld [vmem:[%s8210_s1 + $0x7d8] sm:$0xff]  }
  0xbb   :  { %5636 = vmatpush3.bf16.msra.mxu0 %v6212_v13  ;;  %v6280_v13 = vld [vmem:[%s8210_s1 + $0x718] sm:$0xff]  }
  0xbc   :  { %5637 = vmatprep.subr.bf16.mxu0 %v6215_v16  ;;  %v6283_v16 = vld [vmem:[%s8210_s1 + $0x750] sm:$0xff]  }
  0xbd   :  { %5658 = vmatpush3.bf16.msra.mxu1 %v6214_v15  ;;  %v6282_v15 = vld [vmem:[%s8210_s1 + $0x798] sm:$0xff]  }
  0xbe   :  { %5659 = vmatprep.subr.bf16.mxu1 %v6217_v18  ;;  %v6285_v18 = vld [vmem:[%s8210_s1 + $0x7d0] sm:$0xff]  }
  0xbf   :  { %5638 = vmatpush3.bf16.msra.mxu0 %v6216_v17  ;;  %v6284_v17 = vld [vmem:[%s8210_s1 + $0x710] sm:$0xff]  }
  0xc0   :  { %5667 = vmatprep.subr.bf16.mxu0 %v6222_v22  ;;  %v6289_v22 = vld [vmem:[%s8210_s1 + $0x7c8] sm:$0xff]  }
  0xc1   :  { %5660 = vmatpush3.bf16.msra.mxu1 %v6221_v21  ;;  %v6288_v21 = vld [vmem:[%s8210_s1 + $0x708] sm:$0xff]  }
  0xc2   :  { %4245 = vmatmul.mubr.bf16.vlgmr.msra.gmra.mxu0 %v6218_v19  ;;  %5689 = vmatprep.subr.bf16.mxu1 %v6227_v26  ;;  %v6286_v19 = vld [vmem:[%s8210_s1 + $0x790] sm:$0xff]   ;;  %v6293_v26 = vld [vmem:[%s8210_s1 + $0x7c0] sm:$0xff]  }
  0xc3   :  { %5668 = vmatpush3.bf16.msra.mxu0 %v6226_v25  ;;  %4326 = vmatprep.mubr.bf16.mxu0 %v6258_v56  ;;  %v6292_v25 = vld [vmem:[%s8210_s1 + $0x700] sm:$0xff]   ;;  %v6325_v56 = vld [vmem:[%s8210_s1 + $0x848] sm:$0xff]  }
  0xc4   :  { %4286 = vmatmul.mubr.bf16.vlgmr.msra.gmra.mxu1 %v6223_v23  ;;  %5669 = vmatprep.subr.bf16.mxu0 %v6229_v28  ;;  %v6290_v23 = vld [vmem:[%s8210_s1 + $0x788] sm:$0xff]  }
  0xc5   :  { %5690 = vmatpush3.bf16.msra.mxu1 %v6228_v27  ;;  %4367 = vmatprep.mubr.bf16.mxu1 %v6263_v60  ;;  %v6294_v27 = vld [vmem:[%s8211_s0 + $0x70] ss:$216 sps:$4 sm:$0xff]   ;;  %v6296_v28 = vld [vmem:[%s8211_s0 + $0x74] ss:$216 sps:$4 sm:$0xff]   ;;  %v6329_v60 = vld [vmem:[%s8210_s1 + $0x840] sm:$0xff]  }
  0xc6   :  { %5691 = vmatprep.subr.bf16.mxu1 %v6231_v30  ;;  %v6298_v30 = vld [vmem:[%s8210_s1 + $0x878] sm:$0xff]  }
  0xc7   :  { %5670 = vmatpush3.bf16.msra.mxu0 %v6230_v29  ;;  %v6297_v29 = vld [vmem:[%s8210_s1 + $0x780] sm:$0xff]  }
  0xc8   :  { %5671 = vmatprep.subr.bf16.mxu0 %v6233_v32  ;;  %v6301_v32 = vld [vmem:[%s8211_s0 + $0x7c] ss:$216 sps:$4 sm:$0xff]  }
  0xc9   :  { %5692 = vmatpush3.bf16.msra.mxu1 %v6232_v31  ;;  %v6299_v31 = vld [vmem:[%s8211_s0 + $0x78] ss:$216 sps:$4 sm:$0xff]  }
  0xca   :  { %5693 = vmatprep.subr.bf16.mxu1 %v6235_v34  ;;  %v6303_v34 = vld [vmem:[%s8210_s1 + $0x8f8] sm:$0xff]  }
  0xcb   :  { %5672 = vmatpush3.bf16.msra.mxu0 %v6234_v33  ;;  %v6302_v33 = vld [vmem:[%s8210_s1 + $0x838] sm:$0xff]  }
  0xcc   :  { %5673 = vmatprep.subr.bf16.mxu0 %v6237_v36  ;;  %v6305_v36 = vld [vmem:[%s8210_s1 + $0x870] sm:$0xff]  }
  0xcd   :  { %5694 = vmatpush3.bf16.msra.mxu1 %v6236_v35  ;;  %v6304_v35 = vld [vmem:[%s8210_s1 + $0x8b8] sm:$0xff]  }
  0xce   :  { %5695 = vmatprep.subr.bf16.mxu1 %v6239_v38  ;;  %v6307_v38 = vld [vmem:[%s8210_s1 + $0x8f0] sm:$0xff]  }
  0xcf   :  { %5674 = vmatpush3.bf16.msra.mxu0 %v6238_v37  ;;  %v6306_v37 = vld [vmem:[%s8210_s1 + $0x830] sm:$0xff]  }
  0xd0   :  { %5675 = vmatprep.subr.bf16.mxu0 %v6241_v40  ;;  %v6309_v40 = vld [vmem:[%s8210_s1 + $0x868] sm:$0xff]  }
  0xd1   :  { %5696 = vmatpush3.bf16.msra.mxu1 %v6240_v39  ;;  %v6308_v39 = vld [vmem:[%s8210_s1 + $0x8b0] sm:$0xff]  }
  0xd2   :  { %5697 = vmatprep.subr.bf16.mxu1 %v6243_v42  ;;  %v6311_v42 = vld [vmem:[%s8210_s1 + $0x8e8] sm:$0xff]  }
  0xd3   :  { %5676 = vmatpush3.bf16.msra.mxu0 %v6242_v41  ;;  %v6310_v41 = vld [vmem:[%s8210_s1 + $0x828] sm:$0xff]  }
  0xd4   :  { %5677 = vmatprep.subr.bf16.mxu0 %v6245_v44  ;;  %v6313_v44 = vld [vmem:[%s8210_s1 + $0x860] sm:$0xff]  }
  0xd5   :  { %5698 = vmatpush3.bf16.msra.mxu1 %v6244_v43  ;;  %v6312_v43 = vld [vmem:[%s8210_s1 + $0x8a8] sm:$0xff]  }
  0xd6   :  { %5699 = vmatprep.subr.bf16.mxu1 %v6247_v46  ;;  %v6315_v46 = vld [vmem:[%s8210_s1 + $0x8e0] sm:$0xff]  }
  0xd7   :  { %5678 = vmatpush3.bf16.msra.mxu0 %v6246_v45  ;;  %v6314_v45 = vld [vmem:[%s8210_s1 + $0x820] sm:$0xff]  }
  0xd8   :  { %5679 = vmatprep.subr.bf16.mxu0 %v6249_v48  ;;  %v6317_v48 = vld [vmem:[%s8210_s1 + $0x858] sm:$0xff]  }
  0xd9   :  { %5700 = vmatpush3.bf16.msra.mxu1 %v6248_v47  ;;  %v6316_v47 = vld [vmem:[%s8210_s1 + $0x8a0] sm:$0xff]  }
  0xda   :  { %5701 = vmatprep.subr.bf16.mxu1 %v6251_v50  ;;  %v6319_v50 = vld [vmem:[%s8210_s1 + $0x8d8] sm:$0xff]  }
  0xdb   :  { %5680 = vmatpush3.bf16.msra.mxu0 %v6250_v49  ;;  %v6318_v49 = vld [vmem:[%s8210_s1 + $0x818] sm:$0xff]  }
  0xdc   :  { %5681 = vmatprep.subr.bf16.mxu0 %v6253_v52  ;;  %v6321_v52 = vld [vmem:[%s8210_s1 + $0x850] sm:$0xff]  }
  0xdd   :  { %5702 = vmatpush3.bf16.msra.mxu1 %v6252_v51  ;;  %v6320_v51 = vld [vmem:[%s8210_s1 + $0x898] sm:$0xff]  }
  0xde   :  { %5703 = vmatprep.subr.bf16.mxu1 %v6255_v54  ;;  %v6323_v54 = vld [vmem:[%s8210_s1 + $0x8d0] sm:$0xff]  }
  0xdf   :  { %5682 = vmatpush3.bf16.msra.mxu0 %v6254_v53  ;;  %v6322_v53 = vld [vmem:[%s8210_s1 + $0x810] sm:$0xff]  }
  0xe0   :  { %5711 = vmatprep.subr.bf16.mxu0 %v6260_v58  ;;  %v6327_v58 = vld [vmem:[%s8210_s1 + $0x8c8] sm:$0xff]  }
  0xe1   :  { %5704 = vmatpush3.bf16.msra.mxu1 %v6259_v57  ;;  %v6326_v57 = vld [vmem:[%s8210_s1 + $0x808] sm:$0xff]  }
  0xe2   :  { %4327 = vmatmul.mubr.bf16.vlgmr.msra.gmra.mxu0 %v6256_v55  ;;  %5733 = vmatprep.subr.bf16.mxu1 %v6265_v62  ;;  %v6324_v55 = vld [vmem:[%s8210_s1 + $0x890] sm:$0xff]   ;;  %v6331_v62 = vld [vmem:[%s8210_s1 + $0x8c0] sm:$0xff]  }
  0xe3   :  { %5712 = vmatpush3.bf16.msra.mxu0 %v6264_v61  ;;  %4408 = vmatprep.mubr.bf16.mxu0 %v6296_v28  ;;  %v6330_v61 = vld [vmem:[%s8210_s1 + $0x800] sm:$0xff]   ;;  %v6363_v28 = vld [vmem:[%s8210_s1 + $0x948] sm:$0xff]  }
  0xe4   :  { %4368 = vmatmul.mubr.bf16.vlgmr.msra.gmra.mxu1 %v6261_v59  ;;  %5713 = vmatprep.subr.bf16.mxu0 %v6267_v0  ;;  %v6328_v59 = vld [vmem:[%s8210_s1 + $0x888] sm:$0xff]   ;;  %v6334_v0 = vld [vmem:[%s8211_s0 + $0x84] ss:$216 sps:$4 sm:$0xff]  }
  0xe5   :  { %5734 = vmatpush3.bf16.msra.mxu1 %v6266_v63  ;;  %4449 = vmatprep.mubr.bf16.mxu1 %v6301_v32  ;;  %v6332_v63 = vld [vmem:[%s8211_s0 + $0x80] ss:$216 sps:$4 sm:$0xff]  }
  0xe6   :  { %5735 = vmatprep.subr.bf16.mxu1 %v6269_v2  ;;  %v6336_v2 = vld [vmem:[%s8210_s1 + $0x978] sm:$0xff]   ;;  %v6367_v32 = vld [vmem:[%s8210_s1 + $0x940] sm:$0xff]  }
  0xe7   :  { %5714 = vmatpush3.bf16.msra.mxu0 %v6268_v1  ;;  %v6335_v1 = vld [vmem:[%s8210_s1 + $0x880] sm:$0xff]  }
  0xe8   :  { %5715 = vmatprep.subr.bf16.mxu0 %v6271_v4  ;;  %v6339_v4 = vld [vmem:[%s8211_s0 + $0x8c] ss:$216 sps:$4 sm:$0xff]  }
  0xe9   :  { %5736 = vmatpush3.bf16.msra.mxu1 %v6270_v3  ;;  %v6337_v3 = vld [vmem:[%s8211_s0 + $0x88] ss:$216 sps:$4 sm:$0xff]  }
  0xea   :  { %5737 = vmatprep.subr.bf16.mxu1 %v6273_v6  ;;  %v6341_v6 = vld [vmem:[%s8210_s1 + $0x9f8] sm:$0xff]  }
  0xeb   :  { %5716 = vmatpush3.bf16.msra.mxu0 %v6272_v5  ;;  %v6340_v5 = vld [vmem:[%s8210_s1 + $0x938] sm:$0xff]  }
  0xec   :  { %5717 = vmatprep.subr.bf16.mxu0 %v6275_v8  ;;  %v6343_v8 = vld [vmem:[%s8210_s1 + $0x970] sm:$0xff]  }
  0xed   :  { %5738 = vmatpush3.bf16.msra.mxu1 %v6274_v7  ;;  %v6342_v7 = vld [vmem:[%s8210_s1 + $0x9b8] sm:$0xff]  }
  0xee   :  { %5739 = vmatprep.subr.bf16.mxu1 %v6277_v10  ;;  %v6345_v10 = vld [vmem:[%s8210_s1 + $0x9f0] sm:$0xff]  }
  0xef   :  { %5718 = vmatpush3.bf16.msra.mxu0 %v6276_v9  ;;  %v6344_v9 = vld [vmem:[%s8210_s1 + $0x930] sm:$0xff]  }
  0xf0   :  { %5719 = vmatprep.subr.bf16.mxu0 %v6279_v12  ;;  %v6347_v12 = vld [vmem:[%s8210_s1 + $0x968] sm:$0xff]  }
  0xf1   :  { %5740 = vmatpush3.bf16.msra.mxu1 %v6278_v11  ;;  %v6346_v11 = vld [vmem:[%s8210_s1 + $0x9b0] sm:$0xff]  }
  0xf2   :  { %5741 = vmatprep.subr.bf16.mxu1 %v6281_v14  ;;  %v6349_v14 = vld [vmem:[%s8210_s1 + $0x9e8] sm:$0xff]  }
  0xf3   :  { %5720 = vmatpush3.bf16.msra.mxu0 %v6280_v13  ;;  %v6348_v13 = vld [vmem:[%s8210_s1 + $0x928] sm:$0xff]  }
  0xf4   :  { %5721 = vmatprep.subr.bf16.mxu0 %v6283_v16  ;;  %v6351_v16 = vld [vmem:[%s8210_s1 + $0x960] sm:$0xff]  }
  0xf5   :  { %5742 = vmatpush3.bf16.msra.mxu1 %v6282_v15  ;;  %v6350_v15 = vld [vmem:[%s8210_s1 + $0x9a8] sm:$0xff]  }
  0xf6   :  { %5743 = vmatprep.subr.bf16.mxu1 %v6285_v18  ;;  %v6353_v18 = vld [vmem:[%s8210_s1 + $0x9e0] sm:$0xff]  }
  0xf7   :  { %5722 = vmatpush3.bf16.msra.mxu0 %v6284_v17  ;;  %v6352_v17 = vld [vmem:[%s8210_s1 + $0x920] sm:$0xff]  }
  0xf8   :  { %5723 = vmatprep.subr.bf16.mxu0 %v6287_v20  ;;  %v6355_v20 = vld [vmem:[%s8210_s1 + $0x958] sm:$0xff]  }
  0xf9   :  { %5744 = vmatpush3.bf16.msra.mxu1 %v6286_v19  ;;  %v6354_v19 = vld [vmem:[%s8210_s1 + $0x9a0] sm:$0xff]  }
  0xfa   :  { %5745 = vmatprep.subr.bf16.mxu1 %v6289_v22  ;;  %v6357_v22 = vld [vmem:[%s8210_s1 + $0x9d8] sm:$0xff]  }
  0xfb   :  { %5724 = vmatpush3.bf16.msra.mxu0 %v6288_v21  ;;  %v6356_v21 = vld [vmem:[%s8210_s1 + $0x918] sm:$0xff]  }
  0xfc   :  { %5725 = vmatprep.subr.bf16.mxu0 %v6291_v24  ;;  %v6359_v24 = vld [vmem:[%s8210_s1 + $0x950] sm:$0xff]  }
  0xfd   :  { %5746 = vmatpush3.bf16.msra.mxu1 %v6290_v23  ;;  %v6358_v23 = vld [vmem:[%s8210_s1 + $0x998] sm:$0xff]  }
  0xfe   :  { %5747 = vmatprep.subr.bf16.mxu1 %v6293_v26  ;;  %v6361_v26 = vld [vmem:[%s8210_s1 + $0x9d0] sm:$0xff]  }
  0xff   :  { %5726 = vmatpush3.bf16.msra.mxu0 %v6292_v25  ;;  %v6360_v25 = vld [vmem:[%s8210_s1 + $0x910] sm:$0xff]  }
 0x100   :  { %5755 = vmatprep.subr.bf16.mxu0 %v6298_v30  ;;  %v6365_v30 = vld [vmem:[%s8210_s1 + $0x9c8] sm:$0xff]  }
 0x101   :  { %5748 = vmatpush3.bf16.msra.mxu1 %v6297_v29  ;;  %v6364_v29 = vld [vmem:[%s8210_s1 + $0x908] sm:$0xff]  }
 0x102   :  { %4409 = vmatmul.mubr.bf16.vlgmr.msra.gmra.mxu0 %v6294_v27  ;;  %5777 = vmatprep.subr.bf16.mxu1 %v6303_v34  ;;  %v6362_v27 = vld [vmem:[%s8210_s1 + $0x990] sm:$0xff]   ;;  %v6369_v34 = vld [vmem:[%s8210_s1 + $0x9c0] sm:$0xff]  }
 0x103   :  { %5756 = vmatpush3.bf16.msra.mxu0 %v6302_v33  ;;  %4490 = vmatprep.mubr.bf16.mxu0 %v6334_v0  ;;  %v6368_v33 = vld [vmem:[%s8210_s1 + $0x900] sm:$0xff]   ;;  %v6401_v0 = vld [vmem:[%s8210_s1 + $0xa48] sm:$0xff]  }
 0x104   :  { %4450 = vmatmul.mubr.bf16.vlgmr.msra.gmra.mxu1 %v6299_v31  ;;  %5757 = vmatprep.subr.bf16.mxu0 %v6305_v36  ;;  %v6366_v31 = vld [vmem:[%s8210_s1 + $0x988] sm:$0xff]  }
 0x105   :  { %5778 = vmatpush3.bf16.msra.mxu1 %v6304_v35  ;;  %4531 = vmatprep.mubr.bf16.mxu1 %v6339_v4  ;;  %v6370_v35 = vld [vmem:[%s8211_s0 + $0x90] ss:$216 sps:$4 sm:$0xff]   ;;  %v6372_v36 = vld [vmem:[%s8211_s0 + $0x94] ss:$216 sps:$4 sm:$0xff]   ;;  %v6405_v4 = vld [vmem:[%s8210_s1 + $0xa40] sm:$0xff]  }
 0x106   :  { %5779 = vmatprep.subr.bf16.mxu1 %v6307_v38  ;;  %v6374_v38 = vld [vmem:[%s8210_s1 + $0xa78] sm:$0xff]  }
 0x107   :  { %5758 = vmatpush3.bf16.msra.mxu0 %v6306_v37  ;;  %v6373_v37 = vld [vmem:[%s8210_s1 + $0x980] sm:$0xff]  }
 0x108   :  { %5759 = vmatprep.subr.bf16.mxu0 %v6309_v40  ;;  %v6377_v40 = vld [vmem:[%s8211_s0 + $0x9c] ss:$216 sps:$4 sm:$0xff]  }
 0x109   :  { %5780 = vmatpush3.bf16.msra.mxu1 %v6308_v39  ;;  %v6375_v39 = vld [vmem:[%s8211_s0 + $0x98] ss:$216 sps:$4 sm:$0xff]  }
 0x10a   :  { %5781 = vmatprep.subr.bf16.mxu1 %v6311_v42  ;;  %v6379_v42 = vld [vmem:[%s8210_s1 + $0xaf8] sm:$0xff]  }
 0x10b   :  { %5760 = vmatpush3.bf16.msra.mxu0 %v6310_v41  ;;  %v6378_v41 = vld [vmem:[%s8210_s1 + $0xa38] sm:$0xff]  }
 0x10c   :  { %5761 = vmatprep.subr.bf16.mxu0 %v6313_v44  ;;  %v6381_v44 = vld [vmem:[%s8210_s1 + $0xa70] sm:$0xff]  }
 0x10d   :  { %5782 = vmatpush3.bf16.msra.mxu1 %v6312_v43  ;;  %v6380_v43 = vld [vmem:[%s8210_s1 + $0xab8] sm:$0xff]  }
 0x10e   :  { %5783 = vmatprep.subr.bf16.mxu1 %v6315_v46  ;;  %v6383_v46 = vld [vmem:[%s8210_s1 + $0xaf0] sm:$0xff]  }
 0x10f   :  { %5762 = vmatpush3.bf16.msra.mxu0 %v6314_v45  ;;  %v6382_v45 = vld [vmem:[%s8210_s1 + $0xa30] sm:$0xff]  }
 0x110   :  { %5763 = vmatprep.subr.bf16.mxu0 %v6317_v48  ;;  %v6385_v48 = vld [vmem:[%s8210_s1 + $0xa68] sm:$0xff]  }
 0x111   :  { %5784 = vmatpush3.bf16.msra.mxu1 %v6316_v47  ;;  %v6384_v47 = vld [vmem:[%s8210_s1 + $0xab0] sm:$0xff]  }
 0x112   :  { %5785 = vmatprep.subr.bf16.mxu1 %v6319_v50  ;;  %v6387_v50 = vld [vmem:[%s8210_s1 + $0xae8] sm:$0xff]  }
 0x113   :  { %5764 = vmatpush3.bf16.msra.mxu0 %v6318_v49  ;;  %v6386_v49 = vld [vmem:[%s8210_s1 + $0xa28] sm:$0xff]  }
 0x114   :  { %5765 = vmatprep.subr.bf16.mxu0 %v6321_v52  ;;  %v6389_v52 = vld [vmem:[%s8210_s1 + $0xa60] sm:$0xff]  }
 0x115   :  { %5786 = vmatpush3.bf16.msra.mxu1 %v6320_v51  ;;  %v6388_v51 = vld [vmem:[%s8210_s1 + $0xaa8] sm:$0xff]  }
 0x116   :  { %5787 = vmatprep.subr.bf16.mxu1 %v6323_v54  ;;  %v6391_v54 = vld [vmem:[%s8210_s1 + $0xae0] sm:$0xff]  }
 0x117   :  { %5766 = vmatpush3.bf16.msra.mxu0 %v6322_v53  ;;  %v6390_v53 = vld [vmem:[%s8210_s1 + $0xa20] sm:$0xff]  }
 0x118   :  { %5767 = vmatprep.subr.bf16.mxu0 %v6325_v56  ;;  %v6393_v56 = vld [vmem:[%s8210_s1 + $0xa58] sm:$0xff]  }
 0x119   :  { %5788 = vmatpush3.bf16.msra.mxu1 %v6324_v55  ;;  %v6392_v55 = vld [vmem:[%s8210_s1 + $0xaa0] sm:$0xff]  }
 0x11a   :  { %5789 = vmatprep.subr.bf16.mxu1 %v6327_v58  ;;  %v6395_v58 = vld [vmem:[%s8210_s1 + $0xad8] sm:$0xff]  }
 0x11b   :  { %5768 = vmatpush3.bf16.msra.mxu0 %v6326_v57  ;;  %v6394_v57 = vld [vmem:[%s8210_s1 + $0xa18] sm:$0xff]  }
 0x11c   :  { %5769 = vmatprep.subr.bf16.mxu0 %v6329_v60  ;;  %v6397_v60 = vld [vmem:[%s8210_s1 + $0xa50] sm:$0xff]  }
 0x11d   :  { %5790 = vmatpush3.bf16.msra.mxu1 %v6328_v59  ;;  %v6396_v59 = vld [vmem:[%s8210_s1 + $0xa98] sm:$0xff]  }
 0x11e   :  { %5791 = vmatprep.subr.bf16.mxu1 %v6331_v62  ;;  %v6399_v62 = vld [vmem:[%s8210_s1 + $0xad0] sm:$0xff]  }
 0x11f   :  { %5770 = vmatpush3.bf16.msra.mxu0 %v6330_v61  ;;  %v6398_v61 = vld [vmem:[%s8210_s1 + $0xa10] sm:$0xff]  }
 0x120   :  { %5799 = vmatprep.subr.bf16.mxu0 %v6336_v2  ;;  %v6403_v2 = vld [vmem:[%s8210_s1 + $0xac8] sm:$0xff]  }
 0x121   :  { %5792 = vmatpush3.bf16.msra.mxu1 %v6335_v1  ;;  %v6402_v1 = vld [vmem:[%s8210_s1 + $0xa08] sm:$0xff]  }
 0x122   :  { %4491 = vmatmul.mubr.bf16.vlgmr.msra.gmra.mxu0 %v6332_v63  ;;  %5821 = vmatprep.subr.bf16.mxu1 %v6341_v6  ;;  %v6400_v63 = vld [vmem:[%s8210_s1 + $0xa90] sm:$0xff]   ;;  %v6407_v6 = vld [vmem:[%s8210_s1 + $0xac0] sm:$0xff]  }
 0x123   :  { %5800 = vmatpush3.bf16.msra.mxu0 %v6340_v5  ;;  %4572 = vmatprep.mubr.bf16.mxu0 %v6372_v36  ;;  %v6406_v5 = vld [vmem:[%s8210_s1 + $0xa00] sm:$0xff]   ;;  %v6439_v36 = vld [vmem:[%s8210_s1 + $0xb48] sm:$0xff]  }
 0x124   :  { %4532 = vmatmul.mubr.bf16.vlgmr.msra.gmra.mxu1 %v6337_v3  ;;  %5801 = vmatprep.subr.bf16.mxu0 %v6343_v8  ;;  %v6404_v3 = vld [vmem:[%s8210_s1 + $0xa88] sm:$0xff]   ;;  %v6410_v8 = vld [vmem:[%s8211_s0 + $0xa4] ss:$216 sps:$4 sm:$0xff]  }
 0x125   :  { %5822 = vmatpush3.bf16.msra.mxu1 %v6342_v7  ;;  %4613 = vmatprep.mubr.bf16.mxu1 %v6377_v40  ;;  %v6408_v7 = vld [vmem:[%s8211_s0 + $0xa0] ss:$216 sps:$4 sm:$0xff]  }
 0x126   :  { %5823 = vmatprep.subr.bf16.mxu1 %v6345_v10  ;;  %v6412_v10 = vld [vmem:[%s8210_s1 + $0xb78] sm:$0xff]   ;;  %v6443_v40 = vld [vmem:[%s8210_s1 + $0xb40] sm:$0xff]  }
 0x127   :  { %5802 = vmatpush3.bf16.msra.mxu0 %v6344_v9  ;;  %v6411_v9 = vld [vmem:[%s8210_s1 + $0xa80] sm:$0xff]  }
 0x128   :  { %5803 = vmatprep.subr.bf16.mxu0 %v6347_v12  ;;  %v6415_v12 = vld [vmem:[%s8211_s0 + $0xac] ss:$216 sps:$4 sm:$0xff]  }
 0x129   :  { %5824 = vmatpush3.bf16.msra.mxu1 %v6346_v11  ;;  %v6413_v11 = vld [vmem:[%s8211_s0 + $0xa8] ss:$216 sps:$4 sm:$0xff]  }
 0x12a   :  { %5825 = vmatprep.subr.bf16.mxu1 %v6349_v14  ;;  %v6417_v14 = vld [vmem:[%s8210_s1 + $0xbf8] sm:$0xff]  }
 0x12b   :  { %5804 = vmatpush3.bf16.msra.mxu0 %v6348_v13  ;;  %v6416_v13 = vld [vmem:[%s8210_s1 + $0xb38] sm:$0xff]  }
 0x12c   :  { %5805 = vmatprep.subr.bf16.mxu0 %v6351_v16  ;;  %v6419_v16 = vld [vmem:[%s8210_s1 + $0xb70] sm:$0xff]  }
 0x12d   :  { %5826 = vmatpush3.bf16.msra.mxu1 %v6350_v15  ;;  %v6418_v15 = vld [vmem:[%s8210_s1 + $0xbb8] sm:$0xff]  }
 0x12e   :  { %5827 = vmatprep.subr.bf16.mxu1 %v6353_v18  ;;  %v6421_v18 = vld [vmem:[%s8210_s1 + $0xbf0] sm:$0xff]  }
 0x12f   :  { %5806 = vmatpush3.bf16.msra.mxu0 %v6352_v17  ;;  %v6420_v17 = vld [vmem:[%s8210_s1 + $0xb30] sm:$0xff]  }
 0x130   :  { %5807 = vmatprep.subr.bf16.mxu0 %v6355_v20  ;;  %v6423_v20 = vld [vmem:[%s8210_s1 + $0xb68] sm:$0xff]  }
 0x131   :  { %5828 = vmatpush3.bf16.msra.mxu1 %v6354_v19  ;;  %v6422_v19 = vld [vmem:[%s8210_s1 + $0xbb0] sm:$0xff]  }
 0x132   :  { %5829 = vmatprep.subr.bf16.mxu1 %v6357_v22  ;;  %v6425_v22 = vld [vmem:[%s8210_s1 + $0xbe8] sm:$0xff]  }
 0x133   :  { %5808 = vmatpush3.bf16.msra.mxu0 %v6356_v21  ;;  %v6424_v21 = vld [vmem:[%s8210_s1 + $0xb28] sm:$0xff]  }
 0x134   :  { %5809 = vmatprep.subr.bf16.mxu0 %v6359_v24  ;;  %v6427_v24 = vld [vmem:[%s8210_s1 + $0xb60] sm:$0xff]  }
 0x135   :  { %5830 = vmatpush3.bf16.msra.mxu1 %v6358_v23  ;;  %v6426_v23 = vld [vmem:[%s8210_s1 + $0xba8] sm:$0xff]  }
 0x136   :  { %5831 = vmatprep.subr.bf16.mxu1 %v6361_v26  ;;  %v6429_v26 = vld [vmem:[%s8210_s1 + $0xbe0] sm:$0xff]  }
 0x137   :  { %5810 = vmatpush3.bf16.msra.mxu0 %v6360_v25  ;;  %v6428_v25 = vld [vmem:[%s8210_s1 + $0xb20] sm:$0xff]  }
 0x138   :  { %5811 = vmatprep.subr.bf16.mxu0 %v6363_v28  ;;  %v6431_v28 = vld [vmem:[%s8210_s1 + $0xb58] sm:$0xff]  }
 0x139   :  { %5832 = vmatpush3.bf16.msra.mxu1 %v6362_v27  ;;  %v6430_v27 = vld [vmem:[%s8210_s1 + $0xba0] sm:$0xff]  }
 0x13a   :  { %5833 = vmatprep.subr.bf16.mxu1 %v6365_v30  ;;  %v6433_v30 = vld [vmem:[%s8210_s1 + $0xbd8] sm:$0xff]  }
 0x13b   :  { %5812 = vmatpush3.bf16.msra.mxu0 %v6364_v29  ;;  %v6432_v29 = vld [vmem:[%s8210_s1 + $0xb18] sm:$0xff]  }
 0x13c   :  { %5813 = vmatprep.subr.bf16.mxu0 %v6367_v32  ;;  %v6435_v32 = vld [vmem:[%s8210_s1 + $0xb50] sm:$0xff]  }
 0x13d   :  { %5834 = vmatpush3.bf16.msra.mxu1 %v6366_v31  ;;  %v6434_v31 = vld [vmem:[%s8210_s1 + $0xb98] sm:$0xff]  }
 0x13e   :  { %5835 = vmatprep.subr.bf16.mxu1 %v6369_v34  ;;  %v6437_v34 = vld [vmem:[%s8210_s1 + $0xbd0] sm:$0xff]  }
 0x13f   :  { %5814 = vmatpush3.bf16.msra.mxu0 %v6368_v33  ;;  %v6436_v33 = vld [vmem:[%s8210_s1 + $0xb10] sm:$0xff]  }
 0x140   :  { %5843 = vmatprep.subr.bf16.mxu0 %v6374_v38  ;;  %v6441_v38 = vld [vmem:[%s8210_s1 + $0xbc8] sm:$0xff]  }
 0x141   :  { %5836 = vmatpush3.bf16.msra.mxu1 %v6373_v37  ;;  %v6440_v37 = vld [vmem:[%s8210_s1 + $0xb08] sm:$0xff]  }
 0x142   :  { %4573 = vmatmul.mubr.bf16.vlgmr.msra.gmra.mxu0 %v6370_v35  ;;  %5865 = vmatprep.subr.bf16.mxu1 %v6379_v42  ;;  %v6438_v35 = vld [vmem:[%s8210_s1 + $0xb90] sm:$0xff]   ;;  %v6445_v42 = vld [vmem:[%s8210_s1 + $0xbc0] sm:$0xff]  }
 0x143   :  { %5844 = vmatpush3.bf16.msra.mxu0 %v6378_v41  ;;  %4654 = vmatprep.mubr.bf16.mxu0 %v6410_v8  ;;  %v6444_v41 = vld [vmem:[%s8210_s1 + $0xb00] sm:$0xff]   ;;  %v6477_v8 = vld [vmem:[%s8210_s1 + $0xc48] sm:$0xff]  }
 0x144   :  { %4614 = vmatmul.mubr.bf16.vlgmr.msra.gmra.mxu1 %v6375_v39  ;;  %5845 = vmatprep.subr.bf16.mxu0 %v6381_v44  ;;  %v6442_v39 = vld [vmem:[%s8210_s1 + $0xb88] sm:$0xff]  }
 0x145   :  { %5866 = vmatpush3.bf16.msra.mxu1 %v6380_v43  ;;  %4695 = vmatprep.mubr.bf16.mxu1 %v6415_v12  ;;  %v6446_v43 = vld [vmem:[%s8211_s0 + $0xb0] ss:$216 sps:$4 sm:$0xff]   ;;  %v6448_v44 = vld [vmem:[%s8211_s0 + $0xb4] ss:$216 sps:$4 sm:$0xff]   ;;  %v6481_v12 = vld [vmem:[%s8210_s1 + $0xc40] sm:$0xff]  }
 0x146   :  { %5867 = vmatprep.subr.bf16.mxu1 %v6383_v46  ;;  %v6450_v46 = vld [vmem:[%s8210_s1 + $0xc78] sm:$0xff]  }
 0x147   :  { %5846 = vmatpush3.bf16.msra.mxu0 %v6382_v45  ;;  %v6449_v45 = vld [vmem:[%s8210_s1 + $0xb80] sm:$0xff]  }
 0x148   :  { %5847 = vmatprep.subr.bf16.mxu0 %v6385_v48  ;;  %v6453_v48 = vld [vmem:[%s8211_s0 + $0xbc] ss:$216 sps:$4 sm:$0xff]  }
 0x149   :  { %5868 = vmatpush3.bf16.msra.mxu1 %v6384_v47  ;;  %v6451_v47 = vld [vmem:[%s8211_s0 + $0xb8] ss:$216 sps:$4 sm:$0xff]  }
 0x14a   :  { %5869 = vmatprep.subr.bf16.mxu1 %v6387_v50  ;;  %v6455_v50 = vld [vmem:[%s8210_s1 + $0xcf8] sm:$0xff]  }
 0x14b   :  { %5848 = vmatpush3.bf16.msra.mxu0 %v6386_v49  ;;  %v6454_v49 = vld [vmem:[%s8210_s1 + $0xc38] sm:$0xff]  }
 0x14c   :  { %5849 = vmatprep.subr.bf16.mxu0 %v6389_v52  ;;  %v6457_v52 = vld [vmem:[%s8210_s1 + $0xc70] sm:$0xff]  }
 0x14d   :  { %5870 = vmatpush3.bf16.msra.mxu1 %v6388_v51  ;;  %v6456_v51 = vld [vmem:[%s8210_s1 + $0xcb8] sm:$0xff]  }
 0x14e   :  { %5871 = vmatprep.subr.bf16.mxu1 %v6391_v54  ;;  %v6459_v54 = vld [vmem:[%s8210_s1 + $0xcf0] sm:$0xff]  }
 0x14f   :  { %5850 = vmatpush3.bf16.msra.mxu0 %v6390_v53  ;;  %v6458_v53 = vld [vmem:[%s8210_s1 + $0xc30] sm:$0xff]  }
 0x150   :  { %5851 = vmatprep.subr.bf16.mxu0 %v6393_v56  ;;  %v6461_v56 = vld [vmem:[%s8210_s1 + $0xc68] sm:$0xff]  }
 0x151   :  { %5872 = vmatpush3.bf16.msra.mxu1 %v6392_v55  ;;  %v6460_v55 = vld [vmem:[%s8210_s1 + $0xcb0] sm:$0xff]  }
 0x152   :  { %5873 = vmatprep.subr.bf16.mxu1 %v6395_v58  ;;  %v6463_v58 = vld [vmem:[%s8210_s1 + $0xce8] sm:$0xff]  }
 0x153   :  { %5852 = vmatpush3.bf16.msra.mxu0 %v6394_v57  ;;  %v6462_v57 = vld [vmem:[%s8210_s1 + $0xc28] sm:$0xff]  }
 0x154   :  { %5853 = vmatprep.subr.bf16.mxu0 %v6397_v60  ;;  %v6465_v60 = vld [vmem:[%s8210_s1 + $0xc60] sm:$0xff]  }
 0x155   :  { %5874 = vmatpush3.bf16.msra.mxu1 %v6396_v59  ;;  %v6464_v59 = vld [vmem:[%s8210_s1 + $0xca8] sm:$0xff]  }
 0x156   :  { %5875 = vmatprep.subr.bf16.mxu1 %v6399_v62  ;;  %v6467_v62 = vld [vmem:[%s8210_s1 + $0xce0] sm:$0xff]  }
 0x157   :  { %5854 = vmatpush3.bf16.msra.mxu0 %v6398_v61  ;;  %v6466_v61 = vld [vmem:[%s8210_s1 + $0xc20] sm:$0xff]  }
 0x158   :  { %5855 = vmatprep.subr.bf16.mxu0 %v6401_v0  ;;  %v6469_v0 = vld [vmem:[%s8210_s1 + $0xc58] sm:$0xff]  }
 0x159   :  { %5876 = vmatpush3.bf16.msra.mxu1 %v6400_v63  ;;  %v6468_v63 = vld [vmem:[%s8210_s1 + $0xca0] sm:$0xff]  }
 0x15a   :  { %5877 = vmatprep.subr.bf16.mxu1 %v6403_v2  ;;  %v6471_v2 = vld [vmem:[%s8210_s1 + $0xcd8] sm:$0xff]  }
 0x15b   :  { %5856 = vmatpush3.bf16.msra.mxu0 %v6402_v1  ;;  %v6470_v1 = vld [vmem:[%s8210_s1 + $0xc18] sm:$0xff]  }
 0x15c   :  { %5857 = vmatprep.subr.bf16.mxu0 %v6405_v4  ;;  %v6473_v4 = vld [vmem:[%s8210_s1 + $0xc50] sm:$0xff]  }
 0x15d   :  { %5878 = vmatpush3.bf16.msra.mxu1 %v6404_v3  ;;  %v6472_v3 = vld [vmem:[%s8210_s1 + $0xc98] sm:$0xff]  }
 0x15e   :  { %5879 = vmatprep.subr.bf16.mxu1 %v6407_v6  ;;  %v6475_v6 = vld [vmem:[%s8210_s1 + $0xcd0] sm:$0xff]  }
 0x15f   :  { %5858 = vmatpush3.bf16.msra.mxu0 %v6406_v5  ;;  %v6474_v5 = vld [vmem:[%s8210_s1 + $0xc10] sm:$0xff]  }
 0x160   :  { %5887 = vmatprep.subr.bf16.mxu0 %v6412_v10  ;;  %v6479_v10 = vld [vmem:[%s8210_s1 + $0xcc8] sm:$0xff]  }
 0x161   :  { %5880 = vmatpush3.bf16.msra.mxu1 %v6411_v9  ;;  %v6478_v9 = vld [vmem:[%s8210_s1 + $0xc08] sm:$0xff]  }
 0x162   :  { %4655 = vmatmul.mubr.bf16.vlgmr.msra.gmra.mxu0 %v6408_v7  ;;  %5909 = vmatprep.subr.bf16.mxu1 %v6417_v14  ;;  %v6476_v7 = vld [vmem:[%s8210_s1 + $0xc90] sm:$0xff]   ;;  %v6483_v14 = vld [vmem:[%s8210_s1 + $0xcc0] sm:$0xff]  }
 0x163   :  { %5888 = vmatpush3.bf16.msra.mxu0 %v6416_v13  ;;  %4736 = vmatprep.mubr.bf16.mxu0 %v6448_v44  ;;  %v6482_v13 = vld [vmem:[%s8210_s1 + $0xc00] sm:$0xff]  }
 0x164   :  { %4696 = vmatmul.mubr.bf16.vlgmr.msra.gmra.mxu1 %v6413_v11  ;;  %5889 = vmatprep.subr.bf16.mxu0 %v6419_v16  ;;  %v6480_v11 = vld [vmem:[%s8210_s1 + $0xc88] sm:$0xff]   ;;  %v6486_v16 = vld [vmem:[%s8211_s0 + $0xc4] ss:$216 sps:$4 sm:$0xff]  }
 0x165   :  { %5910 = vmatpush3.bf16.msra.mxu1 %v6418_v15  ;;  %4777 = vmatprep.mubr.bf16.mxu1 %v6453_v48  ;;  %v6484_v15 = vld [vmem:[%s8211_s0 + $0xc0] ss:$216 sps:$4 sm:$0xff]  }
 0x166   :  { %5911 = vmatprep.subr.bf16.mxu1 %v6421_v18  ;;  %v6488_v18 = vld [vmem:[%s8210_s1 + $0xd78] sm:$0xff]  }
 0x167   :  { %5890 = vmatpush3.bf16.msra.mxu0 %v6420_v17  ;;  %v6487_v17 = vld [vmem:[%s8210_s1 + $0xc80] sm:$0xff]  }
 0x168   :  { %5891 = vmatprep.subr.bf16.mxu0 %v6423_v20  ;;  %v6491_v20 = vld [vmem:[%s8211_s0 + $0xcc] ss:$216 sps:$4 sm:$0xff]  }
 0x169   :  { %5912 = vmatpush3.bf16.msra.mxu1 %v6422_v19  ;;  %v6489_v19 = vld [vmem:[%s8211_s0 + $0xc8] ss:$216 sps:$4 sm:$0xff]  }
 0x16a   :  { %5913 = vmatprep.subr.bf16.mxu1 %v6425_v22  ;;  %v6493_v22 = vld [vmem:[%s8210_s1 + $0xd70] sm:$0xff]  }
 0x16b   :  { %5892 = vmatpush3.bf16.msra.mxu0 %v6424_v21  ;;  %v6492_v21 = vld [vmem:[%s8210_s1 + $0xd38] sm:$0xff]  }
 0x16c   :  { %5893 = vmatprep.subr.bf16.mxu0 %v6427_v24  ;;  %v6495_v24 = vld [vmem:[%s8210_s1 + $0xd68] sm:$0xff]  }
 0x16d   :  { %5914 = vmatpush3.bf16.msra.mxu1 %v6426_v23  ;;  %v6494_v23 = vld [vmem:[%s8210_s1 + $0xd30] sm:$0xff]  }
 0x16e   :  { %5915 = vmatprep.subr.bf16.mxu1 %v6429_v26  ;;  %v6497_v26 = vld [vmem:[%s8210_s1 + $0xd60] sm:$0xff]  }
 0x16f   :  { %5894 = vmatpush3.bf16.msra.mxu0 %v6428_v25  ;;  %v6496_v25 = vld [vmem:[%s8210_s1 + $0xd28] sm:$0xff]  }
 0x170   :  { %5895 = vmatprep.subr.bf16.mxu0 %v6431_v28  ;;  %v6499_v28 = vld [vmem:[%s8210_s1 + $0xd58] sm:$0xff]  }
 0x171   :  { %5916 = vmatpush3.bf16.msra.mxu1 %v6430_v27  ;;  %v6498_v27 = vld [vmem:[%s8210_s1 + $0xd20] sm:$0xff]  }
 0x172   :  { %5917 = vmatprep.subr.bf16.mxu1 %v6433_v30  ;;  %v6501_v30 = vld [vmem:[%s8210_s1 + $0xd50] sm:$0xff]  }
 0x173   :  { %5896 = vmatpush3.bf16.msra.mxu0 %v6432_v29  ;;  %v6500_v29 = vld [vmem:[%s8210_s1 + $0xd18] sm:$0xff]  }
 0x174   :  { %5897 = vmatprep.subr.bf16.mxu0 %v6435_v32  ;;  %v6502_v32 = vld [vmem:[%s8210_s1 + $0xd10] sm:$0xff]  }
 0x175   :  { %5918 = vmatpush3.bf16.msra.mxu1 %v6434_v31  ;;  %v6509_v31 = vld [vmem:[%s8211_s0 + $0xd4] ss:$216 sps:$4 sm:$0xff]  }
 0x176   :  { %5919 = vmatprep.subr.bf16.mxu1 %v6437_v34  ;;  %v6504_v34 = vld [vmem:[%s8210_s1 + $0xd08] sm:$0xff]  }
 0x177   :  { %5898 = vmatpush3.bf16.msra.mxu0 %v6436_v33  ;;  %v6503_v33 = vld [vmem:[%s8210_s1 + $0xd48] sm:$0xff]  }
 0x178   :  { %5899 = vmatprep.subr.bf16.mxu0 %v6439_v36  ;;  %v6506_v36 = vld [vmem:[%s8210_s1 + $0xd00] sm:$0xff]  }
 0x179   :  { %5920 = vmatpush3.bf16.msra.mxu1 %v6438_v35  ;;  %v6505_v35 = vld [vmem:[%s8210_s1 + $0xd40] sm:$0xff]  }
 0x17a   :  { %5921 = vmatprep.subr.bf16.mxu1 %v6441_v38  ;;  %v5419_v38 = vpop.f32.mrf.mxu0 }
 0x17b   :  { %5900 = vmatpush3.bf16.msra.mxu0 %v6440_v37  ;;  %v6507_v37 = vld [vmem:[%s8211_s0 + $0xd0] ss:$216 sps:$4 sm:$0xff]  }
 0x17c   :  { %5901 = vmatprep.subr.bf16.mxu0 %v6443_v40  ;;  %v7988_v40 = vpop.f32.mrf.mxu1 }
 0x17d   :  { %5922 = vmatpush3.bf16.msra.mxu1 %v6442_v39  ;;  %v5420_v39 = vpop.f32.mrf.mxu0 }
 0x17e   :  { %5923 = vmatprep.subr.bf16.mxu1 %v6445_v42  ;;  %v7992_v42 = vpop.f32.mrf.mxu1 }
 0x17f   :  { %5902 = vmatpush3.bf16.msra.mxu0 %v6444_v41  ;;  %v7990_v41 = vpop.f32.mrf.mxu0 }
 0x180   :  { %5931 = vmatprep.subr.bf16.mxu0 %v6450_v46  ;;  %v7996_v44 = vpop.f32.mrf.mxu1 }
 0x181   :  { %5924 = vmatpush3.bf16.msra.mxu1 %v6449_v45 }
 0x182   :  { %4737 = vmatmul.mubr.bf16.vlgmr.msra.gmra.mxu0 %v6446_v43  ;;  %5953 = vmatprep.subr.bf16.mxu1 %v6455_v50  ;;  %v7994_v43 = vpop.f32.mrf.mxu0  ;;  %v8000_v46 = vpop.f32.mrf.mxu1 }
 0x183   :  { %5932 = vmatpush3.bf16.msra.mxu0 %v6454_v49  ;;  %4818 = vmatprep.mubr.bf16.mxu0 %v6486_v16 }
 0x184   :  { %4778 = vmatmul.mubr.bf16.vlgmr.msra.gmra.mxu1 %v6451_v47  ;;  %5933 = vmatprep.subr.bf16.mxu0 %v6457_v52  ;;  %v7998_v45 = vpop.f32.mrf.mxu0  ;;  %v8002_v48 = vpop.f32.mrf.mxu1 }
 0x185   :  { %5954 = vmatpush3.bf16.msra.mxu1 %v6456_v51  ;;  %4859 = vmatprep.mubr.bf16.mxu1 %v6491_v20 }
 0x186   :  { %5955 = vmatprep.subr.bf16.mxu1 %v6459_v54  ;;  %v5464_v47 = vpop.f32.mrf.mxu0  ;;  %v8006_v50 = vpop.f32.mrf.mxu1 }
 0x187   :  { %5934 = vmatpush3.bf16.msra.mxu0 %v6458_v53 }
 0x188   :  { %5935 = vmatprep.subr.bf16.mxu0 %v6461_v56  ;;  %v8004_v49 = vpop.f32.mrf.mxu0  ;;  %v8010_v52 = vpop.f32.mrf.mxu1 }
 0x189   :  { %5956 = vmatpush3.bf16.msra.mxu1 %v6460_v55 }
 0x18a   :  { %5957 = vmatprep.subr.bf16.mxu1 %v6463_v58  ;;  %v8008_v51 = vpop.f32.mrf.mxu0  ;;  %v8014_v54 = vpop.f32.mrf.mxu1 }
 0x18b   :  { %5936 = vmatpush3.bf16.msra.mxu0 %v6462_v57 }
 0x18c   :  { %5937 = vmatprep.subr.bf16.mxu0 %v6465_v60  ;;  %v8012_v53 = vpop.f32.mrf.mxu0  ;;  %v8018_v56 = vpop.f32.mrf.mxu1 }
 0x18d   :  { %5958 = vmatpush3.bf16.msra.mxu1 %v6464_v59 }
 0x18e   :  { %5959 = vmatprep.subr.bf16.mxu1 %v6467_v62  ;;  %v8016_v55 = vpop.f32.mrf.mxu0  ;;  %v8022_v58 = vpop.f32.mrf.mxu1 }
 0x18f   :  { %5938 = vmatpush3.bf16.msra.mxu0 %v6466_v61 }
 0x190   :  { %5939 = vmatprep.subr.bf16.mxu0 %v6469_v0  ;;  %v8020_v57 = vpop.f32.mrf.mxu0  ;;  %v8026_v60 = vpop.f32.mrf.mxu1 }
 0x191   :  { %5960 = vmatpush3.bf16.msra.mxu1 %v6468_v63 }
 0x192   :  { %5961 = vmatprep.subr.bf16.mxu1 %v6471_v2  ;;  %v8024_v59 = vpop.f32.mrf.mxu0  ;;  %v8030_v62 = vpop.f32.mrf.mxu1 }
 0x193   :  { %5940 = vmatpush3.bf16.msra.mxu0 %v6470_v1 }
 0x194   :  { %5941 = vmatprep.subr.bf16.mxu0 %v6473_v4  ;;  %v8028_v61 = vpop.f32.mrf.mxu0  ;;  %v8034_v0 = vpop.f32.mrf.mxu1 }
 0x195   :  { %5962 = vmatpush3.bf16.msra.mxu1 %v6472_v3 }
 0x196   :  { %5963 = vmatprep.subr.bf16.mxu1 %v6475_v6  ;;  %v8032_v63 = vpop.f32.mrf.mxu0  ;;  %v8038_v2 = vpop.f32.mrf.mxu1 }
 0x197   :  { %5942 = vmatpush3.bf16.msra.mxu0 %v6474_v5 }
 0x198   :  { %5943 = vmatprep.subr.bf16.mxu0 %v6477_v8  ;;  %v8036_v1 = vpop.f32.mrf.mxu0  ;;  %v8042_v4 = vpop.f32.mrf.mxu1 }
 0x199   :  { %5964 = vmatpush3.bf16.msra.mxu1 %v6476_v7 }
 0x19a   :  { %5965 = vmatprep.subr.bf16.mxu1 %v6479_v10  ;;  %v8040_v3 = vpop.f32.mrf.mxu0  ;;  %v8046_v6 = vpop.f32.mrf.mxu1 }
 0x19b   :  { %5944 = vmatpush3.bf16.msra.mxu0 %v6478_v9 }
 0x19c   :  { %5945 = vmatprep.subr.bf16.mxu0 %v6481_v12  ;;  %v8044_v5 = vpop.f32.mrf.mxu0  ;;  %v8050_v8 = vpop.f32.mrf.mxu1 }
 0x19d   :  { %5966 = vmatpush3.bf16.msra.mxu1 %v6480_v11 }
 0x19e   :  { %5967 = vmatprep.subr.bf16.mxu1 %v6483_v14  ;;  %v8048_v7 = vpop.f32.mrf.mxu0  ;;  %v8054_v10 = vpop.f32.mrf.mxu1 }
 0x19f   :  { %5946 = vmatpush3.bf16.msra.mxu0 %v6482_v13 }
 0x1a0   :  { %5975 = vmatprep.subr.bf16.mxu0 %v6488_v18  ;;  %v8052_v9 = vpop.f32.mrf.mxu0  ;;  %v8058_v12 = vpop.f32.mrf.mxu1 }
 0x1a1   :  { %5968 = vmatpush3.bf16.msra.mxu1 %v6487_v17 }
 0x1a2   :  { %4819 = vmatmul.mubr.bf16.vlgmr.msra.gmra.mxu0 %v6484_v15  ;;  %v8056_v11 = vpop.f32.mrf.mxu0  ;;  %v8062_v14 = vpop.f32.mrf.mxu1 }
 0x1a3   :  { %5976 = vmatpush3.bf16.msra.mxu0 %v6492_v21  ;;  %4900 = vmatprep.mubr.bf16.mxu0 %v6509_v31 }
 0x1a4   :  { %4860 = vmatmul.mubr.bf16.vlgmr.msra.gmra.mxu1 %v6489_v19  ;;  %5977 = vmatprep.subr.bf16.mxu0 %v6493_v22  ;;  %v8060_v13 = vpop.f32.mrf.mxu0  ;;  %v8066_v16 = vpop.f32.mrf.mxu1 }
 0x1a6   :  { %v8064_v15 = vpop.f32.mrf.mxu0  ;;  %v8070_v18 = vpop.f32.mrf.mxu1 }
 0x1a7   :  { %5978 = vmatpush3.bf16.msra.mxu0 %v6494_v23 }
 0x1a8   :  { %5979 = vmatprep.subr.bf16.mxu0 %v6495_v24  ;;  %v8068_v17 = vpop.f32.mrf.mxu0  ;;  %v8074_v20 = vpop.f32.mrf.mxu1 }
 0x1aa   :  { %v8072_v19 = vpop.f32.mrf.mxu0  ;;  %v8078_v22 = vpop.f32.mrf.mxu1 }
 0x1ab   :  { %5980 = vmatpush3.bf16.msra.mxu0 %v6496_v25 }
 0x1ac   :  { %5981 = vmatprep.subr.bf16.mxu0 %v6497_v26  ;;  %v8076_v21 = vpop.f32.mrf.mxu0  ;;  %v8082_v24 = vpop.f32.mrf.mxu1 }
 0x1ae   :  { %v8080_v23 = vpop.f32.mrf.mxu0  ;;  %v8086_v26 = vpop.f32.mrf.mxu1 }
 0x1af   :  { %5982 = vmatpush3.bf16.msra.mxu0 %v6498_v27 }
 0x1b0   :  { %5983 = vmatprep.subr.bf16.mxu0 %v6499_v28  ;;  %v8084_v25 = vpop.f32.mrf.mxu0  ;;  %v8090_v28 = vpop.f32.mrf.mxu1 }
 0x1b1   :  { %8215 = vst [vmem:[#allocation3_spill] sm:$0xff] %v8090_v28 }
 0x1b2   :  { %v8088_v27 = vpop.f32.mrf.mxu0 }
 0x1b3   :  { %5984 = vmatpush3.bf16.msra.mxu0 %v6500_v29  ;;  %8214 = vst [vmem:[#allocation2_spill] sm:$0xff] %v8088_v27 }
 0x1b4   :  { %5985 = vmatprep.subr.bf16.mxu0 %v6501_v30  ;;  %v8094_v30 = vpop.f32.mrf.mxu1 }
 0x1b5   :  { %8217 = vst [vmem:[#allocation5_spill] sm:$0xff] %v8094_v30  ;;  %v5443_v30 = vadd.f32 %v7992_v42, %v7988_v40  ;;  %v5487_v40 = vadd.f32 %v8006_v50, %v8002_v48  ;;  %v5531_v48 = vadd.f32 %v8022_v58, %v8018_v56  ;;  %v5556_v58 = vadd.f32 %v8040_v3, %v8036_v1 }
 0x1b6   :  { %v5600_v1 = vadd.f32 %v8056_v11, %v8052_v9  ;;  %v5641_v3 = vadd.f32 %v8064_v15, %v8060_v13  ;;  %v5685_v11 = vadd.f32 %v8080_v23, %v8076_v21 }
 0x1b7   :  { %5986 = vmatpush3.bf16.msra.mxu0 %v6502_v32 }
 0x1b8   :  { %5987 = vmatprep.subr.bf16.mxu0 %v6503_v33 }
 0x1bb   :  { %5988 = vmatpush3.bf16.msra.mxu0 %v6504_v34 }
 0x1bc   :  { %5989 = vmatprep.subr.bf16.mxu0 %v6505_v35  ;;  %v5421_v35 = vadd.f32 %v5420_v39, %v5419_v38 }
 0x1bf   :  { %5990 = vmatpush3.bf16.msra.mxu0 %v6506_v36  ;;  %v4916_v36 = vld [vmem:[%s8212_s2] ss:$0 sm:$0xff] }
 0x1c2   :  { %4901 = vmatmul.mubr.bf16.vlgmr.msra.gmra.mxu0 %v6507_v37  ;;  %v8092_v29 = vpop.f32.mrf.mxu0 }
 0x1c3   :  { %8216 = vst [vmem:[#allocation4_spill] sm:$0xff] %v8092_v29  ;;  %v3837_v29 = vadd.f32 %v5421_v35, %v4916_v36 }
 0x1c4   :  { %v8096_v31 = vpop.f32.mrf.mxu0  ;;  %v8098_v32 = vpop.f32.mrf.mxu1 }
 0x1c5   :  { %8218 = vst [vmem:[#allocation6_spill] sm:$0xff] %v8096_v31  ;;  %8219 = vst [vmem:[#allocation7_spill] sm:$0xff] %v8098_v32  ;;  %v5424_v32 = vadd.f32 %v7994_v43, %v7990_v41  ;;  %v3878_v39 = vadd.f32 %v5443_v30, %v3837_v29  ;;  %v5468_v41 = vadd.f32 %v8008_v51, %v8004_v49 }
 0x1c6   :  { %v8100_v33 = vpop.f32.mrf.mxu0  ;;  %v8102_v34 = vpop.f32.mrf.mxu1  ;;  %v5509_v43 = vadd.f32 %v8016_v55, %v8012_v53  ;;  %v5490_v29 = vadd.f32 %v8014_v54, %v8010_v52  ;;  %v5512_v49 = vadd.f32 %v8024_v59, %v8020_v57  ;;  %v5553_v55 = vadd.f32 %v8032_v63, %v8028_v61 }
 0x1c7   :  { %8220 = vst [vmem:[#allocation8_spill] sm:$0xff] %v8100_v33  ;;  %8221 = vst [vmem:[#allocation9_spill] sm:$0xff] %v8102_v34  ;;  %v5465_v33 = vadd.f32 %v5464_v47, %v7998_v45  ;;  %v3840_v34 = vadd.f32 %v5424_v32, %v4916_v36  ;;  %v5534_v52 = vadd.f32 %v8030_v62, %v8026_v60 }
 0x1c8   :  { %v8107_v37 = vpop.f32.mrf.mxu0  ;;  %v8109_v28 = vpop.f32.mrf.mxu1  ;;  %v5575_v57 = vadd.f32 %v8038_v2, %v8034_v0  ;;  %v5597_v63 = vadd.f32 %v8048_v7, %v8044_v5  ;;  %v5578_v60 = vadd.f32 %v8046_v6, %v8042_v4  ;;  %v5619_v0 = vadd.f32 %v8054_v10, %v8050_v8 }
 0x1c9   :  { %8222 = vst [vmem:[#allocation10_spill] sm:$0xff] %v8107_v37  ;;  %8223 = vst [vmem:[#allocation11_spill] sm:$0xff] %v8109_v28  ;;  %v5446_v37 = vadd.f32 %v8000_v46, %v7996_v44  ;;  %v3919_v28 = vadd.f32 %v5465_v33, %v3878_v39  ;;  %v5622_v4 = vadd.f32 %v8062_v14, %v8058_v12 }
 0x1ca   :  { %v8118_v38 = vpop.f32.mrf.mxu1  ;;  %v5644_v8 = vadd.f32 %v8072_v19, %v8068_v17  ;;  %v5666_v12 = vadd.f32 %v8078_v22, %v8074_v20 }
 0x1cb   :  { %v3881_v42 = vadd.f32 %v5446_v37, %v3840_v34  ;;  %v3960_v44 = vadd.f32 %v5487_v40, %v3919_v28 }
 0x1cd   :  { %v3922_v46 = vadd.f32 %v5468_v41, %v3881_v42  ;;  %v4001_v30 = vadd.f32 %v5509_v43, %v3960_v44  ;;  %v5663_v44 = vadd.f32 %v8070_v18, %v8066_v16  ;;  %v8224_v16 = vld [vmem:[#allocation2_spill] sm:$0xff] }
 0x1ce   :  { %v5688_v18 = vadd.f32 %v8224_v16, %v8084_v25 }
 0x1cf   :  { %v3963_v53 = vadd.f32 %v5490_v29, %v3922_v46  ;;  %v4042_v32 = vadd.f32 %v5531_v48, %v4001_v30  ;;  %v5707_v30 = vadd.f32 %v8086_v26, %v8082_v24  ;;  %v8231_v26 = vld [vmem:[#allocation8_spill] sm:$0xff] }
 0x1d1   :  { %v4004_v33 = vadd.f32 %v5512_v49, %v3963_v53  ;;  %v4083_v56 = vadd.f32 %v5553_v55, %v4042_v32  ;;  %v8225_v49 = vld [vmem:[#allocation4_spill] sm:$0xff]  ;;  %v8226_v53 = vld [vmem:[#allocation6_spill] sm:$0xff]  ;;  %v8227_v32 = vld [vmem:[#allocation3_spill] sm:$0xff] }
 0x1d2   :  { %v5729_v21 = vadd.f32 %v8226_v53, %v8225_v49 }
 0x1d3   :  { %v4045_v61 = vadd.f32 %v5534_v52, %v4004_v33  ;;  %v4124_v36 = vadd.f32 %v5575_v57, %v4083_v56  ;;  %v8228_v33 = vld [vmem:[#allocation5_spill] sm:$0xff]  ;;  %v8229_v57 = vld [vmem:[#allocation7_spill] sm:$0xff] }
 0x1d4   :  { %v5710_v52 = vadd.f32 %v8228_v33, %v8227_v32 }
 0x1d5   :  { %v4086_v37 = vadd.f32 %v5556_v58, %v4045_v61  ;;  %v4165_v40 = vadd.f32 %v5597_v63, %v4124_v36  ;;  %v8230_v58 = vld [vmem:[#allocation9_spill] sm:$0xff]  ;;  %v8232_v61 = vld [vmem:[#allocation10_spill] sm:$0xff] }
 0x1d6   :  { %v5751_v24 = vadd.f32 %v8230_v58, %v8229_v57  ;;  %v5732_v25 = vadd.f32 %v8232_v61, %v8231_v26 }
 0x1d7   :  { %v4127_v2 = vadd.f32 %v5578_v60, %v4086_v37  ;;  %v4206_v7 = vadd.f32 %v5619_v0, %v4165_v40 }
 0x1d9   :  { %v4168_v42 = vadd.f32 %v5600_v1, %v4127_v2  ;;  %v4247_v43 = vadd.f32 %v5641_v3, %v4206_v7  ;;  %v8233_v1 = vld [vmem:[#allocation11_spill] sm:$0xff] }
 0x1da   :  { %v5754_v2 = vadd.f32 %v8118_v38, %v8233_v1 }
 0x1db   :  { %v4209_v10 = vadd.f32 %v5622_v4, %v4168_v42  ;;  %v4288_v46 = vadd.f32 %v5663_v44, %v4247_v43 }
 0x1dd   :  { %v4250_v29 = vadd.f32 %v5644_v8, %v4209_v10  ;;  %v4329_v14 = vadd.f32 %v5685_v11, %v4288_v46 }
 0x1df   :  { %v4291_v48 = vadd.f32 %v5666_v12, %v4250_v29  ;;  %v4370_v23 = vadd.f32 %v5707_v30, %v4329_v14 }
 0x1e1   :  { %v4332_v55 = vadd.f32 %v5688_v18, %v4291_v48  ;;  %v4411_v22 = vadd.f32 %v5729_v21, %v4370_v23 }
 0x1e2   :  { %v8115_v31 = vpop.f32.mrf.mxu0 }
 0x1e3   :  { %v4373_v36 = vadd.f32 %v5710_v52, %v4332_v55  ;;  %v4452_v40 = vadd.f32 %v5751_v24, %v4411_v22 }
 0x1e4   :  { %v8122_v27 = vpop.f32.mrf.mxu0  ;;  %v8124_v35 = vpop.f32.mrf.mxu1 }
 0x1e5   :  { %v5773_v37 = vadd.f32 %v8122_v27, %v8115_v31  ;;  %v4414_v0 = vadd.f32 %v5732_v25, %v4373_v36 }
 0x1e6   :  { %v8132_v45 = vpop.f32.mrf.mxu0  ;;  %v8134_v47 = vpop.f32.mrf.mxu1 }
 0x1e7   :  { %v4493_v42 = vadd.f32 %v5773_v37, %v4452_v40  ;;  %v5795_v4 = vadd.f32 %v8134_v47, %v8124_v35  ;;  %v4455_v44 = vadd.f32 %v5754_v2, %v4414_v0 }
 0x1e8   :  { %v8142_v50 = vpop.f32.mrf.mxu0  ;;  %v8144_v51 = vpop.f32.mrf.mxu1 }
 0x1e9   :  { %v5776_v43 = vadd.f32 %v8142_v50, %v8132_v45  ;;  %v4534_v31 = vadd.f32 %v5795_v4, %v4493_v42 }
 0x1ea   :  { %v8152_v54 = vpop.f32.mrf.mxu1 }
 0x1eb   :  { %v4496_v11 = vadd.f32 %v5776_v43, %v4455_v44  ;;  %v5798_v46 = vadd.f32 %v8152_v54, %v8144_v51 }
 0x1ed   :  { %v4537_v35 = vadd.f32 %v5798_v46, %v4496_v11 }
 0x202   :  { %v8148_v28 = vpop.f32.mrf.mxu0 }
 0x204   :  { %v5816_v59 = vpop.f32.mrf.mxu0  ;;  %v8158_v34 = vpop.f32.mrf.mxu1 }
 0x205   :  { %v5817_v8 = vadd.f32 %v5816_v59, %v8148_v28 }
 0x206   :  { %v5818_v62 = vpop.f32.mrf.mxu0  ;;  %v5838_v39 = vpop.f32.mrf.mxu1 }
 0x207   :  { %v4575_v38 = vadd.f32 %v5817_v8, %v4534_v31  ;;  %v5839_v29 = vadd.f32 %v5838_v39, %v8158_v34 }
 0x208   :  { %v5819_v41 = vpop.f32.mrf.mxu0  ;;  %v5840_v5 = vpop.f32.mrf.mxu1 }
 0x209   :  { %v5820_v12 = vadd.f32 %v5819_v41, %v5818_v62  ;;  %v4616_v45 = vadd.f32 %v5839_v29, %v4575_v38 }
 0x20a   :  { %v5841_v9 = vpop.f32.mrf.mxu1 }
 0x20b   :  { %v4578_v50 = vadd.f32 %v5820_v12, %v4537_v35  ;;  %v5842_v18 = vadd.f32 %v5841_v9, %v5840_v5 }
 0x20d   :  { %v4619_v23 = vadd.f32 %v5842_v18, %v4578_v50 }
 0x222   :  { %v5859_v6 = vpop.f32.mrf.mxu0 }
 0x224   :  { %v5860_v13 = vpop.f32.mrf.mxu0  ;;  %v5881_v15 = vpop.f32.mrf.mxu1 }
 0x225   :  { %v5861_v47 = vadd.f32 %v5860_v13, %v5859_v6 }
 0x226   :  { %v5862_v17 = vpop.f32.mrf.mxu0  ;;  %v5882_v19 = vpop.f32.mrf.mxu1 }
 0x227   :  { %v4657_v59 = vadd.f32 %v5861_v47, %v4616_v45  ;;  %v5883_v48 = vadd.f32 %v5882_v19, %v5881_v15 }
 0x228   :  { %v5863_v56 = vpop.f32.mrf.mxu0  ;;  %v5884_v20 = vpop.f32.mrf.mxu1 }
 0x229   :  { %v5864_v49 = vadd.f32 %v5863_v56, %v5862_v17  ;;  %v4698_v54 = vadd.f32 %v5883_v48, %v4657_v59 }
 0x22a   :  { %v5885_v60 = vpop.f32.mrf.mxu1 }
 0x22b   :  { %v4660_v55 = vadd.f32 %v5864_v49, %v4619_v23  ;;  %v5886_v34 = vadd.f32 %v5885_v60, %v5884_v20 }
 0x22d   :  { %v4701_v13 = vadd.f32 %v5886_v34, %v4660_v55 }
 0x242   :  { %v5903_v63 = vpop.f32.mrf.mxu0 }
 0x244   :  { %v5904_v3 = vpop.f32.mrf.mxu0  ;;  %v5925_v7 = vpop.f32.mrf.mxu1 }
 0x245   :  { %v5905_v51 = vadd.f32 %v5904_v3, %v5903_v63 }
 0x246   :  { %v5906_v10 = vpop.f32.mrf.mxu0  ;;  %v5926_v27 = vpop.f32.mrf.mxu1 }
 0x247   :  { %v4739_v41 = vadd.f32 %v5905_v51, %v4698_v54  ;;  %v5927_v32 = vadd.f32 %v5926_v27, %v5925_v7 }
 0x248   :  { %v5907_v14 = vpop.f32.mrf.mxu0  ;;  %v5928_v30 = vpop.f32.mrf.mxu1 }
 0x249   :  { %v5908_v6 = vadd.f32 %v5907_v14, %v5906_v10  ;;  %v4780_v9 = vadd.f32 %v5927_v32, %v4739_v41 }
 0x24a   :  { %v5929_v28 = vpop.f32.mrf.mxu1 }
 0x24b   :  { %v4742_v22 = vadd.f32 %v5908_v6, %v4701_v13  ;;  %v5930_v15 = vadd.f32 %v5929_v28, %v5928_v30 }
 0x24d   :  { %v4783_v24 = vadd.f32 %v5930_v15, %v4742_v22 }
 0x262   :  { %v5947_v16 = vpop.f32.mrf.mxu0 }
 0x264   :  { %v5948_v53 = vpop.f32.mrf.mxu0  ;;  %v5969_v21 = vpop.f32.mrf.mxu1 }
 0x265   :  { %v5949_v33 = vadd.f32 %v5948_v53, %v5947_v16 }
 0x266   :  { %v5950_v62 = vpop.f32.mrf.mxu0  ;;  %v5970_v39 = vpop.f32.mrf.mxu1 }
 0x267   :  { %v4821_v17 = vadd.f32 %v5949_v33, %v4780_v9  ;;  %v5971_v19 = vadd.f32 %v5970_v39, %v5969_v21 }
 0x268   :  { %v5951_v52 = vpop.f32.mrf.mxu0  ;;  %v5972_v5 = vpop.f32.mrf.mxu1 }
 0x269   :  { %v5952_v56 = vadd.f32 %v5951_v52, %v5950_v62  ;;  %v4862_v20 = vadd.f32 %v5971_v19, %v4821_v17 }
 0x26a   :  { %v5973_v57 = vpop.f32.mrf.mxu1 }
 0x26b   :  { %v4824_v61 = vadd.f32 %v5952_v56, %v4783_v24  ;;  %v5974_v25 = vadd.f32 %v5973_v57, %v5972_v5 }
 0x26d   :  { %v4865_v40 = vadd.f32 %v5974_v25, %v4824_v61 }
 0x282   :  { %v5991_v58 = vpop.f32.mrf.mxu0 }
 0x284   :  { %v5992_v26 = vpop.f32.mrf.mxu0 }
 0x285   :  { %v5993_v63 = vadd.f32 %v5992_v26, %v5991_v58 }
 0x286   :  { %v5994_v36 = vpop.f32.mrf.mxu0 }
 0x287   :  { %v4903_v37 = vadd.f32 %v5993_v63, %v4862_v20 }
 0x288   :  { %v5995_v60 = vpop.f32.mrf.mxu0 }
 0x289   :  { %4910 = vst.msk [vmem:[%s8213_s3] sm:$0xff] %vm4909_vm0, %v4903_v37  ;;  %v5996_v0 = vadd.f32 %v5995_v60, %v5994_v36 }
 0x28b   :  { %v4906_v1 = vadd.f32 %v5996_v0, %v4865_v40 }
 0x28d   :  { %4911 = vst.msk [vmem:[%s8213_s3 + $0x8] sm:$0xff] %vm4909_vm0, %v4906_v1 }

</bundles_post_ra>
